<compile_context>
chip_gen: v7x
topology: tpu7x:2x2x1
jax: 0.10.0
libtpu: 0.0.40
codegen_flags: <defaults>
</compile_context>

<pallas_src>
import jax
import jax.numpy as jnp
from jax.experimental import pallas as pl
from jax.experimental.pallas import tpu as pltpu

LN_EPS = 1e-5            # PyTorch nn.LayerNorm default eps
H1, H2 = 2560, 1280      # hidden sizes from the module definition
TB_MAX = 256             # max batch rows per grid step (fills a 256x256 MXU; v7x-safe)
LANE = 128


def _round_up(x, m):
    return (x + m - 1) // m * m


def _layernorm(h, gamma, beta):
    # LayerNorm over the last (feature) dim, biased variance, affine params (f32).
    mu = jnp.mean(h, axis=-1, keepdims=True)
    var = jnp.mean(jnp.square(h - mu), axis=-1, keepdims=True)
    return (h - mu) * jax.lax.rsqrt(var + LN_EPS) * gamma + beta


def dqn_kernel(x_ref, w1_ref, b1_ref, g1_ref, be1_ref,
               w2_ref, b2_ref, g2_ref, be2_ref,
               w3_ref, b3_ref, o_ref):
    # Layer 1: Linear(d_in, 2560) + LayerNorm(2560) + ReLU
    x = x_ref[...]                                   # bf16 (cast in wrapper)
    h1 = jnp.dot(x, w1_ref[...], preferred_element_type=jnp.float32) + b1_ref[...]
    h1 = _layernorm(h1, g1_ref[...], be1_ref[...])
    h1 = jnp.maximum(h1, 0.0).astype(jnp.bfloat16)
    # Dropout(0.1): identity in eval/inference mode.
    # TODO(synk): training-mode stochastic dropout (pltpu.prng_random_bits) not emitted.

    # Layer 2: Linear(2560, 1280) + LayerNorm(1280) + ReLU  (w2 resident, MXU-internal K reduction)
    h2 = jnp.dot(h1, w2_ref[...], preferred_element_type=jnp.float32) + b2_ref[...]
    h2 = _layernorm(h2, g2_ref[...], be2_ref[...])
    h2 = jnp.maximum(h2, 0.0).astype(jnp.bfloat16)

    # Layer 3: Linear(1280, out) -> lane-padded f32 output slab
    o_ref[...] = (jnp.dot(h2, w3_ref[...], preferred_element_type=jnp.float32)
                  + b3_ref[...]).astype(o_ref.dtype)


def dqn_forward(x, params):
    B, d_in = x.shape
    out_size = params["w3"].shape[1]

    # Batch tiling: round to a multiple of 16 (bf16 sublane packing), cap at TB_MAX.
    tb = min(TB_MAX, _round_up(B, 16))
    b_pad = _round_up(B, tb)
    nb = b_pad // tb

    # Lane-dense input / output (unmasked vld / vst); padding is mathematically inert.
    d_in_pad = _round_up(d_in, LANE)
    out_pad = _round_up(out_size, LANE)

    # Pad + cast activations once in the wrapper (halves activation DMA).
    xp = x
    if b_pad != B or d_in_pad != d_in:
        xp = jnp.pad(xp, ((0, b_pad - B), (0, d_in_pad - d_in)))
    xp = xp.astype(jnp.bfloat16)
    # NOTE: padded batch rows are all-zero; LayerNorm on them hits var=0 which is
    # finite thanks to eps>0, and those rows are sliced off below.

    w1 = params["w1"]
    if d_in_pad != d_in:
        w1 = jnp.pad(w1, ((0, d_in_pad - d_in), (0, 0)))   # zero rows: inert
    w3, b3 = params["w3"], params["b3"]
    if out_pad != out_size:
        w3 = jnp.pad(w3, ((0, 0), (0, out_pad - out_size)))
        b3 = jnp.pad(b3, ((0, 0), (0, out_pad - out_size)))

    args = (xp,
            w1, params["b1"], params["g1"], params["be1"],
            params["w2"], params["b2"], params["g2"], params["be2"],
            w3, b3)

    # Constant index_maps -> weights/params stay resident in VMEM across batch tiles.
    in_specs = [
        pl.BlockSpec((tb, d_in_pad), lambda i: (i, 0)),      # x (per batch tile)
        pl.BlockSpec((d_in_pad, H1), lambda i: (0, 0)),      # w1 (resident)
        pl.BlockSpec((1, H1), lambda i: (0, 0)),             # b1
        pl.BlockSpec((1, H1), lambda i: (0, 0)),             # gamma1
        pl.BlockSpec((1, H1), lambda i: (0, 0)),             # beta1
        pl.BlockSpec((H1, H2), lambda i: (0, 0)),            # w2 (resident, 6.25 MiB bf16)
        pl.BlockSpec((1, H2), lambda i: (0, 0)),             # b2
        pl.BlockSpec((1, H2), lambda i: (0, 0)),             # gamma2
        pl.BlockSpec((1, H2), lambda i: (0, 0)),             # beta2
        pl.BlockSpec((H2, out_pad), lambda i: (0, 0)),       # w3 (resident, lane-padded)
        pl.BlockSpec((1, out_pad), lambda i: (0, 0)),        # b3 (lane-padded)
    ]
    out_spec = pl.BlockSpec((tb, out_pad), lambda i: (i, 0))

    weight_bytes = (d_in_pad * H1 + H1 * H2 + H2 * out_pad) * 2          # bf16 weights
    small_bytes = (3 * H1 + 3 * H2 + out_pad) * 4                        # biases / LN params
    cost = pl.CostEstimate(
        flops=2 * b_pad * (d_in_pad * H1 + H1 * H2 + H2 * out_pad),
        transcendentals=2 * b_pad,                                       # rsqrt per LayerNorm row
        bytes_accessed=weight_bytes + small_bytes
        + b_pad * d_in_pad * 2 + b_pad * out_pad * 4,
    )

    out = pl.pallas_call(
        dqn_kernel,
        out_shape=jax.ShapeDtypeStruct((b_pad, out_pad), jnp.float32),
        grid_spec=pltpu.PrefetchScalarGridSpec(
            num_scalar_prefetch=0,
            grid=(nb,),
            in_specs=in_specs,
            out_specs=out_spec,
        ),
        compiler_params=pltpu.CompilerParams(
            dimension_semantics=("parallel",),
            vmem_limit_bytes=32 * 1024 * 1024,
        ),
        cost_estimate=cost,
    )(*args)

    return out[:B, :out_size]


def init_params(key, input_size, output_size):
    """Deterministic init matching PyTorch shapes. Weights in bf16 (bandwidth), rest f32."""
    def linear(k, fan_in, fan_out):
        kw, kb = jax.random.split(k)
        bound = 1.0 / (fan_in ** 0.5)
        w = jax.random.uniform(kw, (fan_in, fan_out), jnp.float32, -bound, bound)
        b = jax.random.uniform(kb, (1, fan_out), jnp.float32, -bound, bound)
        return w.astype(jnp.bfloat16), b

    k1, k2, k3 = jax.random.split(key, 3)
    w1, b1 = linear(k1, input_size, H1)
    w2, b2 = linear(k2, H1, H2)
    w3, b3 = linear(k3, H2, output_size)
    return dict(
        w1=w1, b1=b1, g1=jnp.ones((1, H1), jnp.float32), be1=jnp.zeros((1, H1), jnp.float32),
        w2=w2, b2=b2, g2=jnp.ones((1, H2), jnp.float32), be2=jnp.zeros((1, H2), jnp.float32),
        w3=w3, b3=b3,
    )


def dqn_reference(x, p):
    """Pure-JAX reference mirroring the kernel's numerics (bf16 operands, f32 accumulation)."""
    h1 = jnp.dot(x.astype(jnp.bfloat16), p["w1"], preferred_element_type=jnp.float32) + p["b1"]
    h1 = jnp.maximum(_layernorm(h1, p["g1"], p["be1"]), 0.0).astype(jnp.bfloat16)
    h2 = jnp.dot(h1, p["w2"], preferred_element_type=jnp.float32) + p["b2"]
    h2 = jnp.maximum(_layernorm(h2, p["g2"], p["be2"]), 0.0).astype(jnp.bfloat16)
    return jnp.dot(h2, p["w3"], preferred_element_type=jnp.float32) + p["b3"]


if __name__ == "__main__":
    key = jax.random.PRNGKey(0)
    k_x, k_p = jax.random.split(key)

    batch, input_size, output_size = 8, 32, 8
    x = jax.random.normal(k_x, (batch, input_size), jnp.float32)
    params = init_params(k_p, input_size, output_size)

    out = dqn_forward(x, params)
    jax.block_until_ready(out)

    ref = dqn_reference(x, params)
    assert out.shape == (batch, output_size)
    assert jnp.allclose(out, ref, atol=5e-3, rtol=5e-3), float(jnp.max(jnp.abs(out - ref)))

    print("KERNEL_OK")
</pallas_src>

<mosaic_0001>
module attributes {stable_mosaic.version = 11 : i64} {
  func.func @dqn_kernel(%arg0: i32, %arg1: memref<16x128xbf16, #tpu.memory_space<vmem>>, %arg2: memref<128x2560xbf16, #tpu.memory_space<vmem>>, %arg3: memref<1x2560xf32, #tpu.memory_space<vmem>>, %arg4: memref<1x2560xf32, #tpu.memory_space<vmem>>, %arg5: memref<1x2560xf32, #tpu.memory_space<vmem>>, %arg6: memref<2560x1280xbf16, #tpu.memory_space<vmem>>, %arg7: memref<1x1280xf32, #tpu.memory_space<vmem>>, %arg8: memref<1x1280xf32, #tpu.memory_space<vmem>>, %arg9: memref<1x1280xf32, #tpu.memory_space<vmem>>, %arg10: memref<1280x128xbf16, #tpu.memory_space<vmem>>, %arg11: memref<1x128xf32, #tpu.memory_space<vmem>>, %arg12: memref<16x128xf32, #tpu.memory_space<vmem>>) attributes {dimension_semantics = [#tpu.dimension_semantics<parallel>], iteration_bounds = array<i64: 1>, scalar_prefetch = 0 : i64, scratch_operands = 0 : i64, tpu.core_type = #tpu.core_type<tc>, window_params = [{transform_indices = @transform_0, window_bounds = array<i64: 16, 128>}, {pipeline_mode = #tpu.pipeline_mode<synchronous>, transform_indices = @transform_1, window_bounds = array<i64: 128, 2560>}, {pipeline_mode = #tpu.pipeline_mode<synchronous>, transform_indices = @transform_2, window_bounds = array<i64: 1, 2560>}, {pipeline_mode = #tpu.pipeline_mode<synchronous>, transform_indices = @transform_3, window_bounds = array<i64: 1, 2560>}, {pipeline_mode = #tpu.pipeline_mode<synchronous>, transform_indices = @transform_4, window_bounds = array<i64: 1, 2560>}, {pipeline_mode = #tpu.pipeline_mode<synchronous>, transform_indices = @transform_5, window_bounds = array<i64: 2560, 1280>}, {pipeline_mode = #tpu.pipeline_mode<synchronous>, transform_indices = @transform_6, window_bounds = array<i64: 1, 1280>}, {pipeline_mode = #tpu.pipeline_mode<synchronous>, transform_indices = @transform_7, window_bounds = array<i64: 1, 1280>}, {pipeline_mode = #tpu.pipeline_mode<synchronous>, transform_indices = @transform_8, window_bounds = array<i64: 1, 1280>}, {pipeline_mode = #tpu.pipeline_mode<synchronous>, transform_indices = @transform_9, window_bounds = array<i64: 1280, 128>}, {pipeline_mode = #tpu.pipeline_mode<synchronous>, transform_indices = @transform_10, window_bounds = array<i64: 1, 128>}, {transform_indices = @transform_11, window_bounds = array<i64: 16, 128>}]} {
    %c0 = arith.constant 0 : index
    %c0_0 = arith.constant 0 : index
    %0 = vector.load %arg1[%c0, %c0_0] : memref<16x128xbf16, #tpu.memory_space<vmem>>, vector<16x128xbf16>
    %c0_1 = arith.constant 0 : index
    %c0_2 = arith.constant 0 : index
    %1 = vector.load %arg2[%c0_1, %c0_2] : memref<128x2560xbf16, #tpu.memory_space<vmem>>, vector<128x2560xbf16>
    %cst = arith.constant dense<0.000000e+00> : vector<16x2560xf32>
    %2 = tpu.matmul %0, %1, %cst {dimension_numbers = #tpu.dot_dimension_numbers<[1], [0], [0], [1], [0, 0, 1, 1], [], []>} : vector<16x128xbf16>, vector<128x2560xbf16>, vector<16x2560xf32> -> vector<16x2560xf32>
    %c0_3 = arith.constant 0 : index
    %c0_4 = arith.constant 0 : index
    %3 = vector.load %arg3[%c0_3, %c0_4] : memref<1x2560xf32, #tpu.memory_space<vmem>>, vector<1x2560xf32>
    %4 = vector.broadcast %3 : vector<1x2560xf32> to vector<16x2560xf32>
    %5 = arith.addf %2, %4 : vector<16x2560xf32>
    %c0_5 = arith.constant 0 : index
    %c0_6 = arith.constant 0 : index
    %6 = vector.load %arg4[%c0_5, %c0_6] : memref<1x2560xf32, #tpu.memory_space<vmem>>, vector<1x2560xf32>
    %c0_7 = arith.constant 0 : index
    %c0_8 = arith.constant 0 : index
    %7 = vector.load %arg5[%c0_7, %c0_8] : memref<1x2560xf32, #tpu.memory_space<vmem>>, vector<1x2560xf32>
    %cst_9 = arith.constant dense<0.000000e+00> : vector<16xf32>
    %8 = vector.multi_reduction <add>, %5, %cst_9 [1] : vector<16x2560xf32> to vector<16xf32>
    %9 = vector.shape_cast %8 : vector<16xf32> to vector<16x1xf32>
    %cst_10 = arith.constant 2.560000e+03 : f32
    %10 = vector.broadcast %cst_10 : f32 to vector<16x1xf32>
    %11 = arith.divf %9, %10 : vector<16x1xf32>
    %12 = vector.broadcast %11 : vector<16x1xf32> to vector<16x2560xf32>
    %13 = arith.subf %5, %12 : vector<16x2560xf32>
    %14 = arith.mulf %13, %13 : vector<16x2560xf32>
    %cst_11 = arith.constant dense<0.000000e+00> : vector<16xf32>
    %15 = vector.multi_reduction <add>, %14, %cst_11 [1] : vector<16x2560xf32> to vector<16xf32>
    %16 = vector.shape_cast %15 : vector<16xf32> to vector<16x1xf32>
    %cst_12 = arith.constant 2.560000e+03 : f32
    %17 = vector.broadcast %cst_12 : f32 to vector<16x1xf32>
    %18 = arith.divf %16, %17 : vector<16x1xf32>
    %19 = vector.broadcast %11 : vector<16x1xf32> to vector<16x2560xf32>
    %20 = arith.subf %5, %19 : vector<16x2560xf32>
    %cst_13 = arith.constant 9.99999974E-6 : f32
    %21 = vector.broadcast %cst_13 : f32 to vector<16x1xf32>
    %22 = arith.addf %18, %21 : vector<16x1xf32>
    %23 = math.rsqrt %22 : vector<16x1xf32>
    %24 = vector.broadcast %23 : vector<16x1xf32> to vector<16x2560xf32>
    %25 = arith.mulf %20, %24 : vector<16x2560xf32>
    %26 = vector.broadcast %6 : vector<1x2560xf32> to vector<16x2560xf32>
    %27 = arith.mulf %25, %26 : vector<16x2560xf32>
    %28 = vector.broadcast %7 : vector<1x2560xf32> to vector<16x2560xf32>
    %29 = arith.addf %27, %28 : vector<16x2560xf32>
    %cst_14 = arith.constant 0.000000e+00 : f32
    %30 = vector.broadcast %cst_14 : f32 to vector<16x2560xf32>
    %31 = arith.maximumf %29, %30 : vector<16x2560xf32>
    %32 = arith.truncf %31 : vector<16x2560xf32> to vector<16x2560xbf16>
    %c0_15 = arith.constant 0 : index
    %c0_16 = arith.constant 0 : index
    %33 = vector.load %arg6[%c0_15, %c0_16] : memref<2560x1280xbf16, #tpu.memory_space<vmem>>, vector<2560x1280xbf16>
    %cst_17 = arith.constant dense<0.000000e+00> : vector<16x1280xf32>
    %34 = tpu.matmul %32, %33, %cst_17 {dimension_numbers = #tpu.dot_dimension_numbers<[1], [0], [0], [1], [0, 0, 1, 1], [], []>} : vector<16x2560xbf16>, vector<2560x1280xbf16>, vector<16x1280xf32> -> vector<16x1280xf32>
    %c0_18 = arith.constant 0 : index
    %c0_19 = arith.constant 0 : index
    %35 = vector.load %arg7[%c0_18, %c0_19] : memref<1x1280xf32, #tpu.memory_space<vmem>>, vector<1x1280xf32>
    %36 = vector.broadcast %35 : vector<1x1280xf32> to vector<16x1280xf32>
    %37 = arith.addf %34, %36 : vector<16x1280xf32>
    %c0_20 = arith.constant 0 : index
    %c0_21 = arith.constant 0 : index
    %38 = vector.load %arg8[%c0_20, %c0_21] : memref<1x1280xf32, #tpu.memory_space<vmem>>, vector<1x1280xf32>
    %c0_22 = arith.constant 0 : index
    %c0_23 = arith.constant 0 : index
    %39 = vector.load %arg9[%c0_22, %c0_23] : memref<1x1280xf32, #tpu.memory_space<vmem>>, vector<1x1280xf32>
    %cst_24 = arith.constant dense<0.000000e+00> : vector<16xf32>
    %40 = vector.multi_reduction <add>, %37, %cst_24 [1] : vector<16x1280xf32> to vector<16xf32>
    %41 = vector.shape_cast %40 : vector<16xf32> to vector<16x1xf32>
    %cst_25 = arith.constant 1.280000e+03 : f32
    %42 = vector.broadcast %cst_25 : f32 to vector<16x1xf32>
    %43 = arith.divf %41, %42 : vector<16x1xf32>
    %44 = vector.broadcast %43 : vector<16x1xf32> to vector<16x1280xf32>
    %45 = arith.subf %37, %44 : vector<16x1280xf32>
    %46 = arith.mulf %45, %45 : vector<16x1280xf32>
    %cst_26 = arith.constant dense<0.000000e+00> : vector<16xf32>
    %47 = vector.multi_reduction <add>, %46, %cst_26 [1] : vector<16x1280xf32> to vector<16xf32>
    %48 = vector.shape_cast %47 : vector<16xf32> to vector<16x1xf32>
    %cst_27 = arith.constant 1.280000e+03 : f32
    %49 = vector.broadcast %cst_27 : f32 to vector<16x1xf32>
    %50 = arith.divf %48, %49 : vector<16x1xf32>
    %51 = vector.broadcast %43 : vector<16x1xf32> to vector<16x1280xf32>
    %52 = arith.subf %37, %51 : vector<16x1280xf32>
    %cst_28 = arith.constant 9.99999974E-6 : f32
    %53 = vector.broadcast %cst_28 : f32 to vector<16x1xf32>
    %54 = arith.addf %50, %53 : vector<16x1xf32>
    %55 = math.rsqrt %54 : vector<16x1xf32>
    %56 = vector.broadcast %55 : vector<16x1xf32> to vector<16x1280xf32>
    %57 = arith.mulf %52, %56 : vector<16x1280xf32>
    %58 = vector.broadcast %38 : vector<1x1280xf32> to vector<16x1280xf32>
    %59 = arith.mulf %57, %58 : vector<16x1280xf32>
    %60 = vector.broadcast %39 : vector<1x1280xf32> to vector<16x1280xf32>
    %61 = arith.addf %59, %60 : vector<16x1280xf32>
    %cst_29 = arith.constant 0.000000e+00 : f32
    %62 = vector.broadcast %cst_29 : f32 to vector<16x1280xf32>
    %63 = arith.maximumf %61, %62 : vector<16x1280xf32>
    %64 = arith.truncf %63 : vector<16x1280xf32> to vector<16x1280xbf16>
    %c0_30 = arith.constant 0 : index
    %c0_31 = arith.constant 0 : index
    %65 = vector.load %arg10[%c0_30, %c0_31] : memref<1280x128xbf16, #tpu.memory_space<vmem>>, vector<1280x128xbf16>
    %cst_32 = arith.constant dense<0.000000e+00> : vector<16x128xf32>
    %66 = tpu.matmul %64, %65, %cst_32 {dimension_numbers = #tpu.dot_dimension_numbers<[1], [0], [0], [1], [0, 0, 1, 1], [], []>} : vector<16x1280xbf16>, vector<1280x128xbf16>, vector<16x128xf32> -> vector<16x128xf32>
    %c0_33 = arith.constant 0 : index
    %c0_34 = arith.constant 0 : index
    %67 = vector.load %arg11[%c0_33, %c0_34] : memref<1x128xf32, #tpu.memory_space<vmem>>, vector<1x128xf32>
    %68 = vector.broadcast %67 : vector<1x128xf32> to vector<16x128xf32>
    %69 = arith.addf %66, %68 : vector<16x128xf32>
    %c0_35 = arith.constant 0 : index
    %c0_36 = arith.constant 0 : index
    %70 = vector.load %arg12[%c0_35, %c0_36] : memref<16x128xf32, #tpu.memory_space<vmem>>, vector<16x128xf32>
    tpu.vector_store %arg12[%c0_35, %c0_36], %69 {strides = array<i32>} : memref<16x128xf32, #tpu.memory_space<vmem>>, vector<16x128xf32>,
    return
  }
  func.func @transform_0(%arg0: i32) -> (i32, i32) {
    %c0_i32 = arith.constant 0 : i32
    %c0_i32_0 = arith.constant 0 : i32
    return %arg0, %c0_i32 : i32, i32
  }
  func.func @transform_1(%arg0: i32) -> (i32, i32) {
    %c0_i32 = arith.constant 0 : i32
    %c0_i32_0 = arith.constant 0 : i32
    %c0_i32_1 = arith.constant 0 : i32
    return %c0_i32, %c0_i32_0 : i32, i32
  }
  func.func @transform_2(%arg0: i32) -> (i32, i32) {
    %c0_i32 = arith.constant 0 : i32
    %c0_i32_0 = arith.constant 0 : i32
    %c0_i32_1 = arith.constant 0 : i32
    return %c0_i32, %c0_i32_0 : i32, i32
  }
  func.func @transform_3(%arg0: i32) -> (i32, i32) {
    %c0_i32 = arith.constant 0 : i32
    %c0_i32_0 = arith.constant 0 : i32
    %c0_i32_1 = arith.constant 0 : i32
    return %c0_i32, %c0_i32_0 : i32, i32
  }
  func.func @transform_4(%arg0: i32) -> (i32, i32) {
    %c0_i32 = arith.constant 0 : i32
    %c0_i32_0 = arith.constant 0 : i32
    %c0_i32_1 = arith.constant 0 : i32
    return %c0_i32, %c0_i32_0 : i32, i32
  }
  func.func @transform_5(%arg0: i32) -> (i32, i32) {
    %c0_i32 = arith.constant 0 : i32
    %c0_i32_0 = arith.constant 0 : i32
    %c0_i32_1 = arith.constant 0 : i32
    return %c0_i32, %c0_i32_0 : i32, i32
  }
  func.func @transform_6(%arg0: i32) -> (i32, i32) {
    %c0_i32 = arith.constant 0 : i32
    %c0_i32_0 = arith.constant 0 : i32
    %c0_i32_1 = arith.constant 0 : i32
    return %c0_i32, %c0_i32_0 : i32, i32
  }
  func.func @transform_7(%arg0: i32) -> (i32, i32) {
    %c0_i32 = arith.constant 0 : i32
    %c0_i32_0 = arith.constant 0 : i32
    %c0_i32_1 = arith.constant 0 : i32
    return %c0_i32, %c0_i32_0 : i32, i32
  }
  func.func @transform_8(%arg0: i32) -> (i32, i32) {
    %c0_i32 = arith.constant 0 : i32
    %c0_i32_0 = arith.constant 0 : i32
    %c0_i32_1 = arith.constant 0 : i32
    return %c0_i32, %c0_i32_0 : i32, i32
  }
  func.func @transform_9(%arg0: i32) -> (i32, i32) {
    %c0_i32 = arith.constant 0 : i32
    %c0_i32_0 = arith.constant 0 : i32
    %c0_i32_1 = arith.constant 0 : i32
    return %c0_i32, %c0_i32_0 : i32, i32
  }
  func.func @transform_10(%arg0: i32) -> (i32, i32) {
    %c0_i32 = arith.constant 0 : i32
    %c0_i32_0 = arith.constant 0 : i32
    %c0_i32_1 = arith.constant 0 : i32
    return %c0_i32, %c0_i32_0 : i32, i32
  }
  func.func @transform_11(%arg0: i32) -> (i32, i32) {
    %c0_i32 = arith.constant 0 : i32
    %c0_i32_0 = arith.constant 0 : i32
    return %arg0, %c0_i32 : i32, i32
  }
}

</mosaic_0001>

<bundles_post_ra>
// kernel: tpu_custom_call.1
= control target key start
LH: loop header
LB: loop body
LE: loop exit
PB: predicated region body
PF: predicated region fallthrough
CT: control target
= control target key end

     0   :  { %16 = vsyncpa [#allocation3], 0  ;;  %s21851_s0 = inlined_call_operand.hbm [shape: bf16[16,128], index: 0, kind: input, shape index: {}]   ;;  %s21852_s1 = inlined_call_operand.hbm [shape: bf16[128,2560], index: 1, kind: input, shape index: {}]   ;;  %s21853_s2 = inlined_call_operand.hbm [shape: f32[1,2560], index: 2, kind: input, shape index: {}]   ;;  %s21854_s3 = inlined_call_operand.hbm [shape: f32[1,2560], index: 3, kind: input, shape index: {}]   ;;  %s21855_s4 = inlined_call_operand.hbm [shape: f32[1,2560], index: 4, kind: input, shape index: {}]   ;;  %s21856_s5 = inlined_call_operand.hbm [shape: bf16[2560,1280], index: 5, kind: input, shape index: {}]   ;;  %s21857_s6 = inlined_call_operand.hbm [shape: f32[1,1280], index: 6, kind: input, shape index: {}]   ;;  %s21858_s7 = inlined_call_operand.hbm [shape: f32[1,1280], index: 7, kind: input, shape index: {}]   ;;  %s21859_s8 = inlined_call_operand.hbm [shape: f32[1,1280], index: 8, kind: input, shape index: {}]   ;;  %s21860_s9 = inlined_call_operand.hbm [shape: bf16[1280,128], index: 9, kind: input, shape index: {}]   ;;  %s21861_s10 = inlined_call_operand.hbm [shape: f32[1,128], index: 10, kind: input, shape index: {}]   ;;  %s21862_s11 = inlined_call_operand.hbm [shape: f32[16,128], index: 11, kind: output, shape index: {}]  }
   0x1   :  { %17 = vsyncpa [#allocation6], 0 }
   0x2   :  { %18 = vsyncpa [#allocation9], 0 }
   0x3   :  { %19 = vsyncpa [#allocation12], 0 }
   0x4   :  { %20 = vsyncpa [#allocation15], 0 }
   0x5   :  { %21 = vsyncpa [#allocation18], 0 }
   0x6   :  { %22 = vsyncpa [#allocation4], 0  ;;  %s20397_s17 = smov [#allocation5]   ;;  %s20119_s21 = scalar_lea.hbm %s21852_s1, 20480 }
   0x7   :  { %s40_s18 = sshll.u32 %s20397_s17, 4  ;;  %p20120_p0 = scmp.ne.s32.totalorder %s21852_s1, %s20119_s21  ;;  %s41_s18 = int_to_ptr.vmem [resolvable:$true] %s40_s18 }
   0x8   :  { %p20123_p1 = scmp.lt.u32.totalorder %s20119_s21, %s21852_s1 }
   0xa   :  { %p20125_p2 = pnand %p20123_p1, %p20120_p0 }
   0xc   :  { %20128 = shalt.err (!%p20125_p2)
}
   0xd   :  { %s20129_s26 = scalar_lea.vmem %s41_s18, 20480  ;;  %p20134_p4 = scmp.lt.s32.totalorder %s41_s18, %s41_s18 }
   0xe   :  { %p20130_p3 = scmp.ne.s32.totalorder %s41_s18, %s20129_s26  ;;  %p20135_p5 = scmp.lt.s32.totalorder %s20129_s26, %s20129_s26 }
  0x10   :  { %p20136_p6 = por %p20135_p5, %p20134_p4 }
  0x12   :  { %p20137_p7 = pnand %p20136_p6, %p20130_p3 }
  0x14   :  { %20140 = shalt.err (!%p20137_p7)
}
  0x15   :  { %s20398_s27 = smov 1280   ;;  %s20399_s28 = smov 80  }
  0x16   :  { %46 = dma.hbm_to_vmem [thread:$0]  %s21852_s1, 20480, %s41_s18, [#allocation6], %s20398_s27, %s20398_s27, %s20399_s28  }
  0x17   :  { %s20400_s12 = smov [#allocation8]   ;;  %s20401_s14 = smov [#allocation11]  }
  0x18   :  { %s63_s13 = sshll.u32 %s20400_s12, 4  ;;  %s82_s15 = sshll.u32 %s20401_s14, 4  ;;  %s64_s13 = int_to_ptr.vmem [resolvable:$true] %s63_s13  ;;  %s83_s15 = int_to_ptr.vmem [resolvable:$true] %s82_s15 }
  0x19   :  { %s20141_s19 = scalar_lea.hbm %s21854_s3, 320 }
  0x1a   :  { %p20142_p8 = scmp.ne.s32.totalorder %s21854_s3, %s20141_s19  ;;  %p20145_p9 = scmp.lt.u32.totalorder %s20141_s19, %s21854_s3 }
  0x1c   :  { %p20147_p10 = pnand %p20145_p9, %p20142_p8 }
  0x1e   :  { %20150 = shalt.err (!%p20147_p10)
}
  0x1f   :  { %s20151_s1 = scalar_lea.vmem %s64_s13, 320  ;;  %p20156_p12 = scmp.lt.s32.totalorder %s64_s13, %s64_s13 }
  0x20   :  { %p20152_p11 = scmp.ne.s32.totalorder %s64_s13, %s20151_s1  ;;  %p20157_p13 = scmp.lt.s32.totalorder %s20151_s1, %s20151_s1 }
  0x22   :  { %p20158_p0 = por %p20157_p13, %p20156_p12 }
  0x24   :  { %p20159_p1 = pnand %p20158_p0, %p20152_p11 }
  0x26   :  { %20162 = shalt.err (!%p20159_p1)
}
  0x27   :  { %66 = dma.hbm_to_vmem [thread:$0]  %s21854_s3, 320, %s64_s13, [#allocation9]  }
  0x28   :  { %s20163_s27 = scalar_lea.hbm %s21856_s5, 204800 }
  0x29   :  { %p20164_p2 = scmp.ne.s32.totalorder %s21856_s5, %s20163_s27  ;;  %p20167_p3 = scmp.lt.u32.totalorder %s20163_s27, %s21856_s5 }
  0x2b   :  { %p20169_p4 = pnand %p20167_p3, %p20164_p2 }
  0x2d   :  { %20172 = shalt.err (!%p20169_p4)
}
  0x2e   :  { %s20173_s14 = scalar_lea.vmem %s83_s15, 204800  ;;  %p20178_p6 = scmp.lt.s32.totalorder %s83_s15, %s83_s15 }
  0x2f   :  { %p20174_p5 = scmp.ne.s32.totalorder %s83_s15, %s20173_s14  ;;  %p20179_p7 = scmp.lt.s32.totalorder %s20173_s14, %s20173_s14 }
  0x31   :  { %p20180_p8 = por %p20179_p7, %p20178_p6 }
  0x33   :  { %p20181_p9 = pnand %p20180_p8, %p20174_p5 }
  0x35   :  { %20184 = shalt.err (!%p20181_p9)
}
  0x36   :  { %s20402_s3 = smov 640   ;;  %s20403_s13 = smov 40  }
  0x37   :  { %88 = dma.hbm_to_vmem [thread:$0]  %s21856_s5, 204800, %s83_s15, [#allocation12], %s20402_s3, %s20402_s3, %s20403_s13  }
  0x38   :  { %s20404_s19 = smov [#allocation14]   ;;  %s20185_s23 = scalar_lea.hbm %s21858_s7, 160 }
  0x39   :  { %s105_s20 = sshll.u32 %s20404_s19, 4  ;;  %p20186_p10 = scmp.ne.s32.totalorder %s21858_s7, %s20185_s23  ;;  %s106_s20 = int_to_ptr.vmem [resolvable:$true] %s105_s20 }
  0x3a   :  { %p20189_p11 = scmp.lt.u32.totalorder %s20185_s23, %s21858_s7 }
  0x3c   :  { %p20191_p12 = pnand %p20189_p11, %p20186_p10 }
  0x3e   :  { %20194 = shalt.err (!%p20191_p12)
}
  0x3f   :  { %s20195_s26 = scalar_lea.vmem %s106_s20, 160  ;;  %p20200_p0 = scmp.lt.s32.totalorder %s106_s20, %s106_s20 }
  0x40   :  { %p20196_p13 = scmp.ne.s32.totalorder %s106_s20, %s20195_s26  ;;  %p20201_p1 = scmp.lt.s32.totalorder %s20195_s26, %s20195_s26 }
  0x42   :  { %p20202_p2 = por %p20201_p1, %p20200_p0 }
  0x44   :  { %p20203_p3 = pnand %p20202_p2, %p20196_p13 }
  0x46   :  { %20206 = shalt.err (!%p20203_p3)
}
  0x47   :  { %108 = dma.hbm_to_vmem [thread:$0]  %s21858_s7, 160, %s106_s20, [#allocation15]  }
  0x48   :  { %s20405_s27 = smov [#allocation17]   ;;  %s20406_s29 = smov [#allocation2]  }
  0x49   :  { %s124_s28 = sshll.u32 %s20405_s27, 4  ;;  %s28_s30 = sshll.u32 %s20406_s29, 4  ;;  %s125_s28 = int_to_ptr.vmem [resolvable:$true] %s124_s28  ;;  %s20526_s30 = int_to_ptr.vmem [resolvable:$true] %s28_s30 }
  0x4a   :  { %s20207_s3 = scalar_lea.hbm %s21860_s9, 10240 }
  0x4b   :  { %p20208_p4 = scmp.ne.s32.totalorder %s21860_s9, %s20207_s3  ;;  %p20211_p5 = scmp.lt.u32.totalorder %s20207_s3, %s21860_s9 }
  0x4d   :  { %p20213_p6 = pnand %p20211_p5, %p20208_p4 }
  0x4f   :  { %20216 = shalt.err (!%p20213_p6)
}
  0x50   :  { %s20217_s7 = scalar_lea.vmem %s125_s28, 10240  ;;  %p20222_p8 = scmp.lt.s32.totalorder %s125_s28, %s125_s28 }
  0x51   :  { %p20218_p7 = scmp.ne.s32.totalorder %s125_s28, %s20217_s7  ;;  %p20223_p9 = scmp.lt.s32.totalorder %s20217_s7, %s20217_s7 }
  0x53   :  { %p20224_p10 = por %p20223_p9, %p20222_p8 }
  0x55   :  { %p20225_p11 = pnand %p20224_p10, %p20218_p7 }
  0x57   :  { %20228 = shalt.err (!%p20225_p11)
}
  0x58   :  { %s20407_s20 = smov 64   ;;  %s20408_s21 = smov 4  }
  0x59   :  { %130 = dma.hbm_to_vmem [thread:$0]  %s21860_s9, 10240, %s125_s28, [#allocation18], %s20407_s20, %s20407_s20, %s20408_s21  }
  0x5a   :  { %s20229_s24 = scalar_lea.hbm %s21851_s0, 128 }
  0x5b   :  { %p20230_p12 = scmp.ne.s32.totalorder %s21851_s0, %s20229_s24  ;;  %p20233_p13 = scmp.lt.u32.totalorder %s20229_s24, %s21851_s0 }
  0x5d   :  { %p20235_p0 = pnand %p20233_p13, %p20230_p12 }
  0x5f   :  { %20238 = shalt.err (!%p20235_p0)
}
  0x60   :  { %s20239_s27 = scalar_lea.vmem %s20526_s30, 128  ;;  %p20244_p2 = scmp.lt.s32.totalorder %s20526_s30, %s20526_s30 }
  0x61   :  { %p20240_p1 = scmp.ne.s32.totalorder %s20526_s30, %s20239_s27  ;;  %p20245_p3 = scmp.lt.s32.totalorder %s20239_s27, %s20239_s27 }
  0x63   :  { %p20246_p4 = por %p20245_p3, %p20244_p2 }
  0x65   :  { %p20247_p5 = pnand %p20246_p4, %p20240_p1 }
  0x67   :  { %20250 = shalt.err (!%p20247_p5)
}
  0x68   :  { %34 = dma.hbm_to_vmem [thread:$0]  %s21851_s0, 128, %s20526_s30, [#allocation3], %s20407_s20, %s20407_s20, %s20408_s21  }
  0x69   :  { %s20409_s29 = smov [#allocation7]   ;;  %s20410_s14 = smov [#allocation10]  }
  0x6a   :  { %s53_s12 = sshll.u32 %s20409_s29, 4  ;;  %s73_s3 = sshll.u32 %s20410_s14, 4  ;;  %s54_s12 = int_to_ptr.vmem [resolvable:$true] %s53_s12  ;;  %s74_s3 = int_to_ptr.vmem [resolvable:$true] %s73_s3 }
  0x6b   :  { %s20251_s17 = scalar_lea.hbm %s21853_s2, 320 }
  0x6c   :  { %p20252_p6 = scmp.ne.s32.totalorder %s21853_s2, %s20251_s17  ;;  %p20255_p7 = scmp.lt.u32.totalorder %s20251_s17, %s21853_s2 }
  0x6e   :  { %p20257_p8 = pnand %p20255_p7, %p20252_p6 }
  0x70   :  { %20260 = shalt.err (!%p20257_p8)
}
  0x71   :  { %s20261_s0 = scalar_lea.vmem %s54_s12, 320  ;;  %p20266_p10 = scmp.lt.s32.totalorder %s54_s12, %s54_s12 }
  0x72   :  { %p20262_p9 = scmp.ne.s32.totalorder %s54_s12, %s20261_s0  ;;  %p20267_p11 = scmp.lt.s32.totalorder %s20261_s0, %s20261_s0 }
  0x74   :  { %p20268_p12 = por %p20267_p11, %p20266_p10 }
  0x76   :  { %p20269_p13 = pnand %p20268_p12, %p20262_p9 }
  0x78   :  { %20272 = shalt.err (!%p20269_p13)
}
  0x79   :  { %56 = dma.hbm_to_vmem [thread:$0]  %s21853_s2, 320, %s54_s12, [#allocation6]  }
  0x7a   :  { %s20273_s18 = scalar_lea.hbm %s21855_s4, 320 }
  0x7b   :  { %p20274_p0 = scmp.ne.s32.totalorder %s21855_s4, %s20273_s18  ;;  %p20277_p1 = scmp.lt.u32.totalorder %s20273_s18, %s21855_s4 }
  0x7d   :  { %p20279_p2 = pnand %p20277_p1, %p20274_p0 }
  0x7f   :  { %20282 = shalt.err (!%p20279_p2)
}
  0x80   :  { %s20283_s15 = scalar_lea.vmem %s74_s3, 320  ;;  %p20288_p4 = scmp.lt.s32.totalorder %s74_s3, %s74_s3 }
  0x81   :  { %p20284_p3 = scmp.ne.s32.totalorder %s74_s3, %s20283_s15  ;;  %p20289_p5 = scmp.lt.s32.totalorder %s20283_s15, %s20283_s15 }
  0x83   :  { %p20290_p6 = por %p20289_p5, %p20288_p4 }
  0x85   :  { %p20291_p7 = pnand %p20290_p6, %p20284_p3 }
  0x87   :  { %20294 = shalt.err (!%p20291_p7)
}
  0x88   :  { %76 = dma.hbm_to_vmem [thread:$0]  %s21855_s4, 320, %s74_s3, [#allocation9]  }
  0x89   :  { %s20411_s9 = smov [#allocation13]   ;;  %s20412_s29 = smov [#allocation16]  }
  0x8a   :  { %s95_s28 = sshll.u32 %s20411_s9, 4  ;;  %s115_s12 = sshll.u32 %s20412_s29, 4  ;;  %s96_s28 = int_to_ptr.vmem [resolvable:$true] %s95_s28  ;;  %s116_s12 = int_to_ptr.vmem [resolvable:$true] %s115_s12 }
  0x8b   :  { %s20295_s16 = scalar_lea.hbm %s21857_s6, 160 }
  0x8c   :  { %p20296_p8 = scmp.ne.s32.totalorder %s21857_s6, %s20295_s16  ;;  %p20299_p9 = scmp.lt.u32.totalorder %s20295_s16, %s21857_s6 }
  0x8e   :  { %p20301_p10 = pnand %p20299_p9, %p20296_p8 }
  0x90   :  { %20304 = shalt.err (!%p20301_p10)
}
  0x91   :  { %s20305_s4 = scalar_lea.vmem %s96_s28, 160  ;;  %p20310_p12 = scmp.lt.s32.totalorder %s96_s28, %s96_s28 }
  0x92   :  { %p20306_p11 = scmp.ne.s32.totalorder %s96_s28, %s20305_s4  ;;  %p20311_p13 = scmp.lt.s32.totalorder %s20305_s4, %s20305_s4 }
  0x94   :  { %p20312_p0 = por %p20311_p13, %p20310_p12 }
  0x96   :  { %p20313_p1 = pnand %p20312_p0, %p20306_p11 }
  0x98   :  { %20316 = shalt.err (!%p20313_p1)
}
  0x99   :  { %98 = dma.hbm_to_vmem [thread:$0]  %s21857_s6, 160, %s96_s28, [#allocation12]  }
  0x9a   :  { %s20317_s20 = scalar_lea.hbm %s21859_s8, 160 }
  0x9b   :  { %p20318_p2 = scmp.ne.s32.totalorder %s21859_s8, %s20317_s20  ;;  %p20321_p3 = scmp.lt.u32.totalorder %s20317_s20, %s21859_s8 }
  0x9d   :  { %p20323_p4 = pnand %p20321_p3, %p20318_p2 }
  0x9f   :  { %20326 = shalt.err (!%p20323_p4)
}
  0xa0   :  { %s20327_s25 = scalar_lea.vmem %s116_s12, 160  ;;  %p20332_p6 = scmp.lt.s32.totalorder %s116_s12, %s116_s12 }
  0xa1   :  { %p20328_p5 = scmp.ne.s32.totalorder %s116_s12, %s20327_s25  ;;  %p20333_p7 = scmp.lt.s32.totalorder %s20327_s25, %s20327_s25 }
  0xa3   :  { %p20334_p8 = por %p20333_p7, %p20332_p6 }
  0xa5   :  { %p20335_p9 = pnand %p20334_p8, %p20328_p5 }
  0xa7   :  { %20338 = shalt.err (!%p20335_p9)
}
  0xa8   :  { %118 = dma.hbm_to_vmem [thread:$0]  %s21859_s8, 160, %s116_s12, [#allocation15]  }
  0xa9   :  { %s20413_s5 = smov [#allocation19]   ;;  %s20339_s9 = scalar_lea.hbm %s21861_s10, 16 }
  0xaa   :  { %s137_s15 = sshll.u32 %s20413_s5, 4  ;;  %p20340_p10 = scmp.ne.s32.totalorder %s21861_s10, %s20339_s9  ;;  %s138_s15 = int_to_ptr.vmem [resolvable:$true] %s137_s15 }
  0xab   :  { %p20343_p11 = scmp.lt.u32.totalorder %s20339_s9, %s21861_s10 }
  0xad   :  { %p20345_p12 = pnand %p20343_p11, %p20340_p10 }
  0xaf   :  { %20348 = shalt.err (!%p20345_p12)
}
  0xb0   :  { %s20349_s16 = scalar_lea.vmem %s138_s15, 16  ;;  %s20353_s8 = scalar_lea.vmem %s138_s15, 32 }
  0xb1   :  { %p20350_p13 = scmp.ne.s32.totalorder %s138_s15, %s20349_s16  ;;  %p20354_p0 = scmp.lt.s32.totalorder %s138_s15, %s138_s15 }
  0xb2   :  { %p20355_p1 = scmp.lt.s32.totalorder %s20353_s8, %s20349_s16 }
  0xb4   :  { %p20356_p2 = por %p20355_p1, %p20354_p0 }
  0xb6   :  { %p20357_p3 = pnand %p20356_p2, %p20350_p13 }
  0xb8   :  { %20360 = shalt.err (!%p20357_p3)
}
  0xb9   :  { %140 = dma.hbm_to_vmem [thread:$0]  %s21861_s10, 16, %s138_s15, [#allocation18]  }
  0xba   :  { %20383 = dma.done.wait [#allocation3], 128  }
  0xbb   :  { %20384 = vsyncadd [#allocation3], 4294967168 }
  0xbc   :  { %20385 = dma.done.wait [#allocation6], 20800  }
  0xbd   :  { %20386 = vsyncadd [#allocation6], 4294946496 }
  0xbe   :  { %20387 = dma.done.wait [#allocation9], 640  }
  0xbf   :  { %20388 = vsyncadd [#allocation9], 4294966656 }
  0xc0   :  { %20389 = dma.done.wait [#allocation12], 204960  }
  0xc1   :  { %20390 = vsyncadd [#allocation12], 4294762336 }
  0xc2   :  { %20391 = dma.done.wait [#allocation15], 320  }
  0xc3   :  { %20392 = vsyncadd [#allocation15], 4294966976 }
  0xc4   :  { %20393 = dma.done.wait [#allocation18], 10256  }
  0xc5   :  { %20394 = vsyncadd [#allocation18], 4294957040  ;;  %v20414_v0 = vmov 0   ;;  %v17388_v1 = vld [vmem:[#allocation5 + $0x4] ss:$80 sps:$4 sm:$0xff]   ;;  %v20619_v27 = vld [vmem:[#allocation2] sm:$0xff]  }
  0xc6   :  { %1281 = vmatprep.mubr.bf16.mxu1 %v20414_v0  ;;  %1367 = vmatprep.mubr.bf16.mxu0 %v20414_v0  ;;  %v17390_v2 = vld [vmem:[#allocation5] ss:$80 sps:$4 sm:$0xff]   ;;  %v17391_v3 = vld [vmem:[#allocation5 + $0xa4] ss:$80 sps:$4 sm:$0xff]   ;;  %v17415_v26 = vld [vmem:[#allocation5 + $0xc] ss:$80 sps:$4 sm:$0xff]  }
  0xc7   :  { %1249 = vmatprep.subr.bf16.mxu1 %v17388_v1  ;;  %v17393_v4 = vld [vmem:[#allocation5 + $0xa0] ss:$80 sps:$4 sm:$0xff]   ;;  %v17394_v5 = vld [vmem:[#allocation5 + $0x144] ss:$80 sps:$4 sm:$0xff]   ;;  %v17413_v29 = vld [vmem:[#allocation5 + $0x8] ss:$80 sps:$4 sm:$0xff]  }
  0xc8   :  { %1250 = vmatpush1.bf16.msra.mxu1 %v17390_v2  ;;  %v17396_v6 = vld [vmem:[#allocation5 + $0x140] ss:$80 sps:$4 sm:$0xff]   ;;  %v17397_v7 = vld [vmem:[#allocation5 + $0x1e4] ss:$80 sps:$4 sm:$0xff]   ;;  %v17418_v31 = vld [vmem:[#allocation5 + $0xac] ss:$80 sps:$4 sm:$0xff]  }
  0xc9   :  { %1251 = vmatprep.subr.bf16.mxu1 %v17391_v3  ;;  %v17399_v8 = vld [vmem:[#allocation5 + $0x1e0] ss:$80 sps:$4 sm:$0xff]   ;;  %v17400_v9 = vld [vmem:[#allocation5 + $0x284] ss:$80 sps:$4 sm:$0xff]   ;;  %v17416_v33 = vld [vmem:[#allocation5 + $0xa8] ss:$80 sps:$4 sm:$0xff]  }
  0xca   :  { %v17402_v10 = vld [vmem:[#allocation5 + $0x280] ss:$80 sps:$4 sm:$0xff]   ;;  %v17419_v11 = vld [vmem:[#allocation5 + $0x14] ss:$80 sps:$4 sm:$0xff]   ;;  %v17424_v35 = vld [vmem:[#allocation5 + $0x14c] ss:$80 sps:$4 sm:$0xff]  }
  0xcb   :  { %v17421_v12 = vld [vmem:[#allocation5 + $0x10] ss:$80 sps:$4 sm:$0xff]   ;;  %v17403_v13 = vld [vmem:[#allocation5 + $0x324] ss:$80 sps:$4 sm:$0xff]   ;;  %1335 = vmatprep.subr.bf16.mxu0 %v17419_v11  ;;  %v17422_v37 = vld [vmem:[#allocation5 + $0x148] ss:$80 sps:$4 sm:$0xff]  }
  0xcc   :  { %1252 = vmatpush1.bf16.msra.mxu1 %v17393_v4  ;;  %v17425_v14 = vld [vmem:[#allocation5 + $0xb4] ss:$80 sps:$4 sm:$0xff]   ;;  %1336 = vmatpush1.bf16.msra.mxu0 %v17421_v12  ;;  %v17427_v15 = vld [vmem:[#allocation5 + $0xb0] ss:$80 sps:$4 sm:$0xff]   ;;  %v17430_v39 = vld [vmem:[#allocation5 + $0x1ec] ss:$80 sps:$4 sm:$0xff]  }
  0xcd   :  { %1253 = vmatprep.subr.bf16.mxu1 %v17394_v5  ;;  %v17405_v16 = vld [vmem:[#allocation5 + $0x320] ss:$80 sps:$4 sm:$0xff]   ;;  %1337 = vmatprep.subr.bf16.mxu0 %v17425_v14  ;;  %v17406_v17 = vld [vmem:[#allocation5 + $0x3c4] ss:$80 sps:$4 sm:$0xff]   ;;  %v17428_v41 = vld [vmem:[#allocation5 + $0x1e8] ss:$80 sps:$4 sm:$0xff]  }
  0xce   :  { %v17431_v18 = vld [vmem:[#allocation5 + $0x154] ss:$80 sps:$4 sm:$0xff]   ;;  %v17433_v19 = vld [vmem:[#allocation5 + $0x150] ss:$80 sps:$4 sm:$0xff]   ;;  %v17436_v43 = vld [vmem:[#allocation5 + $0x28c] ss:$80 sps:$4 sm:$0xff]  }
  0xcf   :  { %v17408_v20 = vld [vmem:[#allocation5 + $0x3c0] ss:$80 sps:$4 sm:$0xff]   ;;  %v17437_v21 = vld [vmem:[#allocation5 + $0x1f4] ss:$80 sps:$4 sm:$0xff]   ;;  %v17434_v45 = vld [vmem:[#allocation5 + $0x288] ss:$80 sps:$4 sm:$0xff]  }
  0xd0   :  { %1254 = vmatpush1.bf16.msra.mxu1 %v17396_v6  ;;  %1338 = vmatpush1.bf16.msra.mxu0 %v17427_v15  ;;  %v17409_v22 = vld [vmem:[#allocation5 + $0x464] ss:$80 sps:$4 sm:$0xff]   ;;  %v17439_v23 = vld [vmem:[#allocation5 + $0x1f0] ss:$80 sps:$4 sm:$0xff]   ;;  %v17442_v47 = vld [vmem:[#allocation5 + $0x32c] ss:$80 sps:$4 sm:$0xff]  }
  0xd1   :  { %1255 = vmatprep.subr.bf16.mxu1 %v17397_v7  ;;  %1339 = vmatprep.subr.bf16.mxu0 %v17431_v18  ;;  %v17411_v24 = vld [vmem:[#allocation5 + $0x460] ss:$80 sps:$4 sm:$0xff]   ;;  %v17443_v25 = vld [vmem:[#allocation5 + $0x294] ss:$80 sps:$4 sm:$0xff]   ;;  %v17440_v49 = vld [vmem:[#allocation5 + $0x328] ss:$80 sps:$4 sm:$0xff]  }
  0xd2   :  { %v17445_v28 = vld [vmem:[#allocation5 + $0x290] ss:$80 sps:$4 sm:$0xff]   ;;  %v17449_v30 = vld [vmem:[#allocation5 + $0x334] ss:$80 sps:$4 sm:$0xff]   ;;  %v17448_v51 = vld [vmem:[#allocation5 + $0x3cc] ss:$80 sps:$4 sm:$0xff]  }
  0xd3   :  { %v17451_v32 = vld [vmem:[#allocation5 + $0x330] ss:$80 sps:$4 sm:$0xff]   ;;  %v17455_v34 = vld [vmem:[#allocation5 + $0x3d4] ss:$80 sps:$4 sm:$0xff]   ;;  %v17446_v53 = vld [vmem:[#allocation5 + $0x3c8] ss:$80 sps:$4 sm:$0xff]  }
  0xd4   :  { %1256 = vmatpush1.bf16.msra.mxu1 %v17399_v8  ;;  %1340 = vmatpush1.bf16.msra.mxu0 %v17433_v19  ;;  %v17457_v36 = vld [vmem:[#allocation5 + $0x3d0] ss:$80 sps:$4 sm:$0xff]   ;;  %v17458_v38 = vld [vmem:[#allocation5 + $0x474] ss:$80 sps:$4 sm:$0xff]   ;;  %v17454_v55 = vld [vmem:[#allocation5 + $0x46c] ss:$80 sps:$4 sm:$0xff]  }
  0xd5   :  { %1257 = vmatprep.subr.bf16.mxu1 %v17400_v9  ;;  %1341 = vmatprep.subr.bf16.mxu0 %v17437_v21  ;;  %v17463_v40 = vld [vmem:[#allocation5 + $0x470] ss:$80 sps:$4 sm:$0xff]   ;;  %v17469_v42 = vld [vmem:[#allocation5 + $0x24] ss:$80 sps:$4 sm:$0xff]   ;;  %v17452_v57 = vld [vmem:[#allocation5 + $0x468] ss:$80 sps:$4 sm:$0xff]  }
  0xd6   :  { %v17467_v44 = vld [vmem:[#allocation5 + $0x20] ss:$80 sps:$4 sm:$0xff]   ;;  %v17475_v46 = vld [vmem:[#allocation5 + $0xc4] ss:$80 sps:$4 sm:$0xff]   ;;  %v17462_v59 = vld [vmem:[#allocation5 + $0x1c] ss:$80 sps:$4 sm:$0xff]  }
  0xd7   :  { %v17473_v48 = vld [vmem:[#allocation5 + $0xc0] ss:$80 sps:$4 sm:$0xff]   ;;  %v17481_v50 = vld [vmem:[#allocation5 + $0x164] ss:$80 sps:$4 sm:$0xff]   ;;  %v17460_v61 = vld [vmem:[#allocation5 + $0x18] ss:$80 sps:$4 sm:$0xff]  }
  0xd8   :  { %1258 = vmatpush1.bf16.msra.mxu1 %v17402_v10  ;;  %1342 = vmatpush1.bf16.msra.mxu0 %v17439_v23  ;;  %v17479_v52 = vld [vmem:[#allocation5 + $0x160] ss:$80 sps:$4 sm:$0xff]   ;;  %v17487_v54 = vld [vmem:[#allocation5 + $0x204] ss:$80 sps:$4 sm:$0xff]   ;;  %v17466_v63 = vld [vmem:[#allocation5 + $0xbc] ss:$80 sps:$4 sm:$0xff]  }
  0xd9   :  { %1259 = vmatprep.subr.bf16.mxu1 %v17403_v13  ;;  %1343 = vmatprep.subr.bf16.mxu0 %v17443_v25  ;;  %v17485_v56 = vld [vmem:[#allocation5 + $0x200] ss:$80 sps:$4 sm:$0xff]   ;;  %v17493_v58 = vld [vmem:[#allocation5 + $0x2a4] ss:$80 sps:$4 sm:$0xff]   ;;  %v17464_v2 = vld [vmem:[#allocation5 + $0xb8] ss:$80 sps:$4 sm:$0xff]  }
  0xda   :  { %v17491_v60 = vld [vmem:[#allocation5 + $0x2a0] ss:$80 sps:$4 sm:$0xff]   ;;  %v17499_v62 = vld [vmem:[#allocation5 + $0x344] ss:$80 sps:$4 sm:$0xff]   ;;  %v17472_v4 = vld [vmem:[#allocation5 + $0x15c] ss:$80 sps:$4 sm:$0xff]  }
  0xdb   :  { %v17497_v1 = vld [vmem:[#allocation5 + $0x340] ss:$80 sps:$4 sm:$0xff]   ;;  %v17505_v3 = vld [vmem:[#allocation5 + $0x3e4] ss:$80 sps:$4 sm:$0xff]   ;;  %v17470_v6 = vld [vmem:[#allocation5 + $0x158] ss:$80 sps:$4 sm:$0xff]  }
  0xdc   :  { %1260 = vmatpush1.bf16.msra.mxu1 %v17405_v16  ;;  %1344 = vmatpush1.bf16.msra.mxu0 %v17445_v28  ;;  %v17503_v5 = vld [vmem:[#allocation5 + $0x3e0] ss:$80 sps:$4 sm:$0xff]   ;;  %v17508_v7 = vld [vmem:[#allocation5 + $0x484] ss:$80 sps:$4 sm:$0xff]   ;;  %v17478_v8 = vld [vmem:[#allocation5 + $0x1fc] ss:$80 sps:$4 sm:$0xff]  }
  0xdd   :  { %1261 = vmatprep.subr.bf16.mxu1 %v17406_v17  ;;  %1345 = vmatprep.subr.bf16.mxu0 %v17449_v30  ;;  %v17506_v9 = vld [vmem:[#allocation5 + $0x480] ss:$80 sps:$4 sm:$0xff]   ;;  %v17476_v10 = vld [vmem:[#allocation5 + $0x1f8] ss:$80 sps:$4 sm:$0xff]   ;;  %v17517_v11 = vld [vmem:[#allocation5 + $0x34] ss:$80 sps:$4 sm:$0xff]  }
  0xde   :  { %v17484_v12 = vld [vmem:[#allocation5 + $0x29c] ss:$80 sps:$4 sm:$0xff]   ;;  %v17515_v13 = vld [vmem:[#allocation5 + $0x30] ss:$80 sps:$4 sm:$0xff]   ;;  %v17482_v14 = vld [vmem:[#allocation5 + $0x298] ss:$80 sps:$4 sm:$0xff]  }
  0xdf   :  { %v17523_v15 = vld [vmem:[#allocation5 + $0xd4] ss:$80 sps:$4 sm:$0xff]   ;;  %v17490_v16 = vld [vmem:[#allocation5 + $0x33c] ss:$80 sps:$4 sm:$0xff]   ;;  %v17521_v17 = vld [vmem:[#allocation5 + $0xd0] ss:$80 sps:$4 sm:$0xff]  }
  0xe0   :  { %1262 = vmatpush1.bf16.msra.mxu1 %v17408_v20  ;;  %1346 = vmatpush1.bf16.msra.mxu0 %v17451_v32  ;;  %v17488_v18 = vld [vmem:[#allocation5 + $0x338] ss:$80 sps:$4 sm:$0xff]   ;;  %v17529_v19 = vld [vmem:[#allocation5 + $0x174] ss:$80 sps:$4 sm:$0xff]   ;;  %v17496_v20 = vld [vmem:[#allocation5 + $0x3dc] ss:$80 sps:$4 sm:$0xff]  }
  0xe1   :  { %1263 = vmatprep.subr.bf16.mxu1 %v17409_v22  ;;  %1347 = vmatprep.subr.bf16.mxu0 %v17455_v34  ;;  %v17527_v21 = vld [vmem:[#allocation5 + $0x170] ss:$80 sps:$4 sm:$0xff]   ;;  %v17494_v22 = vld [vmem:[#allocation5 + $0x3d8] ss:$80 sps:$4 sm:$0xff]   ;;  %v17535_v23 = vld [vmem:[#allocation5 + $0x214] ss:$80 sps:$4 sm:$0xff]  }
  0xe2   :  { %v17533_v25 = vld [vmem:[#allocation5 + $0x210] ss:$80 sps:$4 sm:$0xff]   ;;  %v17541_v28 = vld [vmem:[#allocation5 + $0x2b4] ss:$80 sps:$4 sm:$0xff]   ;;  %s20415_s10 = smov [#allocation20]  }
  0xe3   :  { %v17539_v30 = vld [vmem:[#allocation5 + $0x2b0] ss:$80 sps:$4 sm:$0xff]   ;;  %v17547_v32 = vld [vmem:[#allocation5 + $0x354] ss:$80 sps:$4 sm:$0xff]   ;;  %s15198_s19 = sshll.u32 %s20415_s10, 4  ;;  %s15199_s19 = int_to_ptr.vmem [resolvable:$true] %s15198_s19 }
  0xe4   :  { %1264 = vmatpush1.bf16.msra.mxu1 %v17411_v24  ;;  %1348 = vmatpush1.bf16.msra.mxu0 %v17457_v36  ;;  %v17502_v24 = vld [vmem:[#allocation5 + $0x47c] ss:$80 sps:$4 sm:$0xff]   ;;  %v17545_v34 = vld [vmem:[#allocation5 + $0x350] ss:$80 sps:$4 sm:$0xff]   ;;  %v17553_v36 = vld [vmem:[#allocation5 + $0x3f4] ss:$80 sps:$4 sm:$0xff]   ;;  %p20366_p5 = scmp.lt.s32.totalorder %s15199_s19, %s15199_s19 }
  0xe5   :  { %1292 = vmatprep.subr.bf16.mxu1 %v17415_v26  ;;  %1349 = vmatprep.subr.bf16.mxu0 %v17458_v38  ;;  %v17500_v26 = vld [vmem:[#allocation5 + $0x478] ss:$80 sps:$4 sm:$0xff]   ;;  %v17551_v38 = vld [vmem:[#allocation5 + $0x3f0] ss:$80 sps:$4 sm:$0xff]   ;;  %s20361_s7 = scalar_lea.vmem %s15199_s19, 256 }
  0xe6   :  { %p20362_p4 = scmp.ne.s32.totalorder %s15199_s19, %s20361_s7  ;;  %p20367_p6 = scmp.lt.s32.totalorder %s20361_s7, %s20361_s7 }
  0xe7   :  { %1282 = vmatmul.mubr.bf16.vlgmr.msra.gmra.mrb[0].mxu1 %v20619_v27 }
  0xe8   :  { %1293 = vmatpush1.bf16.msra.mxu1 %v17413_v29  ;;  %1324 = vmatprep.mubr.bf16.mxu1 %v20414_v0  ;;  %v17511_v29 = vld [vmem:[#allocation5 + $0x2c] ss:$80 sps:$4 sm:$0xff]   ;;  %p20368_p7 = por %p20367_p6, %p20366_p5 }
  0xe9   :  { %1294 = vmatprep.subr.bf16.mxu1 %v17418_v31  ;;  %1350 = vmatpush1.bf16.msra.mxu0 %v17463_v40  ;;  %v17509_v31 = vld [vmem:[#allocation5 + $0x28] ss:$80 sps:$4 sm:$0xff]   ;;  %v17556_v40 = vld [vmem:[#allocation5 + $0x494] ss:$80 sps:$4 sm:$0xff]  }
  0xea   :  { %1421 = vmatprep.subr.bf16.mxu0 %v17469_v42  ;;  %v17554_v42 = vld [vmem:[#allocation5 + $0x490] ss:$80 sps:$4 sm:$0xff]   ;;  %p20369_p8 = pnand %p20368_p7, %p20362_p4 }
  0xec   :  { %1295 = vmatpush1.bf16.msra.mxu1 %v17416_v33  ;;  %1368 = vmatmul.mubr.bf16.vlgmr.msra.gmra.mrb[0].mxu0 %v20619_v27  ;;  %v17514_v33 = vld [vmem:[#allocation5 + $0xcc] ss:$80 sps:$4 sm:$0xff]  }
  0xed   :  { %1296 = vmatprep.subr.bf16.mxu1 %v17424_v35  ;;  %1422 = vmatpush1.bf16.msra.mxu0 %v17467_v44  ;;  %v17512_v35 = vld [vmem:[#allocation5 + $0xc8] ss:$80 sps:$4 sm:$0xff]   ;;  %v17532_v44 = vld [vmem:[#allocation5 + $0x2ac] ss:$80 sps:$4 sm:$0xff]  }
  0xee   :  { %1453 = vmatprep.mubr.bf16.mxu0 %v20414_v0  ;;  %1423 = vmatprep.subr.bf16.mxu0 %v17475_v46  ;;  %v17563_v46 = vld [vmem:[#allocation5 + $0x40] ss:$80 sps:$4 sm:$0xff]  }
  0xf0   :  { %1297 = vmatpush1.bf16.msra.mxu1 %v17422_v37  ;;  %v17520_v37 = vld [vmem:[#allocation5 + $0x16c] ss:$80 sps:$4 sm:$0xff]  }
  0xf1   :  { %1298 = vmatprep.subr.bf16.mxu1 %v17430_v39  ;;  %1424 = vmatpush1.bf16.msra.mxu0 %v17473_v48  ;;  %v17518_v39 = vld [vmem:[#allocation5 + $0x168] ss:$80 sps:$4 sm:$0xff]   ;;  %v17571_v48 = vld [vmem:[#allocation5 + $0xe4] ss:$80 sps:$4 sm:$0xff]  }
  0xf2   :  { %1425 = vmatprep.subr.bf16.mxu0 %v17481_v50  ;;  %v17569_v50 = vld [vmem:[#allocation5 + $0xe0] ss:$80 sps:$4 sm:$0xff]  }
  0xf4   :  { %1299 = vmatpush1.bf16.msra.mxu1 %v17428_v41  ;;  %v17526_v41 = vld [vmem:[#allocation5 + $0x20c] ss:$80 sps:$4 sm:$0xff]  }
  0xf5   :  { %1300 = vmatprep.subr.bf16.mxu1 %v17436_v43  ;;  %1426 = vmatpush1.bf16.msra.mxu0 %v17479_v52  ;;  %v17524_v43 = vld [vmem:[#allocation5 + $0x208] ss:$80 sps:$4 sm:$0xff]   ;;  %v17577_v52 = vld [vmem:[#allocation5 + $0x184] ss:$80 sps:$4 sm:$0xff]  }
  0xf6   :  { %1427 = vmatprep.subr.bf16.mxu0 %v17487_v54  ;;  %v17575_v54 = vld [vmem:[#allocation5 + $0x180] ss:$80 sps:$4 sm:$0xff]  }
  0xf8   :  { %1301 = vmatpush1.bf16.msra.mxu1 %v17434_v45  ;;  %v17565_v45 = vld [vmem:[#allocation5 + $0x44] ss:$80 sps:$4 sm:$0xff]  }
  0xf9   :  { %1302 = vmatprep.subr.bf16.mxu1 %v17442_v47  ;;  %1428 = vmatpush1.bf16.msra.mxu0 %v17485_v56  ;;  %v17530_v47 = vld [vmem:[#allocation5 + $0x2a8] ss:$80 sps:$4 sm:$0xff]   ;;  %v17583_v56 = vld [vmem:[#allocation5 + $0x224] ss:$80 sps:$4 sm:$0xff]  }
  0xfa   :  { %1429 = vmatprep.subr.bf16.mxu0 %v17493_v58  ;;  %v17581_v58 = vld [vmem:[#allocation5 + $0x220] ss:$80 sps:$4 sm:$0xff]  }
  0xfc   :  { %1303 = vmatpush1.bf16.msra.mxu1 %v17440_v49  ;;  %v17538_v49 = vld [vmem:[#allocation5 + $0x34c] ss:$80 sps:$4 sm:$0xff]  }
  0xfd   :  { %1304 = vmatprep.subr.bf16.mxu1 %v17448_v51  ;;  %1430 = vmatpush1.bf16.msra.mxu0 %v17491_v60  ;;  %v17536_v51 = vld [vmem:[#allocation5 + $0x348] ss:$80 sps:$4 sm:$0xff]   ;;  %v17589_v60 = vld [vmem:[#allocation5 + $0x2c4] ss:$80 sps:$4 sm:$0xff]  }
  0xfe   :  { %1431 = vmatprep.subr.bf16.mxu0 %v17499_v62  ;;  %v17587_v62 = vld [vmem:[#allocation5 + $0x2c0] ss:$80 sps:$4 sm:$0xff]  }
 0x100   :  { %1305 = vmatpush1.bf16.msra.mxu1 %v17446_v53  ;;  %v17544_v53 = vld [vmem:[#allocation5 + $0x3ec] ss:$80 sps:$4 sm:$0xff]  }
 0x101   :  { %1306 = vmatprep.subr.bf16.mxu1 %v17454_v55  ;;  %1432 = vmatpush1.bf16.msra.mxu0 %v17497_v1  ;;  %v17542_v55 = vld [vmem:[#allocation5 + $0x3e8] ss:$80 sps:$4 sm:$0xff]   ;;  %v17595_v1 = vld [vmem:[#allocation5 + $0x364] ss:$80 sps:$4 sm:$0xff]  }
 0x102   :  { %1433 = vmatprep.subr.bf16.mxu0 %v17505_v3  ;;  %v17593_v3 = vld [vmem:[#allocation5 + $0x360] ss:$80 sps:$4 sm:$0xff]  }
 0x104   :  { %1307 = vmatpush1.bf16.msra.mxu1 %v17452_v57  ;;  %v17550_v57 = vld [vmem:[#allocation5 + $0x48c] ss:$80 sps:$4 sm:$0xff]  }
 0x105   :  { %1378 = vmatprep.subr.bf16.mxu1 %v17462_v59  ;;  %1434 = vmatpush1.bf16.msra.mxu0 %v17503_v5  ;;  %v17548_v59 = vld [vmem:[#allocation5 + $0x488] ss:$80 sps:$4 sm:$0xff]   ;;  %v17601_v5 = vld [vmem:[#allocation5 + $0x404] ss:$80 sps:$4 sm:$0xff]  }
 0x106   :  { %1435 = vmatprep.subr.bf16.mxu0 %v17508_v7  ;;  %v17599_v7 = vld [vmem:[#allocation5 + $0x400] ss:$80 sps:$4 sm:$0xff]  }
 0x107   :  { %1325 = vmatmul.mubr.bf16.vlgmr.msra.gmra.mrb[4].mxu1 %v20619_v27 }
 0x108   :  { %1379 = vmatpush1.bf16.msra.mxu1 %v17460_v61  ;;  %1410 = vmatprep.mubr.bf16.mxu1 %v20414_v0  ;;  %v17559_v61 = vld [vmem:[#allocation5 + $0x3c] ss:$80 sps:$4 sm:$0xff]  }
 0x109   :  { %1380 = vmatprep.subr.bf16.mxu1 %v17466_v63  ;;  %1436 = vmatpush1.bf16.msra.mxu0 %v17506_v9  ;;  %v17557_v63 = vld [vmem:[#allocation5 + $0x38] ss:$80 sps:$4 sm:$0xff]   ;;  %v17604_v9 = vld [vmem:[#allocation5 + $0x4a4] ss:$80 sps:$4 sm:$0xff]  }
 0x10a   :  { %1507 = vmatprep.subr.bf16.mxu0 %v17517_v11  ;;  %v17602_v11 = vld [vmem:[#allocation5 + $0x4a0] ss:$80 sps:$4 sm:$0xff]  }
 0x10c   :  { %1381 = vmatpush1.bf16.msra.mxu1 %v17464_v2  ;;  %1454 = vmatmul.mubr.bf16.vlgmr.msra.gmra.mrb[4].mxu0 %v20619_v27  ;;  %v17562_v2 = vld [vmem:[#allocation5 + $0xdc] ss:$80 sps:$4 sm:$0xff]  }
 0x10d   :  { %1382 = vmatprep.subr.bf16.mxu1 %v17472_v4  ;;  %1508 = vmatpush1.bf16.msra.mxu0 %v17515_v13  ;;  %v17560_v4 = vld [vmem:[#allocation5 + $0xd8] ss:$80 sps:$4 sm:$0xff]   ;;  %v17580_v13 = vld [vmem:[#allocation5 + $0x2bc] ss:$80 sps:$4 sm:$0xff]  }
 0x10e   :  { %1539 = vmatprep.mubr.bf16.mxu0 %v20414_v0  ;;  %1509 = vmatprep.subr.bf16.mxu0 %v17523_v15  ;;  %v17586_v15 = vld [vmem:[#allocation5 + $0x35c] ss:$80 sps:$4 sm:$0xff]  }
 0x110   :  { %1383 = vmatpush1.bf16.msra.mxu1 %v17470_v6  ;;  %v17568_v6 = vld [vmem:[#allocation5 + $0x17c] ss:$80 sps:$4 sm:$0xff]  }
 0x111   :  { %1384 = vmatprep.subr.bf16.mxu1 %v17478_v8  ;;  %1510 = vmatpush1.bf16.msra.mxu0 %v17521_v17  ;;  %v17566_v8 = vld [vmem:[#allocation5 + $0x178] ss:$80 sps:$4 sm:$0xff]   ;;  %v17592_v17 = vld [vmem:[#allocation5 + $0x3fc] ss:$80 sps:$4 sm:$0xff]  }
 0x112   :  { %1511 = vmatprep.subr.bf16.mxu0 %v17529_v19  ;;  %v17598_v19 = vld [vmem:[#allocation5 + $0x49c] ss:$80 sps:$4 sm:$0xff]  }
 0x114   :  { %1385 = vmatpush1.bf16.msra.mxu1 %v17476_v10  ;;  %v17574_v10 = vld [vmem:[#allocation5 + $0x21c] ss:$80 sps:$4 sm:$0xff]  }
 0x115   :  { %1386 = vmatprep.subr.bf16.mxu1 %v17484_v12  ;;  %1512 = vmatpush1.bf16.msra.mxu0 %v17527_v21  ;;  %v17572_v12 = vld [vmem:[#allocation5 + $0x218] ss:$80 sps:$4 sm:$0xff]   ;;  %v17607_v21 = vld [vmem:[#allocation5 + $0x4c] ss:$80 sps:$4 sm:$0xff]  }
 0x116   :  { %1513 = vmatprep.subr.bf16.mxu0 %v17535_v23  ;;  %v17610_v23 = vld [vmem:[#allocation5 + $0xec] ss:$80 sps:$4 sm:$0xff]  }
 0x118   :  { %1387 = vmatpush1.bf16.msra.mxu1 %v17482_v14  ;;  %v17578_v14 = vld [vmem:[#allocation5 + $0x2b8] ss:$80 sps:$4 sm:$0xff]  }
 0x119   :  { %1388 = vmatprep.subr.bf16.mxu1 %v17490_v16  ;;  %1514 = vmatpush1.bf16.msra.mxu0 %v17533_v25  ;;  %v17584_v16 = vld [vmem:[#allocation5 + $0x358] ss:$80 sps:$4 sm:$0xff]  }
 0x11a   :  { %1515 = vmatprep.subr.bf16.mxu0 %v17541_v28  ;;  %v20117_v25 = vld [vmem:[#allocation2] sm:$0xff]  }
 0x11b   :  { %v17616_v28 = vld [vmem:[#allocation5 + $0x22c] ss:$80 sps:$4 sm:$0xff]  }
 0x11c   :  { %1389 = vmatpush1.bf16.msra.mxu1 %v17488_v18  ;;  %v17590_v18 = vld [vmem:[#allocation5 + $0x3f8] ss:$80 sps:$4 sm:$0xff]  }
 0x11d   :  { %1390 = vmatprep.subr.bf16.mxu1 %v17496_v20  ;;  %1516 = vmatpush1.bf16.msra.mxu0 %v17539_v30  ;;  %v17596_v20 = vld [vmem:[#allocation5 + $0x498] ss:$80 sps:$4 sm:$0xff]   ;;  %v17619_v30 = vld [vmem:[#allocation5 + $0x2cc] ss:$80 sps:$4 sm:$0xff]  }
 0x11e   :  { %1517 = vmatprep.subr.bf16.mxu0 %v17547_v32  ;;  %v17622_v32 = vld [vmem:[#allocation5 + $0x36c] ss:$80 sps:$4 sm:$0xff]  }
 0x120   :  { %1391 = vmatpush1.bf16.msra.mxu1 %v17494_v22  ;;  %v17605_v22 = vld [vmem:[#allocation5 + $0x48] ss:$80 sps:$4 sm:$0xff]  }
 0x121   :  { %1392 = vmatprep.subr.bf16.mxu1 %v17502_v24  ;;  %1518 = vmatpush1.bf16.msra.mxu0 %v17545_v34  ;;  %v17608_v24 = vld [vmem:[#allocation5 + $0xe8] ss:$80 sps:$4 sm:$0xff]   ;;  %v17625_v34 = vld [vmem:[#allocation5 + $0x40c] ss:$80 sps:$4 sm:$0xff]  }
 0x122   :  { %1519 = vmatprep.subr.bf16.mxu0 %v17553_v36  ;;  %v17626_v36 = vld [vmem:[#allocation5 + $0x4a8] ss:$80 sps:$4 sm:$0xff]  }
 0x124   :  { %1393 = vmatpush1.bf16.msra.mxu1 %v17500_v26  ;;  %v17613_v26 = vld [vmem:[#allocation5 + $0x18c] ss:$80 sps:$4 sm:$0xff]  }
 0x125   :  { %1464 = vmatprep.subr.bf16.mxu1 %v17511_v29  ;;  %1520 = vmatpush1.bf16.msra.mxu0 %v17551_v38  ;;  %v17614_v29 = vld [vmem:[#allocation5 + $0x228] ss:$80 sps:$4 sm:$0xff]  }
 0x126   :  { %1521 = vmatprep.subr.bf16.mxu0 %v17556_v40 }
 0x127   :  { %1411 = vmatmul.mubr.bf16.vlgmr.msra.gmra.mrb[8].mxu1 %v20619_v27 }
 0x128   :  { %1465 = vmatpush1.bf16.msra.mxu1 %v17509_v31  ;;  %1496 = vmatprep.mubr.bf16.mxu1 %v20414_v0  ;;  %v17617_v31 = vld [vmem:[#allocation5 + $0x2c8] ss:$80 sps:$4 sm:$0xff]  }
 0x129   :  { %1466 = vmatprep.subr.bf16.mxu1 %v17514_v33  ;;  %1522 = vmatpush1.bf16.msra.mxu0 %v17554_v42  ;;  %v17620_v33 = vld [vmem:[#allocation5 + $0x368] ss:$80 sps:$4 sm:$0xff]  }
 0x12a   :  { %1593 = vmatprep.subr.bf16.mxu0 %v17565_v45 }
 0x12c   :  { %1467 = vmatpush1.bf16.msra.mxu1 %v17512_v35  ;;  %1540 = vmatmul.mubr.bf16.vlgmr.msra.gmra.mrb[8].mxu0 %v20619_v27  ;;  %v17623_v35 = vld [vmem:[#allocation5 + $0x408] ss:$80 sps:$4 sm:$0xff]  }
 0x12d   :  { %1468 = vmatprep.subr.bf16.mxu1 %v17520_v37  ;;  %1594 = vmatpush1.bf16.msra.mxu0 %v17563_v46 }
 0x12e   :  { %1625 = vmatprep.mubr.bf16.mxu0 %v20414_v0  ;;  %1595 = vmatprep.subr.bf16.mxu0 %v17571_v48 }
 0x130   :  { %1469 = vmatpush1.bf16.msra.mxu1 %v17518_v39 }
 0x131   :  { %1470 = vmatprep.subr.bf16.mxu1 %v17526_v41  ;;  %1596 = vmatpush1.bf16.msra.mxu0 %v17569_v50 }
 0x132   :  { %1597 = vmatprep.subr.bf16.mxu0 %v17577_v52 }
 0x134   :  { %1471 = vmatpush1.bf16.msra.mxu1 %v17524_v43 }
 0x135   :  { %1472 = vmatprep.subr.bf16.mxu1 %v17532_v44  ;;  %1598 = vmatpush1.bf16.msra.mxu0 %v17575_v54 }
 0x136   :  { %1599 = vmatprep.subr.bf16.mxu0 %v17583_v56 }
 0x138   :  { %1473 = vmatpush1.bf16.msra.mxu1 %v17530_v47 }
 0x139   :  { %1474 = vmatprep.subr.bf16.mxu1 %v17538_v49  ;;  %1600 = vmatpush1.bf16.msra.mxu0 %v17581_v58 }
 0x13a   :  { %1601 = vmatprep.subr.bf16.mxu0 %v17589_v60 }
 0x13c   :  { %1475 = vmatpush1.bf16.msra.mxu1 %v17536_v51 }
 0x13d   :  { %1476 = vmatprep.subr.bf16.mxu1 %v17544_v53  ;;  %1602 = vmatpush1.bf16.msra.mxu0 %v17587_v62 }
 0x13e   :  { %1603 = vmatprep.subr.bf16.mxu0 %v17595_v1 }
 0x140   :  { %1477 = vmatpush1.bf16.msra.mxu1 %v17542_v55 }
 0x141   :  { %1478 = vmatprep.subr.bf16.mxu1 %v17550_v57  ;;  %1604 = vmatpush1.bf16.msra.mxu0 %v17593_v3 }
 0x142   :  { %1605 = vmatprep.subr.bf16.mxu0 %v17601_v5 }
 0x144   :  { %1479 = vmatpush1.bf16.msra.mxu1 %v17548_v59 }
 0x145   :  { %1550 = vmatprep.subr.bf16.mxu1 %v17559_v61  ;;  %1606 = vmatpush1.bf16.msra.mxu0 %v17599_v7  ;;  %v343_v61 = vlaneseq }
 0x146   :  { %1607 = vmatprep.subr.bf16.mxu0 %v17604_v9 }
 0x147   :  { %1497 = vmatmul.mubr.bf16.vlgmr.msra.gmra.mrb[12].mxu1 %v20619_v27  ;;  %v344_v62 = vshrl.u32 %v343_v61, 7 }
 0x148   :  { %1551 = vmatpush1.bf16.msra.mxu1 %v17557_v63  ;;  %1582 = vmatprep.mubr.bf16.mxu1 %v20414_v0  ;;  %v337_v63 = vld [vmem:[#allocation7] sm:$0xff] }
 0x149   :  { %1552 = vmatprep.subr.bf16.mxu1 %v17562_v2  ;;  %1608 = vmatpush1.bf16.msra.mxu0 %v17602_v11  ;;  %v20655_v1 = vsub.s32 0, %v344_v62  ;;  %v20657_v2 = vsub.s32 1, %v344_v62  ;;  %v20659_v3 = vsub.s32 2, %v344_v62 }
 0x14b   :  { %21906 = vst [vmem:[#allocation28_spill] sm:$0xff] %v20655_v1  ;;  %21907 = vst [vmem:[#allocation29_spill] sm:$0xff] %v20657_v2  ;;  %v346_v5 = vrot.slane %v337_v63, %v20655_v1  ;;  %v354_v9 = vrot.slane %v337_v63, %v20659_v3 }
 0x14c   :  { %1553 = vmatpush1.bf16.msra.mxu1 %v17560_v4  ;;  %1626 = vmatmul.mubr.bf16.vlgmr.msra.gmra.mrb[12].mxu0 %v20619_v27  ;;  %v17611_v27 = vld [vmem:[#allocation5 + $0x188] ss:$80 sps:$4 sm:$0xff]  }
 0x14d   :  { %1554 = vmatprep.subr.bf16.mxu1 %v17568_v6  ;;  %v350_v6 = vrot.slane %v337_v63, %v20657_v2 }
 0x150   :  { %1555 = vmatpush1.bf16.msra.mxu1 %v17566_v8 }
 0x151   :  { %1556 = vmatprep.subr.bf16.mxu1 %v17574_v10  ;;  %v20670_v10 = vsub.s32 3, %v344_v62 }
 0x153   :  { %21908 = vst [vmem:[#allocation30_spill] sm:$0xff] %v20670_v10 }
 0x154   :  { %1557 = vmatpush1.bf16.msra.mxu1 %v17572_v12 }
 0x155   :  { %1558 = vmatprep.subr.bf16.mxu1 %v17580_v13 }
 0x158   :  { %1559 = vmatpush1.bf16.msra.mxu1 %v17578_v14  ;;  %v20678_v14 = vsub.s32 4, %v344_v62 }
 0x159   :  { %1560 = vmatprep.subr.bf16.mxu1 %v17586_v15 }
 0x15a   :  { %21909 = vst [vmem:[#allocation31_spill] sm:$0xff] %v20678_v14 }
 0x15c   :  { %1561 = vmatpush1.bf16.msra.mxu1 %v17584_v16 }
 0x15d   :  { %1562 = vmatprep.subr.bf16.mxu1 %v17592_v17 }
 0x160   :  { %1563 = vmatpush1.bf16.msra.mxu1 %v17590_v18  ;;  %v358_v18 = vrot.slane %v337_v63, %v20670_v10 }
 0x161   :  { %1564 = vmatprep.subr.bf16.mxu1 %v17598_v19 }
 0x164   :  { %1565 = vmatpush1.bf16.msra.mxu1 %v17596_v20 }
 0x165   :  { %1636 = vmatprep.subr.bf16.mxu1 %v17607_v21  ;;  %v362_v21 = vrot.slane %v337_v63, %v20678_v14 }
 0x167   :  { %1583 = vmatmul.mubr.bf16.vlgmr.msra.gmra.mrb[16].mxu1 %v20117_v25 }
 0x168   :  { %1637 = vmatpush1.bf16.msra.mxu1 %v17605_v22  ;;  %1668 = vmatprep.mubr.bf16.mxu1 %v20414_v0  ;;  %v17628_v0 = vld [vmem:[#allocation5 + $0x4ac] ss:$80 sps:$4 sm:$0xff]  }
 0x169   :  { %1638 = vmatprep.subr.bf16.mxu1 %v17610_v23 }
 0x16c   :  { %1639 = vmatpush1.bf16.msra.mxu1 %v17608_v24 }
 0x16d   :  { %1640 = vmatprep.subr.bf16.mxu1 %v17613_v26 }
 0x170   :  { %1641 = vmatpush1.bf16.msra.mxu1 %v17611_v27 }
 0x171   :  { %1642 = vmatprep.subr.bf16.mxu1 %v17616_v28  ;;  %v20702_v28 = vsub.s32 6, %v344_v62 }
 0x173   :  { %21911 = vst [vmem:[#allocation33_spill] sm:$0xff] %v20702_v28 }
 0x174   :  { %1643 = vmatpush1.bf16.msra.mxu1 %v17614_v29 }
 0x175   :  { %1644 = vmatprep.subr.bf16.mxu1 %v17619_v30 }
 0x178   :  { %1645 = vmatpush1.bf16.msra.mxu1 %v17617_v31 }
 0x179   :  { %1646 = vmatprep.subr.bf16.mxu1 %v17622_v32 }
 0x17c   :  { %1647 = vmatpush1.bf16.msra.mxu1 %v17620_v33 }
 0x17d   :  { %1648 = vmatprep.subr.bf16.mxu1 %v17625_v34 }
 0x180   :  { %1649 = vmatpush1.bf16.msra.mxu1 %v17623_v35 }
 0x181   :  { %1650 = vmatprep.subr.bf16.mxu1 %v17628_v0  ;;  %v370_v0 = vrot.slane %v337_v63, %v20702_v28 }
 0x184   :  { %1651 = vmatpush1.bf16.msra.mxu1 %v17626_v36  ;;  %v20716_v36 = vsub.s32 7, %v344_v62 }
 0x186   :  { %21912 = vst [vmem:[#allocation34_spill] sm:$0xff] %v20716_v36 }
 0x187   :  { %1669 = vmatmul.mubr.bf16.vlgmr.msra.gmra.mrb[20].mxu1 %v20117_v25  ;;  %v20697_v25 = vsub.s32 5, %v344_v62 }
 0x189   :  { %21910 = vst [vmem:[#allocation32_spill] sm:$0xff] %v20697_v25  ;;  %v366_v31 = vrot.slane %v337_v63, %v20697_v25 }
 0x1ba   :  { %v1283_v37 = vpop.f32.mrb[0].mxu1 }
 0x1bb   :  { %v1285_v38 = vpop.f32.mrb[1].mxu1  ;;  %v20674_v12 = vadd.f32 %v1283_v37, %v346_v5 }
 0x1bc   :  { %v1287_v39 = vpop.f32.mrb[2].mxu1  ;;  %v20676_v13 = vadd.f32 %v1285_v38, %v350_v6 }
 0x1bd   :  { %v1289_v40 = vpop.f32.mrb[3].mxu1  ;;  %v20680_v15 = vadd.f32 %v1287_v39, %v346_v5 }
 0x1be   :  { %v20682_v16 = vadd.f32 %v1289_v40, %v350_v6  ;;  %v1685_v19 = vadd.f32 %v20676_v13, %v20674_v12 }
 0x1bf   :  { %v1369_v41 = vpop.f32.mrb[0].mxu0 }
 0x1c0   :  { %v1371_v42 = vpop.f32.mrb[1].mxu0  ;;  %v1706_v22 = vadd.f32 %v20682_v16, %v20680_v15  ;;  %v20705_v30 = vadd.f32 %v1369_v41, %v362_v21  ;;  %v338_v41 = vld [vmem:[#allocation7 + $0x8] sm:$0xff] }
 0x1c1   :  { %v1373_v43 = vpop.f32.mrb[2].mxu0  ;;  %v20723_v40 = vadd.f32 %v1371_v42, %v366_v31  ;;  %v378_v6 = vrot.slane %v338_v41, %v20655_v1 }
 0x1c2   :  { %v20637_v44 = vpop.f32.mrb[3].mxu0  ;;  %v20713_v35 = vadd.f32 %v1373_v43, %v362_v21 }
 0x1da   :  { %v1326_v45 = vpop.f32.mrb[4].mxu1 }
 0x1db   :  { %v1328_v46 = vpop.f32.mrb[5].mxu1  ;;  %v20684_v17 = vadd.f32 %v1326_v45, %v354_v9 }
 0x1dc   :  { %v1330_v47 = vpop.f32.mrb[6].mxu1  ;;  %v20695_v24 = vadd.f32 %v1328_v46, %v358_v18  ;;  %v20727_v46 = vadd.f32 %v20637_v44, %v366_v31 }
 0x1dd   :  { %v1332_v48 = vpop.f32.mrb[7].mxu1  ;;  %v20689_v20 = vadd.f32 %v1330_v47, %v354_v9  ;;  %v1686_v23 = vadd.f32 %v1685_v19, %v20684_v17  ;;  %v374_v47 = vrot.slane %v337_v63, %v20716_v36 }
 0x1de   :  { %v20700_v27 = vadd.f32 %v1332_v48, %v358_v18 }
 0x1df   :  { %v20639_v49 = vpop.f32.mrb[4].mxu0  ;;  %v1707_v26 = vadd.f32 %v1706_v22, %v20689_v20  ;;  %v1687_v29 = vadd.f32 %v1686_v23, %v20695_v24 }
 0x1e0   :  { %v20641_v50 = vpop.f32.mrb[5].mxu0  ;;  %v20745_v63 = vadd.f32 %v20639_v49, %v378_v6 }
 0x1e1   :  { %v20643_v51 = vpop.f32.mrb[6].mxu0  ;;  %v1708_v34 = vadd.f32 %v1707_v26, %v20700_v27  ;;  %v1688_v39 = vadd.f32 %v1687_v29, %v20705_v30 }
 0x1e2   :  { %v20645_v52 = vpop.f32.mrb[7].mxu0  ;;  %v20750_v19 = vadd.f32 %v20643_v51, %v378_v6  ;;  %v390_v51 = vrot.slane %v338_v41, %v20670_v10 }
 0x1e3   :  { %v1709_v45 = vadd.f32 %v1708_v34, %v20713_v35  ;;  %v1689_v48 = vadd.f32 %v1688_v39, %v20723_v40 }
 0x1e5   :  { %v1710_v62 = vadd.f32 %v1709_v45, %v20727_v46 }
 0x1fa   :  { %v1412_v53 = vpop.f32.mrb[8].mxu1 }
 0x1fb   :  { %v1414_v54 = vpop.f32.mrb[9].mxu1  ;;  %v20729_v43 = vadd.f32 %v1412_v53, %v370_v0 }
 0x1fc   :  { %v1416_v55 = vpop.f32.mrb[10].mxu1  ;;  %v20737_v42 = vadd.f32 %v1414_v54, %v374_v47  ;;  %v386_v54 = vrot.slane %v338_v41, %v20659_v3 }
 0x1fd   :  { %v1418_v56 = vpop.f32.mrb[11].mxu1  ;;  %v20733_v61 = vadd.f32 %v1416_v55, %v370_v0  ;;  %v1690_v5 = vadd.f32 %v1689_v48, %v20729_v43  ;;  %v382_v55 = vrot.slane %v338_v41, %v20657_v2 }
 0x1fe   :  { %v20741_v44 = vadd.f32 %v1418_v56, %v374_v47 }
 0x1ff   :  { %v20647_v57 = vpop.f32.mrb[8].mxu0  ;;  %v1711_v9 = vadd.f32 %v1710_v62, %v20733_v61  ;;  %v1691_v53 = vadd.f32 %v1690_v5, %v20737_v42  ;;  %v20755_v56 = vadd.f32 %v20641_v50, %v382_v55  ;;  %v20759_v29 = vadd.f32 %v20645_v52, %v382_v55 }
 0x200   :  { %v20649_v58 = vpop.f32.mrb[9].mxu0  ;;  %v394_v52 = vrot.slane %v338_v41, %v20678_v14 }
 0x201   :  { %v20651_v59 = vpop.f32.mrb[10].mxu0  ;;  %v1712_v18 = vadd.f32 %v1711_v9, %v20741_v44  ;;  %v1692_v22 = vadd.f32 %v1691_v53, %v20745_v63 }
 0x202   :  { %v20653_v60 = vpop.f32.mrb[11].mxu0  ;;  %v20781_v5 = vadd.f32 %v20647_v57, %v394_v52  ;;  %v20786_v9 = vadd.f32 %v20651_v59, %v394_v52 }
 0x203   :  { %v1713_v49 = vadd.f32 %v1712_v18, %v20750_v19  ;;  %v1693_v0 = vadd.f32 %v1692_v22, %v20755_v56  ;;  %v406_v22 = vrot.slane %v338_v41, %v20716_v36 }
 0x205   :  { %v1714_v50 = vadd.f32 %v1713_v49, %v20759_v29 }
 0x21a   :  { %v20661_v4 = vpop.f32.mrb[12].mxu1 }
 0x21b   :  { %v20665_v7 = vpop.f32.mrb[13].mxu1  ;;  %v20762_v31 = vadd.f32 %v20661_v4, %v386_v54 }
 0x21c   :  { %v20667_v8 = vpop.f32.mrb[14].mxu1  ;;  %v20772_v47 = vadd.f32 %v20665_v7, %v390_v51  ;;  %v402_v7 = vrot.slane %v338_v41, %v20702_v28 }
 0x21d   :  { %v20672_v11 = vpop.f32.mrb[15].mxu1  ;;  %v20767_v39 = vadd.f32 %v20667_v8, %v386_v54  ;;  %v1694_v45 = vadd.f32 %v1693_v0, %v20762_v31  ;;  %v398_v8 = vrot.slane %v338_v41, %v20697_v25 }
 0x21e   :  { %v20777_v48 = vadd.f32 %v20672_v11, %v390_v51  ;;  %v339_v11 = vld [vmem:[#allocation7 + $0x10] sm:$0xf] }
 0x21f   :  { %v20708_v32 = vpop.f32.mrb[12].mxu0  ;;  %v1715_v4 = vadd.f32 %v1714_v50, %v20767_v39  ;;  %v1695_v62 = vadd.f32 %v1694_v45, %v20772_v47  ;;  %v20791_v55 = vadd.f32 %v20649_v58, %v398_v8  ;;  %v20795_v57 = vadd.f32 %v20653_v60, %v398_v8 }
 0x220   :  { %v20710_v33 = vpop.f32.mrb[13].mxu0  ;;  %v410_v50 = vrot.slane %v339_v11, %v20655_v1  ;;  %v422_v8 = vrot.slane %v339_v11, %v20670_v10 }
 0x221   :  { %v20718_v37 = vpop.f32.mrb[14].mxu0  ;;  %v1716_v6 = vadd.f32 %v1715_v4, %v20777_v48  ;;  %v1696_v53 = vadd.f32 %v1695_v62, %v20781_v5 }
 0x222   :  { %v20720_v38 = vpop.f32.mrb[15].mxu0  ;;  %v20813_v41 = vadd.f32 %v20708_v32, %v410_v50  ;;  %v20818_v4 = vadd.f32 %v20718_v37, %v410_v50 }
 0x223   :  { %v1717_v18 = vadd.f32 %v1716_v6, %v20786_v9  ;;  %v1697_v59 = vadd.f32 %v1696_v53, %v20791_v55 }
 0x225   :  { %v1718_v51 = vadd.f32 %v1717_v18, %v20795_v57 }
 0x23a   :  { %v1584_v21 = vpop.f32.mrb[16].mxu1 }
 0x23b   :  { %v1586_v23 = vpop.f32.mrb[17].mxu1  ;;  %v20797_v54 = vadd.f32 %v1584_v21, %v402_v7 }
 0x23c   :  { %v1588_v26 = vpop.f32.mrb[18].mxu1  ;;  %v20805_v58 = vadd.f32 %v1586_v23, %v406_v22 }
 0x23d   :  { %v1590_v34 = vpop.f32.mrb[19].mxu1  ;;  %v20801_v49 = vadd.f32 %v1588_v26, %v402_v7  ;;  %v1698_v0 = vadd.f32 %v1697_v59, %v20797_v54  ;;  %v414_v26 = vrot.slane %v339_v11, %v20657_v2 }
 0x23e   :  { %v20809_v60 = vadd.f32 %v1590_v34, %v406_v22  ;;  %v418_v34 = vrot.slane %v339_v11, %v20659_v3 }
 0x23f   :  { %v1719_v45 = vadd.f32 %v1718_v51, %v20801_v49  ;;  %v1699_v21 = vadd.f32 %v1698_v0, %v20805_v58  ;;  %v20822_v62 = vadd.f32 %v20710_v33, %v414_v26  ;;  %v20828_v32 = vadd.f32 %v20720_v38, %v414_v26  ;;  %v17629_v26 = vld [vmem:[#allocation11] ss:$40 sps:$4 sm:$0xff]  }
 0x241   :  { %v1720_v52 = vadd.f32 %v1719_v45, %v20809_v60  ;;  %v1700_v23 = vadd.f32 %v1699_v21, %v20813_v41 }
 0x243   :  { %v1721_v6 = vadd.f32 %v1720_v52, %v20818_v4  ;;  %v1701_v53 = vadd.f32 %v1700_v23, %v20822_v62  ;;  %v17631_v52 = vld [vmem:[#allocation11 + $0x4] ss:$40 sps:$4 sm:$0xff]   ;;  %v17632_v23 = vld [vmem:[#allocation11 + $0xf00] ss:$40 sps:$4 sm:$0xff]  }
 0x244   :  { %11898 = vmatprep.subr.bf16.mxu1 %v17631_v52  ;;  %v17655_v52 = vld [vmem:[#allocation11 + $0x144] ss:$40 sps:$4 sm:$0xff]  }
 0x245   :  { %v1722_v33 = vadd.f32 %v1721_v6, %v20828_v32  ;;  %v17637_v6 = vld [vmem:[#allocation11 + $0x54] ss:$40 sps:$4 sm:$0xff]   ;;  %11899 = vmatpush1.bf16.msra.mxu1 %v17629_v26  ;;  %v17658_v26 = vld [vmem:[#allocation11 + $0x1044] ss:$40 sps:$4 sm:$0xff]  }
 0x246   :  { %11900 = vmatprep.subr.bf16.mxu1 %v17637_v6  ;;  %v17661_v6 = vld [vmem:[#allocation11 + $0x194] ss:$40 sps:$4 sm:$0xff]  }
 0x25a   :  { %v1670_v7 = vpop.f32.mrb[20].mxu1 }
 0x25b   :  { %v20831_v18 = vadd.f32 %v1670_v7, %v418_v34  ;;  %v1672_v37 = vpop.f32.mrb[21].mxu1  ;;  %v17634_v7 = vld [vmem:[#allocation11 + $0xf04] ss:$40 sps:$4 sm:$0xff]  }
 0x25c   :  { %v20833_v22 = vadd.f32 %v1672_v37, %v422_v8  ;;  %v1674_v59 = vpop.f32.mrb[22].mxu1  ;;  %12027 = vmatprep.subr.bf16.mxu0 %v17634_v7  ;;  %v17643_v37 = vld [vmem:[#allocation11 + $0xa4] ss:$40 sps:$4 sm:$0xff]   ;;  %v17656_v7 = vld [vmem:[#allocation11 + $0x1040] ss:$40 sps:$4 sm:$0xff]  }
 0x25d   :  { %v20836_v51 = vadd.f32 %v1674_v59, %v418_v34  ;;  %v1676_v0 = vpop.f32.mrb[23].mxu1  ;;  %v1702_v11 = vadd.f32 %v1701_v53, %v20831_v18  ;;  %v17640_v34 = vld [vmem:[#allocation11 + $0xf54] ss:$40 sps:$4 sm:$0xff]   ;;  %v17635_v53 = vld [vmem:[#allocation11 + $0x50] ss:$40 sps:$4 sm:$0xff]   ;;  %12028 = vmatpush1.bf16.msra.mxu0 %v17632_v23 }
 0x25e   :  { %v20840_v38 = vadd.f32 %v1676_v0, %v422_v8  ;;  %v17638_v8 = vld [vmem:[#allocation11 + $0xf50] ss:$40 sps:$4 sm:$0xff]   ;;  %12029 = vmatprep.subr.bf16.mxu0 %v17640_v34  ;;  %v17646_v59 = vld [vmem:[#allocation11 + $0xfa4] ss:$40 sps:$4 sm:$0xff]   ;;  %11901 = vmatpush1.bf16.msra.mxu1 %v17635_v53  ;;  %v17644_v0 = vld [vmem:[#allocation11 + $0xfa0] ss:$40 sps:$4 sm:$0xff]  }
 0x25f   :  { %v1723_v50 = vadd.f32 %v1722_v33, %v20836_v51  ;;  %v1703_v45 = vadd.f32 %v1702_v11, %v20833_v22  ;;  %v17641_v33 = vld [vmem:[#allocation11 + $0xa0] ss:$40 sps:$4 sm:$0xff]   ;;  %11902 = vmatprep.subr.bf16.mxu1 %v17643_v37  ;;  %v17649_v11 = vld [vmem:[#allocation11 + $0xf4] ss:$40 sps:$4 sm:$0xff]   ;;  %v17659_v53 = vld [vmem:[#allocation11 + $0x190] ss:$40 sps:$4 sm:$0xff]  }
 0x260   :  { %v17653_v23 = vld [vmem:[#allocation11 + $0x140] ss:$40 sps:$4 sm:$0xff]   ;;  %v17664_v34 = vld [vmem:[#allocation11 + $0x1094] ss:$40 sps:$4 sm:$0xff]   ;;  %v17667_v37 = vld [vmem:[#allocation11 + $0x1e4] ss:$40 sps:$4 sm:$0xff]  }
 0x261   :  { %1704 = vadd.xlane.f32.xlu0 %v1703_v45  ;;  %v1724_v21 = vadd.f32 %v1723_v50, %v20840_v38  ;;  %12030 = vmatpush1.bf16.msra.mxu0 %v17638_v8  ;;  %v17652_v50 = vld [vmem:[#allocation11 + $0xff4] ss:$40 sps:$4 sm:$0xff]   ;;  %v17647_v45 = vld [vmem:[#allocation11 + $0xf0] ss:$40 sps:$4 sm:$0xff]  }
 0x262   :  { %12031 = vmatprep.subr.bf16.mxu0 %v17646_v59  ;;  %11903 = vmatpush1.bf16.msra.mxu1 %v17641_v33  ;;  %v17662_v8 = vld [vmem:[#allocation11 + $0x1090] ss:$40 sps:$4 sm:$0xff]   ;;  %v17670_v59 = vld [vmem:[#allocation11 + $0x10e4] ss:$40 sps:$4 sm:$0xff]   ;;  %v17665_v33 = vld [vmem:[#allocation11 + $0x1e0] ss:$40 sps:$4 sm:$0xff]  }
 0x263   :  { %11904 = vmatprep.subr.bf16.mxu1 %v17649_v11  ;;  %v17673_v11 = vld [vmem:[#allocation11 + $0x234] ss:$40 sps:$4 sm:$0xff]  }
 0x265   :  { %1725 = vadd.xlane.f32.xlu0 %v1724_v21  ;;  %v17650_v21 = vld [vmem:[#allocation11 + $0xff0] ss:$40 sps:$4 sm:$0xff]   ;;  %12032 = vmatpush1.bf16.msra.mxu0 %v17644_v0  ;;  %v17668_v0 = vld [vmem:[#allocation11 + $0x10e0] ss:$40 sps:$4 sm:$0xff]  }
 0x266   :  { %12033 = vmatprep.subr.bf16.mxu0 %v17652_v50  ;;  %11905 = vmatpush1.bf16.msra.mxu1 %v17647_v45  ;;  %v17676_v50 = vld [vmem:[#allocation11 + $0x1134] ss:$40 sps:$4 sm:$0xff]   ;;  %v17671_v45 = vld [vmem:[#allocation11 + $0x230] ss:$40 sps:$4 sm:$0xff]  }
 0x267   :  { %11906 = vmatprep.subr.bf16.mxu1 %v17655_v52  ;;  %v17679_v52 = vld [vmem:[#allocation11 + $0x284] ss:$40 sps:$4 sm:$0xff]  }
 0x269   :  { %12034 = vmatpush1.bf16.msra.mxu0 %v17650_v21  ;;  %v17674_v21 = vld [vmem:[#allocation11 + $0x1130] ss:$40 sps:$4 sm:$0xff]  }
 0x26a   :  { %12035 = vmatprep.subr.bf16.mxu0 %v17658_v26  ;;  %11907 = vmatpush1.bf16.msra.mxu1 %v17653_v23  ;;  %v17682_v26 = vld [vmem:[#allocation11 + $0x1184] ss:$40 sps:$4 sm:$0xff]   ;;  %v17677_v23 = vld [vmem:[#allocation11 + $0x280] ss:$40 sps:$4 sm:$0xff]  }
 0x26b   :  { %11908 = vmatprep.subr.bf16.mxu1 %v17661_v6 }
 0x26d   :  { %12036 = vmatpush1.bf16.msra.mxu0 %v17656_v7  ;;  %v17680_v7 = vld [vmem:[#allocation11 + $0x1180] ss:$40 sps:$4 sm:$0xff]  }
 0x26e   :  { %12037 = vmatprep.subr.bf16.mxu0 %v17664_v34  ;;  %11909 = vmatpush1.bf16.msra.mxu1 %v17659_v53 }
 0x26f   :  { %11910 = vmatprep.subr.bf16.mxu1 %v17667_v37 }
 0x271   :  { %12038 = vmatpush1.bf16.msra.mxu0 %v17662_v8 }
 0x272   :  { %12039 = vmatprep.subr.bf16.mxu0 %v17670_v59  ;;  %11911 = vmatpush1.bf16.msra.mxu1 %v17665_v33 }
 0x273   :  { %11912 = vmatprep.subr.bf16.mxu1 %v17673_v11 }
 0x275   :  { %12040 = vmatpush1.bf16.msra.mxu0 %v17668_v0 }
 0x276   :  { %12041 = vmatprep.subr.bf16.mxu0 %v17676_v50  ;;  %11913 = vmatpush1.bf16.msra.mxu1 %v17671_v45 }
 0x277   :  { %11914 = vmatprep.subr.bf16.mxu1 %v17679_v52 }
 0x279   :  { %12042 = vmatpush1.bf16.msra.mxu0 %v17674_v21 }
 0x27a   :  { %12043 = vmatprep.subr.bf16.mxu0 %v17682_v26  ;;  %11915 = vmatpush1.bf16.msra.mxu1 %v17677_v23 }
 0x27d   :  { %12044 = vmatpush1.bf16.msra.mxu0 %v17680_v7 }
 0x2ee   :  { %v1705_v6 = vpop.xlane.xlu0 %1704 }
 0x2ef   :  { %v20844_v34 = vmul.f32 0.000390625, %v1705_v6 }
 0x2f1   :  { %v20848_v53 = vsub.f32 %v20674_v12, %v20844_v34  ;;  %v20852_v8 = vsub.f32 %v20676_v13, %v20844_v34  ;;  %v20856_v59 = vsub.f32 %v20684_v17, %v20844_v34  ;;  %v20864_v11 = vsub.f32 %v20695_v24, %v20844_v34 }
 0x2f2   :  { %v1726_v37 = vpop.xlane.xlu0 %1725  ;;  %v20870_v13 = vsub.f32 %v20705_v30, %v20844_v34  ;;  %v20876_v45 = vsub.f32 %v20723_v40, %v20844_v34  ;;  %v20890_v26 = vsub.f32 %v20729_v43, %v20844_v34  ;;  %v20896_v7 = vsub.f32 %v20737_v42, %v20844_v34 }
 0x2f3   :  { %v1770_v33 = vmul.f32 %v20848_v53, %v20848_v53  ;;  %v1771_v0 = vmul.f32 %v20852_v8, %v20852_v8  ;;  %v20866_v12 = vmul.f32 0.000390625, %v1726_v37  ;;  %v1772_v17 = vmul.f32 %v20856_v59, %v20856_v59 }
 0x2f4   :  { %v1773_v21 = vmul.f32 %v20864_v11, %v20864_v11  ;;  %v1774_v40 = vmul.f32 %v20870_v13, %v20870_v13  ;;  %v1776_v42 = vmul.f32 %v20890_v26, %v20890_v26 }
 0x2f5   :  { %v1810_v50 = vadd.f32 %v1771_v0, %v1770_v33  ;;  %v20882_v24 = vsub.f32 %v20680_v15, %v20866_v12  ;;  %v20886_v30 = vsub.f32 %v20682_v16, %v20866_v12  ;;  %v1775_v15 = vmul.f32 %v20876_v45, %v20876_v45 }
 0x2f6   :  { %v20902_v16 = vsub.f32 %v20689_v20, %v20866_v12  ;;  %v20910_v33 = vsub.f32 %v20745_v63, %v20844_v34  ;;  %v20920_v20 = vsub.f32 %v20755_v56, %v20844_v34  ;;  %v20926_v63 = vsub.f32 %v20713_v35, %v20866_v12 }
 0x2f7   :  { %v1811_v52 = vadd.f32 %v1810_v50, %v1772_v17  ;;  %v1790_v43 = vmul.f32 %v20882_v24, %v20882_v24  ;;  %v1791_v37 = vmul.f32 %v20886_v30, %v20886_v30  ;;  %v20916_v17 = vsub.f32 %v20700_v27, %v20866_v12 }
 0x2f8   :  { %v1777_v50 = vmul.f32 %v20896_v7, %v20896_v7  ;;  %21913 = vst [vmem:[#allocation35_spill] sm:$0xff] %v20926_v63  ;;  %v20932_v27 = vsub.f32 %v20762_v31, %v20844_v34  ;;  %v1778_v56 = vmul.f32 %v20910_v33, %v20910_v33  ;;  %v1779_v31 = vmul.f32 %v20920_v20, %v20920_v20 }
 0x2f9   :  { %v1812_v23 = vadd.f32 %v1811_v52, %v1773_v21  ;;  %v1792_v52 = vmul.f32 %v20902_v16, %v20902_v16  ;;  %v1793_v35 = vmul.f32 %v20916_v17, %v20916_v17 }
 0x2fb   :  { %v1813_v6 = vadd.f32 %v1812_v23, %v1774_v40  ;;  %v1831_v40 = vadd.f32 %v1791_v37, %v1790_v43  ;;  %v20950_v37 = vsub.f32 %v20733_v61, %v20866_v12 }
 0x2fd   :  { %v1814_v0 = vadd.f32 %v1813_v6, %v1775_v15  ;;  %v20938_v15 = vsub.f32 %v20727_v46, %v20866_v12  ;;  %v1832_v6 = vadd.f32 %v1831_v40, %v1792_v52  ;;  %v1794_v46 = vmul.f32 %v20926_v63, %v20926_v63 }
 0x2fe   :  { %v20962_v52 = vsub.f32 %v20741_v44, %v20866_v12  ;;  %v1796_v44 = vmul.f32 %v20950_v37, %v20950_v37 }
 0x2ff   :  { %v1815_v21 = vadd.f32 %v1814_v0, %v1776_v42  ;;  %21914 = vst [vmem:[#allocation36_spill] sm:$0xff] %v20938_v15  ;;  %v20944_v42 = vsub.f32 %v20772_v47, %v20844_v34  ;;  %v1833_v0 = vadd.f32 %v1832_v6, %v1793_v35  ;;  %v1780_v47 = vmul.f32 %v20932_v27, %v20932_v27 }
 0x300   :  { %v1795_v61 = vmul.f32 %v20938_v15, %v20938_v15  ;;  %v20974_v35 = vsub.f32 %v20750_v19, %v20866_v12  ;;  %v1797_v19 = vmul.f32 %v20962_v52, %v20962_v52 }
 0x301   :  { %v1816_v23 = vadd.f32 %v1815_v21, %v1777_v50  ;;  %v20956_v50 = vsub.f32 %v20781_v5, %v20844_v34  ;;  %v1834_v40 = vadd.f32 %v1833_v0, %v1794_v46  ;;  %v1781_v5 = vmul.f32 %v20944_v42, %v20944_v42 }
 0x302   :  { %v20986_v46 = vsub.f32 %v20759_v29, %v20866_v12  ;;  %v1798_v29 = vmul.f32 %v20974_v35, %v20974_v35 }
 0x303   :  { %v1817_v43 = vadd.f32 %v1816_v23, %v1778_v56  ;;  %v20968_v56 = vsub.f32 %v20791_v55, %v20844_v34  ;;  %v1835_v6 = vadd.f32 %v1834_v40, %v1795_v61  ;;  %v1782_v55 = vmul.f32 %v20956_v50, %v20956_v50 }
 0x304   :  { %v20998_v61 = vsub.f32 %v20767_v39, %v20866_v12  ;;  %v1799_v39 = vmul.f32 %v20986_v46, %v20986_v46 }
 0x305   :  { %v1818_v21 = vadd.f32 %v1817_v43, %v1779_v31  ;;  %v20980_v31 = vsub.f32 %v20797_v54, %v20844_v34  ;;  %v1836_v0 = vadd.f32 %v1835_v6, %v1796_v44  ;;  %v1783_v54 = vmul.f32 %v20968_v56, %v20968_v56 }
 0x306   :  { %21915 = vst [vmem:[#allocation37_spill] sm:$0xff] %v20998_v61  ;;  %v21010_v44 = vsub.f32 %v20777_v48, %v20866_v12  ;;  %v1800_v48 = vmul.f32 %v20998_v61, %v20998_v61 }
 0x307   :  { %v1819_v23 = vadd.f32 %v1818_v21, %v1780_v47  ;;  %v20992_v47 = vsub.f32 %v20805_v58, %v20844_v34  ;;  %v1837_v40 = vadd.f32 %v1836_v0, %v1797_v19  ;;  %v1784_v58 = vmul.f32 %v20980_v31, %v20980_v31 }
 0x308   :  { %21917 = vst [vmem:[#allocation39_spill] sm:$0xff] %v21010_v44  ;;  %v21022_v19 = vsub.f32 %v20786_v9, %v20866_v12  ;;  %v1801_v9 = vmul.f32 %v21010_v44, %v21010_v44  ;;  %v1681_v44 = vld [vmem:[#allocation8 + $0x10] sm:$0xf] }
 0x309   :  { %v1820_v43 = vadd.f32 %v1819_v23, %v1781_v5  ;;  %v21004_v5 = vsub.f32 %v20813_v41, %v20844_v34  ;;  %v1838_v6 = vadd.f32 %v1837_v40, %v1798_v29  ;;  %v1785_v41 = vmul.f32 %v20992_v47, %v20992_v47 }
 0x30a   :  { %21919 = vst [vmem:[#allocation41_spill] sm:$0xff] %v21022_v19  ;;  %v21034_v29 = vsub.f32 %v20795_v57, %v20866_v12  ;;  %v1802_v57 = vmul.f32 %v21022_v19, %v21022_v19 }
 0x30b   :  { %v1821_v21 = vadd.f32 %v1820_v43, %v1782_v55  ;;  %21916 = vst [vmem:[#allocation38_spill] sm:$0xff] %v21004_v5  ;;  %v21016_v55 = vsub.f32 %v20822_v62, %v20844_v34  ;;  %v1839_v0 = vadd.f32 %v1838_v6, %v1799_v39  ;;  %v1786_v62 = vmul.f32 %v21004_v5, %v21004_v5 }
 0x30c   :  { %21921 = vst [vmem:[#allocation43_spill] sm:$0xff] %v21034_v29  ;;  %v21046_v39 = vsub.f32 %v20801_v49, %v20866_v12 }
 0x30d   :  { %v1822_v23 = vadd.f32 %v1821_v21, %v1783_v54  ;;  %21918 = vst [vmem:[#allocation40_spill] sm:$0xff] %v21016_v55  ;;  %v21028_v54 = vsub.f32 %v20831_v18, %v20844_v34  ;;  %v1840_v40 = vadd.f32 %v1839_v0, %v1800_v48  ;;  %v1787_v18 = vmul.f32 %v21016_v55, %v21016_v55 }
 0x30e   :  { %21923 = vst [vmem:[#allocation45_spill] sm:$0xff] %v21046_v39 }
 0x30f   :  { %v1823_v43 = vadd.f32 %v1822_v23, %v1784_v58  ;;  %21920 = vst [vmem:[#allocation42_spill] sm:$0xff] %v21028_v54  ;;  %v21040_v58 = vsub.f32 %v20833_v22, %v20844_v34  ;;  %v1841_v6 = vadd.f32 %v1840_v40, %v1801_v9  ;;  %v21054_v22 = vsub.f32 %v20809_v60, %v20866_v12 }
 0x310   :  { %v1803_v34 = vmul.f32 %v21034_v29, %v21034_v29  ;;  %v21068_v60 = vsub.f32 %v20828_v32, %v20866_v12 }
 0x311   :  { %v1824_v21 = vadd.f32 %v1823_v43, %v1785_v41  ;;  %21922 = vst [vmem:[#allocation44_spill] sm:$0xff] %v21040_v58  ;;  %v1788_v41 = vmul.f32 %v21028_v54, %v21028_v54  ;;  %21924 = vst [vmem:[#allocation46_spill] sm:$0xff] %v21054_v22  ;;  %v1842_v48 = vadd.f32 %v1841_v6, %v1802_v57 }
 0x312   :  { %v1789_v49 = vmul.f32 %v21040_v58, %v21040_v58  ;;  %21926 = vst [vmem:[#allocation48_spill] sm:$0xff] %v21068_v60  ;;  %v21074_v57 = vsub.f32 %v20836_v51, %v20866_v12  ;;  %v1807_v32 = vmul.f32 %v21068_v60, %v21068_v60 }
 0x313   :  { %v1825_v23 = vadd.f32 %v1824_v21, %v1786_v62  ;;  %v21062_v62 = vsub.f32 %v20818_v4, %v20866_v12  ;;  %v1804_v21 = vmul.f32 %v21046_v39, %v21046_v39  ;;  %v1843_v9 = vadd.f32 %v1842_v48, %v1803_v34 }
 0x314   :  { %21927 = vst [vmem:[#allocation49_spill] sm:$0xff] %v21074_v57  ;;  %v1808_v34 = vmul.f32 %v21074_v57, %v21074_v57 }
 0x315   :  { %v1826_v43 = vadd.f32 %v1825_v23, %v1787_v18  ;;  %21925 = vst [vmem:[#allocation47_spill] sm:$0xff] %v21062_v62  ;;  %v1805_v18 = vmul.f32 %v21054_v22, %v21054_v22  ;;  %v1844_v23 = vadd.f32 %v1843_v9, %v1804_v21  ;;  %v1806_v4 = vmul.f32 %v21062_v62, %v21062_v62  ;;  %v17683_v21 = vld [vmem:[#allocation11 + $0x2d0] ss:$40 sps:$4 sm:$0xff]   ;;  %v17685_v9 = vld [vmem:[#allocation11 + $0x2d4] ss:$40 sps:$4 sm:$0xff]  }
 0x316   :  { %11916 = vmatprep.subr.bf16.mxu1 %v17685_v9  ;;  %v17712_v9 = vld [vmem:[#allocation11 + $0x1314] ss:$40 sps:$4 sm:$0xff]  }
 0x317   :  { %v1827_v0 = vadd.f32 %v1826_v43, %v1788_v41  ;;  %v1845_v6 = vadd.f32 %v1844_v23, %v1805_v18  ;;  %v21080_v41 = vsub.f32 %v20840_v38, %v20866_v12  ;;  %v17688_v18 = vld [vmem:[#allocation11 + $0x11d4] ss:$40 sps:$4 sm:$0xff]   ;;  %11917 = vmatpush1.bf16.msra.mxu1 %v17683_v21  ;;  %v17691_v38 = vld [vmem:[#allocation11 + $0x324] ss:$40 sps:$4 sm:$0xff]   ;;  %v17689_v23 = vld [vmem:[#allocation11 + $0x320] ss:$40 sps:$4 sm:$0xff]  }
 0x318   :  { %12045 = vmatprep.subr.bf16.mxu0 %v17688_v18  ;;  %v17694_v12 = vld [vmem:[#allocation11 + $0x1224] ss:$40 sps:$4 sm:$0xff]   ;;  %11918 = vmatprep.subr.bf16.mxu1 %v17691_v38  ;;  %v17709_v21 = vld [vmem:[#allocation11 + $0x414] ss:$40 sps:$4 sm:$0xff]   ;;  %v17710_v18 = vld [vmem:[#allocation11 + $0x1310] ss:$40 sps:$4 sm:$0xff]  }
 0x319   :  { %v1828_v40 = vadd.f32 %v1827_v0, %v1789_v49  ;;  %21928 = vst [vmem:[#allocation50_spill] sm:$0xff] %v21080_v41  ;;  %v1846_v43 = vadd.f32 %v1845_v6, %v1806_v4  ;;  %v1809_v51 = vmul.f32 %v21080_v41, %v21080_v41  ;;  %v17692_v4 = vld [vmem:[#allocation11 + $0x1220] ss:$40 sps:$4 sm:$0xff]   ;;  %v17695_v6 = vld [vmem:[#allocation11 + $0x370] ss:$40 sps:$4 sm:$0xff]  }
 0x31a   :  { %v17715_v38 = vld [vmem:[#allocation11 + $0x464] ss:$40 sps:$4 sm:$0xff]  }
 0x31b   :  { %1829 = vadd.xlane.f32.xlu1 %v1828_v40  ;;  %v1847_v48 = vadd.f32 %v1846_v43, %v1807_v32  ;;  %v17686_v40 = vld [vmem:[#allocation11 + $0x11d0] ss:$40 sps:$4 sm:$0xff]   ;;  %11919 = vmatpush1.bf16.msra.mxu1 %v17689_v23  ;;  %v17697_v32 = vld [vmem:[#allocation11 + $0x374] ss:$40 sps:$4 sm:$0xff]   ;;  %v17713_v23 = vld [vmem:[#allocation11 + $0x460] ss:$40 sps:$4 sm:$0xff]  }
 0x31c   :  { %12046 = vmatpush1.bf16.msra.mxu0 %v17686_v40  ;;  %v17698_v43 = vld [vmem:[#allocation11 + $0x1270] ss:$40 sps:$4 sm:$0xff]   ;;  %11920 = vmatprep.subr.bf16.mxu1 %v17697_v32  ;;  %v17721_v32 = vld [vmem:[#allocation11 + $0x4b4] ss:$40 sps:$4 sm:$0xff]  }
 0x31d   :  { %v1848_v49 = vadd.f32 %v1847_v48, %v1808_v34  ;;  %12047 = vmatprep.subr.bf16.mxu0 %v17694_v12  ;;  %v17700_v34 = vld [vmem:[#allocation11 + $0x1274] ss:$40 sps:$4 sm:$0xff]   ;;  %v17703_v48 = vld [vmem:[#allocation11 + $0x3c4] ss:$40 sps:$4 sm:$0xff]   ;;  %v17707_v40 = vld [vmem:[#allocation11 + $0x410] ss:$40 sps:$4 sm:$0xff]  }
 0x31e   :  { %v17718_v12 = vld [vmem:[#allocation11 + $0x1364] ss:$40 sps:$4 sm:$0xff]  }
 0x31f   :  { %v1849_v0 = vadd.f32 %v1848_v49, %v1809_v51  ;;  %v17706_v51 = vld [vmem:[#allocation11 + $0x12c4] ss:$40 sps:$4 sm:$0xff]   ;;  %11921 = vmatpush1.bf16.msra.mxu1 %v17695_v6  ;;  %v17701_v49 = vld [vmem:[#allocation11 + $0x3c0] ss:$40 sps:$4 sm:$0xff]   ;;  %v17719_v6 = vld [vmem:[#allocation11 + $0x4b0] ss:$40 sps:$4 sm:$0xff]  }
 0x320   :  { %12048 = vmatpush1.bf16.msra.mxu0 %v17692_v4  ;;  %11922 = vmatprep.subr.bf16.mxu1 %v17703_v48  ;;  %v17716_v4 = vld [vmem:[#allocation11 + $0x1360] ss:$40 sps:$4 sm:$0xff]   ;;  %v17727_v48 = vld [vmem:[#allocation11 + $0x504] ss:$40 sps:$4 sm:$0xff]  }
 0x321   :  { %1850 = vadd.xlane.f32.xlu1 %v1849_v0  ;;  %12049 = vmatprep.subr.bf16.mxu0 %v17700_v34  ;;  %v17704_v0 = vld [vmem:[#allocation11 + $0x12c0] ss:$40 sps:$4 sm:$0xff]   ;;  %v17724_v34 = vld [vmem:[#allocation11 + $0x13b4] ss:$40 sps:$4 sm:$0xff]  }
 0x323   :  { %11923 = vmatpush1.bf16.msra.mxu1 %v17701_v49 }
 0x324   :  { %12050 = vmatpush1.bf16.msra.mxu0 %v17698_v43  ;;  %11924 = vmatprep.subr.bf16.mxu1 %v17709_v21  ;;  %v17722_v43 = vld [vmem:[#allocation11 + $0x13b0] ss:$40 sps:$4 sm:$0xff]  }
 0x325   :  { %12051 = vmatprep.subr.bf16.mxu0 %v17706_v51  ;;  %v17730_v51 = vld [vmem:[#allocation11 + $0x1404] ss:$40 sps:$4 sm:$0xff]   ;;  %v1679_v21 = vld [vmem:[#allocation8] sm:$0xff] }
 0x326   :  { %v21137_v62 = vrot.slane %v1679_v21, %v20697_v25  ;;  %v21149_v39 = vrot.slane %v1679_v21, %v20678_v14 }
 0x327   :  { %11925 = vmatpush1.bf16.msra.mxu1 %v17707_v40  ;;  %v1682_v40 = vld [vmem:[#allocation10] sm:$0xff] }
 0x328   :  { %12052 = vmatpush1.bf16.msra.mxu0 %v17704_v0  ;;  %11926 = vmatprep.subr.bf16.mxu1 %v17715_v38  ;;  %v21089_v38 = vrot.slane %v1679_v21, %v20657_v2  ;;  %v21128_v54 = vrot.slane %v1682_v40, %v20659_v3  ;;  %v21140_v5 = vrot.slane %v1682_v40, %v20697_v25 }
 0x329   :  { %12053 = vmatprep.subr.bf16.mxu0 %v17712_v9  ;;  %v21152_v19 = vrot.slane %v1682_v40, %v20678_v14 }
 0x32a   :  { %21929 = vst [vmem:[#allocation51_spill] sm:$0xff] %v21140_v5  ;;  %v21163_v5 = vld [vmem:[#allocation10 + $0x10] sm:$0xf] }
 0x32b   :  { %11927 = vmatpush1.bf16.msra.mxu1 %v17713_v23  ;;  %v21092_v23 = vrot.slane %v1679_v21, %v20716_v36 }
 0x32c   :  { %12054 = vmatpush1.bf16.msra.mxu0 %v17710_v18  ;;  %11928 = vmatprep.subr.bf16.mxu1 %v17721_v32  ;;  %v1680_v18 = vld [vmem:[#allocation8 + $0x8] sm:$0xff]  ;;  %v21098_v32 = vrot.slane %v1679_v21, %v20702_v28 }
 0x32d   :  { %12055 = vmatprep.subr.bf16.mxu0 %v17718_v12  ;;  %v1683_v12 = vld [vmem:[#allocation10 + $0x8] sm:$0xff]  ;;  %v21131_v41 = vrot.slane %v1680_v18, %v20655_v1  ;;  %v21143_v60 = vrot.slane %v1680_v18, %v20670_v10  ;;  %v21155_v29 = vrot.slane %v1680_v18, %v20659_v3  ;;  %v21161_v63 = vrot.slane %v1680_v18, %v20697_v25 }
 0x32e   :  { %v21125_v57 = vrot.slane %v1683_v12, %v20657_v2  ;;  %v21134_v58 = vrot.slane %v1683_v12, %v20655_v1  ;;  %v21146_v55 = vrot.slane %v1683_v12, %v20670_v10  ;;  %v21158_v61 = vrot.slane %v1683_v12, %v20659_v3 }
 0x32f   :  { %11929 = vmatpush1.bf16.msra.mxu1 %v17719_v6  ;;  %v21104_v6 = vrot.slane %v1682_v40, %v20657_v2  ;;  %21931 = vst [vmem:[#allocation53_spill] sm:$0xff] %v21155_v29  ;;  %21933 = vst [vmem:[#allocation55_spill] sm:$0xff] %v21161_v63  ;;  %v21169_v15 = vrot.slane %v1680_v18, %v20678_v14  ;;  %v21175_v29 = vrot.slane %v1683_v12, %v20678_v14 }
 0x330   :  { %12056 = vmatpush1.bf16.msra.mxu0 %v17716_v4  ;;  %11941 = vmatprep.subr.bf16.mxu1 %v17727_v48  ;;  %v21095_v4 = vrot.slane %v1679_v21, %v20655_v1  ;;  %v21110_v48 = vrot.slane %v1680_v18, %v20657_v2  ;;  %21930 = vst [vmem:[#allocation52_spill] sm:$0xff] %v21146_v55  ;;  %21932 = vst [vmem:[#allocation54_spill] sm:$0xff] %v21158_v61 }
 0x331   :  { %12057 = vmatprep.subr.bf16.mxu0 %v17724_v34  ;;  %v21101_v34 = vrot.slane %v1679_v21, %v20670_v10  ;;  %21935 = vst [vmem:[#allocation57_spill] sm:$0xff] %v21169_v15  ;;  %v21178_v61 = vrot.slane %v1683_v12, %v20716_v36  ;;  %v21181_v63 = vrot.slane %v1680_v18, %v20702_v28 }
 0x332   :  { %v21191_v15 = vrot.slane %v21163_v5, %v20657_v2  ;;  %v21194_v14 = vrot.slane %v1681_v44, %v20655_v1 }
 0x334   :  { %12058 = vmatpush1.bf16.msra.mxu0 %v17722_v43  ;;  %v21107_v43 = vrot.slane %v1682_v40, %v20716_v36  ;;  %21937 = vst [vmem:[#allocation59_spill] sm:$0xff] %v21194_v14 }
 0x335   :  { %12070 = vmatprep.subr.bf16.mxu0 %v17730_v51  ;;  %v21113_v51 = vrot.slane %v1679_v21, %v20659_v3  ;;  %v21166_v21 = vrot.slane %v1683_v12, %v20697_v25 }
 0x337   :  { %21934 = vst [vmem:[#allocation56_spill] sm:$0xff] %v21166_v21  ;;  %v21187_v21 = vrot.slane %v1681_v44, %v20657_v2 }
 0x3a8   :  { %v1830_v49 = vpop.xlane.xlu1 %1829 }
 0x3a9   :  { %v1852_v0 = vmul.f32 0.000390625, %v1830_v49  ;;  %v21116_v49 = vrot.slane %v1682_v40, %v20655_v1 }
 0x3ab   :  { %v1854_v9 = vadd.f32 1e-05, %v1852_v0  ;;  %v21119_v0 = vrot.slane %v1682_v40, %v20702_v28 }
 0x3ad   :  { %20109 = vrsqrt.f32 %v1854_v9  ;;  %v21122_v9 = vrot.slane %v1682_v40, %v20670_v10  ;;  %v21172_v40 = vrot.slane %v1680_v18, %v20716_v36  ;;  %v21200_v18 = vrot.slane %v21163_v5, %v20655_v1 }
 0x3ae   :  { %v1851_v22 = vpop.xlane.xlu1 %1850  ;;  %v21210_v36 = vrot.slane %v1681_v44, %v20659_v3 }
 0x3af   :  { %v1853_v55 = vmul.f32 0.000390625, %v1851_v22  ;;  %21936 = vst [vmem:[#allocation58_spill] sm:$0xff] %v21172_v40  ;;  %v21184_v22 = vrot.slane %v1683_v12, %v20702_v28  ;;  %21938 = vst [vmem:[#allocation60_spill] sm:$0xff] %v21200_v18  ;;  %v21203_v12 = vrot.slane %v1681_v44, %v20670_v10 }
 0x3b0   :  { %21941 = vst [vmem:[#allocation63_spill] sm:$0xff] %v21210_v36 }
 0x3b1   :  { %v1855_v25 = vadd.f32 1e-05, %v1853_v55  ;;  %21939 = vst [vmem:[#allocation61_spill] sm:$0xff] %v21203_v12  ;;  %v21207_v55 = vrot.slane %v21163_v5, %v20670_v10 }
 0x3b3   :  { %21940 = vst [vmem:[#allocation62_spill] sm:$0xff] %v21207_v55  ;;  %20111 = vrsqrt.f32 %v1855_v25 }
 0x3b7   :  { %v21196_v40 = vpop.eup %20109 }
 0x3b8   :  { %v1859_v28 = vmul.f32 %v21196_v40, %v20852_v8  ;;  %v1865_v2 = vmul.f32 %v21196_v40, %v20896_v7  ;;  %v1858_v1 = vmul.f32 %v21196_v40, %v20848_v53  ;;  %v1864_v12 = vmul.f32 %v21196_v40, %v20890_v26 }
 0x3b9   :  { %v1861_v10 = vmul.f32 %v21196_v40, %v20864_v11  ;;  %v1867_v44 = vmul.f32 %v21196_v40, %v20920_v20  ;;  %v1860_v25 = vmul.f32 %v21196_v40, %v20856_v59  ;;  %v1866_v53 = vmul.f32 %v21196_v40, %v20910_v33 }
 0x3ba   :  { %v2002_v8 = vmul.f32 %v21089_v38, %v1859_v28  ;;  %v2008_v36 = vmul.f32 %v21092_v23, %v1865_v2  ;;  %v2001_v7 = vmul.f32 %v21095_v4, %v1858_v1  ;;  %v2007_v26 = vmul.f32 %v21098_v32, %v1864_v12 }
 0x3bb   :  { %v2004_v55 = vmul.f32 %v21101_v34, %v1861_v10  ;;  %v2010_v11 = vmul.f32 %v21110_v48, %v1867_v44  ;;  %v2003_v20 = vmul.f32 %v21113_v51, %v1860_v25  ;;  %v2009_v1 = vmul.f32 %v21131_v41, %v1866_v53 }
 0x3bc   :  { %v2145_v18 = vadd.f32 %v21104_v6, %v2002_v8  ;;  %v21237_v59 = vadd.f32 %v21107_v43, %v2008_v36  ;;  %v21240_v2 = vadd.f32 %v21116_v49, %v2001_v7  ;;  %v21244_v28 = vadd.f32 %v21119_v0, %v2007_v26 }
 0x3bd   :  { %v21247_v33 = vadd.f32 %v21122_v9, %v2004_v55  ;;  %v21250_v10 = vadd.f32 %v21125_v57, %v2010_v11  ;;  %v21253_v12 = vadd.f32 %v21128_v54, %v2003_v20  ;;  %v2152_v8 = vadd.f32 %v21134_v58, %v2009_v1 }
 0x3be   :  { %v2185_v44 = vmax.f32 %v2145_v18, 0.0  ;;  %v2191_v36 = vmax.f32 %v21237_v59, 0.0  ;;  %v2184_v25 = vmax.f32 %v21240_v2, 0.0  ;;  %v2190_v7 = vmax.f32 %v21244_v28, 0.0 }
 0x3bf   :  { %v2187_v53 = vmax.f32 %v21247_v33, 0.0  ;;  %v2193_v55 = vmax.f32 %v21250_v10, 0.0  ;;  %v2186_v26 = vmax.f32 %v21253_v12, 0.0  ;;  %v2192_v11 = vmax.f32 %v2152_v8, 0.0 }
 0x3c0   :  { %v1863_v20 = vmul.f32 %v21196_v40, %v20876_v45  ;;  %v1869_v18 = vmul.f32 %v21196_v40, %v20944_v42  ;;  %v1862_v59 = vmul.f32 %v21196_v40, %v20870_v13  ;;  %v21270_v2 = vmul.f32 %v21196_v40, %v20932_v27  ;;  %v21284_v42 = vpop.eup %20111 }
 0x3c1   :  { %v21274_v1 = vmul.f32 %v21196_v40, %v20968_v56  ;;  %v21278_v28 = vmul.f32 %v21196_v40, %v20956_v50  ;;  %v21282_v45 = vmul.f32 %v21196_v40, %v20992_v47  ;;  %v21291_v56 = vmul.f32 %v21196_v40, %v20980_v31 }
 0x3c2   :  { %v2006_v13 = vmul.f32 %v21137_v62, %v1863_v20  ;;  %v2012_v33 = vmul.f32 %v21143_v60, %v1869_v18  ;;  %v2005_v27 = vmul.f32 %v21149_v39, %v1862_v59  ;;  %v1879_v50 = vmul.f32 %v21284_v42, %v20886_v30 }
 0x3c3   :  { %v1885_v10 = vmul.f32 %v21284_v42, %v20962_v52  ;;  %v1878_v47 = vmul.f32 %v21284_v42, %v20882_v24  ;;  %v1884_v12 = vmul.f32 %v21284_v42, %v20950_v37  ;;  %v1881_v8 = vmul.f32 %v21284_v42, %v20916_v17 }
 0x3c4   :  { %v1887_v20 = vmul.f32 %v21284_v42, %v20986_v46  ;;  %v1880_v31 = vmul.f32 %v21284_v42, %v20902_v16  ;;  %v1886_v30 = vmul.f32 %v21284_v42, %v20974_v35  ;;  %v2022_v52 = vmul.f32 %v21089_v38, %v1879_v50 }
 0x3c5   :  { %v2028_v18 = vmul.f32 %v21092_v23, %v1885_v10  ;;  %v2021_v24 = vmul.f32 %v21095_v4, %v1878_v47  ;;  %v2027_v37 = vmul.f32 %v21098_v32, %v1884_v12  ;;  %v2024_v59 = vmul.f32 %v21101_v34, %v1881_v8 }
 0x3c6   :  { %v2030_v17 = vmul.f32 %v21110_v48, %v1887_v20  ;;  %v2023_v46 = vmul.f32 %v21113_v51, %v1880_v31  ;;  %v2029_v14 = vmul.f32 %v21131_v41, %v1886_v30  ;;  %v2165_v16 = vadd.f32 %v21104_v6, %v2022_v52  ;;  %v21942_v30 = vld [vmem:[#allocation36_spill] sm:$0xff]  ;;  %v21943_v52 = vld [vmem:[#allocation51_spill] sm:$0xff] }
 0x3c7   :  { %v2171_v35 = vadd.f32 %v21107_v43, %v2028_v18  ;;  %v2164_v38 = vadd.f32 %v21116_v49, %v2021_v24  ;;  %v2170_v23 = vadd.f32 %v21119_v0, %v2027_v37  ;;  %v2167_v4 = vadd.f32 %v21122_v9, %v2024_v59  ;;  %v17725_v49 = vld [vmem:[#allocation11 + $0x500] ss:$40 sps:$4 sm:$0xff]   ;;  %v17731_v59 = vld [vmem:[#allocation11 + $0x550] ss:$40 sps:$4 sm:$0xff]  }
 0x3c8   :  { %v2173_v32 = vadd.f32 %v21125_v57, %v2030_v17  ;;  %v2166_v34 = vadd.f32 %v21128_v54, %v2023_v46  ;;  %v2172_v48 = vadd.f32 %v21134_v58, %v2029_v14  ;;  %v2205_v50 = vmax.f32 %v2165_v16, 0.0  ;;  %v17728_v9 = vld [vmem:[#allocation11 + $0x1400] ss:$40 sps:$4 sm:$0xff]   ;;  %v17734_v17 = vld [vmem:[#allocation11 + $0x1450] ss:$40 sps:$4 sm:$0xff]  }
 0x3c9   :  { %v2211_v51 = vmax.f32 %v2171_v35, 0.0  ;;  %v2204_v10 = vmax.f32 %v2164_v38, 0.0  ;;  %v2210_v41 = vmax.f32 %v2170_v23, 0.0  ;;  %v2207_v47 = vmax.f32 %v2167_v4, 0.0  ;;  %v21944_v18 = vld [vmem:[#allocation39_spill] sm:$0xff]  ;;  %v21947_v16 = vld [vmem:[#allocation37_spill] sm:$0xff] }
 0x3ca   :  { %v2213_v6 = vmax.f32 %v2173_v32, 0.0  ;;  %v2206_v12 = vmax.f32 %v2166_v34, 0.0  ;;  %v2212_v43 = vmax.f32 %v2172_v48, 0.0  ;;  %v21325_v8 = vpack.c.bf16 %v2205_v50, %v2185_v44  ;;  %v17733_v44 = vld [vmem:[#allocation11 + $0x554] ss:$40 sps:$4 sm:$0xff]  }
 0x3cb   :  { %v21327_v0 = vpack.c.bf16 %v2211_v51, %v2191_v36  ;;  %v21329_v20 = vpack.c.bf16 %v2204_v10, %v2184_v25  ;;  %v21331_v57 = vpack.c.bf16 %v2210_v41, %v2190_v7  ;;  %v21333_v54 = vpack.c.bf16 %v2207_v47, %v2187_v53  ;;  %v17736_v36 = vld [vmem:[#allocation11 + $0x1454] ss:$40 sps:$4 sm:$0xff]   ;;  %v17742_v38 = vld [vmem:[#allocation11 + $0x14a4] ss:$40 sps:$4 sm:$0xff]  }
 0x3cc   :  { %v21335_v14 = vpack.c.bf16 %v2213_v6, %v2193_v55  ;;  %v21337_v58 = vpack.c.bf16 %v2206_v12, %v2186_v26  ;;  %v21339_v31 = vpack.c.bf16 %v2212_v43, %v2192_v11  ;;  %11930 = vmatprep.mubr.bf16.mxu1 %v21325_v8  ;;  %v1883_v25 = vmul.f32 %v21284_v42, %v21942_v30  ;;  %v21945_v55 = vld [vmem:[#allocation52_spill] sm:$0xff]  ;;  %v21946_v11 = vld [vmem:[#allocation35_spill] sm:$0xff]  ;;  %v21948_v32 = vld [vmem:[#allocation53_spill] sm:$0xff] }
 0x3cd   :  { %12059 = vmatprep.mubr.bf16.mxu0 %v21327_v0  ;;  %v2149_v7 = vadd.f32 %v21943_v52, %v2006_v13  ;;  %v1889_v53 = vmul.f32 %v21284_v42, %v21944_v18  ;;  %11931 = vmatmul.mubr.bf16.vlgmr.msra.gmra.mrb[24].mxu1 %v21329_v20  ;;  %v2155_v26 = vadd.f32 %v21945_v55, %v2012_v33  ;;  %v17739_v33 = vld [vmem:[#allocation11 + $0x5a4] ss:$40 sps:$4 sm:$0xff]   ;;  %v17740_v43 = vld [vmem:[#allocation11 + $0x14a0] ss:$40 sps:$4 sm:$0xff]  }
 0x3ce   :  { %12060 = vmatmul.mubr.bf16.vlgmr.msra.gmra.mrb[16].mxu0 %v21331_v57  ;;  %v1882_v24 = vmul.f32 %v21284_v42, %v21946_v11  ;;  %v2148_v37 = vadd.f32 %v21152_v19, %v2005_v27  ;;  %11942 = vmatpush1.bf16.msra.mxu1 %v17725_v49  ;;  %v2026_v13 = vmul.f32 %v21137_v62, %v1883_v25  ;;  %v21949_v10 = vld [vmem:[#allocation54_spill] sm:$0xff]  ;;  %v21950_v47 = vld [vmem:[#allocation43_spill] sm:$0xff]  ;;  %v17748_v25 = vld [vmem:[#allocation11 + $0x14f4] ss:$40 sps:$4 sm:$0xff]  }
 0x3cf   :  { %12071 = vmatpush1.bf16.msra.mxu0 %v17728_v9  ;;  %v2032_v46 = vmul.f32 %v21143_v60, %v1889_v53  ;;  %v1888_v35 = vmul.f32 %v21284_v42, %v21947_v16  ;;  %11973 = vmatprep.mubr.bf16.mxu1 %v21333_v54  ;;  %v2189_v23 = vmax.f32 %v2149_v7, 0.0  ;;  %v2195_v4 = vmax.f32 %v2155_v26, 0.0  ;;  %v17743_v16 = vld [vmem:[#allocation11 + $0x5f0] ss:$40 sps:$4 sm:$0xff]  }
 0x3d0   :  { %12102 = vmatprep.mubr.bf16.mxu0 %v21335_v14  ;;  %v2025_v27 = vmul.f32 %v21149_v39, %v1882_v24  ;;  %v2011_v34 = vmul.f32 %v21948_v32, %v21270_v2  ;;  %11943 = vmatprep.subr.bf16.mxu1 %v17733_v44  ;;  %v2169_v62 = vadd.f32 %v21943_v52, %v2026_v13  ;;  %v2188_v48 = vmax.f32 %v2148_v37, 0.0  ;;  %v21951_v39 = vld [vmem:[#allocation55_spill] sm:$0xff]  ;;  %v21954_v24 = vld [vmem:[#allocation57_spill] sm:$0xff] }
 0x3d1   :  { %12072 = vmatprep.subr.bf16.mxu0 %v17736_v36  ;;  %v2175_v60 = vadd.f32 %v21945_v55, %v2032_v46  ;;  %v2031_v50 = vmul.f32 %v21948_v32, %v1888_v35  ;;  %v1891_v6 = vmul.f32 %v21284_v42, %v21950_v47  ;;  %v2014_v12 = vmul.f32 %v21951_v39, %v21274_v1  ;;  %v17737_v2 = vld [vmem:[#allocation11 + $0x5a0] ss:$40 sps:$4 sm:$0xff]   ;;  %v21952_v36 = vld [vmem:[#allocation41_spill] sm:$0xff]  ;;  %v21953_v1 = vld [vmem:[#allocation56_spill] sm:$0xff] }
 0x3d2   :  { %v2168_v51 = vadd.f32 %v21152_v19, %v2025_v27  ;;  %v2154_v41 = vadd.f32 %v21949_v10, %v2011_v34  ;;  %11944 = vmatpush1.bf16.msra.mxu1 %v17731_v59  ;;  %v2209_v49 = vmax.f32 %v2169_v62, 0.0  ;;  %v1890_v30 = vmul.f32 %v21284_v42, %v21952_v36  ;;  %v17745_v19 = vld [vmem:[#allocation11 + $0x5f4] ss:$40 sps:$4 sm:$0xff]   ;;  %v17746_v35 = vld [vmem:[#allocation11 + $0x14f0] ss:$40 sps:$4 sm:$0xff]   ;;  %v21956_v62 = vld [vmem:[#allocation58_spill] sm:$0xff] }
 0x3d3   :  { %12073 = vmatpush1.bf16.msra.mxu0 %v17734_v17  ;;  %v2215_v9 = vmax.f32 %v2175_v60, 0.0  ;;  %v2174_v44 = vadd.f32 %v21949_v10, %v2031_v50  ;;  %11945 = vmatprep.subr.bf16.mxu1 %v17739_v33  ;;  %v2034_v18 = vmul.f32 %v21951_v39, %v1891_v6  ;;  %v2157_v53 = vadd.f32 %v21953_v1, %v2014_v12  ;;  %v17751_v27 = vld [vmem:[#allocation11 + $0x644] ss:$40 sps:$4 sm:$0xff]   ;;  %v21958_v47 = vld [vmem:[#allocation40_spill] sm:$0xff] }
 0x3d4   :  { %12074 = vmatprep.subr.bf16.mxu0 %v17742_v38  ;;  %v2208_v52 = vmax.f32 %v2168_v51, 0.0  ;;  %v2194_v7 = vmax.f32 %v2154_v41, 0.0  ;;  %v21377_v55 = vpack.c.bf16 %v2209_v49, %v2189_v23  ;;  %v2013_v37 = vmul.f32 %v21954_v24, %v21278_v28  ;;  %v21955_v28 = vld [vmem:[#allocation46_spill] sm:$0xff]  ;;  %v17757_v36 = vld [vmem:[#allocation11 + $0x694] ss:$40 sps:$4 sm:$0xff]  }
 0x3d5   :  { %v21379_v26 = vpack.c.bf16 %v2215_v9, %v2195_v4  ;;  %v2214_v11 = vmax.f32 %v2174_v44, 0.0  ;;  %v2177_v17 = vadd.f32 %v21953_v1, %v2034_v18  ;;  %v2033_v13 = vmul.f32 %v21954_v24, %v1890_v30  ;;  %v17754_v32 = vld [vmem:[#allocation11 + $0x1544] ss:$40 sps:$4 sm:$0xff]   ;;  %v21959_v44 = vld [vmem:[#allocation48_spill] sm:$0xff] }
 0x3d6   :  { %v21383_v59 = vpack.c.bf16 %v2208_v52, %v2188_v48  ;;  %v21389_v46 = vrot.slane %v21163_v5, %v20659_v3  ;;  %11946 = vmatpush1.bf16.msra.mxu1 %v17737_v2  ;;  %v2197_v38 = vmax.f32 %v2157_v53, 0.0  ;;  %v2156_v23 = vadd.f32 %v21175_v29, %v2013_v37  ;;  %v21957_v48 = vld [vmem:[#allocation45_spill] sm:$0xff]  ;;  %v21960_v1 = vld [vmem:[#allocation38_spill] sm:$0xff]  ;;  %v21961_v37 = vld [vmem:[#allocation47_spill] sm:$0xff] }
 0x3d7   :  { %12075 = vmatpush1.bf16.msra.mxu0 %v17740_v43  ;;  %v21391_v33 = vpack.c.bf16 %v2214_v11, %v2194_v7  ;;  %v1893_v4 = vmul.f32 %v21284_v42, %v21955_v28  ;;  %11947 = vmatprep.subr.bf16.mxu1 %v17745_v19  ;;  %v2217_v34 = vmax.f32 %v2177_v17, 0.0  ;;  %v2176_v5 = vadd.f32 %v21175_v29, %v2033_v13  ;;  %v17752_v43 = vld [vmem:[#allocation11 + $0x1540] ss:$40 sps:$4 sm:$0xff]   ;;  %v17760_v30 = vld [vmem:[#allocation11 + $0x1594] ss:$40 sps:$4 sm:$0xff]  }
 0x3d8   :  { %12076 = vmatprep.subr.bf16.mxu0 %v17748_v25  ;;  %v2016_v60 = vmul.f32 %v21956_v62, %v21282_v45  ;;  %v1892_v50 = vmul.f32 %v21284_v42, %v21957_v48  ;;  %v2196_v51 = vmax.f32 %v2156_v23, 0.0  ;;  %v2015_v41 = vmul.f32 %v21181_v63, %v21291_v56  ;;  %v17749_v45 = vld [vmem:[#allocation11 + $0x640] ss:$40 sps:$4 sm:$0xff]   ;;  %v21962_v13 = vld [vmem:[#allocation44_spill] sm:$0xff] }
 0x3d9   :  { %v2036_v10 = vmul.f32 %v21956_v62, %v1893_v4  ;;  %v1875_v6 = vmul.f32 %v21196_v40, %v21958_v47  ;;  %v21406_v39 = vpack.c.bf16 %v2217_v34, %v2197_v38  ;;  %v2216_v12 = vmax.f32 %v2176_v5, 0.0  ;;  %v21963_v23 = vld [vmem:[#allocation59_spill] sm:$0xff]  ;;  %v21964_v62 = vld [vmem:[#allocation50_spill] sm:$0xff] }
 0x3da   :  { %v2159_v29 = vadd.f32 %v21178_v61, %v2016_v60  ;;  %v2035_v2 = vmul.f32 %v21181_v63, %v1892_v50  ;;  %11948 = vmatpush1.bf16.msra.mxu1 %v17743_v16  ;;  %v2158_v9 = vadd.f32 %v21184_v22, %v2015_v41  ;;  %v1895_v56 = vmul.f32 %v21284_v42, %v21959_v44  ;;  %v17763_v4 = vld [vmem:[#allocation11 + $0x6e4] ss:$40 sps:$4 sm:$0xff]   ;;  %v21965_v50 = vld [vmem:[#allocation60_spill] sm:$0xff] }
 0x3db   :  { %12077 = vmatpush1.bf16.msra.mxu0 %v17746_v35  ;;  %v2179_v49 = vadd.f32 %v21178_v61, %v2036_v10  ;;  %11949 = vmatprep.subr.bf16.mxu1 %v17751_v27  ;;  %v21414_v19 = vpack.c.bf16 %v2216_v12, %v2196_v51  ;;  %v2018_v52 = vmul.f32 %v21187_v21, %v1875_v6  ;;  %v17758_v35 = vld [vmem:[#allocation11 + $0x1590] ss:$40 sps:$4 sm:$0xff]   ;;  %v17766_v27 = vld [vmem:[#allocation11 + $0x15e4] ss:$40 sps:$4 sm:$0xff]  }
 0x3dc   :  { %12078 = vmatprep.subr.bf16.mxu0 %v17754_v32  ;;  %v2199_v25 = vmax.f32 %v2159_v29, 0.0  ;;  %v2178_v63 = vadd.f32 %v21184_v22, %v2035_v2  ;;  %v2198_v18 = vmax.f32 %v2158_v9, 0.0  ;;  %v2038_v61 = vmul.f32 %v21187_v21, %v1895_v56  ;;  %v17755_v22 = vld [vmem:[#allocation11 + $0x690] ss:$40 sps:$4 sm:$0xff]   ;;  %v21969_v9 = vld [vmem:[#allocation62_spill] sm:$0xff]  ;;  %v21970_v56 = vld [vmem:[#allocation63_spill] sm:$0xff] }
 0x3dd   :  { %v2219_v7 = vmax.f32 %v2179_v49, 0.0  ;;  %v1874_v53 = vmul.f32 %v21196_v40, %v21960_v1  ;;  %v2161_v24 = vadd.f32 %v21191_v15, %v2018_v52  ;;  %v1894_v17 = vmul.f32 %v21284_v42, %v21961_v37  ;;  %v21966_v10 = vld [vmem:[#allocation61_spill] sm:$0xff]  ;;  %v17775_v37 = vld [vmem:[#allocation11 + $0x784] ss:$40 sps:$4 sm:$0xff]  }
 0x3de   :  { %v2218_v11 = vmax.f32 %v2178_v63, 0.0  ;;  %v1877_v16 = vmul.f32 %v21196_v40, %v21962_v13  ;;  %11950 = vmatpush1.bf16.msra.mxu1 %v17749_v45  ;;  %v2181_v21 = vadd.f32 %v21191_v15, %v2038_v61  ;;  %v1897_v60 = vmul.f32 %v21284_v42, %v21964_v62  ;;  %v21967_v15 = vld [vmem:[#allocation42_spill] sm:$0xff]  ;;  %v21968_v29 = vld [vmem:[#allocation49_spill] sm:$0xff] }
 0x3df   :  { %12079 = vmatpush1.bf16.msra.mxu0 %v17752_v43  ;;  %v21426_v38 = vpack.c.bf16 %v2219_v7, %v2199_v25  ;;  %v2017_v28 = vmul.f32 %v21963_v23, %v1874_v53  ;;  %11951 = vmatprep.subr.bf16.mxu1 %v17757_v36  ;;  %v2201_v34 = vmax.f32 %v2161_v24, 0.0  ;;  %v2037_v5 = vmul.f32 %v21963_v23, %v1894_v17  ;;  %v17761_v45 = vld [vmem:[#allocation11 + $0x6e0] ss:$40 sps:$4 sm:$0xff]   ;;  %v17770_v24 = vld [vmem:[#allocation11 + $0x1630] ss:$40 sps:$4 sm:$0xff]  }
 0x3e0   :  { %12080 = vmatprep.subr.bf16.mxu0 %v17760_v30  ;;  %v21430_v32 = vpack.c.bf16 %v2218_v11, %v2198_v18  ;;  %v2221_v48 = vmax.f32 %v2181_v21, 0.0  ;;  %v2020_v41 = vmul.f32 %v21966_v10, %v1877_v16  ;;  %v1876_v47 = vmul.f32 %v21196_v40, %v21967_v15  ;;  %v17764_v43 = vld [vmem:[#allocation11 + $0x15e0] ss:$40 sps:$4 sm:$0xff]   ;;  %v17769_v40 = vld [vmem:[#allocation11 + $0x734] ss:$40 sps:$4 sm:$0xff]  }
 0x3e1   :  { %v2160_v51 = vadd.f32 %v21965_v50, %v2017_v28  ;;  %v2180_v6 = vadd.f32 %v21965_v50, %v2037_v5  ;;  %v2040_v12 = vmul.f32 %v21966_v10, %v1897_v60  ;;  %v1896_v2 = vmul.f32 %v21284_v42, %v21968_v29  ;;  %v17772_v30 = vld [vmem:[#allocation11 + $0x1634] ss:$40 sps:$4 sm:$0xff]   ;;  %v17767_v11 = vld [vmem:[#allocation11 + $0x730] ss:$40 sps:$4 sm:$0xff]   ;;  %v17778_v17 = vld [vmem:[#allocation11 + $0x1684] ss:$40 sps:$4 sm:$0xff]  }
 0x3e2   :  { %11952 = vmatpush1.bf16.msra.mxu1 %v17755_v22  ;;  %v21443_v49 = vpack.c.bf16 %v2221_v48, %v2201_v34  ;;  %v2163_v44 = vadd.f32 %v21969_v9, %v2020_v41  ;;  %v2019_v36 = vmul.f32 %v21970_v56, %v1876_v47  ;;  %v17773_v21 = vld [vmem:[#allocation11 + $0x780] ss:$40 sps:$4 sm:$0xff]   ;;  %v17784_v28 = vld [vmem:[#allocation11 + $0x16d4] ss:$40 sps:$4 sm:$0xff]   ;;  %v17787_v34 = vld [vmem:[#allocation11 + $0x824] ss:$40 sps:$4 sm:$0xff]  }
 0x3e3   :  { %12081 = vmatpush1.bf16.msra.mxu0 %v17758_v35  ;;  %11953 = vmatprep.subr.bf16.mxu1 %v17763_v4  ;;  %v2200_v25 = vmax.f32 %v2160_v51, 0.0  ;;  %v2220_v63 = vmax.f32 %v2180_v6, 0.0  ;;  %v2183_v52 = vadd.f32 %v21969_v9, %v2040_v12  ;;  %v2039_v42 = vmul.f32 %v21970_v56, %v1896_v2  ;;  %v17776_v23 = vld [vmem:[#allocation11 + $0x1680] ss:$40 sps:$4 sm:$0xff]   ;;  %v17779_v4 = vld [vmem:[#allocation11 + $0x7d0] ss:$40 sps:$4 sm:$0xff]  }
 0x3e4   :  { %12082 = vmatprep.subr.bf16.mxu0 %v17766_v27  ;;  %v2162_v7 = vadd.f32 %v21389_v46, %v2019_v36  ;;  %v2203_v61 = vmax.f32 %v2163_v44, 0.0  ;;  %v17782_v27 = vld [vmem:[#allocation11 + $0x16d0] ss:$40 sps:$4 sm:$0xff]   ;;  %v17790_v5 = vld [vmem:[#allocation11 + $0x1724] ss:$40 sps:$4 sm:$0xff]  }
 0x3e5   :  { %v21450_v18 = vpack.c.bf16 %v2220_v63, %v2200_v25  ;;  %v2223_v1 = vmax.f32 %v2183_v52, 0.0  ;;  %v2182_v53 = vadd.f32 %v21389_v46, %v2039_v42  ;;  %v17781_v46 = vld [vmem:[#allocation11 + $0x7d4] ss:$40 sps:$4 sm:$0xff]   ;;  %v17785_v62 = vld [vmem:[#allocation11 + $0x820] ss:$40 sps:$4 sm:$0xff]  }
 0x3e6   :  { %11954 = vmatpush1.bf16.msra.mxu1 %v17761_v45  ;;  %v2202_v16 = vmax.f32 %v2162_v7, 0.0  ;;  %v17788_v60 = vld [vmem:[#allocation11 + $0x1720] ss:$40 sps:$4 sm:$0xff]   ;;  %v17793_v48 = vld [vmem:[#allocation11 + $0x874] ss:$40 sps:$4 sm:$0xff]  }
 0x3e7   :  { %12083 = vmatpush1.bf16.msra.mxu0 %v17764_v43  ;;  %11955 = vmatprep.subr.bf16.mxu1 %v17769_v40  ;;  %v21453_v13 = vpack.c.bf16 %v2223_v1, %v2203_v61  ;;  %v2222_v22 = vmax.f32 %v2182_v53, 0.0  ;;  %v17796_v50 = vld [vmem:[#allocation11 + $0x1774] ss:$40 sps:$4 sm:$0xff]   ;;  %v17791_v51 = vld [vmem:[#allocation11 + $0x870] ss:$40 sps:$4 sm:$0xff]  }
 0x3e8   :  { %12084 = vmatprep.subr.bf16.mxu0 %v17772_v30  ;;  %v17794_v10 = vld [vmem:[#allocation11 + $0x1770] ss:$40 sps:$4 sm:$0xff]   ;;  %v17799_v41 = vld [vmem:[#allocation11 + $0x8c4] ss:$40 sps:$4 sm:$0xff]   ;;  %v17797_v47 = vld [vmem:[#allocation11 + $0x8c0] ss:$40 sps:$4 sm:$0xff]  }
 0x3e9   :  { %v21455_v35 = vpack.c.bf16 %v2222_v22, %v2202_v16  ;;  %v17802_v15 = vld [vmem:[#allocation11 + $0x17c4] ss:$40 sps:$4 sm:$0xff]   ;;  %v17800_v6 = vld [vmem:[#allocation11 + $0x17c0] ss:$40 sps:$4 sm:$0xff]   ;;  %v17805_v12 = vld [vmem:[#allocation11 + $0x914] ss:$40 sps:$4 sm:$0xff]  }
 0x3ea   :  { %11956 = vmatpush1.bf16.msra.mxu1 %v17767_v11  ;;  %v17808_v29 = vld [vmem:[#allocation11 + $0x1814] ss:$40 sps:$4 sm:$0xff]   ;;  %v17803_v2 = vld [vmem:[#allocation11 + $0x910] ss:$40 sps:$4 sm:$0xff]   ;;  %v17811_v43 = vld [vmem:[#allocation11 + $0x964] ss:$40 sps:$4 sm:$0xff]  }
 0x3eb   :  { %12085 = vmatpush1.bf16.msra.mxu0 %v17770_v24  ;;  %11957 = vmatprep.subr.bf16.mxu1 %v17775_v37  ;;  %v17806_v45 = vld [vmem:[#allocation11 + $0x1810] ss:$40 sps:$4 sm:$0xff]   ;;  %v17814_v9 = vld [vmem:[#allocation11 + $0x1864] ss:$40 sps:$4 sm:$0xff]   ;;  %v17809_v44 = vld [vmem:[#allocation11 + $0x960] ss:$40 sps:$4 sm:$0xff]  }
 0x3ec   :  { %12086 = vmatprep.subr.bf16.mxu0 %v17778_v17  ;;  %v17812_v56 = vld [vmem:[#allocation11 + $0x1860] ss:$40 sps:$4 sm:$0xff]   ;;  %v17817_v36 = vld [vmem:[#allocation11 + $0x9b4] ss:$40 sps:$4 sm:$0xff]   ;;  %v17815_v30 = vld [vmem:[#allocation11 + $0x9b0] ss:$40 sps:$4 sm:$0xff]  }
 0x3ed   :  { %v17820_v40 = vld [vmem:[#allocation11 + $0x18b4] ss:$40 sps:$4 sm:$0xff]   ;;  %v17818_v25 = vld [vmem:[#allocation11 + $0x18b0] ss:$40 sps:$4 sm:$0xff]   ;;  %v17823_v63 = vld [vmem:[#allocation11 + $0xa04] ss:$40 sps:$4 sm:$0xff]  }
 0x3ee   :  { %11958 = vmatpush1.bf16.msra.mxu1 %v17773_v21  ;;  %v17826_v52 = vld [vmem:[#allocation11 + $0x1904] ss:$40 sps:$4 sm:$0xff]   ;;  %v17821_v42 = vld [vmem:[#allocation11 + $0xa00] ss:$40 sps:$4 sm:$0xff]   ;;  %v17829_v61 = vld [vmem:[#allocation11 + $0xa54] ss:$40 sps:$4 sm:$0xff]  }
 0x3ef   :  { %12087 = vmatpush1.bf16.msra.mxu0 %v17776_v23  ;;  %11959 = vmatprep.subr.bf16.mxu1 %v17781_v46  ;;  %v17824_v7 = vld [vmem:[#allocation11 + $0x1900] ss:$40 sps:$4 sm:$0xff]   ;;  %v17832_v1 = vld [vmem:[#allocation11 + $0x1954] ss:$40 sps:$4 sm:$0xff]   ;;  %v17827_v53 = vld [vmem:[#allocation11 + $0xa50] ss:$40 sps:$4 sm:$0xff]  }
 0x3f0   :  { %12088 = vmatprep.subr.bf16.mxu0 %v17784_v28  ;;  %v17830_v11 = vld [vmem:[#allocation11 + $0x1950] ss:$40 sps:$4 sm:$0xff]   ;;  %v17835_v24 = vld [vmem:[#allocation11 + $0xaa4] ss:$40 sps:$4 sm:$0xff]   ;;  %v17833_v17 = vld [vmem:[#allocation11 + $0xaa0] ss:$40 sps:$4 sm:$0xff]  }
 0x3f1   :  { %v17838_v37 = vld [vmem:[#allocation11 + $0x19a4] ss:$40 sps:$4 sm:$0xff]   ;;  %v17836_v16 = vld [vmem:[#allocation11 + $0x19a0] ss:$40 sps:$4 sm:$0xff]   ;;  %v17841_v22 = vld [vmem:[#allocation11 + $0xaf4] ss:$40 sps:$4 sm:$0xff]  }
 0x3f2   :  { %11960 = vmatpush1.bf16.msra.mxu1 %v17779_v4  ;;  %v17844_v21 = vld [vmem:[#allocation11 + $0x19f4] ss:$40 sps:$4 sm:$0xff]   ;;  %v17839_v23 = vld [vmem:[#allocation11 + $0xaf0] ss:$40 sps:$4 sm:$0xff]   ;;  %v17847_v28 = vld [vmem:[#allocation11 + $0xb44] ss:$40 sps:$4 sm:$0xff]  }
 0x3f3   :  { %12089 = vmatpush1.bf16.msra.mxu0 %v17782_v27  ;;  %11961 = vmatprep.subr.bf16.mxu1 %v17787_v34  ;;  %v17842_v46 = vld [vmem:[#allocation11 + $0x19f0] ss:$40 sps:$4 sm:$0xff]   ;;  %v17850_v4 = vld [vmem:[#allocation11 + $0x1a44] ss:$40 sps:$4 sm:$0xff]   ;;  %v17845_v27 = vld [vmem:[#allocation11 + $0xb40] ss:$40 sps:$4 sm:$0xff]  }
 0x3f4   :  { %12090 = vmatprep.subr.bf16.mxu0 %v17790_v5  ;;  %v17848_v34 = vld [vmem:[#allocation11 + $0x1a40] ss:$40 sps:$4 sm:$0xff]   ;;  %v17853_v5 = vld [vmem:[#allocation11 + $0xb94] ss:$40 sps:$4 sm:$0xff]  }
 0x3f6   :  { %11962 = vmatpush1.bf16.msra.mxu1 %v17785_v62  ;;  %v17856_v62 = vld [vmem:[#allocation11 + $0x1a94] ss:$40 sps:$4 sm:$0xff]  }
 0x3f7   :  { %12091 = vmatpush1.bf16.msra.mxu0 %v17788_v60  ;;  %11963 = vmatprep.subr.bf16.mxu1 %v17793_v48  ;;  %v17851_v60 = vld [vmem:[#allocation11 + $0xb90] ss:$40 sps:$4 sm:$0xff]  }
 0x3f8   :  { %12092 = vmatprep.subr.bf16.mxu0 %v17796_v50  ;;  %v17854_v48 = vld [vmem:[#allocation11 + $0x1a90] ss:$40 sps:$4 sm:$0xff]   ;;  %v17859_v50 = vld [vmem:[#allocation11 + $0xbe4] ss:$40 sps:$4 sm:$0xff]  }
 0x3fa   :  { %11964 = vmatpush1.bf16.msra.mxu1 %v17791_v51  ;;  %v17862_v51 = vld [vmem:[#allocation11 + $0x1ae4] ss:$40 sps:$4 sm:$0xff]  }
 0x3fb   :  { %12093 = vmatpush1.bf16.msra.mxu0 %v17794_v10  ;;  %11965 = vmatprep.subr.bf16.mxu1 %v17799_v41  ;;  %v17857_v10 = vld [vmem:[#allocation11 + $0xbe0] ss:$40 sps:$4 sm:$0xff]  }
 0x3fc   :  { %12094 = vmatprep.subr.bf16.mxu0 %v17802_v15  ;;  %v17860_v41 = vld [vmem:[#allocation11 + $0x1ae0] ss:$40 sps:$4 sm:$0xff]   ;;  %v17865_v15 = vld [vmem:[#allocation11 + $0xc34] ss:$40 sps:$4 sm:$0xff]  }
 0x3fe   :  { %11966 = vmatpush1.bf16.msra.mxu1 %v17797_v47  ;;  %v17868_v47 = vld [vmem:[#allocation11 + $0x1b34] ss:$40 sps:$4 sm:$0xff]  }
 0x3ff   :  { %12095 = vmatpush1.bf16.msra.mxu0 %v17800_v6  ;;  %11967 = vmatprep.subr.bf16.mxu1 %v17805_v12  ;;  %v17863_v6 = vld [vmem:[#allocation11 + $0xc30] ss:$40 sps:$4 sm:$0xff]  }
 0x400   :  { %12096 = vmatprep.subr.bf16.mxu0 %v17808_v29  ;;  %v17866_v12 = vld [vmem:[#allocation11 + $0x1b30] ss:$40 sps:$4 sm:$0xff]   ;;  %v17871_v29 = vld [vmem:[#allocation11 + $0xc84] ss:$40 sps:$4 sm:$0xff]  }
 0x402   :  { %11968 = vmatpush1.bf16.msra.mxu1 %v17803_v2  ;;  %v17874_v2 = vld [vmem:[#allocation11 + $0x1b84] ss:$40 sps:$4 sm:$0xff]  }
 0x403   :  { %12097 = vmatpush1.bf16.msra.mxu0 %v17806_v45  ;;  %11969 = vmatprep.subr.bf16.mxu1 %v17811_v43  ;;  %v17869_v45 = vld [vmem:[#allocation11 + $0xc80] ss:$40 sps:$4 sm:$0xff]  }
 0x404   :  { %12098 = vmatprep.subr.bf16.mxu0 %v17814_v9  ;;  %v17872_v43 = vld [vmem:[#allocation11 + $0x1b80] ss:$40 sps:$4 sm:$0xff]   ;;  %v17877_v9 = vld [vmem:[#allocation11 + $0xcd4] ss:$40 sps:$4 sm:$0xff]  }
 0x406   :  { %11970 = vmatpush1.bf16.msra.mxu1 %v17809_v44  ;;  %v17880_v44 = vld [vmem:[#allocation11 + $0x1bd4] ss:$40 sps:$4 sm:$0xff]  }
 0x407   :  { %12099 = vmatpush1.bf16.msra.mxu0 %v17812_v56  ;;  %11971 = vmatprep.subr.bf16.mxu1 %v17817_v36  ;;  %v17875_v56 = vld [vmem:[#allocation11 + $0xcd0] ss:$40 sps:$4 sm:$0xff]  }
 0x408   :  { %12100 = vmatprep.subr.bf16.mxu0 %v17820_v40  ;;  %v17878_v36 = vld [vmem:[#allocation11 + $0x1bd0] ss:$40 sps:$4 sm:$0xff]   ;;  %v17883_v40 = vld [vmem:[#allocation11 + $0xd24] ss:$40 sps:$4 sm:$0xff]  }
 0x40a   :  { %11972 = vmatpush1.bf16.msra.mxu1 %v17815_v30  ;;  %v17886_v30 = vld [vmem:[#allocation11 + $0x1c24] ss:$40 sps:$4 sm:$0xff]  }
 0x40b   :  { %12101 = vmatpush1.bf16.msra.mxu0 %v17818_v25  ;;  %11984 = vmatprep.subr.bf16.mxu1 %v17823_v63  ;;  %v17881_v25 = vld [vmem:[#allocation11 + $0xd20] ss:$40 sps:$4 sm:$0xff]  }
 0x40c   :  { %12113 = vmatprep.subr.bf16.mxu0 %v17826_v52  ;;  %v17884_v63 = vld [vmem:[#allocation11 + $0x1c20] ss:$40 sps:$4 sm:$0xff]   ;;  %v17889_v52 = vld [vmem:[#allocation11 + $0xd74] ss:$40 sps:$4 sm:$0xff]  }
 0x40d   :  { %11974 = vmatmul.mubr.bf16.vlgmr.msra.gmra.mrb[24].mxu1 %v21337_v58 }
 0x40e   :  { %12103 = vmatmul.mubr.bf16.vlgmr.msra.gmra.mrb[16].mxu0 %v21339_v31  ;;  %11985 = vmatpush1.bf16.msra.mxu1 %v17821_v42  ;;  %v17892_v42 = vld [vmem:[#allocation11 + $0x1c74] ss:$40 sps:$4 sm:$0xff]  }
 0x40f   :  { %12016 = vmatprep.mubr.bf16.mxu1 %v21377_v55  ;;  %12114 = vmatpush1.bf16.msra.mxu0 %v17824_v7  ;;  %v17887_v7 = vld [vmem:[#allocation11 + $0xd70] ss:$40 sps:$4 sm:$0xff]  }
 0x410   :  { %12145 = vmatprep.mubr.bf16.mxu0 %v21379_v26  ;;  %11986 = vmatprep.subr.bf16.mxu1 %v17829_v61  ;;  %v17890_v61 = vld [vmem:[#allocation11 + $0x1c70] ss:$40 sps:$4 sm:$0xff]  }
 0x411   :  { %12115 = vmatprep.subr.bf16.mxu0 %v17832_v1  ;;  %v17895_v1 = vld [vmem:[#allocation11 + $0xdc4] ss:$40 sps:$4 sm:$0xff]  }
 0x412   :  { %11987 = vmatpush1.bf16.msra.mxu1 %v17827_v53  ;;  %v17898_v53 = vld [vmem:[#allocation11 + $0x1cc4] ss:$40 sps:$4 sm:$0xff]  }
 0x413   :  { %12116 = vmatpush1.bf16.msra.mxu0 %v17830_v11  ;;  %11988 = vmatprep.subr.bf16.mxu1 %v17835_v24  ;;  %v17893_v11 = vld [vmem:[#allocation11 + $0xdc0] ss:$40 sps:$4 sm:$0xff]  }
 0x414   :  { %12117 = vmatprep.subr.bf16.mxu0 %v17838_v37  ;;  %v17896_v24 = vld [vmem:[#allocation11 + $0x1cc0] ss:$40 sps:$4 sm:$0xff]   ;;  %v17901_v37 = vld [vmem:[#allocation11 + $0xe14] ss:$40 sps:$4 sm:$0xff]  }
 0x416   :  { %11989 = vmatpush1.bf16.msra.mxu1 %v17833_v17  ;;  %v17904_v17 = vld [vmem:[#allocation11 + $0x1d14] ss:$40 sps:$4 sm:$0xff]  }
 0x417   :  { %12118 = vmatpush1.bf16.msra.mxu0 %v17836_v16  ;;  %11990 = vmatprep.subr.bf16.mxu1 %v17841_v22  ;;  %v17899_v16 = vld [vmem:[#allocation11 + $0xe10] ss:$40 sps:$4 sm:$0xff]  }
 0x418   :  { %12119 = vmatprep.subr.bf16.mxu0 %v17844_v21  ;;  %v17902_v22 = vld [vmem:[#allocation11 + $0x1d10] ss:$40 sps:$4 sm:$0xff]   ;;  %v17907_v21 = vld [vmem:[#allocation11 + $0xe64] ss:$40 sps:$4 sm:$0xff]  }
 0x41a   :  { %11991 = vmatpush1.bf16.msra.mxu1 %v17839_v23  ;;  %v17910_v23 = vld [vmem:[#allocation11 + $0x1d64] ss:$40 sps:$4 sm:$0xff]  }
 0x41b   :  { %12120 = vmatpush1.bf16.msra.mxu0 %v17842_v46  ;;  %11992 = vmatprep.subr.bf16.mxu1 %v17847_v28  ;;  %v17905_v46 = vld [vmem:[#allocation11 + $0xe60] ss:$40 sps:$4 sm:$0xff]  }
 0x41c   :  { %12121 = vmatprep.subr.bf16.mxu0 %v17850_v4  ;;  %v17908_v28 = vld [vmem:[#allocation11 + $0x1d60] ss:$40 sps:$4 sm:$0xff]   ;;  %v17913_v4 = vld [vmem:[#allocation11 + $0xeb4] ss:$40 sps:$4 sm:$0xff]  }
 0x41e   :  { %11993 = vmatpush1.bf16.msra.mxu1 %v17845_v27  ;;  %v17916_v27 = vld [vmem:[#allocation11 + $0x1db4] ss:$40 sps:$4 sm:$0xff]  }
 0x41f   :  { %12122 = vmatpush1.bf16.msra.mxu0 %v17848_v34  ;;  %11994 = vmatprep.subr.bf16.mxu1 %v17853_v5  ;;  %v17911_v34 = vld [vmem:[#allocation11 + $0xeb0] ss:$40 sps:$4 sm:$0xff]  }
 0x420   :  { %12123 = vmatprep.subr.bf16.mxu0 %v17856_v62  ;;  %v17914_v5 = vld [vmem:[#allocation11 + $0x1db0] ss:$40 sps:$4 sm:$0xff]   ;;  %v17922_v62 = vld [vmem:[#allocation11 + $0xc] ss:$40 sps:$4 sm:$0xff]  }
 0x422   :  { %11995 = vmatpush1.bf16.msra.mxu1 %v17851_v60  ;;  %v17919_v60 = vld [vmem:[#allocation11 + $0x1e04] ss:$40 sps:$4 sm:$0xff]  }
 0x423   :  { %12124 = vmatpush1.bf16.msra.mxu0 %v17854_v48  ;;  %11996 = vmatprep.subr.bf16.mxu1 %v17859_v50  ;;  %v17920_v48 = vld [vmem:[#allocation11 + $0x8] ss:$40 sps:$4 sm:$0xff]  }
 0x424   :  { %12125 = vmatprep.subr.bf16.mxu0 %v17862_v51  ;;  %v17917_v50 = vld [vmem:[#allocation11 + $0x1e00] ss:$40 sps:$4 sm:$0xff]   ;;  %v17925_v51 = vld [vmem:[#allocation11 + $0x1e54] ss:$40 sps:$4 sm:$0xff]  }
 0x426   :  { %11997 = vmatpush1.bf16.msra.mxu1 %v17857_v10  ;;  %v17928_v10 = vld [vmem:[#allocation11 + $0x5c] ss:$40 sps:$4 sm:$0xff]  }
 0x427   :  { %12126 = vmatpush1.bf16.msra.mxu0 %v17860_v41  ;;  %11998 = vmatprep.subr.bf16.mxu1 %v17865_v15  ;;  %v17926_v41 = vld [vmem:[#allocation11 + $0x58] ss:$40 sps:$4 sm:$0xff]  }
 0x428   :  { %12127 = vmatprep.subr.bf16.mxu0 %v17868_v47  ;;  %v17923_v15 = vld [vmem:[#allocation11 + $0x1e50] ss:$40 sps:$4 sm:$0xff]   ;;  %v17934_v47 = vld [vmem:[#allocation11 + $0xac] ss:$40 sps:$4 sm:$0xff]  }
 0x42a   :  { %11999 = vmatpush1.bf16.msra.mxu1 %v17863_v6  ;;  %v17931_v6 = vld [vmem:[#allocation11 + $0x1ea4] ss:$40 sps:$4 sm:$0xff]  }
 0x42b   :  { %12128 = vmatpush1.bf16.msra.mxu0 %v17866_v12  ;;  %12000 = vmatprep.subr.bf16.mxu1 %v17871_v29  ;;  %v17932_v12 = vld [vmem:[#allocation11 + $0xa8] ss:$40 sps:$4 sm:$0xff]  }
 0x42c   :  { %12129 = vmatprep.subr.bf16.mxu0 %v17874_v2  ;;  %v17929_v29 = vld [vmem:[#allocation11 + $0x1ea0] ss:$40 sps:$4 sm:$0xff]   ;;  %v17940_v2 = vld [vmem:[#allocation11 + $0xfc] ss:$40 sps:$4 sm:$0xff]  }
 0x42e   :  { %12001 = vmatpush1.bf16.msra.mxu1 %v17869_v45  ;;  %v17937_v45 = vld [vmem:[#allocation11 + $0x1ef4] ss:$40 sps:$4 sm:$0xff]  }
 0x42f   :  { %12130 = vmatpush1.bf16.msra.mxu0 %v17872_v43  ;;  %12002 = vmatprep.subr.bf16.mxu1 %v17877_v9  ;;  %v17938_v43 = vld [vmem:[#allocation11 + $0xf8] ss:$40 sps:$4 sm:$0xff]  }
 0x430   :  { %12131 = vmatprep.subr.bf16.mxu0 %v17880_v44  ;;  %v17935_v9 = vld [vmem:[#allocation11 + $0x1ef0] ss:$40 sps:$4 sm:$0xff]   ;;  %v17946_v44 = vld [vmem:[#allocation11 + $0x14c] ss:$40 sps:$4 sm:$0xff]  }
 0x432   :  { %12003 = vmatpush1.bf16.msra.mxu1 %v17875_v56  ;;  %v17943_v56 = vld [vmem:[#allocation11 + $0x1f44] ss:$40 sps:$4 sm:$0xff]  }
 0x433   :  { %12132 = vmatpush1.bf16.msra.mxu0 %v17878_v36  ;;  %12004 = vmatprep.subr.bf16.mxu1 %v17883_v40  ;;  %v17944_v36 = vld [vmem:[#allocation11 + $0x148] ss:$40 sps:$4 sm:$0xff]  }
 0x434   :  { %12133 = vmatprep.subr.bf16.mxu0 %v17886_v30  ;;  %v17941_v40 = vld [vmem:[#allocation11 + $0x1f40] ss:$40 sps:$4 sm:$0xff]   ;;  %v17952_v30 = vld [vmem:[#allocation11 + $0x19c] ss:$40 sps:$4 sm:$0xff]  }
 0x436   :  { %12005 = vmatpush1.bf16.msra.mxu1 %v17881_v25  ;;  %v17949_v25 = vld [vmem:[#allocation11 + $0x1f94] ss:$40 sps:$4 sm:$0xff]  }
 0x437   :  { %12134 = vmatpush1.bf16.msra.mxu0 %v17884_v63  ;;  %12006 = vmatprep.subr.bf16.mxu1 %v17889_v52  ;;  %v17950_v63 = vld [vmem:[#allocation11 + $0x198] ss:$40 sps:$4 sm:$0xff]  }
 0x438   :  { %12135 = vmatprep.subr.bf16.mxu0 %v17892_v42  ;;  %v17947_v52 = vld [vmem:[#allocation11 + $0x1f90] ss:$40 sps:$4 sm:$0xff]   ;;  %v17958_v42 = vld [vmem:[#allocation11 + $0x1ec] ss:$40 sps:$4 sm:$0xff]  }
 0x43a   :  { %12007 = vmatpush1.bf16.msra.mxu1 %v17887_v7  ;;  %v17955_v7 = vld [vmem:[#allocation11 + $0x1fe4] ss:$40 sps:$4 sm:$0xff]  }
 0x43b   :  { %12136 = vmatpush1.bf16.msra.mxu0 %v17890_v61  ;;  %12008 = vmatprep.subr.bf16.mxu1 %v17895_v1  ;;  %v17956_v61 = vld [vmem:[#allocation11 + $0x1e8] ss:$40 sps:$4 sm:$0xff]  }
 0x43c   :  { %12137 = vmatprep.subr.bf16.mxu0 %v17898_v53  ;;  %v17953_v1 = vld [vmem:[#allocation11 + $0x1fe0] ss:$40 sps:$4 sm:$0xff]   ;;  %v17964_v53 = vld [vmem:[#allocation11 + $0x23c] ss:$40 sps:$4 sm:$0xff]  }
 0x43e   :  { %12009 = vmatpush1.bf16.msra.mxu1 %v17893_v11  ;;  %v17961_v11 = vld [vmem:[#allocation11 + $0x2034] ss:$40 sps:$4 sm:$0xff]  }
 0x43f   :  { %12138 = vmatpush1.bf16.msra.mxu0 %v17896_v24  ;;  %12010 = vmatprep.subr.bf16.mxu1 %v17901_v37  ;;  %v17962_v24 = vld [vmem:[#allocation11 + $0x238] ss:$40 sps:$4 sm:$0xff]  }
 0x440   :  { %12139 = vmatprep.subr.bf16.mxu0 %v17904_v17  ;;  %v17959_v37 = vld [vmem:[#allocation11 + $0x2030] ss:$40 sps:$4 sm:$0xff]   ;;  %v17970_v17 = vld [vmem:[#allocation11 + $0x28c] ss:$40 sps:$4 sm:$0xff]  }
 0x442   :  { %12011 = vmatpush1.bf16.msra.mxu1 %v17899_v16  ;;  %v17967_v16 = vld [vmem:[#allocation11 + $0x2084] ss:$40 sps:$4 sm:$0xff]  }
 0x443   :  { %12140 = vmatpush1.bf16.msra.mxu0 %v17902_v22  ;;  %12012 = vmatprep.subr.bf16.mxu1 %v17907_v21  ;;  %v17968_v22 = vld [vmem:[#allocation11 + $0x288] ss:$40 sps:$4 sm:$0xff]  }
 0x444   :  { %12141 = vmatprep.subr.bf16.mxu0 %v17910_v23  ;;  %v17965_v21 = vld [vmem:[#allocation11 + $0x2080] ss:$40 sps:$4 sm:$0xff]   ;;  %v17976_v23 = vld [vmem:[#allocation11 + $0x2dc] ss:$40 sps:$4 sm:$0xff]  }
 0x446   :  { %12013 = vmatpush1.bf16.msra.mxu1 %v17905_v46  ;;  %v17973_v46 = vld [vmem:[#allocation11 + $0x20d4] ss:$40 sps:$4 sm:$0xff]  }
 0x447   :  { %12142 = vmatpush1.bf16.msra.mxu0 %v17908_v28  ;;  %12014 = vmatprep.subr.bf16.mxu1 %v17913_v4  ;;  %v17974_v28 = vld [vmem:[#allocation11 + $0x2d8] ss:$40 sps:$4 sm:$0xff]  }
 0x448   :  { %12143 = vmatprep.subr.bf16.mxu0 %v17916_v27  ;;  %v17971_v4 = vld [vmem:[#allocation11 + $0x20d0] ss:$40 sps:$4 sm:$0xff]   ;;  %v17982_v27 = vld [vmem:[#allocation11 + $0x32c] ss:$40 sps:$4 sm:$0xff]  }
 0x44a   :  { %12015 = vmatpush1.bf16.msra.mxu1 %v17911_v34  ;;  %v17979_v34 = vld [vmem:[#allocation11 + $0x2124] ss:$40 sps:$4 sm:$0xff]  }
 0x44b   :  { %12144 = vmatpush1.bf16.msra.mxu0 %v17914_v5  ;;  %12328 = vmatprep.subr.bf16.mxu1 %v17922_v62  ;;  %v17980_v5 = vld [vmem:[#allocation11 + $0x328] ss:$40 sps:$4 sm:$0xff]  }
 0x44c   :  { %12156 = vmatprep.subr.bf16.mxu0 %v17919_v60  ;;  %v17977_v62 = vld [vmem:[#allocation11 + $0x2120] ss:$40 sps:$4 sm:$0xff]   ;;  %v17988_v60 = vld [vmem:[#allocation11 + $0x37c] ss:$40 sps:$4 sm:$0xff]  }
 0x44d   :  { %12017 = vmatmul.mubr.bf16.vlgmr.msra.gmra.mrb[24].mxu1 %v21383_v59 }
 0x44e   :  { %12146 = vmatmul.mubr.bf16.vlgmr.msra.gmra.mrb[16].mxu0 %v21391_v33  ;;  %12329 = vmatpush1.bf16.msra.mxu1 %v17920_v48  ;;  %v17985_v48 = vld [vmem:[#allocation11 + $0x2174] ss:$40 sps:$4 sm:$0xff]  }
 0x44f   :  { %12157 = vmatpush1.bf16.msra.mxu0 %v17917_v50  ;;  %12188 = vmatprep.mubr.bf16.mxu0 %v21406_v39  ;;  %v17986_v50 = vld [vmem:[#allocation11 + $0x378] ss:$40 sps:$4 sm:$0xff]  }
 0x450   :  { %12360 = vmatprep.mubr.bf16.mxu1 %v21325_v8  ;;  %12158 = vmatprep.subr.bf16.mxu0 %v17925_v51  ;;  %v17983_v51 = vld [vmem:[#allocation11 + $0x2170] ss:$40 sps:$4 sm:$0xff]  }
 0x451   :  { %12330 = vmatprep.subr.bf16.mxu1 %v17928_v10  ;;  %v17994_v10 = vld [vmem:[#allocation11 + $0x3cc] ss:$40 sps:$4 sm:$0xff]  }
 0x452   :  { %12331 = vmatpush1.bf16.msra.mxu1 %v17926_v41  ;;  %v17991_v41 = vld [vmem:[#allocation11 + $0x21c4] ss:$40 sps:$4 sm:$0xff]  }
 0x453   :  { %12159 = vmatpush1.bf16.msra.mxu0 %v17923_v15  ;;  %12332 = vmatprep.subr.bf16.mxu1 %v17934_v47  ;;  %v17992_v15 = vld [vmem:[#allocation11 + $0x3c8] ss:$40 sps:$4 sm:$0xff]  }
 0x454   :  { %12160 = vmatprep.subr.bf16.mxu0 %v17931_v6  ;;  %v17989_v47 = vld [vmem:[#allocation11 + $0x21c0] ss:$40 sps:$4 sm:$0xff]   ;;  %v18000_v6 = vld [vmem:[#allocation11 + $0x41c] ss:$40 sps:$4 sm:$0xff]  }
 0x456   :  { %12333 = vmatpush1.bf16.msra.mxu1 %v17932_v12  ;;  %v17997_v12 = vld [vmem:[#allocation11 + $0x2214] ss:$40 sps:$4 sm:$0xff]  }
 0x457   :  { %12161 = vmatpush1.bf16.msra.mxu0 %v17929_v29  ;;  %12334 = vmatprep.subr.bf16.mxu1 %v17940_v2  ;;  %v17998_v29 = vld [vmem:[#allocation11 + $0x418] ss:$40 sps:$4 sm:$0xff]  }
 0x458   :  { %12162 = vmatprep.subr.bf16.mxu0 %v17937_v45  ;;  %v17995_v2 = vld [vmem:[#allocation11 + $0x2210] ss:$40 sps:$4 sm:$0xff]   ;;  %v18006_v45 = vld [vmem:[#allocation11 + $0x46c] ss:$40 sps:$4 sm:$0xff]  }
 0x45a   :  { %12335 = vmatpush1.bf16.msra.mxu1 %v17938_v43  ;;  %v18003_v43 = vld [vmem:[#allocation11 + $0x2264] ss:$40 sps:$4 sm:$0xff]  }
 0x45b   :  { %12163 = vmatpush1.bf16.msra.mxu0 %v17935_v9  ;;  %12336 = vmatprep.subr.bf16.mxu1 %v17946_v44  ;;  %v18004_v9 = vld [vmem:[#allocation11 + $0x468] ss:$40 sps:$4 sm:$0xff]  }
 0x45c   :  { %12164 = vmatprep.subr.bf16.mxu0 %v17943_v56  ;;  %v18001_v44 = vld [vmem:[#allocation11 + $0x2260] ss:$40 sps:$4 sm:$0xff]   ;;  %v18012_v56 = vld [vmem:[#allocation11 + $0x4bc] ss:$40 sps:$4 sm:$0xff]  }
 0x45e   :  { %12337 = vmatpush1.bf16.msra.mxu1 %v17944_v36  ;;  %v18009_v36 = vld [vmem:[#allocation11 + $0x22b4] ss:$40 sps:$4 sm:$0xff]  }
 0x45f   :  { %12165 = vmatpush1.bf16.msra.mxu0 %v17941_v40  ;;  %12338 = vmatprep.subr.bf16.mxu1 %v17952_v30  ;;  %v18010_v40 = vld [vmem:[#allocation11 + $0x4b8] ss:$40 sps:$4 sm:$0xff]  }
 0x460   :  { %12166 = vmatprep.subr.bf16.mxu0 %v17949_v25  ;;  %v18007_v30 = vld [vmem:[#allocation11 + $0x22b0] ss:$40 sps:$4 sm:$0xff]   ;;  %v18018_v25 = vld [vmem:[#allocation11 + $0x50c] ss:$40 sps:$4 sm:$0xff]  }
 0x462   :  { %12339 = vmatpush1.bf16.msra.mxu1 %v17950_v63  ;;  %v18015_v63 = vld [vmem:[#allocation11 + $0x2304] ss:$40 sps:$4 sm:$0xff]  }
 0x463   :  { %12167 = vmatpush1.bf16.msra.mxu0 %v17947_v52  ;;  %12340 = vmatprep.subr.bf16.mxu1 %v17958_v42  ;;  %v18016_v52 = vld [vmem:[#allocation11 + $0x508] ss:$40 sps:$4 sm:$0xff]  }
 0x464   :  { %12168 = vmatprep.subr.bf16.mxu0 %v17955_v7  ;;  %v18013_v42 = vld [vmem:[#allocation11 + $0x2300] ss:$40 sps:$4 sm:$0xff]   ;;  %v18021_v7 = vld [vmem:[#allocation11 + $0x2354] ss:$40 sps:$4 sm:$0xff]  }
 0x466   :  { %12341 = vmatpush1.bf16.msra.mxu1 %v17956_v61  ;;  %v18024_v61 = vld [vmem:[#allocation11 + $0x55c] ss:$40 sps:$4 sm:$0xff]  }
 0x467   :  { %12169 = vmatpush1.bf16.msra.mxu0 %v17953_v1  ;;  %12342 = vmatprep.subr.bf16.mxu1 %v17964_v53  ;;  %v18022_v1 = vld [vmem:[#allocation11 + $0x558] ss:$40 sps:$4 sm:$0xff]  }
 0x468   :  { %12170 = vmatprep.subr.bf16.mxu0 %v17961_v11  ;;  %v18019_v53 = vld [vmem:[#allocation11 + $0x2350] ss:$40 sps:$4 sm:$0xff]   ;;  %v18030_v11 = vld [vmem:[#allocation11 + $0x5ac] ss:$40 sps:$4 sm:$0xff]  }
 0x46a   :  { %12343 = vmatpush1.bf16.msra.mxu1 %v17962_v24  ;;  %v18027_v24 = vld [vmem:[#allocation11 + $0x23a4] ss:$40 sps:$4 sm:$0xff]  }
 0x46b   :  { %12171 = vmatpush1.bf16.msra.mxu0 %v17959_v37  ;;  %12344 = vmatprep.subr.bf16.mxu1 %v17970_v17  ;;  %v18028_v37 = vld [vmem:[#allocation11 + $0x5a8] ss:$40 sps:$4 sm:$0xff]  }
 0x46c   :  { %12172 = vmatprep.subr.bf16.mxu0 %v17967_v16  ;;  %v18025_v17 = vld [vmem:[#allocation11 + $0x23a0] ss:$40 sps:$4 sm:$0xff]   ;;  %v18036_v16 = vld [vmem:[#allocation11 + $0x5fc] ss:$40 sps:$4 sm:$0xff]  }
 0x46e   :  { %12345 = vmatpush1.bf16.msra.mxu1 %v17968_v22  ;;  %v18033_v22 = vld [vmem:[#allocation11 + $0x23f4] ss:$40 sps:$4 sm:$0xff]  }
 0x46f   :  { %12173 = vmatpush1.bf16.msra.mxu0 %v17965_v21  ;;  %12346 = vmatprep.subr.bf16.mxu1 %v17976_v23  ;;  %v18034_v21 = vld [vmem:[#allocation11 + $0x5f8] ss:$40 sps:$4 sm:$0xff]  }
 0x470   :  { %12174 = vmatprep.subr.bf16.mxu0 %v17973_v46  ;;  %v18031_v23 = vld [vmem:[#allocation11 + $0x23f0] ss:$40 sps:$4 sm:$0xff]   ;;  %v18042_v46 = vld [vmem:[#allocation11 + $0x64c] ss:$40 sps:$4 sm:$0xff]  }
 0x472   :  { %12347 = vmatpush1.bf16.msra.mxu1 %v17974_v28  ;;  %v18039_v28 = vld [vmem:[#allocation11 + $0x2444] ss:$40 sps:$4 sm:$0xff]  }
 0x473   :  { %12175 = vmatpush1.bf16.msra.mxu0 %v17971_v4  ;;  %12348 = vmatprep.subr.bf16.mxu1 %v17982_v27  ;;  %v18040_v4 = vld [vmem:[#allocation11 + $0x648] ss:$40 sps:$4 sm:$0xff]  }
 0x474   :  { %12176 = vmatprep.subr.bf16.mxu0 %v17979_v34  ;;  %v18037_v27 = vld [vmem:[#allocation11 + $0x2440] ss:$40 sps:$4 sm:$0xff]   ;;  %v18048_v34 = vld [vmem:[#allocation11 + $0x69c] ss:$40 sps:$4 sm:$0xff]  }
 0x476   :  { %12349 = vmatpush1.bf16.msra.mxu1 %v17980_v5  ;;  %v18045_v5 = vld [vmem:[#allocation11 + $0x2494] ss:$40 sps:$4 sm:$0xff]  }
 0x477   :  { %12177 = vmatpush1.bf16.msra.mxu0 %v17977_v62  ;;  %12350 = vmatprep.subr.bf16.mxu1 %v17988_v60  ;;  %v18046_v62 = vld [vmem:[#allocation11 + $0x698] ss:$40 sps:$4 sm:$0xff]  }
 0x478   :  { %12178 = vmatprep.subr.bf16.mxu0 %v17985_v48  ;;  %v18043_v60 = vld [vmem:[#allocation11 + $0x2490] ss:$40 sps:$4 sm:$0xff]   ;;  %v18054_v48 = vld [vmem:[#allocation11 + $0x6ec] ss:$40 sps:$4 sm:$0xff]  }
 0x47a   :  { %12351 = vmatpush1.bf16.msra.mxu1 %v17986_v50  ;;  %v18051_v50 = vld [vmem:[#allocation11 + $0x24e4] ss:$40 sps:$4 sm:$0xff]  }
 0x47b   :  { %12179 = vmatpush1.bf16.msra.mxu0 %v17983_v51  ;;  %12352 = vmatprep.subr.bf16.mxu1 %v17994_v10  ;;  %v18052_v51 = vld [vmem:[#allocation11 + $0x6e8] ss:$40 sps:$4 sm:$0xff]  }
 0x47c   :  { %12180 = vmatprep.subr.bf16.mxu0 %v17991_v41  ;;  %v18049_v10 = vld [vmem:[#allocation11 + $0x24e0] ss:$40 sps:$4 sm:$0xff]   ;;  %v18060_v41 = vld [vmem:[#allocation11 + $0x73c] ss:$40 sps:$4 sm:$0xff]  }
 0x47e   :  { %12353 = vmatpush1.bf16.msra.mxu1 %v17992_v15  ;;  %v18057_v15 = vld [vmem:[#allocation11 + $0x2534] ss:$40 sps:$4 sm:$0xff]  }
 0x47f   :  { %12181 = vmatpush1.bf16.msra.mxu0 %v17989_v47  ;;  %12354 = vmatprep.subr.bf16.mxu1 %v18000_v6  ;;  %v18058_v47 = vld [vmem:[#allocation11 + $0x738] ss:$40 sps:$4 sm:$0xff]  }
 0x480   :  { %12182 = vmatprep.subr.bf16.mxu0 %v17997_v12  ;;  %v18055_v6 = vld [vmem:[#allocation11 + $0x2530] ss:$40 sps:$4 sm:$0xff]   ;;  %v18066_v12 = vld [vmem:[#allocation11 + $0x78c] ss:$40 sps:$4 sm:$0xff]  }
 0x482   :  { %12355 = vmatpush1.bf16.msra.mxu1 %v17998_v29  ;;  %v18063_v29 = vld [vmem:[#allocation11 + $0x2584] ss:$40 sps:$4 sm:$0xff]  }
 0x483   :  { %12183 = vmatpush1.bf16.msra.mxu0 %v17995_v2  ;;  %12356 = vmatprep.subr.bf16.mxu1 %v18006_v45  ;;  %v18064_v2 = vld [vmem:[#allocation11 + $0x788] ss:$40 sps:$4 sm:$0xff]  }
 0x484   :  { %12184 = vmatprep.subr.bf16.mxu0 %v18003_v43  ;;  %v18061_v45 = vld [vmem:[#allocation11 + $0x2580] ss:$40 sps:$4 sm:$0xff]   ;;  %v18072_v43 = vld [vmem:[#allocation11 + $0x7dc] ss:$40 sps:$4 sm:$0xff]  }
 0x486   :  { %12357 = vmatpush1.bf16.msra.mxu1 %v18004_v9  ;;  %v18069_v9 = vld [vmem:[#allocation11 + $0x25d4] ss:$40 sps:$4 sm:$0xff]  }
 0x487   :  { %12185 = vmatpush1.bf16.msra.mxu0 %v18001_v44  ;;  %12358 = vmatprep.subr.bf16.mxu1 %v18012_v56  ;;  %v18070_v44 = vld [vmem:[#allocation11 + $0x7d8] ss:$40 sps:$4 sm:$0xff]  }
 0x488   :  { %12186 = vmatprep.subr.bf16.mxu0 %v18009_v36  ;;  %v18067_v56 = vld [vmem:[#allocation11 + $0x25d0] ss:$40 sps:$4 sm:$0xff]   ;;  %v18078_v36 = vld [vmem:[#allocation11 + $0x82c] ss:$40 sps:$4 sm:$0xff]  }
 0x48a   :  { %12359 = vmatpush1.bf16.msra.mxu1 %v18010_v40  ;;  %v18075_v40 = vld [vmem:[#allocation11 + $0x2624] ss:$40 sps:$4 sm:$0xff]  }
 0x48b   :  { %12187 = vmatpush1.bf16.msra.mxu0 %v18007_v30  ;;  %12371 = vmatprep.subr.bf16.mxu1 %v18018_v25  ;;  %v18076_v30 = vld [vmem:[#allocation11 + $0x828] ss:$40 sps:$4 sm:$0xff]  }
 0x48c   :  { %12199 = vmatprep.subr.bf16.mxu0 %v18015_v63  ;;  %v18073_v25 = vld [vmem:[#allocation11 + $0x2620] ss:$40 sps:$4 sm:$0xff]   ;;  %v18084_v63 = vld [vmem:[#allocation11 + $0x87c] ss:$40 sps:$4 sm:$0xff]  }
 0x48d   :  { %12361 = vmatmul.mubr.bf16.vlgmr.msra.gmra.mrb[28].mxu1 %v21329_v20 }
 0x48e   :  { %12189 = vmatmul.mubr.bf16.vlgmr.msra.gmra.mrb[16].mxu0 %v21414_v19  ;;  %12372 = vmatpush1.bf16.msra.mxu1 %v18016_v52  ;;  %v18081_v52 = vld [vmem:[#allocation11 + $0x2674] ss:$40 sps:$4 sm:$0xff]  }
 0x48f   :  { %12200 = vmatpush1.bf16.msra.mxu0 %v18013_v42  ;;  %12231 = vmatprep.mubr.bf16.mxu0 %v21426_v38  ;;  %v18082_v42 = vld [vmem:[#allocation11 + $0x878] ss:$40 sps:$4 sm:$0xff]  }
 0x490   :  { %12403 = vmatprep.mubr.bf16.mxu1 %v21333_v54  ;;  %12201 = vmatprep.subr.bf16.mxu0 %v18021_v7  ;;  %v18079_v7 = vld [vmem:[#allocation11 + $0x2670] ss:$40 sps:$4 sm:$0xff]  }
 0x491   :  { %12373 = vmatprep.subr.bf16.mxu1 %v18024_v61  ;;  %v18090_v61 = vld [vmem:[#allocation11 + $0x8cc] ss:$40 sps:$4 sm:$0xff]  }
 0x492   :  { %12374 = vmatpush1.bf16.msra.mxu1 %v18022_v1  ;;  %v18087_v1 = vld [vmem:[#allocation11 + $0x26c4] ss:$40 sps:$4 sm:$0xff]  }
 0x493   :  { %12202 = vmatpush1.bf16.msra.mxu0 %v18019_v53  ;;  %12375 = vmatprep.subr.bf16.mxu1 %v18030_v11  ;;  %v18088_v53 = vld [vmem:[#allocation11 + $0x8c8] ss:$40 sps:$4 sm:$0xff]  }
 0x494   :  { %12203 = vmatprep.subr.bf16.mxu0 %v18027_v24  ;;  %v18085_v11 = vld [vmem:[#allocation11 + $0x26c0] ss:$40 sps:$4 sm:$0xff]   ;;  %v18096_v24 = vld [vmem:[#allocation11 + $0x91c] ss:$40 sps:$4 sm:$0xff]  }
 0x496   :  { %12376 = vmatpush1.bf16.msra.mxu1 %v18028_v37  ;;  %v18093_v37 = vld [vmem:[#allocation11 + $0x2714] ss:$40 sps:$4 sm:$0xff]  }
 0x497   :  { %12204 = vmatpush1.bf16.msra.mxu0 %v18025_v17  ;;  %12377 = vmatprep.subr.bf16.mxu1 %v18036_v16  ;;  %v18094_v17 = vld [vmem:[#allocation11 + $0x918] ss:$40 sps:$4 sm:$0xff]  }
 0x498   :  { %12205 = vmatprep.subr.bf16.mxu0 %v18033_v22  ;;  %v18091_v16 = vld [vmem:[#allocation11 + $0x2710] ss:$40 sps:$4 sm:$0xff]   ;;  %v18102_v22 = vld [vmem:[#allocation11 + $0x96c] ss:$40 sps:$4 sm:$0xff]  }
 0x49a   :  { %12378 = vmatpush1.bf16.msra.mxu1 %v18034_v21  ;;  %v18099_v21 = vld [vmem:[#allocation11 + $0x2764] ss:$40 sps:$4 sm:$0xff]  }
 0x49b   :  { %12206 = vmatpush1.bf16.msra.mxu0 %v18031_v23  ;;  %12379 = vmatprep.subr.bf16.mxu1 %v18042_v46  ;;  %v18100_v23 = vld [vmem:[#allocation11 + $0x968] ss:$40 sps:$4 sm:$0xff]  }
 0x49c   :  { %12207 = vmatprep.subr.bf16.mxu0 %v18039_v28  ;;  %v18097_v46 = vld [vmem:[#allocation11 + $0x2760] ss:$40 sps:$4 sm:$0xff]   ;;  %v18108_v28 = vld [vmem:[#allocation11 + $0x9bc] ss:$40 sps:$4 sm:$0xff]  }
 0x49e   :  { %12380 = vmatpush1.bf16.msra.mxu1 %v18040_v4  ;;  %v18105_v4 = vld [vmem:[#allocation11 + $0x27b4] ss:$40 sps:$4 sm:$0xff]  }
 0x49f   :  { %12208 = vmatpush1.bf16.msra.mxu0 %v18037_v27  ;;  %12381 = vmatprep.subr.bf16.mxu1 %v18048_v34  ;;  %v18106_v27 = vld [vmem:[#allocation11 + $0x9b8] ss:$40 sps:$4 sm:$0xff]  }
 0x4a0   :  { %12209 = vmatprep.subr.bf16.mxu0 %v18045_v5  ;;  %v18103_v34 = vld [vmem:[#allocation11 + $0x27b0] ss:$40 sps:$4 sm:$0xff]   ;;  %v18114_v5 = vld [vmem:[#allocation11 + $0xa0c] ss:$40 sps:$4 sm:$0xff]  }
 0x4a2   :  { %12382 = vmatpush1.bf16.msra.mxu1 %v18046_v62  ;;  %v18111_v62 = vld [vmem:[#allocation11 + $0x2804] ss:$40 sps:$4 sm:$0xff]  }
 0x4a3   :  { %12210 = vmatpush1.bf16.msra.mxu0 %v18043_v60  ;;  %12383 = vmatprep.subr.bf16.mxu1 %v18054_v48  ;;  %v18112_v60 = vld [vmem:[#allocation11 + $0xa08] ss:$40 sps:$4 sm:$0xff]  }
 0x4a4   :  { %12211 = vmatprep.subr.bf16.mxu0 %v18051_v50  ;;  %v18109_v48 = vld [vmem:[#allocation11 + $0x2800] ss:$40 sps:$4 sm:$0xff]   ;;  %v18117_v50 = vld [vmem:[#allocation11 + $0x2854] ss:$40 sps:$4 sm:$0xff]  }
 0x4a6   :  { %12384 = vmatpush1.bf16.msra.mxu1 %v18052_v51  ;;  %v18120_v51 = vld [vmem:[#allocation11 + $0xa5c] ss:$40 sps:$4 sm:$0xff]  }
 0x4a7   :  { %12212 = vmatpush1.bf16.msra.mxu0 %v18049_v10  ;;  %12385 = vmatprep.subr.bf16.mxu1 %v18060_v41  ;;  %v18118_v10 = vld [vmem:[#allocation11 + $0xa58] ss:$40 sps:$4 sm:$0xff]  }
 0x4a8   :  { %12213 = vmatprep.subr.bf16.mxu0 %v18057_v15  ;;  %v18115_v41 = vld [vmem:[#allocation11 + $0x2850] ss:$40 sps:$4 sm:$0xff]   ;;  %v18126_v15 = vld [vmem:[#allocation11 + $0xaac] ss:$40 sps:$4 sm:$0xff]  }
 0x4aa   :  { %12386 = vmatpush1.bf16.msra.mxu1 %v18058_v47  ;;  %v18123_v47 = vld [vmem:[#allocation11 + $0x28a4] ss:$40 sps:$4 sm:$0xff]  }
 0x4ab   :  { %12214 = vmatpush1.bf16.msra.mxu0 %v18055_v6  ;;  %12387 = vmatprep.subr.bf16.mxu1 %v18066_v12  ;;  %v18124_v6 = vld [vmem:[#allocation11 + $0xaa8] ss:$40 sps:$4 sm:$0xff]  }
 0x4ac   :  { %12215 = vmatprep.subr.bf16.mxu0 %v18063_v29  ;;  %v18121_v12 = vld [vmem:[#allocation11 + $0x28a0] ss:$40 sps:$4 sm:$0xff]   ;;  %v18132_v29 = vld [vmem:[#allocation11 + $0xafc] ss:$40 sps:$4 sm:$0xff]  }
 0x4ae   :  { %12388 = vmatpush1.bf16.msra.mxu1 %v18064_v2  ;;  %v18129_v2 = vld [vmem:[#allocation11 + $0x28f4] ss:$40 sps:$4 sm:$0xff]  }
 0x4af   :  { %12216 = vmatpush1.bf16.msra.mxu0 %v18061_v45  ;;  %12389 = vmatprep.subr.bf16.mxu1 %v18072_v43  ;;  %v18130_v45 = vld [vmem:[#allocation11 + $0xaf8] ss:$40 sps:$4 sm:$0xff]  }
 0x4b0   :  { %12217 = vmatprep.subr.bf16.mxu0 %v18069_v9  ;;  %v18127_v43 = vld [vmem:[#allocation11 + $0x28f0] ss:$40 sps:$4 sm:$0xff]   ;;  %v18138_v9 = vld [vmem:[#allocation11 + $0xb4c] ss:$40 sps:$4 sm:$0xff]  }
 0x4b2   :  { %12390 = vmatpush1.bf16.msra.mxu1 %v18070_v44  ;;  %v18135_v44 = vld [vmem:[#allocation11 + $0x2944] ss:$40 sps:$4 sm:$0xff]  }
 0x4b3   :  { %12218 = vmatpush1.bf16.msra.mxu0 %v18067_v56  ;;  %12391 = vmatprep.subr.bf16.mxu1 %v18078_v36  ;;  %v18136_v56 = vld [vmem:[#allocation11 + $0xb48] ss:$40 sps:$4 sm:$0xff]  }
 0x4b4   :  { %12219 = vmatprep.subr.bf16.mxu0 %v18075_v40  ;;  %v18133_v36 = vld [vmem:[#allocation11 + $0x2940] ss:$40 sps:$4 sm:$0xff]   ;;  %v18144_v40 = vld [vmem:[#allocation11 + $0xb9c] ss:$40 sps:$4 sm:$0xff]  }
 0x4b6   :  { %12392 = vmatpush1.bf16.msra.mxu1 %v18076_v30  ;;  %v18141_v30 = vld [vmem:[#allocation11 + $0x2994] ss:$40 sps:$4 sm:$0xff]  }
 0x4b7   :  { %12220 = vmatpush1.bf16.msra.mxu0 %v18073_v25  ;;  %12393 = vmatprep.subr.bf16.mxu1 %v18084_v63  ;;  %v18142_v25 = vld [vmem:[#allocation11 + $0xb98] ss:$40 sps:$4 sm:$0xff]  }
 0x4b8   :  { %12221 = vmatprep.subr.bf16.mxu0 %v18081_v52  ;;  %v18139_v63 = vld [vmem:[#allocation11 + $0x2990] ss:$40 sps:$4 sm:$0xff]   ;;  %v18150_v52 = vld [vmem:[#allocation11 + $0xbec] ss:$40 sps:$4 sm:$0xff]  }
 0x4ba   :  { %12394 = vmatpush1.bf16.msra.mxu1 %v18082_v42  ;;  %v18147_v42 = vld [vmem:[#allocation11 + $0x29e4] ss:$40 sps:$4 sm:$0xff]  }
 0x4bb   :  { %12222 = vmatpush1.bf16.msra.mxu0 %v18079_v7  ;;  %12395 = vmatprep.subr.bf16.mxu1 %v18090_v61  ;;  %v18148_v7 = vld [vmem:[#allocation11 + $0xbe8] ss:$40 sps:$4 sm:$0xff]  }
 0x4bc   :  { %12223 = vmatprep.subr.bf16.mxu0 %v18087_v1  ;;  %v18145_v61 = vld [vmem:[#allocation11 + $0x29e0] ss:$40 sps:$4 sm:$0xff]   ;;  %v18156_v1 = vld [vmem:[#allocation11 + $0xc3c] ss:$40 sps:$4 sm:$0xff]  }
 0x4be   :  { %12396 = vmatpush1.bf16.msra.mxu1 %v18088_v53  ;;  %v18153_v53 = vld [vmem:[#allocation11 + $0x2a34] ss:$40 sps:$4 sm:$0xff]  }
 0x4bf   :  { %12224 = vmatpush1.bf16.msra.mxu0 %v18085_v11  ;;  %12397 = vmatprep.subr.bf16.mxu1 %v18096_v24  ;;  %v18154_v11 = vld [vmem:[#allocation11 + $0xc38] ss:$40 sps:$4 sm:$0xff]  }
 0x4c0   :  { %12225 = vmatprep.subr.bf16.mxu0 %v18093_v37  ;;  %v18151_v24 = vld [vmem:[#allocation11 + $0x2a30] ss:$40 sps:$4 sm:$0xff]   ;;  %v18162_v37 = vld [vmem:[#allocation11 + $0xc8c] ss:$40 sps:$4 sm:$0xff]  }
 0x4c2   :  { %12398 = vmatpush1.bf16.msra.mxu1 %v18094_v17  ;;  %v18159_v17 = vld [vmem:[#allocation11 + $0x2a84] ss:$40 sps:$4 sm:$0xff]  }
 0x4c3   :  { %12226 = vmatpush1.bf16.msra.mxu0 %v18091_v16  ;;  %12399 = vmatprep.subr.bf16.mxu1 %v18102_v22  ;;  %v18160_v16 = vld [vmem:[#allocation11 + $0xc88] ss:$40 sps:$4 sm:$0xff]  }
 0x4c4   :  { %12227 = vmatprep.subr.bf16.mxu0 %v18099_v21  ;;  %v18157_v22 = vld [vmem:[#allocation11 + $0x2a80] ss:$40 sps:$4 sm:$0xff]   ;;  %v18168_v21 = vld [vmem:[#allocation11 + $0xcdc] ss:$40 sps:$4 sm:$0xff]  }
 0x4c6   :  { %12400 = vmatpush1.bf16.msra.mxu1 %v18100_v23  ;;  %v18165_v23 = vld [vmem:[#allocation11 + $0x2ad4] ss:$40 sps:$4 sm:$0xff]  }
 0x4c7   :  { %12228 = vmatpush1.bf16.msra.mxu0 %v18097_v46  ;;  %12401 = vmatprep.subr.bf16.mxu1 %v18108_v28  ;;  %v18166_v46 = vld [vmem:[#allocation11 + $0xcd8] ss:$40 sps:$4 sm:$0xff]  }
 0x4c8   :  { %12229 = vmatprep.subr.bf16.mxu0 %v18105_v4  ;;  %v18163_v28 = vld [vmem:[#allocation11 + $0x2ad0] ss:$40 sps:$4 sm:$0xff]   ;;  %v18174_v4 = vld [vmem:[#allocation11 + $0xd2c] ss:$40 sps:$4 sm:$0xff]  }
 0x4ca   :  { %12402 = vmatpush1.bf16.msra.mxu1 %v18106_v27  ;;  %v18171_v27 = vld [vmem:[#allocation11 + $0x2b24] ss:$40 sps:$4 sm:$0xff]  }
 0x4cb   :  { %12230 = vmatpush1.bf16.msra.mxu0 %v18103_v34  ;;  %12414 = vmatprep.subr.bf16.mxu1 %v18114_v5  ;;  %v18172_v34 = vld [vmem:[#allocation11 + $0xd28] ss:$40 sps:$4 sm:$0xff]  }
 0x4cc   :  { %12242 = vmatprep.subr.bf16.mxu0 %v18111_v62  ;;  %v18169_v5 = vld [vmem:[#allocation11 + $0x2b20] ss:$40 sps:$4 sm:$0xff]   ;;  %v18180_v62 = vld [vmem:[#allocation11 + $0xd7c] ss:$40 sps:$4 sm:$0xff]  }
 0x4cd   :  { %12404 = vmatmul.mubr.bf16.vlgmr.msra.gmra.mrb[28].mxu1 %v21337_v58 }
 0x4ce   :  { %12232 = vmatmul.mubr.bf16.vlgmr.msra.gmra.mrb[16].mxu0 %v21430_v32  ;;  %12415 = vmatpush1.bf16.msra.mxu1 %v18112_v60  ;;  %v18177_v60 = vld [vmem:[#allocation11 + $0x2b74] ss:$40 sps:$4 sm:$0xff]  }
 0x4cf   :  { %12243 = vmatpush1.bf16.msra.mxu0 %v18109_v48  ;;  %12274 = vmatprep.mubr.bf16.mxu0 %v21443_v49  ;;  %v18178_v48 = vld [vmem:[#allocation11 + $0xd78] ss:$40 sps:$4 sm:$0xff]  }
 0x4d0   :  { %12446 = vmatprep.mubr.bf16.mxu1 %v21377_v55  ;;  %12244 = vmatprep.subr.bf16.mxu0 %v18117_v50  ;;  %v18175_v50 = vld [vmem:[#allocation11 + $0x2b70] ss:$40 sps:$4 sm:$0xff]  }
 0x4d1   :  { %12416 = vmatprep.subr.bf16.mxu1 %v18120_v51  ;;  %v18186_v51 = vld [vmem:[#allocation11 + $0xdcc] ss:$40 sps:$4 sm:$0xff]  }
 0x4d2   :  { %12417 = vmatpush1.bf16.msra.mxu1 %v18118_v10  ;;  %v18183_v10 = vld [vmem:[#allocation11 + $0x2bc4] ss:$40 sps:$4 sm:$0xff]  }
 0x4d3   :  { %12245 = vmatpush1.bf16.msra.mxu0 %v18115_v41  ;;  %12418 = vmatprep.subr.bf16.mxu1 %v18126_v15  ;;  %v18184_v41 = vld [vmem:[#allocation11 + $0xdc8] ss:$40 sps:$4 sm:$0xff]  }
 0x4d4   :  { %12246 = vmatprep.subr.bf16.mxu0 %v18123_v47  ;;  %v18181_v15 = vld [vmem:[#allocation11 + $0x2bc0] ss:$40 sps:$4 sm:$0xff]   ;;  %v18192_v47 = vld [vmem:[#allocation11 + $0xe1c] ss:$40 sps:$4 sm:$0xff]  }
 0x4d6   :  { %12419 = vmatpush1.bf16.msra.mxu1 %v18124_v6  ;;  %v18189_v6 = vld [vmem:[#allocation11 + $0x2c14] ss:$40 sps:$4 sm:$0xff]  }
 0x4d7   :  { %12247 = vmatpush1.bf16.msra.mxu0 %v18121_v12  ;;  %12420 = vmatprep.subr.bf16.mxu1 %v18132_v29  ;;  %v18190_v12 = vld [vmem:[#allocation11 + $0xe18] ss:$40 sps:$4 sm:$0xff]  }
 0x4d8   :  { %12248 = vmatprep.subr.bf16.mxu0 %v18129_v2  ;;  %v18187_v29 = vld [vmem:[#allocation11 + $0x2c10] ss:$40 sps:$4 sm:$0xff]   ;;  %v18198_v2 = vld [vmem:[#allocation11 + $0xe6c] ss:$40 sps:$4 sm:$0xff]  }
 0x4da   :  { %12421 = vmatpush1.bf16.msra.mxu1 %v18130_v45  ;;  %v18195_v45 = vld [vmem:[#allocation11 + $0x2c64] ss:$40 sps:$4 sm:$0xff]  }
 0x4db   :  { %12249 = vmatpush1.bf16.msra.mxu0 %v18127_v43  ;;  %12422 = vmatprep.subr.bf16.mxu1 %v18138_v9  ;;  %v18196_v43 = vld [vmem:[#allocation11 + $0xe68] ss:$40 sps:$4 sm:$0xff]  }
 0x4dc   :  { %12250 = vmatprep.subr.bf16.mxu0 %v18135_v44  ;;  %v18193_v9 = vld [vmem:[#allocation11 + $0x2c60] ss:$40 sps:$4 sm:$0xff]   ;;  %v18204_v44 = vld [vmem:[#allocation11 + $0xebc] ss:$40 sps:$4 sm:$0xff]  }
 0x4de   :  { %12423 = vmatpush1.bf16.msra.mxu1 %v18136_v56  ;;  %v18201_v56 = vld [vmem:[#allocation11 + $0x2cb4] ss:$40 sps:$4 sm:$0xff]  }
 0x4df   :  { %12251 = vmatpush1.bf16.msra.mxu0 %v18133_v36  ;;  %12424 = vmatprep.subr.bf16.mxu1 %v18144_v40  ;;  %v18202_v36 = vld [vmem:[#allocation11 + $0xeb8] ss:$40 sps:$4 sm:$0xff]  }
 0x4e0   :  { %12252 = vmatprep.subr.bf16.mxu0 %v18141_v30  ;;  %v18199_v40 = vld [vmem:[#allocation11 + $0x2cb0] ss:$40 sps:$4 sm:$0xff]   ;;  %v18210_v30 = vld [vmem:[#allocation11 + $0xf0c] ss:$40 sps:$4 sm:$0xff]  }
 0x4e2   :  { %12425 = vmatpush1.bf16.msra.mxu1 %v18142_v25  ;;  %v18207_v25 = vld [vmem:[#allocation11 + $0x2d04] ss:$40 sps:$4 sm:$0xff]  }
 0x4e3   :  { %12253 = vmatpush1.bf16.msra.mxu0 %v18139_v63  ;;  %12426 = vmatprep.subr.bf16.mxu1 %v18150_v52  ;;  %v18208_v63 = vld [vmem:[#allocation11 + $0xf08] ss:$40 sps:$4 sm:$0xff]  }
 0x4e4   :  { %12254 = vmatprep.subr.bf16.mxu0 %v18147_v42  ;;  %v18205_v52 = vld [vmem:[#allocation11 + $0x2d00] ss:$40 sps:$4 sm:$0xff]   ;;  %v18213_v42 = vld [vmem:[#allocation11 + $0x2d54] ss:$40 sps:$4 sm:$0xff]  }
 0x4e6   :  { %12427 = vmatpush1.bf16.msra.mxu1 %v18148_v7  ;;  %v18216_v7 = vld [vmem:[#allocation11 + $0xf5c] ss:$40 sps:$4 sm:$0xff]  }
 0x4e7   :  { %12255 = vmatpush1.bf16.msra.mxu0 %v18145_v61  ;;  %12428 = vmatprep.subr.bf16.mxu1 %v18156_v1  ;;  %v18214_v61 = vld [vmem:[#allocation11 + $0xf58] ss:$40 sps:$4 sm:$0xff]  }
 0x4e8   :  { %12256 = vmatprep.subr.bf16.mxu0 %v18153_v53  ;;  %v18211_v1 = vld [vmem:[#allocation11 + $0x2d50] ss:$40 sps:$4 sm:$0xff]   ;;  %v18222_v53 = vld [vmem:[#allocation11 + $0xfac] ss:$40 sps:$4 sm:$0xff]  }
 0x4ea   :  { %12429 = vmatpush1.bf16.msra.mxu1 %v18154_v11  ;;  %v18219_v11 = vld [vmem:[#allocation11 + $0x2da4] ss:$40 sps:$4 sm:$0xff]  }
 0x4eb   :  { %12257 = vmatpush1.bf16.msra.mxu0 %v18151_v24  ;;  %12430 = vmatprep.subr.bf16.mxu1 %v18162_v37  ;;  %v18220_v24 = vld [vmem:[#allocation11 + $0xfa8] ss:$40 sps:$4 sm:$0xff]  }
 0x4ec   :  { %12258 = vmatprep.subr.bf16.mxu0 %v18159_v17  ;;  %v18217_v37 = vld [vmem:[#allocation11 + $0x2da0] ss:$40 sps:$4 sm:$0xff]   ;;  %v18228_v17 = vld [vmem:[#allocation11 + $0xffc] ss:$40 sps:$4 sm:$0xff]  }
 0x4ee   :  { %12431 = vmatpush1.bf16.msra.mxu1 %v18160_v16  ;;  %v18225_v16 = vld [vmem:[#allocation11 + $0x2df4] ss:$40 sps:$4 sm:$0xff]  }
 0x4ef   :  { %12259 = vmatpush1.bf16.msra.mxu0 %v18157_v22  ;;  %12432 = vmatprep.subr.bf16.mxu1 %v18168_v21  ;;  %v18226_v22 = vld [vmem:[#allocation11 + $0xff8] ss:$40 sps:$4 sm:$0xff]  }
 0x4f0   :  { %12260 = vmatprep.subr.bf16.mxu0 %v18165_v23  ;;  %v18223_v21 = vld [vmem:[#allocation11 + $0x2df0] ss:$40 sps:$4 sm:$0xff]   ;;  %v18234_v23 = vld [vmem:[#allocation11 + $0x104c] ss:$40 sps:$4 sm:$0xff]  }
 0x4f2   :  { %12433 = vmatpush1.bf16.msra.mxu1 %v18166_v46  ;;  %v18231_v46 = vld [vmem:[#allocation11 + $0x2e44] ss:$40 sps:$4 sm:$0xff]  }
 0x4f3   :  { %12261 = vmatpush1.bf16.msra.mxu0 %v18163_v28  ;;  %12434 = vmatprep.subr.bf16.mxu1 %v18174_v4  ;;  %v18232_v28 = vld [vmem:[#allocation11 + $0x1048] ss:$40 sps:$4 sm:$0xff]  }
 0x4f4   :  { %12262 = vmatprep.subr.bf16.mxu0 %v18171_v27  ;;  %v18229_v4 = vld [vmem:[#allocation11 + $0x2e40] ss:$40 sps:$4 sm:$0xff]   ;;  %v18240_v27 = vld [vmem:[#allocation11 + $0x109c] ss:$40 sps:$4 sm:$0xff]  }
 0x4f6   :  { %12435 = vmatpush1.bf16.msra.mxu1 %v18172_v34  ;;  %v18237_v34 = vld [vmem:[#allocation11 + $0x2e94] ss:$40 sps:$4 sm:$0xff]  }
 0x4f7   :  { %12263 = vmatpush1.bf16.msra.mxu0 %v18169_v5  ;;  %12436 = vmatprep.subr.bf16.mxu1 %v18180_v62  ;;  %v18238_v5 = vld [vmem:[#allocation11 + $0x1098] ss:$40 sps:$4 sm:$0xff]  }
 0x4f8   :  { %12264 = vmatprep.subr.bf16.mxu0 %v18177_v60  ;;  %v18235_v62 = vld [vmem:[#allocation11 + $0x2e90] ss:$40 sps:$4 sm:$0xff]   ;;  %v18246_v60 = vld [vmem:[#allocation11 + $0x10ec] ss:$40 sps:$4 sm:$0xff]  }
 0x4fa   :  { %12437 = vmatpush1.bf16.msra.mxu1 %v18178_v48 }
 0x4fb   :  { %12265 = vmatpush1.bf16.msra.mxu0 %v18175_v50  ;;  %12438 = vmatprep.subr.bf16.mxu1 %v18186_v51  ;;  %v18243_v50 = vld [vmem:[#allocation11 + $0x2ee4] ss:$40 sps:$4 sm:$0xff]  }
 0x4fc   :  { %12266 = vmatprep.subr.bf16.mxu0 %v18183_v10 }
 0x4fe   :  { %12439 = vmatpush1.bf16.msra.mxu1 %v18184_v41  ;;  %v18244_v41 = vld [vmem:[#allocation11 + $0x10e8] ss:$40 sps:$4 sm:$0xff]  }
 0x4ff   :  { %12267 = vmatpush1.bf16.msra.mxu0 %v18181_v15  ;;  %12440 = vmatprep.subr.bf16.mxu1 %v18192_v47  ;;  %v18241_v47 = vld [vmem:[#allocation11 + $0x2ee0] ss:$40 sps:$4 sm:$0xff]  }
 0x500   :  { %12268 = vmatprep.subr.bf16.mxu0 %v18189_v6  ;;  %v18252_v6 = vld [vmem:[#allocation11 + $0x113c] ss:$40 sps:$4 sm:$0xff]  }
 0x502   :  { %12441 = vmatpush1.bf16.msra.mxu1 %v18190_v12  ;;  %v18249_v12 = vld [vmem:[#allocation11 + $0x2f34] ss:$40 sps:$4 sm:$0xff]  }
 0x503   :  { %12269 = vmatpush1.bf16.msra.mxu0 %v18187_v29  ;;  %12442 = vmatprep.subr.bf16.mxu1 %v18198_v2  ;;  %v18250_v29 = vld [vmem:[#allocation11 + $0x1138] ss:$40 sps:$4 sm:$0xff]  }
 0x504   :  { %12270 = vmatprep.subr.bf16.mxu0 %v18195_v45  ;;  %v18247_v2 = vld [vmem:[#allocation11 + $0x2f30] ss:$40 sps:$4 sm:$0xff]   ;;  %v18258_v45 = vld [vmem:[#allocation11 + $0x118c] ss:$40 sps:$4 sm:$0xff]  }
 0x506   :  { %12443 = vmatpush1.bf16.msra.mxu1 %v18196_v43  ;;  %v18255_v43 = vld [vmem:[#allocation11 + $0x2f84] ss:$40 sps:$4 sm:$0xff]  }
 0x507   :  { %12271 = vmatpush1.bf16.msra.mxu0 %v18193_v9  ;;  %12444 = vmatprep.subr.bf16.mxu1 %v18204_v44  ;;  %v18256_v9 = vld [vmem:[#allocation11 + $0x1188] ss:$40 sps:$4 sm:$0xff]  }
 0x508   :  { %12272 = vmatprep.subr.bf16.mxu0 %v18201_v56  ;;  %v18253_v44 = vld [vmem:[#allocation11 + $0x2f80] ss:$40 sps:$4 sm:$0xff]   ;;  %v18264_v56 = vld [vmem:[#allocation11 + $0x11dc] ss:$40 sps:$4 sm:$0xff]  }
 0x50a   :  { %12445 = vmatpush1.bf16.msra.mxu1 %v18202_v36  ;;  %v18261_v36 = vld [vmem:[#allocation11 + $0x2fd4] ss:$40 sps:$4 sm:$0xff]  }
 0x50b   :  { %12273 = vmatpush1.bf16.msra.mxu0 %v18199_v40  ;;  %12457 = vmatprep.subr.bf16.mxu1 %v18210_v30  ;;  %v18262_v40 = vld [vmem:[#allocation11 + $0x11d8] ss:$40 sps:$4 sm:$0xff]  }
 0x50c   :  { %12285 = vmatprep.subr.bf16.mxu0 %v18207_v25  ;;  %v18259_v30 = vld [vmem:[#allocation11 + $0x2fd0] ss:$40 sps:$4 sm:$0xff]   ;;  %v18270_v25 = vld [vmem:[#allocation11 + $0x122c] ss:$40 sps:$4 sm:$0xff]  }
 0x50d   :  { %12447 = vmatmul.mubr.bf16.vlgmr.msra.gmra.mrb[28].mxu1 %v21383_v59 }
 0x50e   :  { %12275 = vmatmul.mubr.bf16.vlgmr.msra.gmra.mrb[16].mxu0 %v21450_v18  ;;  %12458 = vmatpush1.bf16.msra.mxu1 %v18208_v63  ;;  %v18267_v63 = vld [vmem:[#allocation11 + $0x3024] ss:$40 sps:$4 sm:$0xff]  }
 0x50f   :  { %12286 = vmatpush1.bf16.msra.mxu0 %v18205_v52  ;;  %12317 = vmatprep.mubr.bf16.mxu0 %v21453_v13  ;;  %v18268_v52 = vld [vmem:[#allocation11 + $0x1228] ss:$40 sps:$4 sm:$0xff]  }
 0x510   :  { %12489 = vmatprep.mubr.bf16.mxu1 %v21327_v0  ;;  %12287 = vmatprep.subr.bf16.mxu0 %v18213_v42  ;;  %v18265_v42 = vld [vmem:[#allocation11 + $0x3020] ss:$40 sps:$4 sm:$0xff]  }
 0x511   :  { %12459 = vmatprep.subr.bf16.mxu1 %v18216_v7  ;;  %v18276_v7 = vld [vmem:[#allocation11 + $0x127c] ss:$40 sps:$4 sm:$0xff]  }
 0x512   :  { %12460 = vmatpush1.bf16.msra.mxu1 %v18214_v61  ;;  %v18273_v61 = vld [vmem:[#allocation11 + $0x3074] ss:$40 sps:$4 sm:$0xff]  }
 0x513   :  { %12288 = vmatpush1.bf16.msra.mxu0 %v18211_v1  ;;  %12461 = vmatprep.subr.bf16.mxu1 %v18222_v53  ;;  %v18274_v1 = vld [vmem:[#allocation11 + $0x1278] ss:$40 sps:$4 sm:$0xff]  }
 0x514   :  { %12289 = vmatprep.subr.bf16.mxu0 %v18219_v11  ;;  %v18271_v53 = vld [vmem:[#allocation11 + $0x3070] ss:$40 sps:$4 sm:$0xff]   ;;  %v18282_v11 = vld [vmem:[#allocation11 + $0x12cc] ss:$40 sps:$4 sm:$0xff]  }
 0x516   :  { %12462 = vmatpush1.bf16.msra.mxu1 %v18220_v24  ;;  %v18279_v24 = vld [vmem:[#allocation11 + $0x30c4] ss:$40 sps:$4 sm:$0xff]  }
 0x517   :  { %12290 = vmatpush1.bf16.msra.mxu0 %v18217_v37  ;;  %12463 = vmatprep.subr.bf16.mxu1 %v18228_v17  ;;  %v18280_v37 = vld [vmem:[#allocation11 + $0x12c8] ss:$40 sps:$4 sm:$0xff]  }
 0x518   :  { %12291 = vmatprep.subr.bf16.mxu0 %v18225_v16  ;;  %v18277_v17 = vld [vmem:[#allocation11 + $0x30c0] ss:$40 sps:$4 sm:$0xff]   ;;  %v18288_v16 = vld [vmem:[#allocation11 + $0x131c] ss:$40 sps:$4 sm:$0xff]  }
 0x51a   :  { %12464 = vmatpush1.bf16.msra.mxu1 %v18226_v22  ;;  %v18285_v22 = vld [vmem:[#allocation11 + $0x3114] ss:$40 sps:$4 sm:$0xff]  }
 0x51b   :  { %12292 = vmatpush1.bf16.msra.mxu0 %v18223_v21  ;;  %12465 = vmatprep.subr.bf16.mxu1 %v18234_v23  ;;  %v18286_v21 = vld [vmem:[#allocation11 + $0x1318] ss:$40 sps:$4 sm:$0xff]  }
 0x51c   :  { %12293 = vmatprep.subr.bf16.mxu0 %v18231_v46  ;;  %v18283_v23 = vld [vmem:[#allocation11 + $0x3110] ss:$40 sps:$4 sm:$0xff]   ;;  %v18294_v46 = vld [vmem:[#allocation11 + $0x136c] ss:$40 sps:$4 sm:$0xff]  }
 0x51e   :  { %12466 = vmatpush1.bf16.msra.mxu1 %v18232_v28  ;;  %v18291_v28 = vld [vmem:[#allocation11 + $0x3164] ss:$40 sps:$4 sm:$0xff]  }
 0x51f   :  { %12294 = vmatpush1.bf16.msra.mxu0 %v18229_v4  ;;  %12467 = vmatprep.subr.bf16.mxu1 %v18240_v27  ;;  %v18292_v4 = vld [vmem:[#allocation11 + $0x1368] ss:$40 sps:$4 sm:$0xff]  }
 0x520   :  { %v21477_v48 = vpop.f32.mrb[24].mxu1  ;;  %12295 = vmatprep.subr.bf16.mxu0 %v18237_v34  ;;  %v18289_v27 = vld [vmem:[#allocation11 + $0x3160] ss:$40 sps:$4 sm:$0xff]   ;;  %v18300_v34 = vld [vmem:[#allocation11 + $0x13bc] ss:$40 sps:$4 sm:$0xff]  }
 0x521   :  { %v21479_v51 = vpop.f32.mrb[25].mxu1 }
 0x522   :  { %v21481_v10 = vpop.f32.mrb[26].mxu1  ;;  %12468 = vmatpush1.bf16.msra.mxu1 %v18238_v5  ;;  %v18297_v5 = vld [vmem:[#allocation11 + $0x31b4] ss:$40 sps:$4 sm:$0xff]  }
 0x523   :  { %12296 = vmatpush1.bf16.msra.mxu0 %v18235_v62  ;;  %v21483_v15 = vpop.f32.mrb[27].mxu1  ;;  %12469 = vmatprep.subr.bf16.mxu1 %v18246_v60  ;;  %v18298_v62 = vld [vmem:[#allocation11 + $0x13b8] ss:$40 sps:$4 sm:$0xff]  }
 0x524   :  { %12297 = vmatprep.subr.bf16.mxu0 %v18243_v50  ;;  %v18295_v60 = vld [vmem:[#allocation11 + $0x31b0] ss:$40 sps:$4 sm:$0xff]   ;;  %v18303_v50 = vld [vmem:[#allocation11 + $0x140c] ss:$40 sps:$4 sm:$0xff]  }
 0x526   :  { %12470 = vmatpush1.bf16.msra.mxu1 %v18244_v41  ;;  %v18306_v41 = vld [vmem:[#allocation11 + $0x14] ss:$40 sps:$4 sm:$0xff]  }
 0x527   :  { %12298 = vmatpush1.bf16.msra.mxu0 %v18241_v47  ;;  %12471 = vmatprep.subr.bf16.mxu1 %v18252_v6  ;;  %v18301_v47 = vld [vmem:[#allocation11 + $0x1408] ss:$40 sps:$4 sm:$0xff]  }
 0x528   :  { %12299 = vmatprep.subr.bf16.mxu0 %v18249_v12  ;;  %v18304_v6 = vld [vmem:[#allocation11 + $0x10] ss:$40 sps:$4 sm:$0xff]   ;;  %v18309_v12 = vld [vmem:[#allocation11 + $0x145c] ss:$40 sps:$4 sm:$0xff]  }
 0x52a   :  { %12472 = vmatpush1.bf16.msra.mxu1 %v18250_v29  ;;  %v18312_v29 = vld [vmem:[#allocation11 + $0x64] ss:$40 sps:$4 sm:$0xff]  }
 0x52b   :  { %12300 = vmatpush1.bf16.msra.mxu0 %v18247_v2  ;;  %12473 = vmatprep.subr.bf16.mxu1 %v18258_v45  ;;  %v18307_v2 = vld [vmem:[#allocation11 + $0x1458] ss:$40 sps:$4 sm:$0xff]  }
 0x52c   :  { %12301 = vmatprep.subr.bf16.mxu0 %v18255_v43  ;;  %v18310_v45 = vld [vmem:[#allocation11 + $0x60] ss:$40 sps:$4 sm:$0xff]   ;;  %v18315_v43 = vld [vmem:[#allocation11 + $0x14ac] ss:$40 sps:$4 sm:$0xff]  }
 0x52e   :  { %12474 = vmatpush1.bf16.msra.mxu1 %v18256_v9  ;;  %v18318_v9 = vld [vmem:[#allocation11 + $0xb4] ss:$40 sps:$4 sm:$0xff]  }
 0x52f   :  { %12302 = vmatpush1.bf16.msra.mxu0 %v18253_v44  ;;  %12475 = vmatprep.subr.bf16.mxu1 %v18264_v56  ;;  %v18313_v44 = vld [vmem:[#allocation11 + $0x14a8] ss:$40 sps:$4 sm:$0xff]  }
 0x530   :  { %12303 = vmatprep.subr.bf16.mxu0 %v18261_v36  ;;  %v18316_v56 = vld [vmem:[#allocation11 + $0xb0] ss:$40 sps:$4 sm:$0xff]   ;;  %v18321_v36 = vld [vmem:[#allocation11 + $0x14fc] ss:$40 sps:$4 sm:$0xff]  }
 0x532   :  { %12476 = vmatpush1.bf16.msra.mxu1 %v18262_v40  ;;  %v18324_v40 = vld [vmem:[#allocation11 + $0x104] ss:$40 sps:$4 sm:$0xff]  }
 0x533   :  { %12304 = vmatpush1.bf16.msra.mxu0 %v18259_v30  ;;  %12477 = vmatprep.subr.bf16.mxu1 %v18270_v25  ;;  %v18319_v30 = vld [vmem:[#allocation11 + $0x14f8] ss:$40 sps:$4 sm:$0xff]  }
 0x534   :  { %12305 = vmatprep.subr.bf16.mxu0 %v18267_v63  ;;  %v18322_v25 = vld [vmem:[#allocation11 + $0x100] ss:$40 sps:$4 sm:$0xff]   ;;  %v18327_v63 = vld [vmem:[#allocation11 + $0x154c] ss:$40 sps:$4 sm:$0xff]  }
 0x536   :  { %12478 = vmatpush1.bf16.msra.mxu1 %v18268_v52  ;;  %v18330_v52 = vld [vmem:[#allocation11 + $0x154] ss:$40 sps:$4 sm:$0xff]  }
 0x537   :  { %12306 = vmatpush1.bf16.msra.mxu0 %v18265_v42  ;;  %12479 = vmatprep.subr.bf16.mxu1 %v18276_v7  ;;  %v18325_v42 = vld [vmem:[#allocation11 + $0x1548] ss:$40 sps:$4 sm:$0xff]  }
 0x538   :  { %12307 = vmatprep.subr.bf16.mxu0 %v18273_v61  ;;  %v18328_v7 = vld [vmem:[#allocation11 + $0x150] ss:$40 sps:$4 sm:$0xff]   ;;  %v18333_v61 = vld [vmem:[#allocation11 + $0x159c] ss:$40 sps:$4 sm:$0xff]  }
 0x53a   :  { %12480 = vmatpush1.bf16.msra.mxu1 %v18274_v1  ;;  %v18336_v1 = vld [vmem:[#allocation11 + $0x1a4] ss:$40 sps:$4 sm:$0xff]  }
 0x53b   :  { %12308 = vmatpush1.bf16.msra.mxu0 %v18271_v53  ;;  %12481 = vmatprep.subr.bf16.mxu1 %v18282_v11  ;;  %v18331_v53 = vld [vmem:[#allocation11 + $0x1598] ss:$40 sps:$4 sm:$0xff]  }
 0x53c   :  { %12309 = vmatprep.subr.bf16.mxu0 %v18279_v24  ;;  %v18334_v11 = vld [vmem:[#allocation11 + $0x1a0] ss:$40 sps:$4 sm:$0xff]   ;;  %v18339_v24 = vld [vmem:[#allocation11 + $0x15ec] ss:$40 sps:$4 sm:$0xff]  }
 0x53e   :  { %12482 = vmatpush1.bf16.msra.mxu1 %v18280_v37  ;;  %v18342_v37 = vld [vmem:[#allocation11 + $0x1f4] ss:$40 sps:$4 sm:$0xff]  }
 0x53f   :  { %12310 = vmatpush1.bf16.msra.mxu0 %v18277_v17  ;;  %12483 = vmatprep.subr.bf16.mxu1 %v18288_v16  ;;  %v18337_v17 = vld [vmem:[#allocation11 + $0x15e8] ss:$40 sps:$4 sm:$0xff]  }
 0x540   :  { %12311 = vmatprep.subr.bf16.mxu0 %v18285_v22  ;;  %v18340_v16 = vld [vmem:[#allocation11 + $0x1f0] ss:$40 sps:$4 sm:$0xff]   ;;  %v18345_v22 = vld [vmem:[#allocation11 + $0x163c] ss:$40 sps:$4 sm:$0xff]  }
 0x542   :  { %12484 = vmatpush1.bf16.msra.mxu1 %v18286_v21  ;;  %v18348_v21 = vld [vmem:[#allocation11 + $0x244] ss:$40 sps:$4 sm:$0xff]  }
 0x543   :  { %12312 = vmatpush1.bf16.msra.mxu0 %v18283_v23  ;;  %12485 = vmatprep.subr.bf16.mxu1 %v18294_v46  ;;  %v18343_v23 = vld [vmem:[#allocation11 + $0x1638] ss:$40 sps:$4 sm:$0xff]  }
 0x544   :  { %12313 = vmatprep.subr.bf16.mxu0 %v18291_v28  ;;  %v18346_v46 = vld [vmem:[#allocation11 + $0x240] ss:$40 sps:$4 sm:$0xff]   ;;  %v18351_v28 = vld [vmem:[#allocation11 + $0x168c] ss:$40 sps:$4 sm:$0xff]  }
 0x546   :  { %12486 = vmatpush1.bf16.msra.mxu1 %v18292_v4  ;;  %v18354_v4 = vld [vmem:[#allocation11 + $0x294] ss:$40 sps:$4 sm:$0xff]  }
 0x547   :  { %12314 = vmatpush1.bf16.msra.mxu0 %v18289_v27  ;;  %12487 = vmatprep.subr.bf16.mxu1 %v18300_v34  ;;  %v18349_v27 = vld [vmem:[#allocation11 + $0x1688] ss:$40 sps:$4 sm:$0xff]  }
 0x548   :  { %12315 = vmatprep.subr.bf16.mxu0 %v18297_v5  ;;  %v18352_v34 = vld [vmem:[#allocation11 + $0x290] ss:$40 sps:$4 sm:$0xff]   ;;  %v18357_v5 = vld [vmem:[#allocation11 + $0x16dc] ss:$40 sps:$4 sm:$0xff]  }
 0x54a   :  { %12488 = vmatpush1.bf16.msra.mxu1 %v18298_v62  ;;  %v18360_v62 = vld [vmem:[#allocation11 + $0x2e4] ss:$40 sps:$4 sm:$0xff]  }
 0x54b   :  { %12316 = vmatpush1.bf16.msra.mxu0 %v18295_v60  ;;  %12500 = vmatprep.subr.bf16.mxu1 %v18303_v50  ;;  %v18355_v60 = vld [vmem:[#allocation11 + $0x16d8] ss:$40 sps:$4 sm:$0xff]  }
 0x54c   :  { %12758 = vmatprep.subr.bf16.mxu0 %v18306_v41  ;;  %v18358_v50 = vld [vmem:[#allocation11 + $0x2e0] ss:$40 sps:$4 sm:$0xff]   ;;  %v18363_v41 = vld [vmem:[#allocation11 + $0x172c] ss:$40 sps:$4 sm:$0xff]  }
 0x54d   :  { %12490 = vmatmul.mubr.bf16.vlgmr.msra.gmra.mrb[28].mxu1 %v21331_v57 }
 0x54e   :  { %12318 = vmatmul.mubr.bf16.vlgmr.msra.gmra.mrb[16].mxu0 %v21455_v35  ;;  %12501 = vmatpush1.bf16.msra.mxu1 %v18301_v47  ;;  %v18366_v47 = vld [vmem:[#allocation11 + $0x334] ss:$40 sps:$4 sm:$0xff]  }
 0x54f   :  { %12532 = vmatprep.mubr.bf16.mxu1 %v21335_v14  ;;  %12759 = vmatpush1.bf16.msra.mxu0 %v18304_v6  ;;  %v18361_v6 = vld [vmem:[#allocation11 + $0x1728] ss:$40 sps:$4 sm:$0xff]  }
 0x550   :  { %12790 = vmatprep.mubr.bf16.mxu0 %v21325_v8  ;;  %12502 = vmatprep.subr.bf16.mxu1 %v18309_v12  ;;  %v18364_v12 = vld [vmem:[#allocation11 + $0x330] ss:$40 sps:$4 sm:$0xff]  }
 0x551   :  { %12760 = vmatprep.subr.bf16.mxu0 %v18312_v29  ;;  %v18369_v29 = vld [vmem:[#allocation11 + $0x177c] ss:$40 sps:$4 sm:$0xff]  }
 0x552   :  { %12503 = vmatpush1.bf16.msra.mxu1 %v18307_v2  ;;  %v18372_v2 = vld [vmem:[#allocation11 + $0x384] ss:$40 sps:$4 sm:$0xff]  }
 0x553   :  { %12761 = vmatpush1.bf16.msra.mxu0 %v18310_v45  ;;  %12504 = vmatprep.subr.bf16.mxu1 %v18315_v43  ;;  %v18367_v45 = vld [vmem:[#allocation11 + $0x1778] ss:$40 sps:$4 sm:$0xff]  }
 0x554   :  { %12762 = vmatprep.subr.bf16.mxu0 %v18318_v9  ;;  %v18370_v43 = vld [vmem:[#allocation11 + $0x380] ss:$40 sps:$4 sm:$0xff]   ;;  %v18375_v9 = vld [vmem:[#allocation11 + $0x17cc] ss:$40 sps:$4 sm:$0xff]  }
 0x556   :  { %12505 = vmatpush1.bf16.msra.mxu1 %v18313_v44  ;;  %v18378_v44 = vld [vmem:[#allocation11 + $0x3d4] ss:$40 sps:$4 sm:$0xff]  }
 0x557   :  { %12763 = vmatpush1.bf16.msra.mxu0 %v18316_v56  ;;  %12506 = vmatprep.subr.bf16.mxu1 %v18321_v36  ;;  %v18373_v56 = vld [vmem:[#allocation11 + $0x17c8] ss:$40 sps:$4 sm:$0xff]  }
 0x558   :  { %12764 = vmatprep.subr.bf16.mxu0 %v18324_v40  ;;  %v18376_v36 = vld [vmem:[#allocation11 + $0x3d0] ss:$40 sps:$4 sm:$0xff]   ;;  %v18381_v40 = vld [vmem:[#allocation11 + $0x181c] ss:$40 sps:$4 sm:$0xff]  }
 0x55a   :  { %12507 = vmatpush1.bf16.msra.mxu1 %v18319_v30  ;;  %v18384_v30 = vld [vmem:[#allocation11 + $0x424] ss:$40 sps:$4 sm:$0xff]  }
 0x55b   :  { %12765 = vmatpush1.bf16.msra.mxu0 %v18322_v25  ;;  %12508 = vmatprep.subr.bf16.mxu1 %v18327_v63  ;;  %v18379_v25 = vld [vmem:[#allocation11 + $0x1818] ss:$40 sps:$4 sm:$0xff]  }
 0x55c   :  { %12766 = vmatprep.subr.bf16.mxu0 %v18330_v52  ;;  %v18382_v63 = vld [vmem:[#allocation11 + $0x420] ss:$40 sps:$4 sm:$0xff]   ;;  %v18387_v52 = vld [vmem:[#allocation11 + $0x186c] ss:$40 sps:$4 sm:$0xff]  }
 0x55e   :  { %12509 = vmatpush1.bf16.msra.mxu1 %v18325_v42  ;;  %v18390_v42 = vld [vmem:[#allocation11 + $0x474] ss:$40 sps:$4 sm:$0xff]  }
 0x55f   :  { %12767 = vmatpush1.bf16.msra.mxu0 %v18328_v7  ;;  %12510 = vmatprep.subr.bf16.mxu1 %v18333_v61  ;;  %v18385_v7 = vld [vmem:[#allocation11 + $0x1868] ss:$40 sps:$4 sm:$0xff]  }
 0x560   :  { %12768 = vmatprep.subr.bf16.mxu0 %v18336_v1  ;;  %v18388_v61 = vld [vmem:[#allocation11 + $0x470] ss:$40 sps:$4 sm:$0xff]   ;;  %v18393_v1 = vld [vmem:[#allocation11 + $0x18bc] ss:$40 sps:$4 sm:$0xff]  }
 0x562   :  { %12511 = vmatpush1.bf16.msra.mxu1 %v18331_v53  ;;  %v18396_v53 = vld [vmem:[#allocation11 + $0x4c4] ss:$40 sps:$4 sm:$0xff]  }
 0x563   :  { %12769 = vmatpush1.bf16.msra.mxu0 %v18334_v11  ;;  %12512 = vmatprep.subr.bf16.mxu1 %v18339_v24  ;;  %v18391_v11 = vld [vmem:[#allocation11 + $0x18b8] ss:$40 sps:$4 sm:$0xff]  }
 0x564   :  { %12770 = vmatprep.subr.bf16.mxu0 %v18342_v37  ;;  %v18394_v24 = vld [vmem:[#allocation11 + $0x4c0] ss:$40 sps:$4 sm:$0xff]   ;;  %v18399_v37 = vld [vmem:[#allocation11 + $0x190c] ss:$40 sps:$4 sm:$0xff]  }
 0x566   :  { %12513 = vmatpush1.bf16.msra.mxu1 %v18337_v17  ;;  %v18402_v17 = vld [vmem:[#allocation11 + $0x514] ss:$40 sps:$4 sm:$0xff]  }
 0x567   :  { %12771 = vmatpush1.bf16.msra.mxu0 %v18340_v16  ;;  %12514 = vmatprep.subr.bf16.mxu1 %v18345_v22  ;;  %v18397_v16 = vld [vmem:[#allocation11 + $0x1908] ss:$40 sps:$4 sm:$0xff]  }
 0x568   :  { %12772 = vmatprep.subr.bf16.mxu0 %v18348_v21  ;;  %v18400_v22 = vld [vmem:[#allocation11 + $0x510] ss:$40 sps:$4 sm:$0xff]   ;;  %v18405_v21 = vld [vmem:[#allocation11 + $0x195c] ss:$40 sps:$4 sm:$0xff]  }
 0x56a   :  { %12515 = vmatpush1.bf16.msra.mxu1 %v18343_v23  ;;  %v18408_v23 = vld [vmem:[#allocation11 + $0x564] ss:$40 sps:$4 sm:$0xff]  }
 0x56b   :  { %12773 = vmatpush1.bf16.msra.mxu0 %v18346_v46  ;;  %12516 = vmatprep.subr.bf16.mxu1 %v18351_v28  ;;  %v18403_v46 = vld [vmem:[#allocation11 + $0x1958] ss:$40 sps:$4 sm:$0xff]  }
 0x56c   :  { %12774 = vmatprep.subr.bf16.mxu0 %v18354_v4  ;;  %v18406_v28 = vld [vmem:[#allocation11 + $0x560] ss:$40 sps:$4 sm:$0xff]   ;;  %v18411_v4 = vld [vmem:[#allocation11 + $0x19ac] ss:$40 sps:$4 sm:$0xff]  }
 0x56e   :  { %12517 = vmatpush1.bf16.msra.mxu1 %v18349_v27  ;;  %v18414_v27 = vld [vmem:[#allocation11 + $0x5b4] ss:$40 sps:$4 sm:$0xff]  }
 0x56f   :  { %12775 = vmatpush1.bf16.msra.mxu0 %v18352_v34  ;;  %12518 = vmatprep.subr.bf16.mxu1 %v18357_v5  ;;  %v18409_v34 = vld [vmem:[#allocation11 + $0x19a8] ss:$40 sps:$4 sm:$0xff]  }
 0x570   :  { %12776 = vmatprep.subr.bf16.mxu0 %v18360_v62  ;;  %v18412_v5 = vld [vmem:[#allocation11 + $0x5b0] ss:$40 sps:$4 sm:$0xff]   ;;  %v18417_v62 = vld [vmem:[#allocation11 + $0x19fc] ss:$40 sps:$4 sm:$0xff]  }
 0x572   :  { %12519 = vmatpush1.bf16.msra.mxu1 %v18355_v60  ;;  %v18420_v60 = vld [vmem:[#allocation11 + $0x604] ss:$40 sps:$4 sm:$0xff]  }
 0x573   :  { %12777 = vmatpush1.bf16.msra.mxu0 %v18358_v50  ;;  %12520 = vmatprep.subr.bf16.mxu1 %v18363_v41  ;;  %v18415_v50 = vld [vmem:[#allocation11 + $0x19f8] ss:$40 sps:$4 sm:$0xff]  }
 0x574   :  { %12778 = vmatprep.subr.bf16.mxu0 %v18366_v47  ;;  %v18418_v41 = vld [vmem:[#allocation11 + $0x600] ss:$40 sps:$4 sm:$0xff]   ;;  %v18423_v47 = vld [vmem:[#allocation11 + $0x1a4c] ss:$40 sps:$4 sm:$0xff]  }
 0x576   :  { %12521 = vmatpush1.bf16.msra.mxu1 %v18361_v6  ;;  %v18426_v6 = vld [vmem:[#allocation11 + $0x654] ss:$40 sps:$4 sm:$0xff]  }
 0x577   :  { %12779 = vmatpush1.bf16.msra.mxu0 %v18364_v12  ;;  %12522 = vmatprep.subr.bf16.mxu1 %v18369_v29  ;;  %v18421_v12 = vld [vmem:[#allocation11 + $0x1a48] ss:$40 sps:$4 sm:$0xff]  }
 0x578   :  { %12780 = vmatprep.subr.bf16.mxu0 %v18372_v2  ;;  %v18424_v29 = vld [vmem:[#allocation11 + $0x650] ss:$40 sps:$4 sm:$0xff]   ;;  %v18429_v2 = vld [vmem:[#allocation11 + $0x1a9c] ss:$40 sps:$4 sm:$0xff]  }
 0x57a   :  { %12523 = vmatpush1.bf16.msra.mxu1 %v18367_v45  ;;  %v18432_v45 = vld [vmem:[#allocation11 + $0x6a4] ss:$40 sps:$4 sm:$0xff]  }
 0x57b   :  { %12781 = vmatpush1.bf16.msra.mxu0 %v18370_v43  ;;  %12524 = vmatprep.subr.bf16.mxu1 %v18375_v9  ;;  %v18427_v43 = vld [vmem:[#allocation11 + $0x1a98] ss:$40 sps:$4 sm:$0xff]  }
 0x57c   :  { %12782 = vmatprep.subr.bf16.mxu0 %v18378_v44  ;;  %v18430_v9 = vld [vmem:[#allocation11 + $0x6a0] ss:$40 sps:$4 sm:$0xff]   ;;  %v18435_v44 = vld [vmem:[#allocation11 + $0x1aec] ss:$40 sps:$4 sm:$0xff]  }
 0x57e   :  { %12525 = vmatpush1.bf16.msra.mxu1 %v18373_v56  ;;  %v18438_v56 = vld [vmem:[#allocation11 + $0x6f4] ss:$40 sps:$4 sm:$0xff]  }
 0x57f   :  { %12783 = vmatpush1.bf16.msra.mxu0 %v18376_v36  ;;  %12526 = vmatprep.subr.bf16.mxu1 %v18381_v40  ;;  %v18433_v36 = vld [vmem:[#allocation11 + $0x1ae8] ss:$40 sps:$4 sm:$0xff]  }
 0x580   :  { %12784 = vmatprep.subr.bf16.mxu0 %v18384_v30  ;;  %v18436_v40 = vld [vmem:[#allocation11 + $0x6f0] ss:$40 sps:$4 sm:$0xff]   ;;  %v18441_v30 = vld [vmem:[#allocation11 + $0x1b3c] ss:$40 sps:$4 sm:$0xff]  }
 0x582   :  { %12527 = vmatpush1.bf16.msra.mxu1 %v18379_v25  ;;  %v18444_v25 = vld [vmem:[#allocation11 + $0x744] ss:$40 sps:$4 sm:$0xff]  }
 0x583   :  { %12785 = vmatpush1.bf16.msra.mxu0 %v18382_v63  ;;  %12528 = vmatprep.subr.bf16.mxu1 %v18387_v52  ;;  %v18439_v63 = vld [vmem:[#allocation11 + $0x1b38] ss:$40 sps:$4 sm:$0xff]  }
 0x584   :  { %12786 = vmatprep.subr.bf16.mxu0 %v18390_v42  ;;  %v18442_v52 = vld [vmem:[#allocation11 + $0x740] ss:$40 sps:$4 sm:$0xff]   ;;  %v18447_v42 = vld [vmem:[#allocation11 + $0x1b8c] ss:$40 sps:$4 sm:$0xff]  }
 0x586   :  { %12529 = vmatpush1.bf16.msra.mxu1 %v18385_v7  ;;  %v18450_v7 = vld [vmem:[#allocation11 + $0x794] ss:$40 sps:$4 sm:$0xff]  }
 0x587   :  { %12787 = vmatpush1.bf16.msra.mxu0 %v18388_v61  ;;  %12530 = vmatprep.subr.bf16.mxu1 %v18393_v1  ;;  %v18445_v61 = vld [vmem:[#allocation11 + $0x1b88] ss:$40 sps:$4 sm:$0xff]  }
 0x588   :  { %12788 = vmatprep.subr.bf16.mxu0 %v18396_v53  ;;  %v18448_v1 = vld [vmem:[#allocation11 + $0x790] ss:$40 sps:$4 sm:$0xff]   ;;  %v18453_v53 = vld [vmem:[#allocation11 + $0x1bdc] ss:$40 sps:$4 sm:$0xff]  }
 0x58a   :  { %12531 = vmatpush1.bf16.msra.mxu1 %v18391_v11  ;;  %v18456_v11 = vld [vmem:[#allocation11 + $0x7e4] ss:$40 sps:$4 sm:$0xff]  }
 0x58b   :  { %12789 = vmatpush1.bf16.msra.mxu0 %v18394_v24  ;;  %12543 = vmatprep.subr.bf16.mxu1 %v18399_v37  ;;  %v18451_v24 = vld [vmem:[#allocation11 + $0x1bd8] ss:$40 sps:$4 sm:$0xff]  }
 0x58c   :  { %12801 = vmatprep.subr.bf16.mxu0 %v18402_v17  ;;  %v18454_v37 = vld [vmem:[#allocation11 + $0x7e0] ss:$40 sps:$4 sm:$0xff]   ;;  %v18459_v17 = vld [vmem:[#allocation11 + $0x1c2c] ss:$40 sps:$4 sm:$0xff]  }
 0x58d   :  { %12533 = vmatmul.mubr.bf16.vlgmr.msra.gmra.mrb[28].mxu1 %v21339_v31 }
 0x58e   :  { %12791 = vmatmul.mubr.bf16.vlgmr.msra.gmra.mrb[20].mxu0 %v21329_v20  ;;  %12544 = vmatpush1.bf16.msra.mxu1 %v18397_v16  ;;  %v18462_v16 = vld [vmem:[#allocation11 + $0x834] ss:$40 sps:$4 sm:$0xff]  }
 0x58f   :  { %12575 = vmatprep.mubr.bf16.mxu1 %v21379_v26  ;;  %12802 = vmatpush1.bf16.msra.mxu0 %v18400_v22  ;;  %v18457_v22 = vld [vmem:[#allocation11 + $0x1c28] ss:$40 sps:$4 sm:$0xff]  }
 0x590   :  { %12833 = vmatprep.mubr.bf16.mxu0 %v21333_v54  ;;  %12545 = vmatprep.subr.bf16.mxu1 %v18405_v21  ;;  %v18460_v21 = vld [vmem:[#allocation11 + $0x830] ss:$40 sps:$4 sm:$0xff]  }
 0x591   :  { %12803 = vmatprep.subr.bf16.mxu0 %v18408_v23  ;;  %v18465_v23 = vld [vmem:[#allocation11 + $0x1c7c] ss:$40 sps:$4 sm:$0xff]  }
 0x592   :  { %12546 = vmatpush1.bf16.msra.mxu1 %v18403_v46  ;;  %v18468_v46 = vld [vmem:[#allocation11 + $0x884] ss:$40 sps:$4 sm:$0xff]  }
 0x593   :  { %12804 = vmatpush1.bf16.msra.mxu0 %v18406_v28  ;;  %12547 = vmatprep.subr.bf16.mxu1 %v18411_v4  ;;  %v18463_v28 = vld [vmem:[#allocation11 + $0x1c78] ss:$40 sps:$4 sm:$0xff]  }
 0x594   :  { %12805 = vmatprep.subr.bf16.mxu0 %v18414_v27  ;;  %v18466_v4 = vld [vmem:[#allocation11 + $0x880] ss:$40 sps:$4 sm:$0xff]   ;;  %v18471_v27 = vld [vmem:[#allocation11 + $0x1ccc] ss:$40 sps:$4 sm:$0xff]  }
 0x596   :  { %12548 = vmatpush1.bf16.msra.mxu1 %v18409_v34  ;;  %v18474_v34 = vld [vmem:[#allocation11 + $0x8d4] ss:$40 sps:$4 sm:$0xff]  }
 0x597   :  { %12806 = vmatpush1.bf16.msra.mxu0 %v18412_v5  ;;  %12549 = vmatprep.subr.bf16.mxu1 %v18417_v62  ;;  %v18469_v5 = vld [vmem:[#allocation11 + $0x1cc8] ss:$40 sps:$4 sm:$0xff]  }
 0x598   :  { %12807 = vmatprep.subr.bf16.mxu0 %v18420_v60  ;;  %v18472_v62 = vld [vmem:[#allocation11 + $0x8d0] ss:$40 sps:$4 sm:$0xff]   ;;  %v18477_v60 = vld [vmem:[#allocation11 + $0x1d1c] ss:$40 sps:$4 sm:$0xff]  }
 0x59a   :  { %12550 = vmatpush1.bf16.msra.mxu1 %v18415_v50  ;;  %v18480_v50 = vld [vmem:[#allocation11 + $0x924] ss:$40 sps:$4 sm:$0xff]  }
 0x59b   :  { %12808 = vmatpush1.bf16.msra.mxu0 %v18418_v41  ;;  %12551 = vmatprep.subr.bf16.mxu1 %v18423_v47  ;;  %v18475_v41 = vld [vmem:[#allocation11 + $0x1d18] ss:$40 sps:$4 sm:$0xff]  }
 0x59c   :  { %12809 = vmatprep.subr.bf16.mxu0 %v18426_v6  ;;  %v18478_v47 = vld [vmem:[#allocation11 + $0x920] ss:$40 sps:$4 sm:$0xff]   ;;  %v18483_v6 = vld [vmem:[#allocation11 + $0x1d6c] ss:$40 sps:$4 sm:$0xff]  }
 0x59e   :  { %12552 = vmatpush1.bf16.msra.mxu1 %v18421_v12  ;;  %v18486_v12 = vld [vmem:[#allocation11 + $0x974] ss:$40 sps:$4 sm:$0xff]  }
 0x59f   :  { %12810 = vmatpush1.bf16.msra.mxu0 %v18424_v29  ;;  %12553 = vmatprep.subr.bf16.mxu1 %v18429_v2  ;;  %v18481_v29 = vld [vmem:[#allocation11 + $0x1d68] ss:$40 sps:$4 sm:$0xff]  }
 0x5a0   :  { %12811 = vmatprep.subr.bf16.mxu0 %v18432_v45  ;;  %v18484_v2 = vld [vmem:[#allocation11 + $0x970] ss:$40 sps:$4 sm:$0xff]   ;;  %v18489_v45 = vld [vmem:[#allocation11 + $0x1dbc] ss:$40 sps:$4 sm:$0xff]  }
 0x5a2   :  { %12554 = vmatpush1.bf16.msra.mxu1 %v18427_v43  ;;  %v18492_v43 = vld [vmem:[#allocation11 + $0x9c4] ss:$40 sps:$4 sm:$0xff]  }
 0x5a3   :  { %12812 = vmatpush1.bf16.msra.mxu0 %v18430_v9  ;;  %12555 = vmatprep.subr.bf16.mxu1 %v18435_v44  ;;  %v18487_v9 = vld [vmem:[#allocation11 + $0x1db8] ss:$40 sps:$4 sm:$0xff]  }
 0x5a4   :  { %12813 = vmatprep.subr.bf16.mxu0 %v18438_v56  ;;  %v18490_v44 = vld [vmem:[#allocation11 + $0x9c0] ss:$40 sps:$4 sm:$0xff]   ;;  %v18495_v56 = vld [vmem:[#allocation11 + $0x1e0c] ss:$40 sps:$4 sm:$0xff]  }
 0x5a6   :  { %12556 = vmatpush1.bf16.msra.mxu1 %v18433_v36  ;;  %v18498_v36 = vld [vmem:[#allocation11 + $0xa14] ss:$40 sps:$4 sm:$0xff]  }
 0x5a7   :  { %12814 = vmatpush1.bf16.msra.mxu0 %v18436_v40  ;;  %12557 = vmatprep.subr.bf16.mxu1 %v18441_v30  ;;  %v18493_v40 = vld [vmem:[#allocation11 + $0x1e08] ss:$40 sps:$4 sm:$0xff]  }
 0x5a8   :  { %12815 = vmatprep.subr.bf16.mxu0 %v18444_v25  ;;  %v18496_v30 = vld [vmem:[#allocation11 + $0xa10] ss:$40 sps:$4 sm:$0xff]   ;;  %v18501_v25 = vld [vmem:[#allocation11 + $0x1e5c] ss:$40 sps:$4 sm:$0xff]  }
 0x5aa   :  { %12558 = vmatpush1.bf16.msra.mxu1 %v18439_v63  ;;  %v18504_v63 = vld [vmem:[#allocation11 + $0xa64] ss:$40 sps:$4 sm:$0xff]  }
 0x5ab   :  { %12816 = vmatpush1.bf16.msra.mxu0 %v18442_v52  ;;  %12559 = vmatprep.subr.bf16.mxu1 %v18447_v42  ;;  %v18499_v52 = vld [vmem:[#allocation11 + $0x1e58] ss:$40 sps:$4 sm:$0xff]  }
 0x5ac   :  { %12817 = vmatprep.subr.bf16.mxu0 %v18450_v7  ;;  %v18502_v42 = vld [vmem:[#allocation11 + $0xa60] ss:$40 sps:$4 sm:$0xff]   ;;  %v18507_v7 = vld [vmem:[#allocation11 + $0x1eac] ss:$40 sps:$4 sm:$0xff]  }
 0x5ae   :  { %12560 = vmatpush1.bf16.msra.mxu1 %v18445_v61  ;;  %v18510_v61 = vld [vmem:[#allocation11 + $0xab4] ss:$40 sps:$4 sm:$0xff]  }
 0x5af   :  { %12818 = vmatpush1.bf16.msra.mxu0 %v18448_v1  ;;  %12561 = vmatprep.subr.bf16.mxu1 %v18453_v53  ;;  %v18505_v1 = vld [vmem:[#allocation11 + $0x1ea8] ss:$40 sps:$4 sm:$0xff]  }
 0x5b0   :  { %12819 = vmatprep.subr.bf16.mxu0 %v18456_v11  ;;  %v18508_v53 = vld [vmem:[#allocation11 + $0xab0] ss:$40 sps:$4 sm:$0xff]   ;;  %v18513_v11 = vld [vmem:[#allocation11 + $0x1efc] ss:$40 sps:$4 sm:$0xff]  }
 0x5b2   :  { %12562 = vmatpush1.bf16.msra.mxu1 %v18451_v24  ;;  %v18516_v24 = vld [vmem:[#allocation11 + $0xb04] ss:$40 sps:$4 sm:$0xff]  }
 0x5b3   :  { %12820 = vmatpush1.bf16.msra.mxu0 %v18454_v37  ;;  %12563 = vmatprep.subr.bf16.mxu1 %v18459_v17  ;;  %v18511_v37 = vld [vmem:[#allocation11 + $0x1ef8] ss:$40 sps:$4 sm:$0xff]  }
 0x5b4   :  { %12821 = vmatprep.subr.bf16.mxu0 %v18462_v16  ;;  %v18514_v17 = vld [vmem:[#allocation11 + $0xb00] ss:$40 sps:$4 sm:$0xff]   ;;  %v18519_v16 = vld [vmem:[#allocation11 + $0x1f4c] ss:$40 sps:$4 sm:$0xff]  }
 0x5b6   :  { %12564 = vmatpush1.bf16.msra.mxu1 %v18457_v22  ;;  %v18522_v22 = vld [vmem:[#allocation11 + $0xb54] ss:$40 sps:$4 sm:$0xff]  }
 0x5b7   :  { %12822 = vmatpush1.bf16.msra.mxu0 %v18460_v21  ;;  %12565 = vmatprep.subr.bf16.mxu1 %v18465_v23  ;;  %v18517_v21 = vld [vmem:[#allocation11 + $0x1f48] ss:$40 sps:$4 sm:$0xff]  }
 0x5b8   :  { %12823 = vmatprep.subr.bf16.mxu0 %v18468_v46  ;;  %v18520_v23 = vld [vmem:[#allocation11 + $0xb50] ss:$40 sps:$4 sm:$0xff]   ;;  %v18525_v46 = vld [vmem:[#allocation11 + $0x1f9c] ss:$40 sps:$4 sm:$0xff]  }
 0x5ba   :  { %12566 = vmatpush1.bf16.msra.mxu1 %v18463_v28  ;;  %v18528_v28 = vld [vmem:[#allocation11 + $0xba4] ss:$40 sps:$4 sm:$0xff]  }
 0x5bb   :  { %12824 = vmatpush1.bf16.msra.mxu0 %v18466_v4  ;;  %12567 = vmatprep.subr.bf16.mxu1 %v18471_v27  ;;  %v18523_v4 = vld [vmem:[#allocation11 + $0x1f98] ss:$40 sps:$4 sm:$0xff]  }
 0x5bc   :  { %12825 = vmatprep.subr.bf16.mxu0 %v18474_v34  ;;  %v18526_v27 = vld [vmem:[#allocation11 + $0xba0] ss:$40 sps:$4 sm:$0xff]   ;;  %v18531_v34 = vld [vmem:[#allocation11 + $0x1fec] ss:$40 sps:$4 sm:$0xff]  }
 0x5be   :  { %12568 = vmatpush1.bf16.msra.mxu1 %v18469_v5  ;;  %v18534_v5 = vld [vmem:[#allocation11 + $0xbf4] ss:$40 sps:$4 sm:$0xff]  }
 0x5bf   :  { %12826 = vmatpush1.bf16.msra.mxu0 %v18472_v62  ;;  %12569 = vmatprep.subr.bf16.mxu1 %v18477_v60  ;;  %v18529_v62 = vld [vmem:[#allocation11 + $0x1fe8] ss:$40 sps:$4 sm:$0xff]  }
 0x5c0   :  { %12827 = vmatprep.subr.bf16.mxu0 %v18480_v50  ;;  %v18532_v60 = vld [vmem:[#allocation11 + $0xbf0] ss:$40 sps:$4 sm:$0xff]   ;;  %v18537_v50 = vld [vmem:[#allocation11 + $0x203c] ss:$40 sps:$4 sm:$0xff]  }
 0x5c2   :  { %12570 = vmatpush1.bf16.msra.mxu1 %v18475_v41  ;;  %v18540_v41 = vld [vmem:[#allocation11 + $0xc44] ss:$40 sps:$4 sm:$0xff]  }
 0x5c3   :  { %12828 = vmatpush1.bf16.msra.mxu0 %v18478_v47  ;;  %12571 = vmatprep.subr.bf16.mxu1 %v18483_v6  ;;  %v18535_v47 = vld [vmem:[#allocation11 + $0x2038] ss:$40 sps:$4 sm:$0xff]  }
 0x5c4   :  { %12829 = vmatprep.subr.bf16.mxu0 %v18486_v12  ;;  %v18538_v6 = vld [vmem:[#allocation11 + $0xc40] ss:$40 sps:$4 sm:$0xff]   ;;  %v18543_v12 = vld [vmem:[#allocation11 + $0x208c] ss:$40 sps:$4 sm:$0xff]  }
 0x5c6   :  { %12572 = vmatpush1.bf16.msra.mxu1 %v18481_v29  ;;  %v18546_v29 = vld [vmem:[#allocation11 + $0xc94] ss:$40 sps:$4 sm:$0xff]  }
 0x5c7   :  { %12830 = vmatpush1.bf16.msra.mxu0 %v18484_v2  ;;  %12573 = vmatprep.subr.bf16.mxu1 %v18489_v45  ;;  %v18541_v2 = vld [vmem:[#allocation11 + $0x2088] ss:$40 sps:$4 sm:$0xff]  }
 0x5c8   :  { %12831 = vmatprep.subr.bf16.mxu0 %v18492_v43  ;;  %v18544_v45 = vld [vmem:[#allocation11 + $0xc90] ss:$40 sps:$4 sm:$0xff]   ;;  %v18549_v43 = vld [vmem:[#allocation11 + $0x20dc] ss:$40 sps:$4 sm:$0xff]  }
 0x5ca   :  { %12574 = vmatpush1.bf16.msra.mxu1 %v18487_v9  ;;  %v18552_v9 = vld [vmem:[#allocation11 + $0xce4] ss:$40 sps:$4 sm:$0xff]  }
 0x5cb   :  { %12832 = vmatpush1.bf16.msra.mxu0 %v18490_v44  ;;  %12586 = vmatprep.subr.bf16.mxu1 %v18495_v56  ;;  %v18547_v44 = vld [vmem:[#allocation11 + $0x20d8] ss:$40 sps:$4 sm:$0xff]  }
 0x5cc   :  { %12844 = vmatprep.subr.bf16.mxu0 %v18498_v36  ;;  %v18550_v56 = vld [vmem:[#allocation11 + $0xce0] ss:$40 sps:$4 sm:$0xff]   ;;  %v18555_v36 = vld [vmem:[#allocation11 + $0x212c] ss:$40 sps:$4 sm:$0xff]  }
 0x5cd   :  { %12576 = vmatmul.mubr.bf16.vlgmr.msra.gmra.mrb[28].mxu1 %v21391_v33 }
 0x5ce   :  { %12834 = vmatmul.mubr.bf16.vlgmr.msra.gmra.mrb[20].mxu0 %v21337_v58  ;;  %12587 = vmatpush1.bf16.msra.mxu1 %v18493_v40  ;;  %v18558_v40 = vld [vmem:[#allocation11 + $0xd34] ss:$40 sps:$4 sm:$0xff]  }
 0x5cf   :  { %12618 = vmatprep.mubr.bf16.mxu1 %v21406_v39  ;;  %12845 = vmatpush1.bf16.msra.mxu0 %v18496_v30  ;;  %v18553_v30 = vld [vmem:[#allocation11 + $0x2128] ss:$40 sps:$4 sm:$0xff]  }
 0x5d0   :  { %12876 = vmatprep.mubr.bf16.mxu0 %v21377_v55  ;;  %12588 = vmatprep.subr.bf16.mxu1 %v18501_v25  ;;  %v18556_v25 = vld [vmem:[#allocation11 + $0xd30] ss:$40 sps:$4 sm:$0xff]  }
 0x5d1   :  { %12846 = vmatprep.subr.bf16.mxu0 %v18504_v63  ;;  %v18561_v63 = vld [vmem:[#allocation11 + $0x217c] ss:$40 sps:$4 sm:$0xff]  }
 0x5d2   :  { %12589 = vmatpush1.bf16.msra.mxu1 %v18499_v52  ;;  %v18564_v52 = vld [vmem:[#allocation11 + $0xd84] ss:$40 sps:$4 sm:$0xff]  }
 0x5d3   :  { %12847 = vmatpush1.bf16.msra.mxu0 %v18502_v42  ;;  %12590 = vmatprep.subr.bf16.mxu1 %v18507_v7  ;;  %v18559_v42 = vld [vmem:[#allocation11 + $0x2178] ss:$40 sps:$4 sm:$0xff]  }
 0x5d4   :  { %12848 = vmatprep.subr.bf16.mxu0 %v18510_v61  ;;  %v18562_v7 = vld [vmem:[#allocation11 + $0xd80] ss:$40 sps:$4 sm:$0xff]   ;;  %v18567_v61 = vld [vmem:[#allocation11 + $0x21cc] ss:$40 sps:$4 sm:$0xff]  }
 0x5d6   :  { %12591 = vmatpush1.bf16.msra.mxu1 %v18505_v1  ;;  %v18570_v1 = vld [vmem:[#allocation11 + $0xdd4] ss:$40 sps:$4 sm:$0xff]  }
 0x5d7   :  { %12849 = vmatpush1.bf16.msra.mxu0 %v18508_v53  ;;  %12592 = vmatprep.subr.bf16.mxu1 %v18513_v11  ;;  %v18565_v53 = vld [vmem:[#allocation11 + $0x21c8] ss:$40 sps:$4 sm:$0xff]  }
 0x5d8   :  { %12850 = vmatprep.subr.bf16.mxu0 %v18516_v24  ;;  %v18568_v11 = vld [vmem:[#allocation11 + $0xdd0] ss:$40 sps:$4 sm:$0xff]   ;;  %v18573_v24 = vld [vmem:[#allocation11 + $0x221c] ss:$40 sps:$4 sm:$0xff]  }
 0x5da   :  { %12593 = vmatpush1.bf16.msra.mxu1 %v18511_v37  ;;  %v18576_v37 = vld [vmem:[#allocation11 + $0xe24] ss:$40 sps:$4 sm:$0xff]  }
 0x5db   :  { %12851 = vmatpush1.bf16.msra.mxu0 %v18514_v17  ;;  %12594 = vmatprep.subr.bf16.mxu1 %v18519_v16  ;;  %v18571_v17 = vld [vmem:[#allocation11 + $0x2218] ss:$40 sps:$4 sm:$0xff]  }
 0x5dc   :  { %12852 = vmatprep.subr.bf16.mxu0 %v18522_v22  ;;  %v18574_v16 = vld [vmem:[#allocation11 + $0xe20] ss:$40 sps:$4 sm:$0xff]   ;;  %v18579_v22 = vld [vmem:[#allocation11 + $0x226c] ss:$40 sps:$4 sm:$0xff]  }
 0x5de   :  { %12595 = vmatpush1.bf16.msra.mxu1 %v18517_v21  ;;  %v18582_v21 = vld [vmem:[#allocation11 + $0xe74] ss:$40 sps:$4 sm:$0xff]  }
 0x5df   :  { %12853 = vmatpush1.bf16.msra.mxu0 %v18520_v23  ;;  %12596 = vmatprep.subr.bf16.mxu1 %v18525_v46  ;;  %v18577_v23 = vld [vmem:[#allocation11 + $0x2268] ss:$40 sps:$4 sm:$0xff]  }
 0x5e0   :  { %12854 = vmatprep.subr.bf16.mxu0 %v18528_v28  ;;  %v18580_v46 = vld [vmem:[#allocation11 + $0xe70] ss:$40 sps:$4 sm:$0xff]   ;;  %v18585_v28 = vld [vmem:[#allocation11 + $0x22bc] ss:$40 sps:$4 sm:$0xff]  }
 0x5e2   :  { %12597 = vmatpush1.bf16.msra.mxu1 %v18523_v4  ;;  %v18588_v4 = vld [vmem:[#allocation11 + $0xec4] ss:$40 sps:$4 sm:$0xff]  }
 0x5e3   :  { %12855 = vmatpush1.bf16.msra.mxu0 %v18526_v27  ;;  %12598 = vmatprep.subr.bf16.mxu1 %v18531_v34  ;;  %v18583_v27 = vld [vmem:[#allocation11 + $0x22b8] ss:$40 sps:$4 sm:$0xff]  }
 0x5e4   :  { %12856 = vmatprep.subr.bf16.mxu0 %v18534_v5  ;;  %v18586_v34 = vld [vmem:[#allocation11 + $0xec0] ss:$40 sps:$4 sm:$0xff]   ;;  %v18591_v5 = vld [vmem:[#allocation11 + $0x230c] ss:$40 sps:$4 sm:$0xff]  }
 0x5e6   :  { %12599 = vmatpush1.bf16.msra.mxu1 %v18529_v62  ;;  %v18594_v62 = vld [vmem:[#allocation11 + $0xf14] ss:$40 sps:$4 sm:$0xff]  }
 0x5e7   :  { %12857 = vmatpush1.bf16.msra.mxu0 %v18532_v60  ;;  %12600 = vmatprep.subr.bf16.mxu1 %v18537_v50  ;;  %v18589_v60 = vld [vmem:[#allocation11 + $0x2308] ss:$40 sps:$4 sm:$0xff]  }
 0x5e8   :  { %12858 = vmatprep.subr.bf16.mxu0 %v18540_v41  ;;  %v18592_v50 = vld [vmem:[#allocation11 + $0xf10] ss:$40 sps:$4 sm:$0xff]   ;;  %v18597_v41 = vld [vmem:[#allocation11 + $0x235c] ss:$40 sps:$4 sm:$0xff]  }
 0x5ea   :  { %12601 = vmatpush1.bf16.msra.mxu1 %v18535_v47  ;;  %v18600_v47 = vld [vmem:[#allocation11 + $0xf64] ss:$40 sps:$4 sm:$0xff]  }
 0x5eb   :  { %12859 = vmatpush1.bf16.msra.mxu0 %v18538_v6  ;;  %12602 = vmatprep.subr.bf16.mxu1 %v18543_v12  ;;  %v18595_v6 = vld [vmem:[#allocation11 + $0x2358] ss:$40 sps:$4 sm:$0xff]  }
 0x5ec   :  { %12860 = vmatprep.subr.bf16.mxu0 %v18546_v29  ;;  %v18598_v12 = vld [vmem:[#allocation11 + $0xf60] ss:$40 sps:$4 sm:$0xff]   ;;  %v18603_v29 = vld [vmem:[#allocation11 + $0x23ac] ss:$40 sps:$4 sm:$0xff]  }
 0x5ee   :  { %12603 = vmatpush1.bf16.msra.mxu1 %v18541_v2  ;;  %v18606_v2 = vld [vmem:[#allocation11 + $0xfb4] ss:$40 sps:$4 sm:$0xff]  }
 0x5ef   :  { %12861 = vmatpush1.bf16.msra.mxu0 %v18544_v45  ;;  %12604 = vmatprep.subr.bf16.mxu1 %v18549_v43  ;;  %v18601_v45 = vld [vmem:[#allocation11 + $0x23a8] ss:$40 sps:$4 sm:$0xff]  }
 0x5f0   :  { %12862 = vmatprep.subr.bf16.mxu0 %v18552_v9  ;;  %v18604_v43 = vld [vmem:[#allocation11 + $0xfb0] ss:$40 sps:$4 sm:$0xff]   ;;  %v18609_v9 = vld [vmem:[#allocation11 + $0x23fc] ss:$40 sps:$4 sm:$0xff]  }
 0x5f2   :  { %12605 = vmatpush1.bf16.msra.mxu1 %v18547_v44  ;;  %v18612_v44 = vld [vmem:[#allocation11 + $0x1004] ss:$40 sps:$4 sm:$0xff]  }
 0x5f3   :  { %12863 = vmatpush1.bf16.msra.mxu0 %v18550_v56  ;;  %12606 = vmatprep.subr.bf16.mxu1 %v18555_v36  ;;  %v18607_v56 = vld [vmem:[#allocation11 + $0x23f8] ss:$40 sps:$4 sm:$0xff]  }
 0x5f4   :  { %12864 = vmatprep.subr.bf16.mxu0 %v18558_v40  ;;  %v18610_v36 = vld [vmem:[#allocation11 + $0x1000] ss:$40 sps:$4 sm:$0xff]   ;;  %v18615_v40 = vld [vmem:[#allocation11 + $0x244c] ss:$40 sps:$4 sm:$0xff]  }
 0x5f6   :  { %12607 = vmatpush1.bf16.msra.mxu1 %v18553_v30  ;;  %v18618_v30 = vld [vmem:[#allocation11 + $0x1054] ss:$40 sps:$4 sm:$0xff]  }
 0x5f7   :  { %12865 = vmatpush1.bf16.msra.mxu0 %v18556_v25  ;;  %12608 = vmatprep.subr.bf16.mxu1 %v18561_v63  ;;  %v3844_v25 = vld [vmem:[#allocation13] sm:$0xff]  ;;  %v18613_v63 = vld [vmem:[#allocation11 + $0x2448] ss:$40 sps:$4 sm:$0xff]  }
 0x5f8   :  { %12866 = vmatprep.subr.bf16.mxu0 %v18564_v52  ;;  %v18616_v52 = vld [vmem:[#allocation11 + $0x1050] ss:$40 sps:$4 sm:$0xff]  }
 0x5fa   :  { %12609 = vmatpush1.bf16.msra.mxu1 %v18559_v42  ;;  %v18621_v42 = vld [vmem:[#allocation11 + $0x249c] ss:$40 sps:$4 sm:$0xff]  }
 0x5fb   :  { %12867 = vmatpush1.bf16.msra.mxu0 %v18562_v7  ;;  %12610 = vmatprep.subr.bf16.mxu1 %v18567_v61  ;;  %v21971_v7 = vld [vmem:[#allocation28_spill] sm:$0xff] }
 0x5fc   :  { %12868 = vmatprep.subr.bf16.mxu0 %v18570_v1  ;;  %v3851_v61 = vrot.slane %v3844_v25, %v21971_v7  ;;  %v18624_v1 = vld [vmem:[#allocation11 + $0x10a4] ss:$40 sps:$4 sm:$0xff]  }
 0x5fe   :  { %12611 = vmatpush1.bf16.msra.mxu1 %v18565_v53  ;;  %v21972_v53 = vld [vmem:[#allocation29_spill] sm:$0xff] }
 0x5ff   :  { %12869 = vmatpush1.bf16.msra.mxu0 %v18568_v11  ;;  %12612 = vmatprep.subr.bf16.mxu1 %v18573_v24  ;;  %v3855_v11 = vrot.slane %v3844_v25, %v21972_v53  ;;  %v18619_v24 = vld [vmem:[#allocation11 + $0x2498] ss:$40 sps:$4 sm:$0xff]   ;;  %v18657_v25 = vld [vmem:[#allocation11 + $0x267c] ss:$40 sps:$4 sm:$0xff]  }
 0x600   :  { %12870 = vmatprep.subr.bf16.mxu0 %v18576_v37  ;;  %v18622_v37 = vld [vmem:[#allocation11 + $0x10a0] ss:$40 sps:$4 sm:$0xff]  }
 0x602   :  { %12613 = vmatpush1.bf16.msra.mxu1 %v18571_v17  ;;  %v18627_v17 = vld [vmem:[#allocation11 + $0x24ec] ss:$40 sps:$4 sm:$0xff]  }
 0x603   :  { %12871 = vmatpush1.bf16.msra.mxu0 %v18574_v16  ;;  %12614 = vmatprep.subr.bf16.mxu1 %v18579_v22  ;;  %v17167_v16 = vadd.f32 %v21477_v48, %v3851_v61  ;;  %v18630_v22 = vld [vmem:[#allocation11 + $0x10f4] ss:$40 sps:$4 sm:$0xff]   ;;  %v18628_v48 = vld [vmem:[#allocation11 + $0x10f0] ss:$40 sps:$4 sm:$0xff]  }
 0x604   :  { %12872 = vmatprep.subr.bf16.mxu0 %v18582_v21  ;;  %v17169_v21 = vadd.f32 %v21479_v51, %v3855_v11 }
 0x606   :  { %12615 = vmatpush1.bf16.msra.mxu1 %v18577_v23 }
 0x607   :  { %12873 = vmatpush1.bf16.msra.mxu0 %v18580_v46  ;;  %12616 = vmatprep.subr.bf16.mxu1 %v18585_v28  ;;  %v17171_v46 = vadd.f32 %v21481_v10, %v3851_v61  ;;  %v18663_v61 = vld [vmem:[#allocation11 + $0x26cc] ss:$40 sps:$4 sm:$0xff]  }
 0x608   :  { %12874 = vmatprep.subr.bf16.mxu0 %v18588_v4 }
 0x60a   :  { %12617 = vmatpush1.bf16.msra.mxu1 %v18583_v27  ;;  %v18625_v27 = vld [vmem:[#allocation11 + $0x24e8] ss:$40 sps:$4 sm:$0xff]  }
 0x60b   :  { %12875 = vmatpush1.bf16.msra.mxu0 %v18586_v34  ;;  %12629 = vmatprep.subr.bf16.mxu1 %v18591_v5  ;;  %v17173_v34 = vadd.f32 %v21483_v15, %v3855_v11  ;;  %v18639_v15 = vld [vmem:[#allocation11 + $0x258c] ss:$40 sps:$4 sm:$0xff]   ;;  %v18661_v11 = vld [vmem:[#allocation11 + $0x26c8] ss:$40 sps:$4 sm:$0xff]  }
 0x60c   :  { %12887 = vmatprep.subr.bf16.mxu0 %v18594_v62 }
 0x60d   :  { %12619 = vmatmul.mubr.bf16.vlgmr.msra.gmra.mrb[28].mxu1 %v21414_v19 }
 0x60e   :  { %12877 = vmatmul.mubr.bf16.vlgmr.msra.gmra.mrb[20].mxu0 %v21383_v59  ;;  %12630 = vmatpush1.bf16.msra.mxu1 %v18589_v60  ;;  %v18633_v60 = vld [vmem:[#allocation11 + $0x253c] ss:$40 sps:$4 sm:$0xff]  }
 0x60f   :  { %12661 = vmatprep.mubr.bf16.mxu1 %v21426_v38  ;;  %12888 = vmatpush1.bf16.msra.mxu0 %v18592_v50 }
 0x610   :  { %12919 = vmatprep.mubr.bf16.mxu0 %v21327_v0  ;;  %12631 = vmatprep.subr.bf16.mxu1 %v18597_v41  ;;  %v18636_v41 = vld [vmem:[#allocation11 + $0x1144] ss:$40 sps:$4 sm:$0xff]  }
 0x611   :  { %12889 = vmatprep.subr.bf16.mxu0 %v18600_v47  ;;  %v18631_v47 = vld [vmem:[#allocation11 + $0x2538] ss:$40 sps:$4 sm:$0xff]  }
 0x612   :  { %12632 = vmatpush1.bf16.msra.mxu1 %v18595_v6  ;;  %v18634_v6 = vld [vmem:[#allocation11 + $0x1140] ss:$40 sps:$4 sm:$0xff]  }
 0x613   :  { %12890 = vmatpush1.bf16.msra.mxu0 %v18598_v12  ;;  %12633 = vmatprep.subr.bf16.mxu1 %v18603_v29  ;;  %v18642_v12 = vld [vmem:[#allocation11 + $0x1194] ss:$40 sps:$4 sm:$0xff]   ;;  %v18637_v29 = vld [vmem:[#allocation11 + $0x2588] ss:$40 sps:$4 sm:$0xff]  }
 0x614   :  { %12891 = vmatprep.subr.bf16.mxu0 %v18606_v2  ;;  %v18640_v2 = vld [vmem:[#allocation11 + $0x1190] ss:$40 sps:$4 sm:$0xff]  }
 0x616   :  { %12634 = vmatpush1.bf16.msra.mxu1 %v18601_v45  ;;  %v18645_v45 = vld [vmem:[#allocation11 + $0x25dc] ss:$40 sps:$4 sm:$0xff]  }
 0x617   :  { %12892 = vmatpush1.bf16.msra.mxu0 %v18604_v43  ;;  %12635 = vmatprep.subr.bf16.mxu1 %v18609_v9  ;;  %v18648_v43 = vld [vmem:[#allocation11 + $0x11e4] ss:$40 sps:$4 sm:$0xff]   ;;  %v18643_v9 = vld [vmem:[#allocation11 + $0x25d8] ss:$40 sps:$4 sm:$0xff]  }
 0x618   :  { %12893 = vmatprep.subr.bf16.mxu0 %v18612_v44  ;;  %v18646_v44 = vld [vmem:[#allocation11 + $0x11e0] ss:$40 sps:$4 sm:$0xff]  }
 0x61a   :  { %12636 = vmatpush1.bf16.msra.mxu1 %v18607_v56  ;;  %v18651_v56 = vld [vmem:[#allocation11 + $0x262c] ss:$40 sps:$4 sm:$0xff]  }
 0x61b   :  { %12894 = vmatpush1.bf16.msra.mxu0 %v18610_v36  ;;  %12637 = vmatprep.subr.bf16.mxu1 %v18615_v40  ;;  %v18654_v36 = vld [vmem:[#allocation11 + $0x1234] ss:$40 sps:$4 sm:$0xff]   ;;  %v18649_v40 = vld [vmem:[#allocation11 + $0x2628] ss:$40 sps:$4 sm:$0xff]  }
 0x61c   :  { %12895 = vmatprep.subr.bf16.mxu0 %v18618_v30  ;;  %v18652_v30 = vld [vmem:[#allocation11 + $0x1230] ss:$40 sps:$4 sm:$0xff]  }
 0x61e   :  { %12638 = vmatpush1.bf16.msra.mxu1 %v18613_v63  ;;  %v18660_v63 = vld [vmem:[#allocation11 + $0x1284] ss:$40 sps:$4 sm:$0xff]  }
 0x61f   :  { %12896 = vmatpush1.bf16.msra.mxu0 %v18616_v52  ;;  %12639 = vmatprep.subr.bf16.mxu1 %v18621_v42  ;;  %v18655_v52 = vld [vmem:[#allocation11 + $0x2678] ss:$40 sps:$4 sm:$0xff]  }
 0x620   :  { %12897 = vmatprep.subr.bf16.mxu0 %v18624_v1  ;;  %v18658_v42 = vld [vmem:[#allocation11 + $0x1280] ss:$40 sps:$4 sm:$0xff]   ;;  %v18666_v1 = vld [vmem:[#allocation11 + $0x12d4] ss:$40 sps:$4 sm:$0xff]  }
 0x621   :  { %v12319_v23 = vpop.f32.mrb[16].mxu0 }
 0x622   :  { %v21506_v28 = vadd.f32 %v17167_v16, %v12319_v23  ;;  %v12321_v4 = vpop.f32.mrb[17].mxu0  ;;  %12640 = vmatpush1.bf16.msra.mxu1 %v18619_v24  ;;  %v18664_v24 = vld [vmem:[#allocation11 + $0x12d0] ss:$40 sps:$4 sm:$0xff]   ;;  %v18678_v23 = vld [vmem:[#allocation11 + $0x1374] ss:$40 sps:$4 sm:$0xff]  }
 0x623   :  { %v21509_v5 = vadd.f32 %v17169_v21, %v12321_v4  ;;  %v12323_v62 = vpop.f32.mrb[18].mxu0  ;;  %12898 = vmatpush1.bf16.msra.mxu0 %v18622_v37  ;;  %12641 = vmatprep.subr.bf16.mxu1 %v18627_v17  ;;  %v18669_v37 = vld [vmem:[#allocation11 + $0x271c] ss:$40 sps:$4 sm:$0xff]   ;;  %v18667_v16 = vld [vmem:[#allocation11 + $0x2718] ss:$40 sps:$4 sm:$0xff]  }
 0x624   :  { %v21511_v50 = vadd.f32 %v17171_v46, %v12323_v62  ;;  %v12325_v51 = vpop.f32.mrb[19].mxu0  ;;  %12899 = vmatprep.subr.bf16.mxu0 %v18630_v22  ;;  %v18672_v17 = vld [vmem:[#allocation11 + $0x1324] ss:$40 sps:$4 sm:$0xff]   ;;  %v18670_v22 = vld [vmem:[#allocation11 + $0x1320] ss:$40 sps:$4 sm:$0xff]  }
 0x625   :  { %v21513_v10 = vadd.f32 %v17173_v34, %v12325_v51  ;;  %v18675_v21 = vld [vmem:[#allocation11 + $0x276c] ss:$40 sps:$4 sm:$0xff]   ;;  %v18673_v46 = vld [vmem:[#allocation11 + $0x2768] ss:$40 sps:$4 sm:$0xff]   ;;  %v18679_v62 = vld [vmem:[#allocation11 + $0x27b8] ss:$40 sps:$4 sm:$0xff]  }
 0x626   :  { %12642 = vmatpush1.bf16.msra.mxu1 %v18625_v27  ;;  %v18676_v4 = vld [vmem:[#allocation11 + $0x1370] ss:$40 sps:$4 sm:$0xff]   ;;  %v18681_v27 = vld [vmem:[#allocation11 + $0x27bc] ss:$40 sps:$4 sm:$0xff]  }
 0x627   :  { %12900 = vmatpush1.bf16.msra.mxu0 %v18628_v48  ;;  %12643 = vmatprep.subr.bf16.mxu1 %v18633_v60  ;;  %v18684_v34 = vld [vmem:[#allocation11 + $0x13c4] ss:$40 sps:$4 sm:$0xff]   ;;  %v18682_v48 = vld [vmem:[#allocation11 + $0x13c0] ss:$40 sps:$4 sm:$0xff]   ;;  %v18690_v51 = vld [vmem:[#allocation11 + $0x1414] ss:$40 sps:$4 sm:$0xff]  }
 0x628   :  { %12901 = vmatprep.subr.bf16.mxu0 %v18636_v41  ;;  %v18687_v60 = vld [vmem:[#allocation11 + $0x280c] ss:$40 sps:$4 sm:$0xff]   ;;  %v18685_v41 = vld [vmem:[#allocation11 + $0x2808] ss:$40 sps:$4 sm:$0xff]  }
 0x62a   :  { %12644 = vmatpush1.bf16.msra.mxu1 %v18631_v47  ;;  %v18688_v47 = vld [vmem:[#allocation11 + $0x1410] ss:$40 sps:$4 sm:$0xff]  }
 0x62b   :  { %12902 = vmatpush1.bf16.msra.mxu0 %v18634_v6  ;;  %12645 = vmatprep.subr.bf16.mxu1 %v18639_v15  ;;  %v18693_v6 = vld [vmem:[#allocation11 + $0x285c] ss:$40 sps:$4 sm:$0xff]  }
 0x62c   :  { %12903 = vmatprep.subr.bf16.mxu0 %v18642_v12  ;;  %v18696_v15 = vld [vmem:[#allocation11 + $0x1464] ss:$40 sps:$4 sm:$0xff]   ;;  %v18691_v12 = vld [vmem:[#allocation11 + $0x2858] ss:$40 sps:$4 sm:$0xff]  }
 0x62e   :  { %12646 = vmatpush1.bf16.msra.mxu1 %v18637_v29  ;;  %v18694_v29 = vld [vmem:[#allocation11 + $0x1460] ss:$40 sps:$4 sm:$0xff]  }
 0x62f   :  { %12904 = vmatpush1.bf16.msra.mxu0 %v18640_v2  ;;  %12647 = vmatprep.subr.bf16.mxu1 %v18645_v45  ;;  %v18699_v2 = vld [vmem:[#allocation11 + $0x28ac] ss:$40 sps:$4 sm:$0xff]  }
 0x630   :  { %12905 = vmatprep.subr.bf16.mxu0 %v18648_v43  ;;  %v18702_v45 = vld [vmem:[#allocation11 + $0x14b4] ss:$40 sps:$4 sm:$0xff]   ;;  %v18697_v43 = vld [vmem:[#allocation11 + $0x28a8] ss:$40 sps:$4 sm:$0xff]  }
 0x632   :  { %12648 = vmatpush1.bf16.msra.mxu1 %v18643_v9  ;;  %v18700_v9 = vld [vmem:[#allocation11 + $0x14b0] ss:$40 sps:$4 sm:$0xff]  }
 0x633   :  { %12906 = vmatpush1.bf16.msra.mxu0 %v18646_v44  ;;  %12649 = vmatprep.subr.bf16.mxu1 %v18651_v56  ;;  %v18705_v44 = vld [vmem:[#allocation11 + $0x28fc] ss:$40 sps:$4 sm:$0xff]  }
 0x634   :  { %12907 = vmatprep.subr.bf16.mxu0 %v18654_v36  ;;  %v18708_v56 = vld [vmem:[#allocation11 + $0x1504] ss:$40 sps:$4 sm:$0xff]   ;;  %v18703_v36 = vld [vmem:[#allocation11 + $0x28f8] ss:$40 sps:$4 sm:$0xff]  }
 0x636   :  { %12650 = vmatpush1.bf16.msra.mxu1 %v18649_v40  ;;  %v18706_v40 = vld [vmem:[#allocation11 + $0x1500] ss:$40 sps:$4 sm:$0xff]  }
 0x637   :  { %12908 = vmatpush1.bf16.msra.mxu0 %v18652_v30  ;;  %12651 = vmatprep.subr.bf16.mxu1 %v18657_v25  ;;  %v18711_v30 = vld [vmem:[#allocation11 + $0x294c] ss:$40 sps:$4 sm:$0xff]  }
 0x638   :  { %12909 = vmatprep.subr.bf16.mxu0 %v18660_v63  ;;  %v18714_v25 = vld [vmem:[#allocation11 + $0x1554] ss:$40 sps:$4 sm:$0xff]   ;;  %v18709_v63 = vld [vmem:[#allocation11 + $0x2948] ss:$40 sps:$4 sm:$0xff]  }
 0x63a   :  { %12652 = vmatpush1.bf16.msra.mxu1 %v18655_v52  ;;  %v18712_v52 = vld [vmem:[#allocation11 + $0x1550] ss:$40 sps:$4 sm:$0xff]  }
 0x63b   :  { %12910 = vmatpush1.bf16.msra.mxu0 %v18658_v42  ;;  %12653 = vmatprep.subr.bf16.mxu1 %v18663_v61  ;;  %v18717_v42 = vld [vmem:[#allocation11 + $0x299c] ss:$40 sps:$4 sm:$0xff]  }
 0x63c   :  { %12911 = vmatprep.subr.bf16.mxu0 %v18666_v1  ;;  %v18720_v61 = vld [vmem:[#allocation11 + $0x15a4] ss:$40 sps:$4 sm:$0xff]   ;;  %v18715_v1 = vld [vmem:[#allocation11 + $0x2998] ss:$40 sps:$4 sm:$0xff]  }
 0x63e   :  { %12654 = vmatpush1.bf16.msra.mxu1 %v18661_v11  ;;  %v18718_v11 = vld [vmem:[#allocation11 + $0x15a0] ss:$40 sps:$4 sm:$0xff]  }
 0x63f   :  { %12912 = vmatpush1.bf16.msra.mxu0 %v18664_v24  ;;  %12655 = vmatprep.subr.bf16.mxu1 %v18669_v37  ;;  %v18723_v24 = vld [vmem:[#allocation11 + $0x29ec] ss:$40 sps:$4 sm:$0xff]  }
 0x640   :  { %12913 = vmatprep.subr.bf16.mxu0 %v18672_v17  ;;  %v18726_v37 = vld [vmem:[#allocation11 + $0x15f4] ss:$40 sps:$4 sm:$0xff]   ;;  %v18721_v17 = vld [vmem:[#allocation11 + $0x29e8] ss:$40 sps:$4 sm:$0xff]  }
 0x642   :  { %12656 = vmatpush1.bf16.msra.mxu1 %v18667_v16  ;;  %v18724_v16 = vld [vmem:[#allocation11 + $0x15f0] ss:$40 sps:$4 sm:$0xff]  }
 0x643   :  { %12914 = vmatpush1.bf16.msra.mxu0 %v18670_v22  ;;  %12657 = vmatprep.subr.bf16.mxu1 %v18675_v21  ;;  %v18729_v22 = vld [vmem:[#allocation11 + $0x2a3c] ss:$40 sps:$4 sm:$0xff]  }
 0x644   :  { %12915 = vmatprep.subr.bf16.mxu0 %v18678_v23  ;;  %v18732_v21 = vld [vmem:[#allocation11 + $0x1644] ss:$40 sps:$4 sm:$0xff]   ;;  %v18727_v23 = vld [vmem:[#allocation11 + $0x2a38] ss:$40 sps:$4 sm:$0xff]  }
 0x646   :  { %12658 = vmatpush1.bf16.msra.mxu1 %v18673_v46  ;;  %v18730_v46 = vld [vmem:[#allocation11 + $0x1640] ss:$40 sps:$4 sm:$0xff]  }
 0x647   :  { %12916 = vmatpush1.bf16.msra.mxu0 %v18676_v4  ;;  %12659 = vmatprep.subr.bf16.mxu1 %v18681_v27  ;;  %v18735_v4 = vld [vmem:[#allocation11 + $0x2a8c] ss:$40 sps:$4 sm:$0xff]  }
 0x648   :  { %12917 = vmatprep.subr.bf16.mxu0 %v18684_v34  ;;  %v18738_v27 = vld [vmem:[#allocation11 + $0x1694] ss:$40 sps:$4 sm:$0xff]   ;;  %v18733_v34 = vld [vmem:[#allocation11 + $0x2a88] ss:$40 sps:$4 sm:$0xff]  }
 0x64a   :  { %12660 = vmatpush1.bf16.msra.mxu1 %v18679_v62  ;;  %v18736_v62 = vld [vmem:[#allocation11 + $0x1690] ss:$40 sps:$4 sm:$0xff]  }
 0x64b   :  { %12918 = vmatpush1.bf16.msra.mxu0 %v18682_v48  ;;  %12672 = vmatprep.subr.bf16.mxu1 %v18687_v60  ;;  %v18741_v48 = vld [vmem:[#allocation11 + $0x2adc] ss:$40 sps:$4 sm:$0xff]  }
 0x64c   :  { %12930 = vmatprep.subr.bf16.mxu0 %v18690_v51  ;;  %v18744_v60 = vld [vmem:[#allocation11 + $0x16e4] ss:$40 sps:$4 sm:$0xff]   ;;  %v18739_v51 = vld [vmem:[#allocation11 + $0x2ad8] ss:$40 sps:$4 sm:$0xff]  }
 0x64d   :  { %12662 = vmatmul.mubr.bf16.vlgmr.msra.gmra.mrb[28].mxu1 %v21430_v32 }
 0x64e   :  { %12920 = vmatmul.mubr.bf16.vlgmr.msra.gmra.mrb[20].mxu0 %v21331_v57  ;;  %12673 = vmatpush1.bf16.msra.mxu1 %v18685_v41  ;;  %v18742_v41 = vld [vmem:[#allocation11 + $0x16e0] ss:$40 sps:$4 sm:$0xff]  }
 0x64f   :  { %12704 = vmatprep.mubr.bf16.mxu1 %v21443_v49  ;;  %12931 = vmatpush1.bf16.msra.mxu0 %v18688_v47  ;;  %v18747_v47 = vld [vmem:[#allocation11 + $0x2b2c] ss:$40 sps:$4 sm:$0xff]  }
 0x650   :  { %12962 = vmatprep.mubr.bf16.mxu0 %v21335_v14  ;;  %12674 = vmatprep.subr.bf16.mxu1 %v18693_v6  ;;  %v18750_v6 = vld [vmem:[#allocation11 + $0x1734] ss:$40 sps:$4 sm:$0xff]  }
 0x651   :  { %12932 = vmatprep.subr.bf16.mxu0 %v18696_v15  ;;  %v18745_v15 = vld [vmem:[#allocation11 + $0x2b28] ss:$40 sps:$4 sm:$0xff]  }
 0x652   :  { %12675 = vmatpush1.bf16.msra.mxu1 %v18691_v12  ;;  %v18748_v12 = vld [vmem:[#allocation11 + $0x1730] ss:$40 sps:$4 sm:$0xff]  }
 0x653   :  { %12933 = vmatpush1.bf16.msra.mxu0 %v18694_v29  ;;  %12676 = vmatprep.subr.bf16.mxu1 %v18699_v2  ;;  %v18753_v29 = vld [vmem:[#allocation11 + $0x2b7c] ss:$40 sps:$4 sm:$0xff]  }
 0x654   :  { %12934 = vmatprep.subr.bf16.mxu0 %v18702_v45  ;;  %v18756_v2 = vld [vmem:[#allocation11 + $0x1784] ss:$40 sps:$4 sm:$0xff]   ;;  %v18751_v45 = vld [vmem:[#allocation11 + $0x2b78] ss:$40 sps:$4 sm:$0xff]  }
 0x656   :  { %12677 = vmatpush1.bf16.msra.mxu1 %v18697_v43  ;;  %v18754_v43 = vld [vmem:[#allocation11 + $0x1780] ss:$40 sps:$4 sm:$0xff]  }
 0x657   :  { %12935 = vmatpush1.bf16.msra.mxu0 %v18700_v9  ;;  %12678 = vmatprep.subr.bf16.mxu1 %v18705_v44  ;;  %v18759_v9 = vld [vmem:[#allocation11 + $0x2bcc] ss:$40 sps:$4 sm:$0xff]  }
 0x658   :  { %12936 = vmatprep.subr.bf16.mxu0 %v18708_v56  ;;  %v18762_v44 = vld [vmem:[#allocation11 + $0x17d4] ss:$40 sps:$4 sm:$0xff]   ;;  %v18757_v56 = vld [vmem:[#allocation11 + $0x2bc8] ss:$40 sps:$4 sm:$0xff]  }
 0x65a   :  { %12679 = vmatpush1.bf16.msra.mxu1 %v18703_v36  ;;  %v18760_v36 = vld [vmem:[#allocation11 + $0x17d0] ss:$40 sps:$4 sm:$0xff]  }
 0x65b   :  { %12937 = vmatpush1.bf16.msra.mxu0 %v18706_v40  ;;  %12680 = vmatprep.subr.bf16.mxu1 %v18711_v30  ;;  %v18765_v40 = vld [vmem:[#allocation11 + $0x2c1c] ss:$40 sps:$4 sm:$0xff]  }
 0x65c   :  { %12938 = vmatprep.subr.bf16.mxu0 %v18714_v25  ;;  %v18768_v30 = vld [vmem:[#allocation11 + $0x1824] ss:$40 sps:$4 sm:$0xff]   ;;  %v18763_v25 = vld [vmem:[#allocation11 + $0x2c18] ss:$40 sps:$4 sm:$0xff]  }
 0x65e   :  { %12681 = vmatpush1.bf16.msra.mxu1 %v18709_v63  ;;  %v18766_v63 = vld [vmem:[#allocation11 + $0x1820] ss:$40 sps:$4 sm:$0xff]  }
 0x65f   :  { %12939 = vmatpush1.bf16.msra.mxu0 %v18712_v52  ;;  %12682 = vmatprep.subr.bf16.mxu1 %v18717_v42  ;;  %v18771_v52 = vld [vmem:[#allocation11 + $0x2c6c] ss:$40 sps:$4 sm:$0xff]  }
 0x660   :  { %12940 = vmatprep.subr.bf16.mxu0 %v18720_v61  ;;  %v18774_v42 = vld [vmem:[#allocation11 + $0x1874] ss:$40 sps:$4 sm:$0xff]   ;;  %v18769_v61 = vld [vmem:[#allocation11 + $0x2c68] ss:$40 sps:$4 sm:$0xff]  }
 0x662   :  { %12683 = vmatpush1.bf16.msra.mxu1 %v18715_v1  ;;  %v18772_v1 = vld [vmem:[#allocation11 + $0x1870] ss:$40 sps:$4 sm:$0xff]  }
 0x663   :  { %12941 = vmatpush1.bf16.msra.mxu0 %v18718_v11  ;;  %12684 = vmatprep.subr.bf16.mxu1 %v18723_v24  ;;  %v18777_v11 = vld [vmem:[#allocation11 + $0x2cbc] ss:$40 sps:$4 sm:$0xff]  }
 0x664   :  { %12942 = vmatprep.subr.bf16.mxu0 %v18726_v37  ;;  %v18780_v24 = vld [vmem:[#allocation11 + $0x18c4] ss:$40 sps:$4 sm:$0xff]   ;;  %v18775_v37 = vld [vmem:[#allocation11 + $0x2cb8] ss:$40 sps:$4 sm:$0xff]  }
 0x666   :  { %12685 = vmatpush1.bf16.msra.mxu1 %v18721_v17  ;;  %v18778_v17 = vld [vmem:[#allocation11 + $0x18c0] ss:$40 sps:$4 sm:$0xff]  }
 0x667   :  { %12943 = vmatpush1.bf16.msra.mxu0 %v18724_v16  ;;  %12686 = vmatprep.subr.bf16.mxu1 %v18729_v22  ;;  %v18783_v16 = vld [vmem:[#allocation11 + $0x2d0c] ss:$40 sps:$4 sm:$0xff]  }
 0x668   :  { %12944 = vmatprep.subr.bf16.mxu0 %v18732_v21  ;;  %v18786_v22 = vld [vmem:[#allocation11 + $0x1914] ss:$40 sps:$4 sm:$0xff]   ;;  %v18781_v21 = vld [vmem:[#allocation11 + $0x2d08] ss:$40 sps:$4 sm:$0xff]  }
 0x66a   :  { %12687 = vmatpush1.bf16.msra.mxu1 %v18727_v23  ;;  %v18784_v23 = vld [vmem:[#allocation11 + $0x1910] ss:$40 sps:$4 sm:$0xff]  }
 0x66b   :  { %12945 = vmatpush1.bf16.msra.mxu0 %v18730_v46  ;;  %12688 = vmatprep.subr.bf16.mxu1 %v18735_v4  ;;  %v18789_v46 = vld [vmem:[#allocation11 + $0x2d5c] ss:$40 sps:$4 sm:$0xff]  }
 0x66c   :  { %12946 = vmatprep.subr.bf16.mxu0 %v18738_v27  ;;  %v18792_v4 = vld [vmem:[#allocation11 + $0x1964] ss:$40 sps:$4 sm:$0xff]   ;;  %v18787_v27 = vld [vmem:[#allocation11 + $0x2d58] ss:$40 sps:$4 sm:$0xff]  }
 0x66e   :  { %12689 = vmatpush1.bf16.msra.mxu1 %v18733_v34  ;;  %v18790_v34 = vld [vmem:[#allocation11 + $0x1960] ss:$40 sps:$4 sm:$0xff]  }
 0x66f   :  { %12947 = vmatpush1.bf16.msra.mxu0 %v18736_v62  ;;  %12690 = vmatprep.subr.bf16.mxu1 %v18741_v48  ;;  %v18795_v62 = vld [vmem:[#allocation11 + $0x2dac] ss:$40 sps:$4 sm:$0xff]  }
 0x670   :  { %12948 = vmatprep.subr.bf16.mxu0 %v18744_v60  ;;  %v18798_v48 = vld [vmem:[#allocation11 + $0x19b4] ss:$40 sps:$4 sm:$0xff]   ;;  %v18793_v60 = vld [vmem:[#allocation11 + $0x2da8] ss:$40 sps:$4 sm:$0xff]  }
 0x672   :  { %12691 = vmatpush1.bf16.msra.mxu1 %v18739_v51  ;;  %v18796_v51 = vld [vmem:[#allocation11 + $0x19b0] ss:$40 sps:$4 sm:$0xff]  }
 0x673   :  { %12949 = vmatpush1.bf16.msra.mxu0 %v18742_v41  ;;  %12692 = vmatprep.subr.bf16.mxu1 %v18747_v47  ;;  %v18801_v41 = vld [vmem:[#allocation11 + $0x2dfc] ss:$40 sps:$4 sm:$0xff]  }
 0x674   :  { %12950 = vmatprep.subr.bf16.mxu0 %v18750_v6  ;;  %v18804_v47 = vld [vmem:[#allocation11 + $0x1a04] ss:$40 sps:$4 sm:$0xff]   ;;  %v18799_v6 = vld [vmem:[#allocation11 + $0x2df8] ss:$40 sps:$4 sm:$0xff]  }
 0x676   :  { %12693 = vmatpush1.bf16.msra.mxu1 %v18745_v15  ;;  %v18802_v15 = vld [vmem:[#allocation11 + $0x1a00] ss:$40 sps:$4 sm:$0xff]  }
 0x677   :  { %12951 = vmatpush1.bf16.msra.mxu0 %v18748_v12  ;;  %12694 = vmatprep.subr.bf16.mxu1 %v18753_v29  ;;  %v18807_v12 = vld [vmem:[#allocation11 + $0x2e4c] ss:$40 sps:$4 sm:$0xff]  }
 0x678   :  { %12952 = vmatprep.subr.bf16.mxu0 %v18756_v2  ;;  %v18810_v29 = vld [vmem:[#allocation11 + $0x1a54] ss:$40 sps:$4 sm:$0xff]   ;;  %v18805_v2 = vld [vmem:[#allocation11 + $0x2e48] ss:$40 sps:$4 sm:$0xff]  }
 0x67a   :  { %12695 = vmatpush1.bf16.msra.mxu1 %v18751_v45  ;;  %v18808_v45 = vld [vmem:[#allocation11 + $0x1a50] ss:$40 sps:$4 sm:$0xff]  }
 0x67b   :  { %12953 = vmatpush1.bf16.msra.mxu0 %v18754_v43  ;;  %12696 = vmatprep.subr.bf16.mxu1 %v18759_v9  ;;  %v18813_v43 = vld [vmem:[#allocation11 + $0x2e9c] ss:$40 sps:$4 sm:$0xff]  }
 0x67c   :  { %12954 = vmatprep.subr.bf16.mxu0 %v18762_v44  ;;  %v18816_v9 = vld [vmem:[#allocation11 + $0x1aa4] ss:$40 sps:$4 sm:$0xff]   ;;  %v18811_v44 = vld [vmem:[#allocation11 + $0x2e98] ss:$40 sps:$4 sm:$0xff]  }
 0x67e   :  { %12697 = vmatpush1.bf16.msra.mxu1 %v18757_v56  ;;  %v18814_v56 = vld [vmem:[#allocation11 + $0x1aa0] ss:$40 sps:$4 sm:$0xff]  }
 0x67f   :  { %12955 = vmatpush1.bf16.msra.mxu0 %v18760_v36  ;;  %12698 = vmatprep.subr.bf16.mxu1 %v18765_v40  ;;  %v18819_v36 = vld [vmem:[#allocation11 + $0x2eec] ss:$40 sps:$4 sm:$0xff]  }
 0x680   :  { %12956 = vmatprep.subr.bf16.mxu0 %v18768_v30  ;;  %v18822_v40 = vld [vmem:[#allocation11 + $0x1af4] ss:$40 sps:$4 sm:$0xff]   ;;  %v18817_v30 = vld [vmem:[#allocation11 + $0x2ee8] ss:$40 sps:$4 sm:$0xff]  }
 0x682   :  { %12699 = vmatpush1.bf16.msra.mxu1 %v18763_v25  ;;  %v18820_v25 = vld [vmem:[#allocation11 + $0x1af0] ss:$40 sps:$4 sm:$0xff]  }
 0x683   :  { %12957 = vmatpush1.bf16.msra.mxu0 %v18766_v63  ;;  %12700 = vmatprep.subr.bf16.mxu1 %v18771_v52  ;;  %v18825_v63 = vld [vmem:[#allocation11 + $0x2f3c] ss:$40 sps:$4 sm:$0xff]  }
 0x684   :  { %12958 = vmatprep.subr.bf16.mxu0 %v18774_v42  ;;  %v18828_v52 = vld [vmem:[#allocation11 + $0x1b44] ss:$40 sps:$4 sm:$0xff]   ;;  %v18823_v42 = vld [vmem:[#allocation11 + $0x2f38] ss:$40 sps:$4 sm:$0xff]  }
 0x686   :  { %12701 = vmatpush1.bf16.msra.mxu1 %v18769_v61  ;;  %v18826_v61 = vld [vmem:[#allocation11 + $0x1b40] ss:$40 sps:$4 sm:$0xff]  }
 0x687   :  { %12959 = vmatpush1.bf16.msra.mxu0 %v18772_v1  ;;  %12702 = vmatprep.subr.bf16.mxu1 %v18777_v11  ;;  %v18831_v1 = vld [vmem:[#allocation11 + $0x2f8c] ss:$40 sps:$4 sm:$0xff]  }
 0x688   :  { %12960 = vmatprep.subr.bf16.mxu0 %v18780_v24  ;;  %v18834_v11 = vld [vmem:[#allocation11 + $0x1b94] ss:$40 sps:$4 sm:$0xff]   ;;  %v18829_v24 = vld [vmem:[#allocation11 + $0x2f88] ss:$40 sps:$4 sm:$0xff]  }
 0x68a   :  { %12703 = vmatpush1.bf16.msra.mxu1 %v18775_v37  ;;  %v18832_v37 = vld [vmem:[#allocation11 + $0x1b90] ss:$40 sps:$4 sm:$0xff]  }
 0x68b   :  { %12961 = vmatpush1.bf16.msra.mxu0 %v18778_v17  ;;  %12715 = vmatprep.subr.bf16.mxu1 %v18783_v16  ;;  %v18837_v17 = vld [vmem:[#allocation11 + $0x2fdc] ss:$40 sps:$4 sm:$0xff]  }
 0x68c   :  { %12973 = vmatprep.subr.bf16.mxu0 %v18786_v22  ;;  %v18840_v16 = vld [vmem:[#allocation11 + $0x1be4] ss:$40 sps:$4 sm:$0xff]   ;;  %v18835_v22 = vld [vmem:[#allocation11 + $0x2fd8] ss:$40 sps:$4 sm:$0xff]  }
 0x68d   :  { %12705 = vmatmul.mubr.bf16.vlgmr.msra.gmra.mrb[28].mxu1 %v21450_v18 }
 0x68e   :  { %12963 = vmatmul.mubr.bf16.vlgmr.msra.gmra.mrb[20].mxu0 %v21339_v31  ;;  %12716 = vmatpush1.bf16.msra.mxu1 %v18781_v21  ;;  %v18838_v21 = vld [vmem:[#allocation11 + $0x1be0] ss:$40 sps:$4 sm:$0xff]  }
 0x68f   :  { %12747 = vmatprep.mubr.bf16.mxu1 %v21453_v13  ;;  %12974 = vmatpush1.bf16.msra.mxu0 %v18784_v23  ;;  %v18843_v23 = vld [vmem:[#allocation11 + $0x302c] ss:$40 sps:$4 sm:$0xff]  }
 0x690   :  { %13005 = vmatprep.mubr.bf16.mxu0 %v21379_v26  ;;  %12717 = vmatprep.subr.bf16.mxu1 %v18789_v46  ;;  %v18846_v46 = vld [vmem:[#allocation11 + $0x1c34] ss:$40 sps:$4 sm:$0xff]  }
 0x691   :  { %12975 = vmatprep.subr.bf16.mxu0 %v18792_v4  ;;  %v18841_v4 = vld [vmem:[#allocation11 + $0x3028] ss:$40 sps:$4 sm:$0xff]  }
 0x692   :  { %12718 = vmatpush1.bf16.msra.mxu1 %v18787_v27  ;;  %v18844_v27 = vld [vmem:[#allocation11 + $0x1c30] ss:$40 sps:$4 sm:$0xff]  }
 0x693   :  { %12976 = vmatpush1.bf16.msra.mxu0 %v18790_v34  ;;  %12719 = vmatprep.subr.bf16.mxu1 %v18795_v62  ;;  %v18849_v34 = vld [vmem:[#allocation11 + $0x307c] ss:$40 sps:$4 sm:$0xff]  }
 0x694   :  { %12977 = vmatprep.subr.bf16.mxu0 %v18798_v48  ;;  %v18852_v62 = vld [vmem:[#allocation11 + $0x1c84] ss:$40 sps:$4 sm:$0xff]   ;;  %v18847_v48 = vld [vmem:[#allocation11 + $0x3078] ss:$40 sps:$4 sm:$0xff]  }
 0x696   :  { %12720 = vmatpush1.bf16.msra.mxu1 %v18793_v60  ;;  %v18850_v60 = vld [vmem:[#allocation11 + $0x1c80] ss:$40 sps:$4 sm:$0xff]  }
 0x697   :  { %12978 = vmatpush1.bf16.msra.mxu0 %v18796_v51  ;;  %12721 = vmatprep.subr.bf16.mxu1 %v18801_v41  ;;  %v18855_v51 = vld [vmem:[#allocation11 + $0x30cc] ss:$40 sps:$4 sm:$0xff]  }
 0x698   :  { %12979 = vmatprep.subr.bf16.mxu0 %v18804_v47  ;;  %v18858_v41 = vld [vmem:[#allocation11 + $0x1cd4] ss:$40 sps:$4 sm:$0xff]   ;;  %v18853_v47 = vld [vmem:[#allocation11 + $0x30c8] ss:$40 sps:$4 sm:$0xff]  }
 0x69a   :  { %12722 = vmatpush1.bf16.msra.mxu1 %v18799_v6  ;;  %v18856_v6 = vld [vmem:[#allocation11 + $0x1cd0] ss:$40 sps:$4 sm:$0xff]  }
 0x69b   :  { %12980 = vmatpush1.bf16.msra.mxu0 %v18802_v15  ;;  %12723 = vmatprep.subr.bf16.mxu1 %v18807_v12  ;;  %v18861_v15 = vld [vmem:[#allocation11 + $0x311c] ss:$40 sps:$4 sm:$0xff]  }
 0x69c   :  { %12981 = vmatprep.subr.bf16.mxu0 %v18810_v29  ;;  %v18864_v12 = vld [vmem:[#allocation11 + $0x1d24] ss:$40 sps:$4 sm:$0xff]   ;;  %v18859_v29 = vld [vmem:[#allocation11 + $0x3118] ss:$40 sps:$4 sm:$0xff]  }
 0x69e   :  { %12724 = vmatpush1.bf16.msra.mxu1 %v18805_v2  ;;  %v18862_v2 = vld [vmem:[#allocation11 + $0x1d20] ss:$40 sps:$4 sm:$0xff]  }
 0x69f   :  { %12982 = vmatpush1.bf16.msra.mxu0 %v18808_v45  ;;  %12725 = vmatprep.subr.bf16.mxu1 %v18813_v43  ;;  %v18867_v45 = vld [vmem:[#allocation11 + $0x316c] ss:$40 sps:$4 sm:$0xff]  }
 0x6a0   :  { %12983 = vmatprep.subr.bf16.mxu0 %v18816_v9  ;;  %v18870_v43 = vld [vmem:[#allocation11 + $0x1d74] ss:$40 sps:$4 sm:$0xff]   ;;  %v18865_v9 = vld [vmem:[#allocation11 + $0x3168] ss:$40 sps:$4 sm:$0xff]  }
 0x6a2   :  { %12726 = vmatpush1.bf16.msra.mxu1 %v18811_v44  ;;  %v18868_v44 = vld [vmem:[#allocation11 + $0x1d70] ss:$40 sps:$4 sm:$0xff]  }
 0x6a3   :  { %12984 = vmatpush1.bf16.msra.mxu0 %v18814_v56  ;;  %12727 = vmatprep.subr.bf16.mxu1 %v18819_v36  ;;  %v18873_v56 = vld [vmem:[#allocation11 + $0x31bc] ss:$40 sps:$4 sm:$0xff]  }
 0x6a4   :  { %12985 = vmatprep.subr.bf16.mxu0 %v18822_v40  ;;  %v18876_v36 = vld [vmem:[#allocation11 + $0x1dc4] ss:$40 sps:$4 sm:$0xff]   ;;  %v18871_v40 = vld [vmem:[#allocation11 + $0x31b8] ss:$40 sps:$4 sm:$0xff]  }
 0x6a6   :  { %12728 = vmatpush1.bf16.msra.mxu1 %v18817_v30  ;;  %v18874_v30 = vld [vmem:[#allocation11 + $0x1dc0] ss:$40 sps:$4 sm:$0xff]  }
 0x6a7   :  { %12986 = vmatpush1.bf16.msra.mxu0 %v18820_v25  ;;  %12729 = vmatprep.subr.bf16.mxu1 %v18825_v63  ;;  %v18882_v25 = vld [vmem:[#allocation11 + $0x1c] ss:$40 sps:$4 sm:$0xff]  }
 0x6a8   :  { %12987 = vmatprep.subr.bf16.mxu0 %v18828_v52  ;;  %v18879_v63 = vld [vmem:[#allocation11 + $0x1e14] ss:$40 sps:$4 sm:$0xff]   ;;  %v18880_v52 = vld [vmem:[#allocation11 + $0x18] ss:$40 sps:$4 sm:$0xff]  }
 0x6aa   :  { %12730 = vmatpush1.bf16.msra.mxu1 %v18823_v42  ;;  %v18877_v42 = vld [vmem:[#allocation11 + $0x1e10] ss:$40 sps:$4 sm:$0xff]  }
 0x6ab   :  { %12988 = vmatpush1.bf16.msra.mxu0 %v18826_v61  ;;  %12731 = vmatprep.subr.bf16.mxu1 %v18831_v1  ;;  %v18885_v61 = vld [vmem:[#allocation11 + $0x1e64] ss:$40 sps:$4 sm:$0xff]  }
 0x6ac   :  { %12989 = vmatprep.subr.bf16.mxu0 %v18834_v11  ;;  %v18888_v1 = vld [vmem:[#allocation11 + $0x6c] ss:$40 sps:$4 sm:$0xff]   ;;  %v18886_v11 = vld [vmem:[#allocation11 + $0x68] ss:$40 sps:$4 sm:$0xff]  }
 0x6ae   :  { %12732 = vmatpush1.bf16.msra.mxu1 %v18829_v24  ;;  %v18883_v24 = vld [vmem:[#allocation11 + $0x1e60] ss:$40 sps:$4 sm:$0xff]  }
 0x6af   :  { %12990 = vmatpush1.bf16.msra.mxu0 %v18832_v37  ;;  %12733 = vmatprep.subr.bf16.mxu1 %v18837_v17  ;;  %v18894_v37 = vld [vmem:[#allocation11 + $0xbc] ss:$40 sps:$4 sm:$0xff]  }
 0x6b0   :  { %12991 = vmatprep.subr.bf16.mxu0 %v18840_v16  ;;  %v18891_v17 = vld [vmem:[#allocation11 + $0x1eb4] ss:$40 sps:$4 sm:$0xff]   ;;  %v18892_v16 = vld [vmem:[#allocation11 + $0xb8] ss:$40 sps:$4 sm:$0xff]  }
 0x6b2   :  { %12734 = vmatpush1.bf16.msra.mxu1 %v18835_v22  ;;  %v18889_v22 = vld [vmem:[#allocation11 + $0x1eb0] ss:$40 sps:$4 sm:$0xff]  }
 0x6b3   :  { %12992 = vmatpush1.bf16.msra.mxu0 %v18838_v21  ;;  %12735 = vmatprep.subr.bf16.mxu1 %v18843_v23  ;;  %v18900_v21 = vld [vmem:[#allocation11 + $0x10c] ss:$40 sps:$4 sm:$0xff]  }
 0x6b4   :  { %12993 = vmatprep.subr.bf16.mxu0 %v18846_v46  ;;  %v18897_v23 = vld [vmem:[#allocation11 + $0x1f04] ss:$40 sps:$4 sm:$0xff]   ;;  %v18898_v46 = vld [vmem:[#allocation11 + $0x108] ss:$40 sps:$4 sm:$0xff]  }
 0x6b6   :  { %12736 = vmatpush1.bf16.msra.mxu1 %v18841_v4  ;;  %v18895_v4 = vld [vmem:[#allocation11 + $0x1f00] ss:$40 sps:$4 sm:$0xff]  }
 0x6b7   :  { %12994 = vmatpush1.bf16.msra.mxu0 %v18844_v27  ;;  %12737 = vmatprep.subr.bf16.mxu1 %v18849_v34  ;;  %v18906_v27 = vld [vmem:[#allocation11 + $0x15c] ss:$40 sps:$4 sm:$0xff]  }
 0x6b8   :  { %12995 = vmatprep.subr.bf16.mxu0 %v18852_v62  ;;  %v18903_v34 = vld [vmem:[#allocation11 + $0x1f54] ss:$40 sps:$4 sm:$0xff]   ;;  %v18904_v62 = vld [vmem:[#allocation11 + $0x158] ss:$40 sps:$4 sm:$0xff]  }
 0x6ba   :  { %12738 = vmatpush1.bf16.msra.mxu1 %v18847_v48  ;;  %v18901_v48 = vld [vmem:[#allocation11 + $0x1f50] ss:$40 sps:$4 sm:$0xff]  }
 0x6bb   :  { %12996 = vmatpush1.bf16.msra.mxu0 %v18850_v60  ;;  %12739 = vmatprep.subr.bf16.mxu1 %v18855_v51  ;;  %v18912_v60 = vld [vmem:[#allocation11 + $0x1ac] ss:$40 sps:$4 sm:$0xff]  }
 0x6bc   :  { %12997 = vmatprep.subr.bf16.mxu0 %v18858_v41  ;;  %v18909_v51 = vld [vmem:[#allocation11 + $0x1fa4] ss:$40 sps:$4 sm:$0xff]   ;;  %v18910_v41 = vld [vmem:[#allocation11 + $0x1a8] ss:$40 sps:$4 sm:$0xff]  }
 0x6be   :  { %12740 = vmatpush1.bf16.msra.mxu1 %v18853_v47  ;;  %v18907_v47 = vld [vmem:[#allocation11 + $0x1fa0] ss:$40 sps:$4 sm:$0xff]  }
 0x6bf   :  { %12998 = vmatpush1.bf16.msra.mxu0 %v18856_v6  ;;  %12741 = vmatprep.subr.bf16.mxu1 %v18861_v15  ;;  %v18918_v6 = vld [vmem:[#allocation11 + $0x1fc] ss:$40 sps:$4 sm:$0xff]  }
 0x6c0   :  { %12999 = vmatprep.subr.bf16.mxu0 %v18864_v12  ;;  %v18915_v15 = vld [vmem:[#allocation11 + $0x1ff4] ss:$40 sps:$4 sm:$0xff]   ;;  %v18916_v12 = vld [vmem:[#allocation11 + $0x1f8] ss:$40 sps:$4 sm:$0xff]  }
 0x6c2   :  { %12742 = vmatpush1.bf16.msra.mxu1 %v18859_v29  ;;  %v18913_v29 = vld [vmem:[#allocation11 + $0x1ff0] ss:$40 sps:$4 sm:$0xff]  }
 0x6c3   :  { %13000 = vmatpush1.bf16.msra.mxu0 %v18862_v2  ;;  %12743 = vmatprep.subr.bf16.mxu1 %v18867_v45  ;;  %v18924_v2 = vld [vmem:[#allocation11 + $0x24c] ss:$40 sps:$4 sm:$0xff]  }
 0x6c4   :  { %13001 = vmatprep.subr.bf16.mxu0 %v18870_v43  ;;  %v18921_v45 = vld [vmem:[#allocation11 + $0x2044] ss:$40 sps:$4 sm:$0xff]   ;;  %v18922_v43 = vld [vmem:[#allocation11 + $0x248] ss:$40 sps:$4 sm:$0xff]  }
 0x6c6   :  { %12744 = vmatpush1.bf16.msra.mxu1 %v18865_v9  ;;  %v18919_v9 = vld [vmem:[#allocation11 + $0x2040] ss:$40 sps:$4 sm:$0xff]  }
 0x6c7   :  { %13002 = vmatpush1.bf16.msra.mxu0 %v18868_v44  ;;  %12745 = vmatprep.subr.bf16.mxu1 %v18873_v56  ;;  %v18930_v44 = vld [vmem:[#allocation11 + $0x29c] ss:$40 sps:$4 sm:$0xff]  }
 0x6c8   :  { %13003 = vmatprep.subr.bf16.mxu0 %v18876_v36  ;;  %v18927_v56 = vld [vmem:[#allocation11 + $0x2094] ss:$40 sps:$4 sm:$0xff]   ;;  %v18928_v36 = vld [vmem:[#allocation11 + $0x298] ss:$40 sps:$4 sm:$0xff]  }
 0x6ca   :  { %12746 = vmatpush1.bf16.msra.mxu1 %v18871_v40  ;;  %v18925_v40 = vld [vmem:[#allocation11 + $0x2090] ss:$40 sps:$4 sm:$0xff]  }
 0x6cb   :  { %13004 = vmatpush1.bf16.msra.mxu0 %v18874_v30  ;;  %13188 = vmatprep.subr.bf16.mxu1 %v18882_v25  ;;  %v18936_v30 = vld [vmem:[#allocation11 + $0x2ec] ss:$40 sps:$4 sm:$0xff]  }
 0x6cc   :  { %13016 = vmatprep.subr.bf16.mxu0 %v18879_v63  ;;  %v18933_v25 = vld [vmem:[#allocation11 + $0x20e4] ss:$40 sps:$4 sm:$0xff]   ;;  %v18934_v63 = vld [vmem:[#allocation11 + $0x2e8] ss:$40 sps:$4 sm:$0xff]  }
 0x6cd   :  { %12748 = vmatmul.mubr.bf16.vlgmr.msra.gmra.mrb[28].mxu1 %v21455_v35 }
 0x6ce   :  { %13006 = vmatmul.mubr.bf16.vlgmr.msra.gmra.mrb[20].mxu0 %v21391_v33  ;;  %13189 = vmatpush1.bf16.msra.mxu1 %v18880_v52  ;;  %v18931_v52 = vld [vmem:[#allocation11 + $0x20e0] ss:$40 sps:$4 sm:$0xff]  }
 0x6cf   :  { %13017 = vmatpush1.bf16.msra.mxu0 %v18877_v42  ;;  %13048 = vmatprep.mubr.bf16.mxu0 %v21406_v39  ;;  %v18942_v42 = vld [vmem:[#allocation11 + $0x33c] ss:$40 sps:$4 sm:$0xff]  }
 0x6d0   :  { %13220 = vmatprep.mubr.bf16.mxu1 %v21325_v8  ;;  %13018 = vmatprep.subr.bf16.mxu0 %v18885_v61  ;;  %v18939_v61 = vld [vmem:[#allocation11 + $0x2134] ss:$40 sps:$4 sm:$0xff]  }
 0x6d1   :  { %13190 = vmatprep.subr.bf16.mxu1 %v18888_v1  ;;  %v18940_v1 = vld [vmem:[#allocation11 + $0x338] ss:$40 sps:$4 sm:$0xff]  }
 0x6d2   :  { %13191 = vmatpush1.bf16.msra.mxu1 %v18886_v11  ;;  %v18937_v11 = vld [vmem:[#allocation11 + $0x2130] ss:$40 sps:$4 sm:$0xff]  }
 0x6d3   :  { %13019 = vmatpush1.bf16.msra.mxu0 %v18883_v24  ;;  %13192 = vmatprep.subr.bf16.mxu1 %v18894_v37  ;;  %v18948_v24 = vld [vmem:[#allocation11 + $0x38c] ss:$40 sps:$4 sm:$0xff]  }
 0x6d4   :  { %13020 = vmatprep.subr.bf16.mxu0 %v18891_v17  ;;  %v18945_v37 = vld [vmem:[#allocation11 + $0x2184] ss:$40 sps:$4 sm:$0xff]   ;;  %v18946_v17 = vld [vmem:[#allocation11 + $0x388] ss:$40 sps:$4 sm:$0xff]  }
 0x6d6   :  { %13193 = vmatpush1.bf16.msra.mxu1 %v18892_v16  ;;  %v18943_v16 = vld [vmem:[#allocation11 + $0x2180] ss:$40 sps:$4 sm:$0xff]  }
 0x6d7   :  { %13021 = vmatpush1.bf16.msra.mxu0 %v18889_v22  ;;  %13194 = vmatprep.subr.bf16.mxu1 %v18900_v21  ;;  %v18954_v22 = vld [vmem:[#allocation11 + $0x3dc] ss:$40 sps:$4 sm:$0xff]  }
 0x6d8   :  { %13022 = vmatprep.subr.bf16.mxu0 %v18897_v23  ;;  %v18951_v21 = vld [vmem:[#allocation11 + $0x21d4] ss:$40 sps:$4 sm:$0xff]   ;;  %v18952_v23 = vld [vmem:[#allocation11 + $0x3d8] ss:$40 sps:$4 sm:$0xff]  }
 0x6da   :  { %13195 = vmatpush1.bf16.msra.mxu1 %v18898_v46  ;;  %v18949_v46 = vld [vmem:[#allocation11 + $0x21d0] ss:$40 sps:$4 sm:$0xff]  }
 0x6db   :  { %13023 = vmatpush1.bf16.msra.mxu0 %v18895_v4  ;;  %13196 = vmatprep.subr.bf16.mxu1 %v18906_v27  ;;  %v18960_v4 = vld [vmem:[#allocation11 + $0x42c] ss:$40 sps:$4 sm:$0xff]  }
 0x6dc   :  { %13024 = vmatprep.subr.bf16.mxu0 %v18903_v34  ;;  %v18957_v27 = vld [vmem:[#allocation11 + $0x2224] ss:$40 sps:$4 sm:$0xff]   ;;  %v18958_v34 = vld [vmem:[#allocation11 + $0x428] ss:$40 sps:$4 sm:$0xff]  }
 0x6de   :  { %13197 = vmatpush1.bf16.msra.mxu1 %v18904_v62  ;;  %v18955_v62 = vld [vmem:[#allocation11 + $0x2220] ss:$40 sps:$4 sm:$0xff]  }
 0x6df   :  { %13025 = vmatpush1.bf16.msra.mxu0 %v18901_v48  ;;  %13198 = vmatprep.subr.bf16.mxu1 %v18912_v60  ;;  %v18966_v48 = vld [vmem:[#allocation11 + $0x47c] ss:$40 sps:$4 sm:$0xff]  }
 0x6e0   :  { %13026 = vmatprep.subr.bf16.mxu0 %v18909_v51  ;;  %v18963_v60 = vld [vmem:[#allocation11 + $0x2274] ss:$40 sps:$4 sm:$0xff]   ;;  %v18964_v51 = vld [vmem:[#allocation11 + $0x478] ss:$40 sps:$4 sm:$0xff]  }
 0x6e2   :  { %13199 = vmatpush1.bf16.msra.mxu1 %v18910_v41  ;;  %v18961_v41 = vld [vmem:[#allocation11 + $0x2270] ss:$40 sps:$4 sm:$0xff]  }
 0x6e3   :  { %13027 = vmatpush1.bf16.msra.mxu0 %v18907_v47  ;;  %13200 = vmatprep.subr.bf16.mxu1 %v18918_v6  ;;  %v18972_v47 = vld [vmem:[#allocation11 + $0x4cc] ss:$40 sps:$4 sm:$0xff]  }
 0x6e4   :  { %13028 = vmatprep.subr.bf16.mxu0 %v18915_v15  ;;  %v18969_v6 = vld [vmem:[#allocation11 + $0x22c4] ss:$40 sps:$4 sm:$0xff]   ;;  %v18970_v15 = vld [vmem:[#allocation11 + $0x4c8] ss:$40 sps:$4 sm:$0xff]  }
 0x6e6   :  { %13201 = vmatpush1.bf16.msra.mxu1 %v18916_v12  ;;  %v18967_v12 = vld [vmem:[#allocation11 + $0x22c0] ss:$40 sps:$4 sm:$0xff]  }
 0x6e7   :  { %13029 = vmatpush1.bf16.msra.mxu0 %v18913_v29  ;;  %13202 = vmatprep.subr.bf16.mxu1 %v18924_v2  ;;  %v18978_v29 = vld [vmem:[#allocation11 + $0x51c] ss:$40 sps:$4 sm:$0xff]  }
 0x6e8   :  { %13030 = vmatprep.subr.bf16.mxu0 %v18921_v45  ;;  %v18975_v2 = vld [vmem:[#allocation11 + $0x2314] ss:$40 sps:$4 sm:$0xff]   ;;  %v18976_v45 = vld [vmem:[#allocation11 + $0x518] ss:$40 sps:$4 sm:$0xff]  }
 0x6ea   :  { %13203 = vmatpush1.bf16.msra.mxu1 %v18922_v43  ;;  %v18973_v43 = vld [vmem:[#allocation11 + $0x2310] ss:$40 sps:$4 sm:$0xff]  }
 0x6eb   :  { %13031 = vmatpush1.bf16.msra.mxu0 %v18919_v9  ;;  %13204 = vmatprep.subr.bf16.mxu1 %v18930_v44  ;;  %v18981_v9 = vld [vmem:[#allocation11 + $0x2364] ss:$40 sps:$4 sm:$0xff]  }
 0x6ec   :  { %13032 = vmatprep.subr.bf16.mxu0 %v18927_v56  ;;  %v18984_v44 = vld [vmem:[#allocation11 + $0x56c] ss:$40 sps:$4 sm:$0xff]   ;;  %v18982_v56 = vld [vmem:[#allocation11 + $0x568] ss:$40 sps:$4 sm:$0xff]  }
 0x6ee   :  { %13205 = vmatpush1.bf16.msra.mxu1 %v18928_v36  ;;  %v18979_v36 = vld [vmem:[#allocation11 + $0x2360] ss:$40 sps:$4 sm:$0xff]  }
 0x6ef   :  { %13033 = vmatpush1.bf16.msra.mxu0 %v18925_v40  ;;  %13206 = vmatprep.subr.bf16.mxu1 %v18936_v30  ;;  %v18990_v40 = vld [vmem:[#allocation11 + $0x5bc] ss:$40 sps:$4 sm:$0xff]  }
 0x6f0   :  { %13034 = vmatprep.subr.bf16.mxu0 %v18933_v25  ;;  %v18987_v30 = vld [vmem:[#allocation11 + $0x23b4] ss:$40 sps:$4 sm:$0xff]   ;;  %v18988_v25 = vld [vmem:[#allocation11 + $0x5b8] ss:$40 sps:$4 sm:$0xff]  }
 0x6f2   :  { %13207 = vmatpush1.bf16.msra.mxu1 %v18934_v63  ;;  %v18985_v63 = vld [vmem:[#allocation11 + $0x23b0] ss:$40 sps:$4 sm:$0xff]  }
 0x6f3   :  { %13035 = vmatpush1.bf16.msra.mxu0 %v18931_v52  ;;  %13208 = vmatprep.subr.bf16.mxu1 %v18942_v42  ;;  %v18996_v52 = vld [vmem:[#allocation11 + $0x60c] ss:$40 sps:$4 sm:$0xff]  }
 0x6f4   :  { %13036 = vmatprep.subr.bf16.mxu0 %v18939_v61  ;;  %v18993_v42 = vld [vmem:[#allocation11 + $0x2404] ss:$40 sps:$4 sm:$0xff]   ;;  %v18994_v61 = vld [vmem:[#allocation11 + $0x608] ss:$40 sps:$4 sm:$0xff]  }
 0x6f6   :  { %13209 = vmatpush1.bf16.msra.mxu1 %v18940_v1  ;;  %v18991_v1 = vld [vmem:[#allocation11 + $0x2400] ss:$40 sps:$4 sm:$0xff]  }
 0x6f7   :  { %13037 = vmatpush1.bf16.msra.mxu0 %v18937_v11  ;;  %13210 = vmatprep.subr.bf16.mxu1 %v18948_v24  ;;  %v19002_v11 = vld [vmem:[#allocation11 + $0x65c] ss:$40 sps:$4 sm:$0xff]  }
 0x6f8   :  { %13038 = vmatprep.subr.bf16.mxu0 %v18945_v37  ;;  %v18999_v24 = vld [vmem:[#allocation11 + $0x2454] ss:$40 sps:$4 sm:$0xff]   ;;  %v19000_v37 = vld [vmem:[#allocation11 + $0x658] ss:$40 sps:$4 sm:$0xff]  }
 0x6fa   :  { %13211 = vmatpush1.bf16.msra.mxu1 %v18946_v17  ;;  %v18997_v17 = vld [vmem:[#allocation11 + $0x2450] ss:$40 sps:$4 sm:$0xff]  }
 0x6fb   :  { %13039 = vmatpush1.bf16.msra.mxu0 %v18943_v16  ;;  %13212 = vmatprep.subr.bf16.mxu1 %v18954_v22  ;;  %v19008_v16 = vld [vmem:[#allocation11 + $0x6ac] ss:$40 sps:$4 sm:$0xff]  }
 0x6fc   :  { %13040 = vmatprep.subr.bf16.mxu0 %v18951_v21  ;;  %v19005_v22 = vld [vmem:[#allocation11 + $0x24a4] ss:$40 sps:$4 sm:$0xff]   ;;  %v19006_v21 = vld [vmem:[#allocation11 + $0x6a8] ss:$40 sps:$4 sm:$0xff]  }
 0x6fe   :  { %13213 = vmatpush1.bf16.msra.mxu1 %v18952_v23  ;;  %v19003_v23 = vld [vmem:[#allocation11 + $0x24a0] ss:$40 sps:$4 sm:$0xff]  }
 0x6ff   :  { %13041 = vmatpush1.bf16.msra.mxu0 %v18949_v46  ;;  %13214 = vmatprep.subr.bf16.mxu1 %v18960_v4  ;;  %v19014_v46 = vld [vmem:[#allocation11 + $0x6fc] ss:$40 sps:$4 sm:$0xff]  }
 0x700   :  { %13042 = vmatprep.subr.bf16.mxu0 %v18957_v27  ;;  %v19011_v4 = vld [vmem:[#allocation11 + $0x24f4] ss:$40 sps:$4 sm:$0xff]   ;;  %v19012_v27 = vld [vmem:[#allocation11 + $0x6f8] ss:$40 sps:$4 sm:$0xff]  }
 0x702   :  { %13215 = vmatpush1.bf16.msra.mxu1 %v18958_v34  ;;  %v19009_v34 = vld [vmem:[#allocation11 + $0x24f0] ss:$40 sps:$4 sm:$0xff]  }
 0x703   :  { %13043 = vmatpush1.bf16.msra.mxu0 %v18955_v62  ;;  %13216 = vmatprep.subr.bf16.mxu1 %v18966_v48  ;;  %v19020_v62 = vld [vmem:[#allocation11 + $0x74c] ss:$40 sps:$4 sm:$0xff]  }
 0x704   :  { %13044 = vmatprep.subr.bf16.mxu0 %v18963_v60  ;;  %v19017_v48 = vld [vmem:[#allocation11 + $0x2544] ss:$40 sps:$4 sm:$0xff]   ;;  %v19018_v60 = vld [vmem:[#allocation11 + $0x748] ss:$40 sps:$4 sm:$0xff]  }
 0x706   :  { %13217 = vmatpush1.bf16.msra.mxu1 %v18964_v51  ;;  %v19015_v51 = vld [vmem:[#allocation11 + $0x2540] ss:$40 sps:$4 sm:$0xff]  }
 0x707   :  { %13045 = vmatpush1.bf16.msra.mxu0 %v18961_v41  ;;  %13218 = vmatprep.subr.bf16.mxu1 %v18972_v47  ;;  %v19026_v41 = vld [vmem:[#allocation11 + $0x79c] ss:$40 sps:$4 sm:$0xff]  }
 0x708   :  { %13046 = vmatprep.subr.bf16.mxu0 %v18969_v6  ;;  %v19023_v47 = vld [vmem:[#allocation11 + $0x2594] ss:$40 sps:$4 sm:$0xff]   ;;  %v19024_v6 = vld [vmem:[#allocation11 + $0x798] ss:$40 sps:$4 sm:$0xff]  }
 0x70a   :  { %13219 = vmatpush1.bf16.msra.mxu1 %v18970_v15  ;;  %v19021_v15 = vld [vmem:[#allocation11 + $0x2590] ss:$40 sps:$4 sm:$0xff]  }
 0x70b   :  { %13047 = vmatpush1.bf16.msra.mxu0 %v18967_v12  ;;  %13231 = vmatprep.subr.bf16.mxu1 %v18978_v29  ;;  %v19032_v12 = vld [vmem:[#allocation11 + $0x7ec] ss:$40 sps:$4 sm:$0xff]  }
 0x70c   :  { %13059 = vmatprep.subr.bf16.mxu0 %v18975_v2  ;;  %v19029_v29 = vld [vmem:[#allocation11 + $0x25e4] ss:$40 sps:$4 sm:$0xff]   ;;  %v19030_v2 = vld [vmem:[#allocation11 + $0x7e8] ss:$40 sps:$4 sm:$0xff]  }
 0x70d   :  { %13221 = vmatmul.mubr.bf16.vlgmr.msra.gmra.mrb[32].mxu1 %v21329_v20 }
 0x70e   :  { %13049 = vmatmul.mubr.bf16.vlgmr.msra.gmra.mrb[20].mxu0 %v21414_v19  ;;  %13232 = vmatpush1.bf16.msra.mxu1 %v18976_v45  ;;  %v19027_v45 = vld [vmem:[#allocation11 + $0x25e0] ss:$40 sps:$4 sm:$0xff]  }
 0x70f   :  { %13060 = vmatpush1.bf16.msra.mxu0 %v18973_v43  ;;  %13091 = vmatprep.mubr.bf16.mxu0 %v21426_v38  ;;  %v19038_v43 = vld [vmem:[#allocation11 + $0x83c] ss:$40 sps:$4 sm:$0xff]  }
 0x710   :  { %13263 = vmatprep.mubr.bf16.mxu1 %v21333_v54  ;;  %13061 = vmatprep.subr.bf16.mxu0 %v18981_v9  ;;  %v19035_v9 = vld [vmem:[#allocation11 + $0x2634] ss:$40 sps:$4 sm:$0xff]  }
 0x711   :  { %13233 = vmatprep.subr.bf16.mxu1 %v18984_v44  ;;  %v19036_v44 = vld [vmem:[#allocation11 + $0x838] ss:$40 sps:$4 sm:$0xff]  }
 0x712   :  { %13234 = vmatpush1.bf16.msra.mxu1 %v18982_v56  ;;  %v19033_v56 = vld [vmem:[#allocation11 + $0x2630] ss:$40 sps:$4 sm:$0xff]  }
 0x713   :  { %13062 = vmatpush1.bf16.msra.mxu0 %v18979_v36  ;;  %13235 = vmatprep.subr.bf16.mxu1 %v18990_v40  ;;  %v19044_v36 = vld [vmem:[#allocation11 + $0x88c] ss:$40 sps:$4 sm:$0xff]  }
 0x714   :  { %13063 = vmatprep.subr.bf16.mxu0 %v18987_v30  ;;  %v19041_v40 = vld [vmem:[#allocation11 + $0x2684] ss:$40 sps:$4 sm:$0xff]   ;;  %v19042_v30 = vld [vmem:[#allocation11 + $0x888] ss:$40 sps:$4 sm:$0xff]  }
 0x716   :  { %13236 = vmatpush1.bf16.msra.mxu1 %v18988_v25  ;;  %v19039_v25 = vld [vmem:[#allocation11 + $0x2680] ss:$40 sps:$4 sm:$0xff]  }
 0x717   :  { %13064 = vmatpush1.bf16.msra.mxu0 %v18985_v63  ;;  %13237 = vmatprep.subr.bf16.mxu1 %v18996_v52  ;;  %v19050_v63 = vld [vmem:[#allocation11 + $0x8dc] ss:$40 sps:$4 sm:$0xff]  }
 0x718   :  { %13065 = vmatprep.subr.bf16.mxu0 %v18993_v42  ;;  %v19047_v52 = vld [vmem:[#allocation11 + $0x26d4] ss:$40 sps:$4 sm:$0xff]   ;;  %v19048_v42 = vld [vmem:[#allocation11 + $0x8d8] ss:$40 sps:$4 sm:$0xff]  }
 0x71a   :  { %13238 = vmatpush1.bf16.msra.mxu1 %v18994_v61  ;;  %v19045_v61 = vld [vmem:[#allocation11 + $0x26d0] ss:$40 sps:$4 sm:$0xff]  }
 0x71b   :  { %13066 = vmatpush1.bf16.msra.mxu0 %v18991_v1  ;;  %13239 = vmatprep.subr.bf16.mxu1 %v19002_v11  ;;  %v19056_v1 = vld [vmem:[#allocation11 + $0x92c] ss:$40 sps:$4 sm:$0xff]  }
 0x71c   :  { %13067 = vmatprep.subr.bf16.mxu0 %v18999_v24  ;;  %v19053_v11 = vld [vmem:[#allocation11 + $0x2724] ss:$40 sps:$4 sm:$0xff]   ;;  %v19054_v24 = vld [vmem:[#allocation11 + $0x928] ss:$40 sps:$4 sm:$0xff]  }
 0x71e   :  { %13240 = vmatpush1.bf16.msra.mxu1 %v19000_v37  ;;  %v19051_v37 = vld [vmem:[#allocation11 + $0x2720] ss:$40 sps:$4 sm:$0xff]  }
 0x71f   :  { %13068 = vmatpush1.bf16.msra.mxu0 %v18997_v17  ;;  %13241 = vmatprep.subr.bf16.mxu1 %v19008_v16  ;;  %v19062_v17 = vld [vmem:[#allocation11 + $0x97c] ss:$40 sps:$4 sm:$0xff]  }
 0x720   :  { %13069 = vmatprep.subr.bf16.mxu0 %v19005_v22  ;;  %v19059_v16 = vld [vmem:[#allocation11 + $0x2774] ss:$40 sps:$4 sm:$0xff]   ;;  %v19060_v22 = vld [vmem:[#allocation11 + $0x978] ss:$40 sps:$4 sm:$0xff]  }
 0x722   :  { %13242 = vmatpush1.bf16.msra.mxu1 %v19006_v21  ;;  %v19057_v21 = vld [vmem:[#allocation11 + $0x2770] ss:$40 sps:$4 sm:$0xff]  }
 0x723   :  { %13070 = vmatpush1.bf16.msra.mxu0 %v19003_v23  ;;  %13243 = vmatprep.subr.bf16.mxu1 %v19014_v46  ;;  %v19068_v23 = vld [vmem:[#allocation11 + $0x9cc] ss:$40 sps:$4 sm:$0xff]  }
 0x724   :  { %13071 = vmatprep.subr.bf16.mxu0 %v19011_v4  ;;  %v19065_v46 = vld [vmem:[#allocation11 + $0x27c4] ss:$40 sps:$4 sm:$0xff]   ;;  %v19066_v4 = vld [vmem:[#allocation11 + $0x9c8] ss:$40 sps:$4 sm:$0xff]  }
 0x726   :  { %13244 = vmatpush1.bf16.msra.mxu1 %v19012_v27  ;;  %v19063_v27 = vld [vmem:[#allocation11 + $0x27c0] ss:$40 sps:$4 sm:$0xff]  }
 0x727   :  { %13072 = vmatpush1.bf16.msra.mxu0 %v19009_v34  ;;  %13245 = vmatprep.subr.bf16.mxu1 %v19020_v62  ;;  %v19074_v34 = vld [vmem:[#allocation11 + $0xa1c] ss:$40 sps:$4 sm:$0xff]  }
 0x728   :  { %13073 = vmatprep.subr.bf16.mxu0 %v19017_v48  ;;  %v19071_v62 = vld [vmem:[#allocation11 + $0x2814] ss:$40 sps:$4 sm:$0xff]   ;;  %v19072_v48 = vld [vmem:[#allocation11 + $0xa18] ss:$40 sps:$4 sm:$0xff]  }
 0x72a   :  { %13246 = vmatpush1.bf16.msra.mxu1 %v19018_v60  ;;  %v19069_v60 = vld [vmem:[#allocation11 + $0x2810] ss:$40 sps:$4 sm:$0xff]  }
 0x72b   :  { %13074 = vmatpush1.bf16.msra.mxu0 %v19015_v51  ;;  %13247 = vmatprep.subr.bf16.mxu1 %v19026_v41  ;;  %v19077_v51 = vld [vmem:[#allocation11 + $0x2864] ss:$40 sps:$4 sm:$0xff]  }
 0x72c   :  { %13075 = vmatprep.subr.bf16.mxu0 %v19023_v47  ;;  %v19080_v41 = vld [vmem:[#allocation11 + $0xa6c] ss:$40 sps:$4 sm:$0xff]   ;;  %v19078_v47 = vld [vmem:[#allocation11 + $0xa68] ss:$40 sps:$4 sm:$0xff]  }
 0x72e   :  { %13248 = vmatpush1.bf16.msra.mxu1 %v19024_v6  ;;  %v19075_v6 = vld [vmem:[#allocation11 + $0x2860] ss:$40 sps:$4 sm:$0xff]  }
 0x72f   :  { %13076 = vmatpush1.bf16.msra.mxu0 %v19021_v15  ;;  %13249 = vmatprep.subr.bf16.mxu1 %v19032_v12  ;;  %v19086_v15 = vld [vmem:[#allocation11 + $0xabc] ss:$40 sps:$4 sm:$0xff]  }
 0x730   :  { %13077 = vmatprep.subr.bf16.mxu0 %v19029_v29  ;;  %v19083_v12 = vld [vmem:[#allocation11 + $0x28b4] ss:$40 sps:$4 sm:$0xff]   ;;  %v19084_v29 = vld [vmem:[#allocation11 + $0xab8] ss:$40 sps:$4 sm:$0xff]  }
 0x732   :  { %13250 = vmatpush1.bf16.msra.mxu1 %v19030_v2  ;;  %v19081_v2 = vld [vmem:[#allocation11 + $0x28b0] ss:$40 sps:$4 sm:$0xff]  }
 0x733   :  { %13078 = vmatpush1.bf16.msra.mxu0 %v19027_v45  ;;  %13251 = vmatprep.subr.bf16.mxu1 %v19038_v43  ;;  %v19092_v45 = vld [vmem:[#allocation11 + $0xb0c] ss:$40 sps:$4 sm:$0xff]  }
 0x734   :  { %13079 = vmatprep.subr.bf16.mxu0 %v19035_v9  ;;  %v19089_v43 = vld [vmem:[#allocation11 + $0x2904] ss:$40 sps:$4 sm:$0xff]   ;;  %v19090_v9 = vld [vmem:[#allocation11 + $0xb08] ss:$40 sps:$4 sm:$0xff]  }
 0x736   :  { %13252 = vmatpush1.bf16.msra.mxu1 %v19036_v44  ;;  %v19087_v44 = vld [vmem:[#allocation11 + $0x2900] ss:$40 sps:$4 sm:$0xff]  }
 0x737   :  { %13080 = vmatpush1.bf16.msra.mxu0 %v19033_v56  ;;  %13253 = vmatprep.subr.bf16.mxu1 %v19044_v36  ;;  %v19098_v56 = vld [vmem:[#allocation11 + $0xb5c] ss:$40 sps:$4 sm:$0xff]  }
 0x738   :  { %13081 = vmatprep.subr.bf16.mxu0 %v19041_v40  ;;  %v19095_v36 = vld [vmem:[#allocation11 + $0x2954] ss:$40 sps:$4 sm:$0xff]   ;;  %v19096_v40 = vld [vmem:[#allocation11 + $0xb58] ss:$40 sps:$4 sm:$0xff]  }
 0x73a   :  { %13254 = vmatpush1.bf16.msra.mxu1 %v19042_v30  ;;  %v19093_v30 = vld [vmem:[#allocation11 + $0x2950] ss:$40 sps:$4 sm:$0xff]  }
 0x73b   :  { %13082 = vmatpush1.bf16.msra.mxu0 %v19039_v25  ;;  %13255 = vmatprep.subr.bf16.mxu1 %v19050_v63  ;;  %v19104_v25 = vld [vmem:[#allocation11 + $0xbac] ss:$40 sps:$4 sm:$0xff]  }
 0x73c   :  { %13083 = vmatprep.subr.bf16.mxu0 %v19047_v52  ;;  %v19101_v63 = vld [vmem:[#allocation11 + $0x29a4] ss:$40 sps:$4 sm:$0xff]   ;;  %v19102_v52 = vld [vmem:[#allocation11 + $0xba8] ss:$40 sps:$4 sm:$0xff]  }
 0x73e   :  { %13256 = vmatpush1.bf16.msra.mxu1 %v19048_v42  ;;  %v19099_v42 = vld [vmem:[#allocation11 + $0x29a0] ss:$40 sps:$4 sm:$0xff]  }
 0x73f   :  { %13084 = vmatpush1.bf16.msra.mxu0 %v19045_v61  ;;  %13257 = vmatprep.subr.bf16.mxu1 %v19056_v1  ;;  %v19110_v61 = vld [vmem:[#allocation11 + $0xbfc] ss:$40 sps:$4 sm:$0xff]  }
 0x740   :  { %13085 = vmatprep.subr.bf16.mxu0 %v19053_v11  ;;  %v19107_v1 = vld [vmem:[#allocation11 + $0x29f4] ss:$40 sps:$4 sm:$0xff]   ;;  %v19108_v11 = vld [vmem:[#allocation11 + $0xbf8] ss:$40 sps:$4 sm:$0xff]  }
 0x742   :  { %13258 = vmatpush1.bf16.msra.mxu1 %v19054_v24  ;;  %v19105_v24 = vld [vmem:[#allocation11 + $0x29f0] ss:$40 sps:$4 sm:$0xff]  }
 0x743   :  { %13086 = vmatpush1.bf16.msra.mxu0 %v19051_v37  ;;  %13259 = vmatprep.subr.bf16.mxu1 %v19062_v17  ;;  %v19116_v37 = vld [vmem:[#allocation11 + $0xc4c] ss:$40 sps:$4 sm:$0xff]  }
 0x744   :  { %13087 = vmatprep.subr.bf16.mxu0 %v19059_v16  ;;  %v19113_v17 = vld [vmem:[#allocation11 + $0x2a44] ss:$40 sps:$4 sm:$0xff]   ;;  %v19114_v16 = vld [vmem:[#allocation11 + $0xc48] ss:$40 sps:$4 sm:$0xff]  }
 0x746   :  { %13260 = vmatpush1.bf16.msra.mxu1 %v19060_v22  ;;  %v19111_v22 = vld [vmem:[#allocation11 + $0x2a40] ss:$40 sps:$4 sm:$0xff]  }
 0x747   :  { %13088 = vmatpush1.bf16.msra.mxu0 %v19057_v21  ;;  %13261 = vmatprep.subr.bf16.mxu1 %v19068_v23  ;;  %v19122_v21 = vld [vmem:[#allocation11 + $0xc9c] ss:$40 sps:$4 sm:$0xff]  }
 0x748   :  { %13089 = vmatprep.subr.bf16.mxu0 %v19065_v46  ;;  %v19119_v23 = vld [vmem:[#allocation11 + $0x2a94] ss:$40 sps:$4 sm:$0xff]   ;;  %v19120_v46 = vld [vmem:[#allocation11 + $0xc98] ss:$40 sps:$4 sm:$0xff]  }
 0x74a   :  { %13262 = vmatpush1.bf16.msra.mxu1 %v19066_v4  ;;  %v19117_v4 = vld [vmem:[#allocation11 + $0x2a90] ss:$40 sps:$4 sm:$0xff]  }
 0x74b   :  { %13090 = vmatpush1.bf16.msra.mxu0 %v19063_v27  ;;  %13274 = vmatprep.subr.bf16.mxu1 %v19074_v34  ;;  %v19128_v27 = vld [vmem:[#allocation11 + $0xcec] ss:$40 sps:$4 sm:$0xff]  }
 0x74c   :  { %13102 = vmatprep.subr.bf16.mxu0 %v19071_v62  ;;  %v19125_v34 = vld [vmem:[#allocation11 + $0x2ae4] ss:$40 sps:$4 sm:$0xff]   ;;  %v19126_v62 = vld [vmem:[#allocation11 + $0xce8] ss:$40 sps:$4 sm:$0xff]  }
 0x74d   :  { %13264 = vmatmul.mubr.bf16.vlgmr.msra.gmra.mrb[32].mxu1 %v21337_v58 }
 0x74e   :  { %13092 = vmatmul.mubr.bf16.vlgmr.msra.gmra.mrb[20].mxu0 %v21430_v32  ;;  %13275 = vmatpush1.bf16.msra.mxu1 %v19072_v48  ;;  %v19123_v48 = vld [vmem:[#allocation11 + $0x2ae0] ss:$40 sps:$4 sm:$0xff]  }
 0x74f   :  { %13103 = vmatpush1.bf16.msra.mxu0 %v19069_v60  ;;  %13134 = vmatprep.mubr.bf16.mxu0 %v21443_v49  ;;  %v19134_v60 = vld [vmem:[#allocation11 + $0xd3c] ss:$40 sps:$4 sm:$0xff]  }
 0x750   :  { %13306 = vmatprep.mubr.bf16.mxu1 %v21377_v55  ;;  %13104 = vmatprep.subr.bf16.mxu0 %v19077_v51  ;;  %v19131_v51 = vld [vmem:[#allocation11 + $0x2b34] ss:$40 sps:$4 sm:$0xff]  }
 0x751   :  { %13276 = vmatprep.subr.bf16.mxu1 %v19080_v41  ;;  %v19132_v41 = vld [vmem:[#allocation11 + $0xd38] ss:$40 sps:$4 sm:$0xff]  }
 0x752   :  { %13277 = vmatpush1.bf16.msra.mxu1 %v19078_v47  ;;  %v19129_v47 = vld [vmem:[#allocation11 + $0x2b30] ss:$40 sps:$4 sm:$0xff]  }
 0x753   :  { %13105 = vmatpush1.bf16.msra.mxu0 %v19075_v6  ;;  %13278 = vmatprep.subr.bf16.mxu1 %v19086_v15  ;;  %v19140_v6 = vld [vmem:[#allocation11 + $0xd8c] ss:$40 sps:$4 sm:$0xff]  }
 0x754   :  { %13106 = vmatprep.subr.bf16.mxu0 %v19083_v12  ;;  %v19137_v15 = vld [vmem:[#allocation11 + $0x2b84] ss:$40 sps:$4 sm:$0xff]   ;;  %v19138_v12 = vld [vmem:[#allocation11 + $0xd88] ss:$40 sps:$4 sm:$0xff]  }
 0x756   :  { %13279 = vmatpush1.bf16.msra.mxu1 %v19084_v29  ;;  %v19135_v29 = vld [vmem:[#allocation11 + $0x2b80] ss:$40 sps:$4 sm:$0xff]  }
 0x757   :  { %13107 = vmatpush1.bf16.msra.mxu0 %v19081_v2  ;;  %13280 = vmatprep.subr.bf16.mxu1 %v19092_v45  ;;  %v19146_v2 = vld [vmem:[#allocation11 + $0xddc] ss:$40 sps:$4 sm:$0xff]  }
 0x758   :  { %13108 = vmatprep.subr.bf16.mxu0 %v19089_v43  ;;  %v19143_v45 = vld [vmem:[#allocation11 + $0x2bd4] ss:$40 sps:$4 sm:$0xff]   ;;  %v19144_v43 = vld [vmem:[#allocation11 + $0xdd8] ss:$40 sps:$4 sm:$0xff]  }
 0x75a   :  { %13281 = vmatpush1.bf16.msra.mxu1 %v19090_v9  ;;  %v19141_v9 = vld [vmem:[#allocation11 + $0x2bd0] ss:$40 sps:$4 sm:$0xff]  }
 0x75b   :  { %13109 = vmatpush1.bf16.msra.mxu0 %v19087_v44  ;;  %13282 = vmatprep.subr.bf16.mxu1 %v19098_v56  ;;  %v19152_v44 = vld [vmem:[#allocation11 + $0xe2c] ss:$40 sps:$4 sm:$0xff]  }
 0x75c   :  { %13110 = vmatprep.subr.bf16.mxu0 %v19095_v36  ;;  %v19149_v56 = vld [vmem:[#allocation11 + $0x2c24] ss:$40 sps:$4 sm:$0xff]   ;;  %v19150_v36 = vld [vmem:[#allocation11 + $0xe28] ss:$40 sps:$4 sm:$0xff]  }
 0x75e   :  { %13283 = vmatpush1.bf16.msra.mxu1 %v19096_v40  ;;  %v19147_v40 = vld [vmem:[#allocation11 + $0x2c20] ss:$40 sps:$4 sm:$0xff]  }
 0x75f   :  { %13111 = vmatpush1.bf16.msra.mxu0 %v19093_v30  ;;  %13284 = vmatprep.subr.bf16.mxu1 %v19104_v25  ;;  %v19158_v30 = vld [vmem:[#allocation11 + $0xe7c] ss:$40 sps:$4 sm:$0xff]  }
 0x760   :  { %13112 = vmatprep.subr.bf16.mxu0 %v19101_v63  ;;  %v19155_v25 = vld [vmem:[#allocation11 + $0x2c74] ss:$40 sps:$4 sm:$0xff]   ;;  %v19156_v63 = vld [vmem:[#allocation11 + $0xe78] ss:$40 sps:$4 sm:$0xff]  }
 0x762   :  { %13285 = vmatpush1.bf16.msra.mxu1 %v19102_v52  ;;  %v19153_v52 = vld [vmem:[#allocation11 + $0x2c70] ss:$40 sps:$4 sm:$0xff]  }
 0x763   :  { %13113 = vmatpush1.bf16.msra.mxu0 %v19099_v42  ;;  %13286 = vmatprep.subr.bf16.mxu1 %v19110_v61  ;;  %v19164_v42 = vld [vmem:[#allocation11 + $0xecc] ss:$40 sps:$4 sm:$0xff]  }
 0x764   :  { %13114 = vmatprep.subr.bf16.mxu0 %v19107_v1  ;;  %v19161_v61 = vld [vmem:[#allocation11 + $0x2cc4] ss:$40 sps:$4 sm:$0xff]   ;;  %v19162_v1 = vld [vmem:[#allocation11 + $0xec8] ss:$40 sps:$4 sm:$0xff]  }
 0x766   :  { %13287 = vmatpush1.bf16.msra.mxu1 %v19108_v11  ;;  %v19159_v11 = vld [vmem:[#allocation11 + $0x2cc0] ss:$40 sps:$4 sm:$0xff]  }
 0x767   :  { %13115 = vmatpush1.bf16.msra.mxu0 %v19105_v24  ;;  %13288 = vmatprep.subr.bf16.mxu1 %v19116_v37  ;;  %v19170_v24 = vld [vmem:[#allocation11 + $0xf1c] ss:$40 sps:$4 sm:$0xff]  }
 0x768   :  { %13116 = vmatprep.subr.bf16.mxu0 %v19113_v17  ;;  %v19167_v37 = vld [vmem:[#allocation11 + $0x2d14] ss:$40 sps:$4 sm:$0xff]   ;;  %v19168_v17 = vld [vmem:[#allocation11 + $0xf18] ss:$40 sps:$4 sm:$0xff]  }
 0x76a   :  { %13289 = vmatpush1.bf16.msra.mxu1 %v19114_v16  ;;  %v19165_v16 = vld [vmem:[#allocation11 + $0x2d10] ss:$40 sps:$4 sm:$0xff]  }
 0x76b   :  { %13117 = vmatpush1.bf16.msra.mxu0 %v19111_v22  ;;  %13290 = vmatprep.subr.bf16.mxu1 %v19122_v21  ;;  %v19173_v22 = vld [vmem:[#allocation11 + $0x2d64] ss:$40 sps:$4 sm:$0xff]  }
 0x76c   :  { %13118 = vmatprep.subr.bf16.mxu0 %v19119_v23  ;;  %v19176_v21 = vld [vmem:[#allocation11 + $0xf6c] ss:$40 sps:$4 sm:$0xff]   ;;  %v19174_v23 = vld [vmem:[#allocation11 + $0xf68] ss:$40 sps:$4 sm:$0xff]  }
 0x76e   :  { %13291 = vmatpush1.bf16.msra.mxu1 %v19120_v46  ;;  %v19171_v46 = vld [vmem:[#allocation11 + $0x2d60] ss:$40 sps:$4 sm:$0xff]  }
 0x76f   :  { %13119 = vmatpush1.bf16.msra.mxu0 %v19117_v4  ;;  %13292 = vmatprep.subr.bf16.mxu1 %v19128_v27  ;;  %v19182_v4 = vld [vmem:[#allocation11 + $0xfbc] ss:$40 sps:$4 sm:$0xff]  }
 0x770   :  { %13120 = vmatprep.subr.bf16.mxu0 %v19125_v34  ;;  %v19179_v27 = vld [vmem:[#allocation11 + $0x2db4] ss:$40 sps:$4 sm:$0xff]   ;;  %v19180_v34 = vld [vmem:[#allocation11 + $0xfb8] ss:$40 sps:$4 sm:$0xff]  }
 0x772   :  { %13293 = vmatpush1.bf16.msra.mxu1 %v19126_v62  ;;  %v19177_v62 = vld [vmem:[#allocation11 + $0x2db0] ss:$40 sps:$4 sm:$0xff]  }
 0x773   :  { %13121 = vmatpush1.bf16.msra.mxu0 %v19123_v48  ;;  %13294 = vmatprep.subr.bf16.mxu1 %v19134_v60  ;;  %v19188_v48 = vld [vmem:[#allocation11 + $0x100c] ss:$40 sps:$4 sm:$0xff]  }
 0x774   :  { %13122 = vmatprep.subr.bf16.mxu0 %v19131_v51  ;;  %v19185_v60 = vld [vmem:[#allocation11 + $0x2e04] ss:$40 sps:$4 sm:$0xff]   ;;  %v19186_v51 = vld [vmem:[#allocation11 + $0x1008] ss:$40 sps:$4 sm:$0xff]  }
 0x776   :  { %13295 = vmatpush1.bf16.msra.mxu1 %v19132_v41  ;;  %v19183_v41 = vld [vmem:[#allocation11 + $0x2e00] ss:$40 sps:$4 sm:$0xff]  }
 0x777   :  { %13123 = vmatpush1.bf16.msra.mxu0 %v19129_v47  ;;  %13296 = vmatprep.subr.bf16.mxu1 %v19140_v6  ;;  %v19194_v47 = vld [vmem:[#allocation11 + $0x105c] ss:$40 sps:$4 sm:$0xff]  }
 0x778   :  { %13124 = vmatprep.subr.bf16.mxu0 %v19137_v15  ;;  %v19191_v6 = vld [vmem:[#allocation11 + $0x2e54] ss:$40 sps:$4 sm:$0xff]   ;;  %v19192_v15 = vld [vmem:[#allocation11 + $0x1058] ss:$40 sps:$4 sm:$0xff]  }
 0x77a   :  { %13297 = vmatpush1.bf16.msra.mxu1 %v19138_v12  ;;  %v19189_v12 = vld [vmem:[#allocation11 + $0x2e50] ss:$40 sps:$4 sm:$0xff]  }
 0x77b   :  { %13125 = vmatpush1.bf16.msra.mxu0 %v19135_v29  ;;  %13298 = vmatprep.subr.bf16.mxu1 %v19146_v2  ;;  %v19200_v29 = vld [vmem:[#allocation11 + $0x10ac] ss:$40 sps:$4 sm:$0xff]  }
 0x77c   :  { %13126 = vmatprep.subr.bf16.mxu0 %v19143_v45  ;;  %v19197_v2 = vld [vmem:[#allocation11 + $0x2ea4] ss:$40 sps:$4 sm:$0xff]   ;;  %v19198_v45 = vld [vmem:[#allocation11 + $0x10a8] ss:$40 sps:$4 sm:$0xff]  }
 0x77e   :  { %13299 = vmatpush1.bf16.msra.mxu1 %v19144_v43  ;;  %v19195_v43 = vld [vmem:[#allocation11 + $0x2ea0] ss:$40 sps:$4 sm:$0xff]  }
 0x77f   :  { %13127 = vmatpush1.bf16.msra.mxu0 %v19141_v9  ;;  %13300 = vmatprep.subr.bf16.mxu1 %v19152_v44  ;;  %v19206_v9 = vld [vmem:[#allocation11 + $0x10fc] ss:$40 sps:$4 sm:$0xff]  }
 0x780   :  { %13128 = vmatprep.subr.bf16.mxu0 %v19149_v56  ;;  %v19203_v56 = vld [vmem:[#allocation11 + $0x2ef4] ss:$40 sps:$4 sm:$0xff]  }
 0x782   :  { %13301 = vmatpush1.bf16.msra.mxu1 %v19150_v36 }
 0x783   :  { %13129 = vmatpush1.bf16.msra.mxu0 %v19147_v40  ;;  %13302 = vmatprep.subr.bf16.mxu1 %v19158_v30  ;;  %v19204_v30 = vld [vmem:[#allocation11 + $0x10f8] ss:$40 sps:$4 sm:$0xff]  }
 0x784   :  { %13130 = vmatprep.subr.bf16.mxu0 %v19155_v25 }
 0x786   :  { %13303 = vmatpush1.bf16.msra.mxu1 %v19156_v63  ;;  %v19201_v63 = vld [vmem:[#allocation11 + $0x2ef0] ss:$40 sps:$4 sm:$0xff]  }
 0x787   :  { %13131 = vmatpush1.bf16.msra.mxu0 %v19153_v52  ;;  %13304 = vmatprep.subr.bf16.mxu1 %v19164_v42  ;;  %v19212_v52 = vld [vmem:[#allocation11 + $0x114c] ss:$40 sps:$4 sm:$0xff]  }
 0x788   :  { %13132 = vmatprep.subr.bf16.mxu0 %v19161_v61  ;;  %v19209_v42 = vld [vmem:[#allocation11 + $0x2f44] ss:$40 sps:$4 sm:$0xff]   ;;  %v19210_v61 = vld [vmem:[#allocation11 + $0x1148] ss:$40 sps:$4 sm:$0xff]  }
 0x78a   :  { %13305 = vmatpush1.bf16.msra.mxu1 %v19162_v1  ;;  %v19207_v1 = vld [vmem:[#allocation11 + $0x2f40] ss:$40 sps:$4 sm:$0xff]  }
 0x78b   :  { %13133 = vmatpush1.bf16.msra.mxu0 %v19159_v11  ;;  %13317 = vmatprep.subr.bf16.mxu1 %v19170_v24  ;;  %v19218_v11 = vld [vmem:[#allocation11 + $0x119c] ss:$40 sps:$4 sm:$0xff]  }
 0x78c   :  { %13145 = vmatprep.subr.bf16.mxu0 %v19167_v37  ;;  %v19215_v24 = vld [vmem:[#allocation11 + $0x2f94] ss:$40 sps:$4 sm:$0xff]   ;;  %v19216_v37 = vld [vmem:[#allocation11 + $0x1198] ss:$40 sps:$4 sm:$0xff]  }
 0x78d   :  { %13307 = vmatmul.mubr.bf16.vlgmr.msra.gmra.mrb[32].mxu1 %v21383_v59 }
 0x78e   :  { %13135 = vmatmul.mubr.bf16.vlgmr.msra.gmra.mrb[20].mxu0 %v21450_v18  ;;  %13318 = vmatpush1.bf16.msra.mxu1 %v19168_v17  ;;  %v19213_v17 = vld [vmem:[#allocation11 + $0x2f90] ss:$40 sps:$4 sm:$0xff]  }
 0x78f   :  { %13146 = vmatpush1.bf16.msra.mxu0 %v19165_v16  ;;  %13177 = vmatprep.mubr.bf16.mxu0 %v21453_v13  ;;  %v19224_v16 = vld [vmem:[#allocation11 + $0x11ec] ss:$40 sps:$4 sm:$0xff]  }
 0x790   :  { %13349 = vmatprep.mubr.bf16.mxu1 %v21327_v0  ;;  %13147 = vmatprep.subr.bf16.mxu0 %v19173_v22  ;;  %v19221_v22 = vld [vmem:[#allocation11 + $0x2fe4] ss:$40 sps:$4 sm:$0xff]  }
 0x791   :  { %13319 = vmatprep.subr.bf16.mxu1 %v19176_v21  ;;  %v19222_v21 = vld [vmem:[#allocation11 + $0x11e8] ss:$40 sps:$4 sm:$0xff]  }
 0x792   :  { %13320 = vmatpush1.bf16.msra.mxu1 %v19174_v23  ;;  %v19219_v23 = vld [vmem:[#allocation11 + $0x2fe0] ss:$40 sps:$4 sm:$0xff]  }
 0x793   :  { %13148 = vmatpush1.bf16.msra.mxu0 %v19171_v46  ;;  %13321 = vmatprep.subr.bf16.mxu1 %v19182_v4  ;;  %v19230_v46 = vld [vmem:[#allocation11 + $0x123c] ss:$40 sps:$4 sm:$0xff]  }
 0x794   :  { %13149 = vmatprep.subr.bf16.mxu0 %v19179_v27  ;;  %v19227_v4 = vld [vmem:[#allocation11 + $0x3034] ss:$40 sps:$4 sm:$0xff]   ;;  %v19228_v27 = vld [vmem:[#allocation11 + $0x1238] ss:$40 sps:$4 sm:$0xff]  }
 0x796   :  { %13322 = vmatpush1.bf16.msra.mxu1 %v19180_v34  ;;  %v19225_v34 = vld [vmem:[#allocation11 + $0x3030] ss:$40 sps:$4 sm:$0xff]  }
 0x797   :  { %13150 = vmatpush1.bf16.msra.mxu0 %v19177_v62  ;;  %13323 = vmatprep.subr.bf16.mxu1 %v19188_v48  ;;  %v19236_v62 = vld [vmem:[#allocation11 + $0x128c] ss:$40 sps:$4 sm:$0xff]  }
 0x798   :  { %13151 = vmatprep.subr.bf16.mxu0 %v19185_v60  ;;  %v19233_v48 = vld [vmem:[#allocation11 + $0x3084] ss:$40 sps:$4 sm:$0xff]   ;;  %v19234_v60 = vld [vmem:[#allocation11 + $0x1288] ss:$40 sps:$4 sm:$0xff]  }
 0x79a   :  { %13324 = vmatpush1.bf16.msra.mxu1 %v19186_v51  ;;  %v19231_v51 = vld [vmem:[#allocation11 + $0x3080] ss:$40 sps:$4 sm:$0xff]  }
 0x79b   :  { %13152 = vmatpush1.bf16.msra.mxu0 %v19183_v41  ;;  %13325 = vmatprep.subr.bf16.mxu1 %v19194_v47  ;;  %v19242_v41 = vld [vmem:[#allocation11 + $0x12dc] ss:$40 sps:$4 sm:$0xff]  }
 0x79c   :  { %13153 = vmatprep.subr.bf16.mxu0 %v19191_v6  ;;  %v19239_v47 = vld [vmem:[#allocation11 + $0x30d4] ss:$40 sps:$4 sm:$0xff]   ;;  %v19240_v6 = vld [vmem:[#allocation11 + $0x12d8] ss:$40 sps:$4 sm:$0xff]  }
 0x79e   :  { %13326 = vmatpush1.bf16.msra.mxu1 %v19192_v15  ;;  %v19237_v15 = vld [vmem:[#allocation11 + $0x30d0] ss:$40 sps:$4 sm:$0xff]  }
 0x79f   :  { %13154 = vmatpush1.bf16.msra.mxu0 %v19189_v12  ;;  %13327 = vmatprep.subr.bf16.mxu1 %v19200_v29  ;;  %v19248_v12 = vld [vmem:[#allocation11 + $0x132c] ss:$40 sps:$4 sm:$0xff]  }
 0x7a0   :  { %v21539_v44 = vpop.f32.mrb[28].mxu1  ;;  %13155 = vmatprep.subr.bf16.mxu0 %v19197_v2  ;;  %v19245_v29 = vld [vmem:[#allocation11 + $0x3124] ss:$40 sps:$4 sm:$0xff]   ;;  %v19246_v2 = vld [vmem:[#allocation11 + $0x1328] ss:$40 sps:$4 sm:$0xff]  }
 0x7a1   :  { %v21541_v36 = vpop.f32.mrb[29].mxu1 }
 0x7a2   :  { %v21543_v40 = vpop.f32.mrb[30].mxu1  ;;  %13328 = vmatpush1.bf16.msra.mxu1 %v19198_v45  ;;  %v19243_v45 = vld [vmem:[#allocation11 + $0x3120] ss:$40 sps:$4 sm:$0xff]  }
 0x7a3   :  { %13156 = vmatpush1.bf16.msra.mxu0 %v19195_v43  ;;  %v21545_v25 = vpop.f32.mrb[31].mxu1  ;;  %13329 = vmatprep.subr.bf16.mxu1 %v19206_v9  ;;  %v19254_v43 = vld [vmem:[#allocation11 + $0x137c] ss:$40 sps:$4 sm:$0xff]  }
 0x7a4   :  { %13157 = vmatprep.subr.bf16.mxu0 %v19203_v56  ;;  %v19251_v9 = vld [vmem:[#allocation11 + $0x3174] ss:$40 sps:$4 sm:$0xff]   ;;  %v19252_v56 = vld [vmem:[#allocation11 + $0x1378] ss:$40 sps:$4 sm:$0xff]  }
 0x7a6   :  { %13330 = vmatpush1.bf16.msra.mxu1 %v19204_v30  ;;  %v19249_v30 = vld [vmem:[#allocation11 + $0x3170] ss:$40 sps:$4 sm:$0xff]  }
 0x7a7   :  { %13158 = vmatpush1.bf16.msra.mxu0 %v19201_v63  ;;  %13331 = vmatprep.subr.bf16.mxu1 %v19212_v52  ;;  %v19260_v63 = vld [vmem:[#allocation11 + $0x13cc] ss:$40 sps:$4 sm:$0xff]  }
 0x7a8   :  { %13159 = vmatprep.subr.bf16.mxu0 %v19209_v42  ;;  %v19257_v52 = vld [vmem:[#allocation11 + $0x31c4] ss:$40 sps:$4 sm:$0xff]   ;;  %v19258_v42 = vld [vmem:[#allocation11 + $0x13c8] ss:$40 sps:$4 sm:$0xff]  }
 0x7aa   :  { %13332 = vmatpush1.bf16.msra.mxu1 %v19210_v61  ;;  %v19255_v61 = vld [vmem:[#allocation11 + $0x31c0] ss:$40 sps:$4 sm:$0xff]  }
 0x7ab   :  { %13160 = vmatpush1.bf16.msra.mxu0 %v19207_v1  ;;  %13333 = vmatprep.subr.bf16.mxu1 %v19218_v11  ;;  %v19263_v1 = vld [vmem:[#allocation11 + $0x141c] ss:$40 sps:$4 sm:$0xff]  }
 0x7ac   :  { %13161 = vmatprep.subr.bf16.mxu0 %v19215_v24  ;;  %v19266_v11 = vld [vmem:[#allocation11 + $0x24] ss:$40 sps:$4 sm:$0xff]   ;;  %v19261_v24 = vld [vmem:[#allocation11 + $0x1418] ss:$40 sps:$4 sm:$0xff]  }
 0x7ae   :  { %13334 = vmatpush1.bf16.msra.mxu1 %v19216_v37  ;;  %v19264_v37 = vld [vmem:[#allocation11 + $0x20] ss:$40 sps:$4 sm:$0xff]  }
 0x7af   :  { %13162 = vmatpush1.bf16.msra.mxu0 %v19213_v17  ;;  %13335 = vmatprep.subr.bf16.mxu1 %v19224_v16  ;;  %v19269_v17 = vld [vmem:[#allocation11 + $0x146c] ss:$40 sps:$4 sm:$0xff]  }
 0x7b0   :  { %13163 = vmatprep.subr.bf16.mxu0 %v19221_v22  ;;  %v19272_v16 = vld [vmem:[#allocation11 + $0x74] ss:$40 sps:$4 sm:$0xff]   ;;  %v19267_v22 = vld [vmem:[#allocation11 + $0x1468] ss:$40 sps:$4 sm:$0xff]  }
 0x7b2   :  { %13336 = vmatpush1.bf16.msra.mxu1 %v19222_v21  ;;  %v19270_v21 = vld [vmem:[#allocation11 + $0x70] ss:$40 sps:$4 sm:$0xff]  }
 0x7b3   :  { %13164 = vmatpush1.bf16.msra.mxu0 %v19219_v23  ;;  %13337 = vmatprep.subr.bf16.mxu1 %v19230_v46  ;;  %v19275_v23 = vld [vmem:[#allocation11 + $0x14bc] ss:$40 sps:$4 sm:$0xff]  }
 0x7b4   :  { %13165 = vmatprep.subr.bf16.mxu0 %v19227_v4  ;;  %v19278_v46 = vld [vmem:[#allocation11 + $0xc4] ss:$40 sps:$4 sm:$0xff]   ;;  %v19273_v4 = vld [vmem:[#allocation11 + $0x14b8] ss:$40 sps:$4 sm:$0xff]  }
 0x7b6   :  { %13338 = vmatpush1.bf16.msra.mxu1 %v19228_v27  ;;  %v19276_v27 = vld [vmem:[#allocation11 + $0xc0] ss:$40 sps:$4 sm:$0xff]  }
 0x7b7   :  { %13166 = vmatpush1.bf16.msra.mxu0 %v19225_v34  ;;  %13339 = vmatprep.subr.bf16.mxu1 %v19236_v62  ;;  %v19281_v34 = vld [vmem:[#allocation11 + $0x150c] ss:$40 sps:$4 sm:$0xff]  }
 0x7b8   :  { %13167 = vmatprep.subr.bf16.mxu0 %v19233_v48  ;;  %v19284_v62 = vld [vmem:[#allocation11 + $0x114] ss:$40 sps:$4 sm:$0xff]   ;;  %v19279_v48 = vld [vmem:[#allocation11 + $0x1508] ss:$40 sps:$4 sm:$0xff]  }
 0x7ba   :  { %13340 = vmatpush1.bf16.msra.mxu1 %v19234_v60  ;;  %v19282_v60 = vld [vmem:[#allocation11 + $0x110] ss:$40 sps:$4 sm:$0xff]  }
 0x7bb   :  { %13168 = vmatpush1.bf16.msra.mxu0 %v19231_v51  ;;  %13341 = vmatprep.subr.bf16.mxu1 %v19242_v41  ;;  %v19287_v51 = vld [vmem:[#allocation11 + $0x155c] ss:$40 sps:$4 sm:$0xff]  }
 0x7bc   :  { %13169 = vmatprep.subr.bf16.mxu0 %v19239_v47  ;;  %v19290_v41 = vld [vmem:[#allocation11 + $0x164] ss:$40 sps:$4 sm:$0xff]   ;;  %v19288_v47 = vld [vmem:[#allocation11 + $0x160] ss:$40 sps:$4 sm:$0xff]  }
 0x7be   :  { %13342 = vmatpush1.bf16.msra.mxu1 %v19240_v6  ;;  %v19293_v6 = vld [vmem:[#allocation11 + $0x15ac] ss:$40 sps:$4 sm:$0xff]  }
 0x7bf   :  { %13170 = vmatpush1.bf16.msra.mxu0 %v19237_v15  ;;  %13343 = vmatprep.subr.bf16.mxu1 %v19248_v12  ;;  %v19296_v15 = vld [vmem:[#allocation11 + $0x1b4] ss:$40 sps:$4 sm:$0xff]   ;;  %v19291_v12 = vld [vmem:[#allocation11 + $0x15a8] ss:$40 sps:$4 sm:$0xff]  }
 0x7c0   :  { %13171 = vmatprep.subr.bf16.mxu0 %v19245_v29  ;;  %v19294_v29 = vld [vmem:[#allocation11 + $0x1b0] ss:$40 sps:$4 sm:$0xff]  }
 0x7c2   :  { %13344 = vmatpush1.bf16.msra.mxu1 %v19246_v2  ;;  %v19299_v2 = vld [vmem:[#allocation11 + $0x15fc] ss:$40 sps:$4 sm:$0xff]  }
 0x7c3   :  { %13172 = vmatpush1.bf16.msra.mxu0 %v19243_v45  ;;  %13345 = vmatprep.subr.bf16.mxu1 %v19254_v43  ;;  %v19302_v45 = vld [vmem:[#allocation11 + $0x204] ss:$40 sps:$4 sm:$0xff]   ;;  %v19297_v43 = vld [vmem:[#allocation11 + $0x15f8] ss:$40 sps:$4 sm:$0xff]  }
 0x7c4   :  { %13173 = vmatprep.subr.bf16.mxu0 %v19251_v9  ;;  %v19300_v9 = vld [vmem:[#allocation11 + $0x200] ss:$40 sps:$4 sm:$0xff]  }
 0x7c6   :  { %13346 = vmatpush1.bf16.msra.mxu1 %v19252_v56  ;;  %v19305_v56 = vld [vmem:[#allocation11 + $0x164c] ss:$40 sps:$4 sm:$0xff]  }
 0x7c7   :  { %13174 = vmatpush1.bf16.msra.mxu0 %v19249_v30  ;;  %13347 = vmatprep.subr.bf16.mxu1 %v19260_v63  ;;  %v19308_v30 = vld [vmem:[#allocation11 + $0x254] ss:$40 sps:$4 sm:$0xff]   ;;  %v19303_v63 = vld [vmem:[#allocation11 + $0x1648] ss:$40 sps:$4 sm:$0xff]  }
 0x7c8   :  { %13175 = vmatprep.subr.bf16.mxu0 %v19257_v52  ;;  %v19306_v52 = vld [vmem:[#allocation11 + $0x250] ss:$40 sps:$4 sm:$0xff]  }
 0x7ca   :  { %13348 = vmatpush1.bf16.msra.mxu1 %v19258_v42  ;;  %v19311_v42 = vld [vmem:[#allocation11 + $0x169c] ss:$40 sps:$4 sm:$0xff]  }
 0x7cb   :  { %13176 = vmatpush1.bf16.msra.mxu0 %v19255_v61  ;;  %13360 = vmatprep.subr.bf16.mxu1 %v19263_v1  ;;  %v19314_v61 = vld [vmem:[#allocation11 + $0x2a4] ss:$40 sps:$4 sm:$0xff]   ;;  %v19309_v1 = vld [vmem:[#allocation11 + $0x1698] ss:$40 sps:$4 sm:$0xff]  }
 0x7cc   :  { %13618 = vmatprep.subr.bf16.mxu0 %v19266_v11  ;;  %v19312_v11 = vld [vmem:[#allocation11 + $0x2a0] ss:$40 sps:$4 sm:$0xff]  }
 0x7cd   :  { %13350 = vmatmul.mubr.bf16.vlgmr.msra.gmra.mrb[32].mxu1 %v21331_v57 }
 0x7ce   :  { %13178 = vmatmul.mubr.bf16.vlgmr.msra.gmra.mrb[20].mxu0 %v21455_v35  ;;  %13361 = vmatpush1.bf16.msra.mxu1 %v19261_v24  ;;  %v19317_v24 = vld [vmem:[#allocation11 + $0x16ec] ss:$40 sps:$4 sm:$0xff]  }
 0x7cf   :  { %13392 = vmatprep.mubr.bf16.mxu1 %v21335_v14  ;;  %13619 = vmatpush1.bf16.msra.mxu0 %v19264_v37  ;;  %v19320_v37 = vld [vmem:[#allocation11 + $0x2f4] ss:$40 sps:$4 sm:$0xff]  }
 0x7d0   :  { %13650 = vmatprep.mubr.bf16.mxu0 %v21325_v8  ;;  %13362 = vmatprep.subr.bf16.mxu1 %v19269_v17  ;;  %v19285_v8 = vld [vmem:[#allocation11 + $0x1558] ss:$40 sps:$4 sm:$0xff]   ;;  %v19315_v17 = vld [vmem:[#allocation11 + $0x16e8] ss:$40 sps:$4 sm:$0xff]  }
 0x7d1   :  { %13620 = vmatprep.subr.bf16.mxu0 %v19272_v16  ;;  %v19318_v16 = vld [vmem:[#allocation11 + $0x2f0] ss:$40 sps:$4 sm:$0xff]  }
 0x7d2   :  { %13363 = vmatpush1.bf16.msra.mxu1 %v19267_v22  ;;  %v19323_v22 = vld [vmem:[#allocation11 + $0x173c] ss:$40 sps:$4 sm:$0xff]  }
 0x7d3   :  { %13621 = vmatpush1.bf16.msra.mxu0 %v19270_v21  ;;  %13364 = vmatprep.subr.bf16.mxu1 %v19275_v23  ;;  %v19326_v21 = vld [vmem:[#allocation11 + $0x344] ss:$40 sps:$4 sm:$0xff]   ;;  %v19321_v23 = vld [vmem:[#allocation11 + $0x1738] ss:$40 sps:$4 sm:$0xff]  }
 0x7d4   :  { %13622 = vmatprep.subr.bf16.mxu0 %v19278_v46  ;;  %v19324_v46 = vld [vmem:[#allocation11 + $0x340] ss:$40 sps:$4 sm:$0xff]  }
 0x7d6   :  { %13365 = vmatpush1.bf16.msra.mxu1 %v19273_v4  ;;  %v19329_v4 = vld [vmem:[#allocation11 + $0x178c] ss:$40 sps:$4 sm:$0xff]  }
 0x7d7   :  { %13623 = vmatpush1.bf16.msra.mxu0 %v19276_v27  ;;  %13366 = vmatprep.subr.bf16.mxu1 %v19281_v34  ;;  %v19332_v27 = vld [vmem:[#allocation11 + $0x394] ss:$40 sps:$4 sm:$0xff]   ;;  %v19327_v34 = vld [vmem:[#allocation11 + $0x1788] ss:$40 sps:$4 sm:$0xff]  }
 0x7d8   :  { %13624 = vmatprep.subr.bf16.mxu0 %v19284_v62  ;;  %v19330_v62 = vld [vmem:[#allocation11 + $0x390] ss:$40 sps:$4 sm:$0xff]  }
 0x7da   :  { %13367 = vmatpush1.bf16.msra.mxu1 %v19279_v48  ;;  %v19335_v48 = vld [vmem:[#allocation11 + $0x17dc] ss:$40 sps:$4 sm:$0xff]  }
 0x7db   :  { %13625 = vmatpush1.bf16.msra.mxu0 %v19282_v60  ;;  %13368 = vmatprep.subr.bf16.mxu1 %v19287_v51  ;;  %v19338_v60 = vld [vmem:[#allocation11 + $0x3e4] ss:$40 sps:$4 sm:$0xff]   ;;  %v19333_v51 = vld [vmem:[#allocation11 + $0x17d8] ss:$40 sps:$4 sm:$0xff]  }
 0x7dc   :  { %13626 = vmatprep.subr.bf16.mxu0 %v19290_v41  ;;  %v19336_v41 = vld [vmem:[#allocation11 + $0x3e0] ss:$40 sps:$4 sm:$0xff]  }
 0x7de   :  { %13369 = vmatpush1.bf16.msra.mxu1 %v19285_v8  ;;  %v19341_v8 = vld [vmem:[#allocation11 + $0x182c] ss:$40 sps:$4 sm:$0xff]  }
 0x7df   :  { %13627 = vmatpush1.bf16.msra.mxu0 %v19288_v47  ;;  %13370 = vmatprep.subr.bf16.mxu1 %v19293_v6  ;;  %v19344_v47 = vld [vmem:[#allocation11 + $0x434] ss:$40 sps:$4 sm:$0xff]   ;;  %v19339_v6 = vld [vmem:[#allocation11 + $0x1828] ss:$40 sps:$4 sm:$0xff]  }
 0x7e0   :  { %13628 = vmatprep.subr.bf16.mxu0 %v19296_v15  ;;  %v19342_v15 = vld [vmem:[#allocation11 + $0x430] ss:$40 sps:$4 sm:$0xff]  }
 0x7e2   :  { %13371 = vmatpush1.bf16.msra.mxu1 %v19291_v12  ;;  %v19347_v12 = vld [vmem:[#allocation11 + $0x187c] ss:$40 sps:$4 sm:$0xff]  }
 0x7e3   :  { %13629 = vmatpush1.bf16.msra.mxu0 %v19294_v29  ;;  %13372 = vmatprep.subr.bf16.mxu1 %v19299_v2  ;;  %v19350_v29 = vld [vmem:[#allocation11 + $0x484] ss:$40 sps:$4 sm:$0xff]   ;;  %v19345_v2 = vld [vmem:[#allocation11 + $0x1878] ss:$40 sps:$4 sm:$0xff]  }
 0x7e4   :  { %13630 = vmatprep.subr.bf16.mxu0 %v19302_v45  ;;  %v19348_v45 = vld [vmem:[#allocation11 + $0x480] ss:$40 sps:$4 sm:$0xff]  }
 0x7e6   :  { %13373 = vmatpush1.bf16.msra.mxu1 %v19297_v43  ;;  %v19353_v43 = vld [vmem:[#allocation11 + $0x18cc] ss:$40 sps:$4 sm:$0xff]  }
 0x7e7   :  { %13631 = vmatpush1.bf16.msra.mxu0 %v19300_v9  ;;  %13374 = vmatprep.subr.bf16.mxu1 %v19305_v56  ;;  %v19356_v9 = vld [vmem:[#allocation11 + $0x4d4] ss:$40 sps:$4 sm:$0xff]   ;;  %v19351_v56 = vld [vmem:[#allocation11 + $0x18c8] ss:$40 sps:$4 sm:$0xff]  }
 0x7e8   :  { %13632 = vmatprep.subr.bf16.mxu0 %v19308_v30  ;;  %v19354_v30 = vld [vmem:[#allocation11 + $0x4d0] ss:$40 sps:$4 sm:$0xff]  }
 0x7ea   :  { %13375 = vmatpush1.bf16.msra.mxu1 %v19303_v63  ;;  %v19359_v63 = vld [vmem:[#allocation11 + $0x191c] ss:$40 sps:$4 sm:$0xff]  }
 0x7eb   :  { %13633 = vmatpush1.bf16.msra.mxu0 %v19306_v52  ;;  %13376 = vmatprep.subr.bf16.mxu1 %v19311_v42  ;;  %v19362_v52 = vld [vmem:[#allocation11 + $0x524] ss:$40 sps:$4 sm:$0xff]   ;;  %v19357_v42 = vld [vmem:[#allocation11 + $0x1918] ss:$40 sps:$4 sm:$0xff]  }
 0x7ec   :  { %13634 = vmatprep.subr.bf16.mxu0 %v19314_v61  ;;  %v19360_v61 = vld [vmem:[#allocation11 + $0x520] ss:$40 sps:$4 sm:$0xff]  }
 0x7ee   :  { %13377 = vmatpush1.bf16.msra.mxu1 %v19309_v1  ;;  %v19365_v1 = vld [vmem:[#allocation11 + $0x196c] ss:$40 sps:$4 sm:$0xff]  }
 0x7ef   :  { %13635 = vmatpush1.bf16.msra.mxu0 %v19312_v11  ;;  %13378 = vmatprep.subr.bf16.mxu1 %v19317_v24  ;;  %v19368_v11 = vld [vmem:[#allocation11 + $0x574] ss:$40 sps:$4 sm:$0xff]   ;;  %v19363_v24 = vld [vmem:[#allocation11 + $0x1968] ss:$40 sps:$4 sm:$0xff]  }
 0x7f0   :  { %13636 = vmatprep.subr.bf16.mxu0 %v19320_v37  ;;  %v19366_v37 = vld [vmem:[#allocation11 + $0x570] ss:$40 sps:$4 sm:$0xff]  }
 0x7f2   :  { %13379 = vmatpush1.bf16.msra.mxu1 %v19315_v17  ;;  %v19371_v17 = vld [vmem:[#allocation11 + $0x19bc] ss:$40 sps:$4 sm:$0xff]  }
 0x7f3   :  { %13637 = vmatpush1.bf16.msra.mxu0 %v19318_v16  ;;  %13380 = vmatprep.subr.bf16.mxu1 %v19323_v22  ;;  %v19374_v16 = vld [vmem:[#allocation11 + $0x5c4] ss:$40 sps:$4 sm:$0xff]   ;;  %v19369_v22 = vld [vmem:[#allocation11 + $0x19b8] ss:$40 sps:$4 sm:$0xff]  }
 0x7f4   :  { %13638 = vmatprep.subr.bf16.mxu0 %v19326_v21  ;;  %v19372_v21 = vld [vmem:[#allocation11 + $0x5c0] ss:$40 sps:$4 sm:$0xff]  }
 0x7f6   :  { %13381 = vmatpush1.bf16.msra.mxu1 %v19321_v23  ;;  %v19377_v23 = vld [vmem:[#allocation11 + $0x1a0c] ss:$40 sps:$4 sm:$0xff]  }
 0x7f7   :  { %13639 = vmatpush1.bf16.msra.mxu0 %v19324_v46  ;;  %13382 = vmatprep.subr.bf16.mxu1 %v19329_v4  ;;  %v19375_v46 = vld [vmem:[#allocation11 + $0x1a08] ss:$40 sps:$4 sm:$0xff]  }
 0x7f8   :  { %13640 = vmatprep.subr.bf16.mxu0 %v19332_v27  ;;  %v19378_v4 = vld [vmem:[#allocation11 + $0x610] ss:$40 sps:$4 sm:$0xff]   ;;  %v19383_v27 = vld [vmem:[#allocation11 + $0x1a5c] ss:$40 sps:$4 sm:$0xff]  }
 0x7fa   :  { %13383 = vmatpush1.bf16.msra.mxu1 %v19327_v34  ;;  %v19386_v34 = vld [vmem:[#allocation11 + $0x664] ss:$40 sps:$4 sm:$0xff]  }
 0x7fb   :  { %13641 = vmatpush1.bf16.msra.mxu0 %v19330_v62  ;;  %13384 = vmatprep.subr.bf16.mxu1 %v19335_v48  ;;  %v19384_v62 = vld [vmem:[#allocation11 + $0x660] ss:$40 sps:$4 sm:$0xff]   ;;  %v19389_v48 = vld [vmem:[#allocation11 + $0x1aac] ss:$40 sps:$4 sm:$0xff]  }
 0x7fc   :  { %13642 = vmatprep.subr.bf16.mxu0 %v19338_v60  ;;  %v19392_v60 = vld [vmem:[#allocation11 + $0x6b4] ss:$40 sps:$4 sm:$0xff]  }
 0x7fe   :  { %13385 = vmatpush1.bf16.msra.mxu1 %v19333_v51  ;;  %v19387_v51 = vld [vmem:[#allocation11 + $0x1aa8] ss:$40 sps:$4 sm:$0xff]  }
 0x7ff   :  { %13643 = vmatpush1.bf16.msra.mxu0 %v19336_v41  ;;  %13386 = vmatprep.subr.bf16.mxu1 %v19341_v8  ;;  %v19390_v41 = vld [vmem:[#allocation11 + $0x6b0] ss:$40 sps:$4 sm:$0xff]   ;;  %v19395_v8 = vld [vmem:[#allocation11 + $0x1afc] ss:$40 sps:$4 sm:$0xff]  }
 0x800   :  { %13644 = vmatprep.subr.bf16.mxu0 %v19344_v47  ;;  %v19398_v47 = vld [vmem:[#allocation11 + $0x704] ss:$40 sps:$4 sm:$0xff]  }
 0x802   :  { %13387 = vmatpush1.bf16.msra.mxu1 %v19339_v6  ;;  %v19393_v6 = vld [vmem:[#allocation11 + $0x1af8] ss:$40 sps:$4 sm:$0xff]  }
 0x803   :  { %13645 = vmatpush1.bf16.msra.mxu0 %v19342_v15  ;;  %13388 = vmatprep.subr.bf16.mxu1 %v19347_v12  ;;  %v19396_v15 = vld [vmem:[#allocation11 + $0x700] ss:$40 sps:$4 sm:$0xff]   ;;  %v19401_v12 = vld [vmem:[#allocation11 + $0x1b4c] ss:$40 sps:$4 sm:$0xff]  }
 0x804   :  { %13646 = vmatprep.subr.bf16.mxu0 %v19350_v29  ;;  %v19404_v29 = vld [vmem:[#allocation11 + $0x754] ss:$40 sps:$4 sm:$0xff]  }
 0x806   :  { %13389 = vmatpush1.bf16.msra.mxu1 %v19345_v2  ;;  %v19399_v2 = vld [vmem:[#allocation11 + $0x1b48] ss:$40 sps:$4 sm:$0xff]  }
 0x807   :  { %13647 = vmatpush1.bf16.msra.mxu0 %v19348_v45  ;;  %13390 = vmatprep.subr.bf16.mxu1 %v19353_v43  ;;  %v19402_v45 = vld [vmem:[#allocation11 + $0x750] ss:$40 sps:$4 sm:$0xff]   ;;  %v19407_v43 = vld [vmem:[#allocation11 + $0x1b9c] ss:$40 sps:$4 sm:$0xff]  }
 0x808   :  { %13648 = vmatprep.subr.bf16.mxu0 %v19356_v9  ;;  %v19410_v9 = vld [vmem:[#allocation11 + $0x7a4] ss:$40 sps:$4 sm:$0xff]  }
 0x80a   :  { %13391 = vmatpush1.bf16.msra.mxu1 %v19351_v56  ;;  %v19405_v56 = vld [vmem:[#allocation11 + $0x1b98] ss:$40 sps:$4 sm:$0xff]  }
 0x80b   :  { %13649 = vmatpush1.bf16.msra.mxu0 %v19354_v30  ;;  %13403 = vmatprep.subr.bf16.mxu1 %v19359_v63  ;;  %v19408_v30 = vld [vmem:[#allocation11 + $0x7a0] ss:$40 sps:$4 sm:$0xff]   ;;  %v19413_v63 = vld [vmem:[#allocation11 + $0x1bec] ss:$40 sps:$4 sm:$0xff]  }
 0x80c   :  { %13661 = vmatprep.subr.bf16.mxu0 %v19362_v52  ;;  %v19416_v52 = vld [vmem:[#allocation11 + $0x7f4] ss:$40 sps:$4 sm:$0xff]  }
 0x80d   :  { %13393 = vmatmul.mubr.bf16.vlgmr.msra.gmra.mrb[32].mxu1 %v21339_v31 }
 0x80e   :  { %13651 = vmatmul.mubr.bf16.vlgmr.msra.gmra.mrb[24].mxu0 %v21329_v20  ;;  %13404 = vmatpush1.bf16.msra.mxu1 %v19357_v42  ;;  %v19380_v20 = vld [vmem:[#allocation11 + $0x614] ss:$40 sps:$4 sm:$0xff]   ;;  %v19411_v42 = vld [vmem:[#allocation11 + $0x1be8] ss:$40 sps:$4 sm:$0xff]  }
 0x80f   :  { %13435 = vmatprep.mubr.bf16.mxu1 %v21379_v26  ;;  %13662 = vmatpush1.bf16.msra.mxu0 %v19360_v61  ;;  %v19414_v61 = vld [vmem:[#allocation11 + $0x7f0] ss:$40 sps:$4 sm:$0xff]  }
 0x810   :  { %13693 = vmatprep.mubr.bf16.mxu0 %v21333_v54  ;;  %13405 = vmatprep.subr.bf16.mxu1 %v19365_v1  ;;  %v19381_v54 = vld [vmem:[#allocation11 + $0x1a58] ss:$40 sps:$4 sm:$0xff]   ;;  %v19419_v1 = vld [vmem:[#allocation11 + $0x1c3c] ss:$40 sps:$4 sm:$0xff]  }
 0x811   :  { %13663 = vmatprep.subr.bf16.mxu0 %v19368_v11  ;;  %v19422_v11 = vld [vmem:[#allocation11 + $0x844] ss:$40 sps:$4 sm:$0xff]  }
 0x812   :  { %13406 = vmatpush1.bf16.msra.mxu1 %v19363_v24  ;;  %v19417_v24 = vld [vmem:[#allocation11 + $0x1c38] ss:$40 sps:$4 sm:$0xff]  }
 0x813   :  { %13664 = vmatpush1.bf16.msra.mxu0 %v19366_v37  ;;  %13407 = vmatprep.subr.bf16.mxu1 %v19371_v17  ;;  %v19420_v37 = vld [vmem:[#allocation11 + $0x840] ss:$40 sps:$4 sm:$0xff]   ;;  %v19425_v17 = vld [vmem:[#allocation11 + $0x1c8c] ss:$40 sps:$4 sm:$0xff]  }
 0x814   :  { %13665 = vmatprep.subr.bf16.mxu0 %v19374_v16  ;;  %v19428_v16 = vld [vmem:[#allocation11 + $0x894] ss:$40 sps:$4 sm:$0xff]  }
 0x816   :  { %13408 = vmatpush1.bf16.msra.mxu1 %v19369_v22  ;;  %v19423_v22 = vld [vmem:[#allocation11 + $0x1c88] ss:$40 sps:$4 sm:$0xff]  }
 0x817   :  { %13666 = vmatpush1.bf16.msra.mxu0 %v19372_v21  ;;  %13409 = vmatprep.subr.bf16.mxu1 %v19377_v23  ;;  %v19426_v21 = vld [vmem:[#allocation11 + $0x890] ss:$40 sps:$4 sm:$0xff]   ;;  %v19431_v23 = vld [vmem:[#allocation11 + $0x1cdc] ss:$40 sps:$4 sm:$0xff]  }
 0x818   :  { %13667 = vmatprep.subr.bf16.mxu0 %v19380_v20  ;;  %v19434_v20 = vld [vmem:[#allocation11 + $0x8e4] ss:$40 sps:$4 sm:$0xff]  }
 0x81a   :  { %13410 = vmatpush1.bf16.msra.mxu1 %v19375_v46  ;;  %v19429_v46 = vld [vmem:[#allocation11 + $0x1cd8] ss:$40 sps:$4 sm:$0xff]  }
 0x81b   :  { %13668 = vmatpush1.bf16.msra.mxu0 %v19378_v4  ;;  %13411 = vmatprep.subr.bf16.mxu1 %v19383_v27  ;;  %v19432_v4 = vld [vmem:[#allocation11 + $0x8e0] ss:$40 sps:$4 sm:$0xff]   ;;  %v19437_v27 = vld [vmem:[#allocation11 + $0x1d2c] ss:$40 sps:$4 sm:$0xff]  }
 0x81c   :  { %13669 = vmatprep.subr.bf16.mxu0 %v19386_v34  ;;  %v19440_v34 = vld [vmem:[#allocation11 + $0x934] ss:$40 sps:$4 sm:$0xff]  }
 0x81e   :  { %13412 = vmatpush1.bf16.msra.mxu1 %v19381_v54  ;;  %v19435_v54 = vld [vmem:[#allocation11 + $0x1d28] ss:$40 sps:$4 sm:$0xff]  }
 0x81f   :  { %13670 = vmatpush1.bf16.msra.mxu0 %v19384_v62  ;;  %13413 = vmatprep.subr.bf16.mxu1 %v19389_v48  ;;  %v19438_v62 = vld [vmem:[#allocation11 + $0x930] ss:$40 sps:$4 sm:$0xff]   ;;  %v19443_v48 = vld [vmem:[#allocation11 + $0x1d7c] ss:$40 sps:$4 sm:$0xff]  }
 0x820   :  { %13671 = vmatprep.subr.bf16.mxu0 %v19392_v60  ;;  %v19446_v60 = vld [vmem:[#allocation11 + $0x984] ss:$40 sps:$4 sm:$0xff]  }
 0x822   :  { %13414 = vmatpush1.bf16.msra.mxu1 %v19387_v51  ;;  %v19441_v51 = vld [vmem:[#allocation11 + $0x1d78] ss:$40 sps:$4 sm:$0xff]  }
 0x823   :  { %13672 = vmatpush1.bf16.msra.mxu0 %v19390_v41  ;;  %13415 = vmatprep.subr.bf16.mxu1 %v19395_v8  ;;  %v19444_v41 = vld [vmem:[#allocation11 + $0x980] ss:$40 sps:$4 sm:$0xff]   ;;  %v19449_v8 = vld [vmem:[#allocation11 + $0x1dcc] ss:$40 sps:$4 sm:$0xff]  }
 0x824   :  { %13673 = vmatprep.subr.bf16.mxu0 %v19398_v47  ;;  %v19452_v47 = vld [vmem:[#allocation11 + $0x9d4] ss:$40 sps:$4 sm:$0xff]  }
 0x826   :  { %13416 = vmatpush1.bf16.msra.mxu1 %v19393_v6  ;;  %v19447_v6 = vld [vmem:[#allocation11 + $0x1dc8] ss:$40 sps:$4 sm:$0xff]  }
 0x827   :  { %13674 = vmatpush1.bf16.msra.mxu0 %v19396_v15  ;;  %13417 = vmatprep.subr.bf16.mxu1 %v19401_v12  ;;  %v19450_v15 = vld [vmem:[#allocation11 + $0x9d0] ss:$40 sps:$4 sm:$0xff]   ;;  %v19455_v12 = vld [vmem:[#allocation11 + $0x1e1c] ss:$40 sps:$4 sm:$0xff]  }
 0x828   :  { %13675 = vmatprep.subr.bf16.mxu0 %v19404_v29  ;;  %v19458_v29 = vld [vmem:[#allocation11 + $0xa24] ss:$40 sps:$4 sm:$0xff]  }
 0x82a   :  { %13418 = vmatpush1.bf16.msra.mxu1 %v19399_v2  ;;  %v19453_v2 = vld [vmem:[#allocation11 + $0x1e18] ss:$40 sps:$4 sm:$0xff]  }
 0x82b   :  { %13676 = vmatpush1.bf16.msra.mxu0 %v19402_v45  ;;  %13419 = vmatprep.subr.bf16.mxu1 %v19407_v43  ;;  %v19456_v45 = vld [vmem:[#allocation11 + $0xa20] ss:$40 sps:$4 sm:$0xff]   ;;  %v19461_v43 = vld [vmem:[#allocation11 + $0x1e6c] ss:$40 sps:$4 sm:$0xff]  }
 0x82c   :  { %13677 = vmatprep.subr.bf16.mxu0 %v19410_v9  ;;  %v19464_v9 = vld [vmem:[#allocation11 + $0xa74] ss:$40 sps:$4 sm:$0xff]  }
 0x82e   :  { %13420 = vmatpush1.bf16.msra.mxu1 %v19405_v56  ;;  %v19459_v56 = vld [vmem:[#allocation11 + $0x1e68] ss:$40 sps:$4 sm:$0xff]  }
 0x82f   :  { %13678 = vmatpush1.bf16.msra.mxu0 %v19408_v30  ;;  %13421 = vmatprep.subr.bf16.mxu1 %v19413_v63  ;;  %v19462_v30 = vld [vmem:[#allocation11 + $0xa70] ss:$40 sps:$4 sm:$0xff]   ;;  %v19467_v63 = vld [vmem:[#allocation11 + $0x1ebc] ss:$40 sps:$4 sm:$0xff]  }
 0x830   :  { %13679 = vmatprep.subr.bf16.mxu0 %v19416_v52  ;;  %v19470_v52 = vld [vmem:[#allocation11 + $0xac4] ss:$40 sps:$4 sm:$0xff]  }
 0x832   :  { %13422 = vmatpush1.bf16.msra.mxu1 %v19411_v42  ;;  %v19465_v42 = vld [vmem:[#allocation11 + $0x1eb8] ss:$40 sps:$4 sm:$0xff]  }
 0x833   :  { %13680 = vmatpush1.bf16.msra.mxu0 %v19414_v61  ;;  %13423 = vmatprep.subr.bf16.mxu1 %v19419_v1  ;;  %v19468_v61 = vld [vmem:[#allocation11 + $0xac0] ss:$40 sps:$4 sm:$0xff]   ;;  %v19473_v1 = vld [vmem:[#allocation11 + $0x1f0c] ss:$40 sps:$4 sm:$0xff]  }
 0x834   :  { %13681 = vmatprep.subr.bf16.mxu0 %v19422_v11  ;;  %v19471_v11 = vld [vmem:[#allocation11 + $0x1f08] ss:$40 sps:$4 sm:$0xff]  }
 0x836   :  { %13424 = vmatpush1.bf16.msra.mxu1 %v19417_v24  ;;  %v19474_v24 = vld [vmem:[#allocation11 + $0xb10] ss:$40 sps:$4 sm:$0xff]  }
 0x837   :  { %13682 = vmatpush1.bf16.msra.mxu0 %v19420_v37  ;;  %13425 = vmatprep.subr.bf16.mxu1 %v19425_v17  ;;  %v19479_v37 = vld [vmem:[#allocation11 + $0x1f5c] ss:$40 sps:$4 sm:$0xff]  }
 0x838   :  { %13683 = vmatprep.subr.bf16.mxu0 %v19428_v16  ;;  %v19482_v17 = vld [vmem:[#allocation11 + $0xb64] ss:$40 sps:$4 sm:$0xff]   ;;  %v19480_v16 = vld [vmem:[#allocation11 + $0xb60] ss:$40 sps:$4 sm:$0xff]  }
 0x83a   :  { %13426 = vmatpush1.bf16.msra.mxu1 %v19423_v22  ;;  %v19485_v22 = vld [vmem:[#allocation11 + $0x1fac] ss:$40 sps:$4 sm:$0xff]  }
 0x83b   :  { %13684 = vmatpush1.bf16.msra.mxu0 %v19426_v21  ;;  %13427 = vmatprep.subr.bf16.mxu1 %v19431_v23  ;;  %v19488_v21 = vld [vmem:[#allocation11 + $0xbb4] ss:$40 sps:$4 sm:$0xff]   ;;  %v19483_v23 = vld [vmem:[#allocation11 + $0x1fa8] ss:$40 sps:$4 sm:$0xff]  }
 0x83c   :  { %13685 = vmatprep.subr.bf16.mxu0 %v19434_v20  ;;  %v19486_v20 = vld [vmem:[#allocation11 + $0xbb0] ss:$40 sps:$4 sm:$0xff]  }
 0x83e   :  { %13428 = vmatpush1.bf16.msra.mxu1 %v19429_v46  ;;  %v19491_v46 = vld [vmem:[#allocation11 + $0x1ffc] ss:$40 sps:$4 sm:$0xff]  }
 0x83f   :  { %13686 = vmatpush1.bf16.msra.mxu0 %v19432_v4  ;;  %13429 = vmatprep.subr.bf16.mxu1 %v19437_v27  ;;  %v19494_v4 = vld [vmem:[#allocation11 + $0xc04] ss:$40 sps:$4 sm:$0xff]   ;;  %v19489_v27 = vld [vmem:[#allocation11 + $0x1ff8] ss:$40 sps:$4 sm:$0xff]  }
 0x840   :  { %13687 = vmatprep.subr.bf16.mxu0 %v19440_v34  ;;  %v19492_v34 = vld [vmem:[#allocation11 + $0xc00] ss:$40 sps:$4 sm:$0xff]  }
 0x842   :  { %13430 = vmatpush1.bf16.msra.mxu1 %v19435_v54  ;;  %v19497_v54 = vld [vmem:[#allocation11 + $0x204c] ss:$40 sps:$4 sm:$0xff]  }
 0x843   :  { %13688 = vmatpush1.bf16.msra.mxu0 %v19438_v62  ;;  %13431 = vmatprep.subr.bf16.mxu1 %v19443_v48  ;;  %v19500_v62 = vld [vmem:[#allocation11 + $0xc54] ss:$40 sps:$4 sm:$0xff]   ;;  %v19495_v48 = vld [vmem:[#allocation11 + $0x2048] ss:$40 sps:$4 sm:$0xff]  }
 0x844   :  { %13689 = vmatprep.subr.bf16.mxu0 %v19446_v60  ;;  %v19498_v60 = vld [vmem:[#allocation11 + $0xc50] ss:$40 sps:$4 sm:$0xff]  }
 0x846   :  { %13432 = vmatpush1.bf16.msra.mxu1 %v19441_v51  ;;  %v19503_v51 = vld [vmem:[#allocation11 + $0x209c] ss:$40 sps:$4 sm:$0xff]  }
 0x847   :  { %13690 = vmatpush1.bf16.msra.mxu0 %v19444_v41  ;;  %13433 = vmatprep.subr.bf16.mxu1 %v19449_v8  ;;  %v19506_v41 = vld [vmem:[#allocation11 + $0xca4] ss:$40 sps:$4 sm:$0xff]   ;;  %v19501_v8 = vld [vmem:[#allocation11 + $0x2098] ss:$40 sps:$4 sm:$0xff]  }
 0x848   :  { %13691 = vmatprep.subr.bf16.mxu0 %v19452_v47  ;;  %v19504_v47 = vld [vmem:[#allocation11 + $0xca0] ss:$40 sps:$4 sm:$0xff]  }
 0x84a   :  { %13434 = vmatpush1.bf16.msra.mxu1 %v19447_v6  ;;  %v19509_v6 = vld [vmem:[#allocation11 + $0x20ec] ss:$40 sps:$4 sm:$0xff]  }
 0x84b   :  { %13692 = vmatpush1.bf16.msra.mxu0 %v19450_v15  ;;  %13446 = vmatprep.subr.bf16.mxu1 %v19455_v12  ;;  %v19512_v15 = vld [vmem:[#allocation11 + $0xcf4] ss:$40 sps:$4 sm:$0xff]   ;;  %v19507_v12 = vld [vmem:[#allocation11 + $0x20e8] ss:$40 sps:$4 sm:$0xff]  }
 0x84c   :  { %13704 = vmatprep.subr.bf16.mxu0 %v19458_v29  ;;  %v19510_v29 = vld [vmem:[#allocation11 + $0xcf0] ss:$40 sps:$4 sm:$0xff]  }
 0x84d   :  { %13436 = vmatmul.mubr.bf16.vlgmr.msra.gmra.mrb[32].mxu1 %v21391_v33 }
 0x84e   :  { %13694 = vmatmul.mubr.bf16.vlgmr.msra.gmra.mrb[24].mxu0 %v21337_v58  ;;  %13447 = vmatpush1.bf16.msra.mxu1 %v19453_v2  ;;  %v19476_v58 = vld [vmem:[#allocation11 + $0xb14] ss:$40 sps:$4 sm:$0xff]  }
 0x84f   :  { %13478 = vmatprep.mubr.bf16.mxu1 %v21406_v39  ;;  %13705 = vmatpush1.bf16.msra.mxu0 %v19456_v45  ;;  %v19515_v2 = vld [vmem:[#allocation11 + $0x213c] ss:$40 sps:$4 sm:$0xff]  }
 0x850   :  { %13736 = vmatprep.mubr.bf16.mxu0 %v21377_v55  ;;  %13448 = vmatprep.subr.bf16.mxu1 %v19461_v43  ;;  %v19477_v55 = vld [vmem:[#allocation11 + $0x1f58] ss:$40 sps:$4 sm:$0xff]   ;;  %v19518_v45 = vld [vmem:[#allocation11 + $0xd44] ss:$40 sps:$4 sm:$0xff]  }
 0x851   :  { %13706 = vmatprep.subr.bf16.mxu0 %v19464_v9  ;;  %v19513_v43 = vld [vmem:[#allocation11 + $0x2138] ss:$40 sps:$4 sm:$0xff]  }
 0x852   :  { %13449 = vmatpush1.bf16.msra.mxu1 %v19459_v56  ;;  %v19516_v9 = vld [vmem:[#allocation11 + $0xd40] ss:$40 sps:$4 sm:$0xff]   ;;  %v19521_v56 = vld [vmem:[#allocation11 + $0x218c] ss:$40 sps:$4 sm:$0xff]  }
 0x853   :  { %13707 = vmatpush1.bf16.msra.mxu0 %v19462_v30  ;;  %13450 = vmatprep.subr.bf16.mxu1 %v19467_v63  ;;  %v19524_v30 = vld [vmem:[#allocation11 + $0xd94] ss:$40 sps:$4 sm:$0xff]   ;;  %v19519_v63 = vld [vmem:[#allocation11 + $0x2188] ss:$40 sps:$4 sm:$0xff]  }
 0x854   :  { %13708 = vmatprep.subr.bf16.mxu0 %v19470_v52  ;;  %v19522_v52 = vld [vmem:[#allocation11 + $0xd90] ss:$40 sps:$4 sm:$0xff]  }
 0x856   :  { %13451 = vmatpush1.bf16.msra.mxu1 %v19465_v42  ;;  %v19527_v42 = vld [vmem:[#allocation11 + $0x21dc] ss:$40 sps:$4 sm:$0xff]  }
 0x857   :  { %13709 = vmatpush1.bf16.msra.mxu0 %v19468_v61  ;;  %13452 = vmatprep.subr.bf16.mxu1 %v19473_v1  ;;  %v19530_v61 = vld [vmem:[#allocation11 + $0xde4] ss:$40 sps:$4 sm:$0xff]   ;;  %v19525_v1 = vld [vmem:[#allocation11 + $0x21d8] ss:$40 sps:$4 sm:$0xff]  }
 0x858   :  { %13710 = vmatprep.subr.bf16.mxu0 %v19476_v58  ;;  %v19528_v58 = vld [vmem:[#allocation11 + $0xde0] ss:$40 sps:$4 sm:$0xff]  }
 0x85a   :  { %13453 = vmatpush1.bf16.msra.mxu1 %v19471_v11  ;;  %v19533_v11 = vld [vmem:[#allocation11 + $0x222c] ss:$40 sps:$4 sm:$0xff]  }
 0x85b   :  { %13711 = vmatpush1.bf16.msra.mxu0 %v19474_v24  ;;  %13454 = vmatprep.subr.bf16.mxu1 %v19479_v37  ;;  %v19536_v24 = vld [vmem:[#allocation11 + $0xe34] ss:$40 sps:$4 sm:$0xff]   ;;  %v19531_v37 = vld [vmem:[#allocation11 + $0x2228] ss:$40 sps:$4 sm:$0xff]  }
 0x85c   :  { %13712 = vmatprep.subr.bf16.mxu0 %v19482_v17  ;;  %v19534_v17 = vld [vmem:[#allocation11 + $0xe30] ss:$40 sps:$4 sm:$0xff]  }
 0x85e   :  { %13455 = vmatpush1.bf16.msra.mxu1 %v19477_v55  ;;  %v19539_v55 = vld [vmem:[#allocation11 + $0x227c] ss:$40 sps:$4 sm:$0xff]  }
 0x85f   :  { %13713 = vmatpush1.bf16.msra.mxu0 %v19480_v16  ;;  %13456 = vmatprep.subr.bf16.mxu1 %v19485_v22  ;;  %v19542_v16 = vld [vmem:[#allocation11 + $0xe84] ss:$40 sps:$4 sm:$0xff]   ;;  %v19537_v22 = vld [vmem:[#allocation11 + $0x2278] ss:$40 sps:$4 sm:$0xff]  }
 0x860   :  { %13714 = vmatprep.subr.bf16.mxu0 %v19488_v21  ;;  %v19540_v21 = vld [vmem:[#allocation11 + $0xe80] ss:$40 sps:$4 sm:$0xff]  }
 0x862   :  { %13457 = vmatpush1.bf16.msra.mxu1 %v19483_v23  ;;  %v19545_v23 = vld [vmem:[#allocation11 + $0x22cc] ss:$40 sps:$4 sm:$0xff]  }
 0x863   :  { %13715 = vmatpush1.bf16.msra.mxu0 %v19486_v20  ;;  %13458 = vmatprep.subr.bf16.mxu1 %v19491_v46  ;;  %v19548_v20 = vld [vmem:[#allocation11 + $0xed4] ss:$40 sps:$4 sm:$0xff]   ;;  %v19543_v46 = vld [vmem:[#allocation11 + $0x22c8] ss:$40 sps:$4 sm:$0xff]  }
 0x864   :  { %13716 = vmatprep.subr.bf16.mxu0 %v19494_v4  ;;  %v19546_v4 = vld [vmem:[#allocation11 + $0xed0] ss:$40 sps:$4 sm:$0xff]  }
 0x866   :  { %13459 = vmatpush1.bf16.msra.mxu1 %v19489_v27  ;;  %v19551_v27 = vld [vmem:[#allocation11 + $0x231c] ss:$40 sps:$4 sm:$0xff]  }
 0x867   :  { %13717 = vmatpush1.bf16.msra.mxu0 %v19492_v34  ;;  %13460 = vmatprep.subr.bf16.mxu1 %v19497_v54  ;;  %v19554_v34 = vld [vmem:[#allocation11 + $0xf24] ss:$40 sps:$4 sm:$0xff]   ;;  %v19549_v54 = vld [vmem:[#allocation11 + $0x2318] ss:$40 sps:$4 sm:$0xff]  }
 0x868   :  { %13718 = vmatprep.subr.bf16.mxu0 %v19500_v62  ;;  %v19552_v62 = vld [vmem:[#allocation11 + $0xf20] ss:$40 sps:$4 sm:$0xff]  }
 0x86a   :  { %13461 = vmatpush1.bf16.msra.mxu1 %v19495_v48  ;;  %v19557_v48 = vld [vmem:[#allocation11 + $0x236c] ss:$40 sps:$4 sm:$0xff]  }
 0x86b   :  { %13719 = vmatpush1.bf16.msra.mxu0 %v19498_v60  ;;  %13462 = vmatprep.subr.bf16.mxu1 %v19503_v51  ;;  %v19560_v60 = vld [vmem:[#allocation11 + $0xf74] ss:$40 sps:$4 sm:$0xff]   ;;  %v19555_v51 = vld [vmem:[#allocation11 + $0x2368] ss:$40 sps:$4 sm:$0xff]  }
 0x86c   :  { %13720 = vmatprep.subr.bf16.mxu0 %v19506_v41  ;;  %v19558_v41 = vld [vmem:[#allocation11 + $0xf70] ss:$40 sps:$4 sm:$0xff]  }
 0x86e   :  { %13463 = vmatpush1.bf16.msra.mxu1 %v19501_v8  ;;  %v19563_v8 = vld [vmem:[#allocation11 + $0x23bc] ss:$40 sps:$4 sm:$0xff]  }
 0x86f   :  { %13721 = vmatpush1.bf16.msra.mxu0 %v19504_v47  ;;  %13464 = vmatprep.subr.bf16.mxu1 %v19509_v6  ;;  %v19566_v47 = vld [vmem:[#allocation11 + $0xfc4] ss:$40 sps:$4 sm:$0xff]   ;;  %v19561_v6 = vld [vmem:[#allocation11 + $0x23b8] ss:$40 sps:$4 sm:$0xff]  }
 0x870   :  { %13722 = vmatprep.subr.bf16.mxu0 %v19512_v15  ;;  %v19564_v15 = vld [vmem:[#allocation11 + $0xfc0] ss:$40 sps:$4 sm:$0xff]  }
 0x872   :  { %13465 = vmatpush1.bf16.msra.mxu1 %v19507_v12  ;;  %v19569_v12 = vld [vmem:[#allocation11 + $0x240c] ss:$40 sps:$4 sm:$0xff]  }
 0x873   :  { %13723 = vmatpush1.bf16.msra.mxu0 %v19510_v29  ;;  %13466 = vmatprep.subr.bf16.mxu1 %v19515_v2  ;;  %v19567_v29 = vld [vmem:[#allocation11 + $0x2408] ss:$40 sps:$4 sm:$0xff]  }
 0x874   :  { %13724 = vmatprep.subr.bf16.mxu0 %v19518_v45  ;;  %v19570_v2 = vld [vmem:[#allocation11 + $0x1010] ss:$40 sps:$4 sm:$0xff]   ;;  %v19575_v45 = vld [vmem:[#allocation11 + $0x245c] ss:$40 sps:$4 sm:$0xff]  }
 0x876   :  { %13467 = vmatpush1.bf16.msra.mxu1 %v19513_v43  ;;  %v19578_v43 = vld [vmem:[#allocation11 + $0x1064] ss:$40 sps:$4 sm:$0xff]  }
 0x877   :  { %13725 = vmatpush1.bf16.msra.mxu0 %v19516_v9  ;;  %13468 = vmatprep.subr.bf16.mxu1 %v19521_v56  ;;  %v19576_v9 = vld [vmem:[#allocation11 + $0x1060] ss:$40 sps:$4 sm:$0xff]   ;;  %v19581_v56 = vld [vmem:[#allocation11 + $0x24ac] ss:$40 sps:$4 sm:$0xff]  }
 0x878   :  { %13726 = vmatprep.subr.bf16.mxu0 %v19524_v30  ;;  %v19584_v30 = vld [vmem:[#allocation11 + $0x10b4] ss:$40 sps:$4 sm:$0xff]  }
 0x87a   :  { %13469 = vmatpush1.bf16.msra.mxu1 %v19519_v63  ;;  %v19579_v63 = vld [vmem:[#allocation11 + $0x24a8] ss:$40 sps:$4 sm:$0xff]  }
 0x87b   :  { %13727 = vmatpush1.bf16.msra.mxu0 %v19522_v52  ;;  %13470 = vmatprep.subr.bf16.mxu1 %v19527_v42  ;;  %v19582_v52 = vld [vmem:[#allocation11 + $0x10b0] ss:$40 sps:$4 sm:$0xff]   ;;  %v19587_v42 = vld [vmem:[#allocation11 + $0x24fc] ss:$40 sps:$4 sm:$0xff]  }
 0x87c   :  { %13728 = vmatprep.subr.bf16.mxu0 %v19530_v61  ;;  %v19590_v61 = vld [vmem:[#allocation11 + $0x1104] ss:$40 sps:$4 sm:$0xff]  }
 0x87e   :  { %13471 = vmatpush1.bf16.msra.mxu1 %v19525_v1 }
 0x87f   :  { %13729 = vmatpush1.bf16.msra.mxu0 %v19528_v58  ;;  %13472 = vmatprep.subr.bf16.mxu1 %v19533_v11  ;;  %v19585_v11 = vld [vmem:[#allocation11 + $0x24f8] ss:$40 sps:$4 sm:$0xff]  }
 0x880   :  { %13730 = vmatprep.subr.bf16.mxu0 %v19536_v24 }
 0x882   :  { %13473 = vmatpush1.bf16.msra.mxu1 %v19531_v37  ;;  %v19588_v37 = vld [vmem:[#allocation11 + $0x1100] ss:$40 sps:$4 sm:$0xff]  }
 0x883   :  { %13731 = vmatpush1.bf16.msra.mxu0 %v19534_v17  ;;  %13474 = vmatprep.subr.bf16.mxu1 %v19539_v55  ;;  %v19593_v17 = vld [vmem:[#allocation11 + $0x254c] ss:$40 sps:$4 sm:$0xff]  }
 0x884   :  { %13732 = vmatprep.subr.bf16.mxu0 %v19542_v16  ;;  %v19596_v16 = vld [vmem:[#allocation11 + $0x1154] ss:$40 sps:$4 sm:$0xff]  }
 0x886   :  { %13475 = vmatpush1.bf16.msra.mxu1 %v19537_v22  ;;  %v19591_v22 = vld [vmem:[#allocation11 + $0x2548] ss:$40 sps:$4 sm:$0xff]  }
 0x887   :  { %13733 = vmatpush1.bf16.msra.mxu0 %v19540_v21  ;;  %13476 = vmatprep.subr.bf16.mxu1 %v19545_v23  ;;  %v19594_v21 = vld [vmem:[#allocation11 + $0x1150] ss:$40 sps:$4 sm:$0xff]   ;;  %v19599_v23 = vld [vmem:[#allocation11 + $0x259c] ss:$40 sps:$4 sm:$0xff]  }
 0x888   :  { %13734 = vmatprep.subr.bf16.mxu0 %v19548_v20  ;;  %v19602_v20 = vld [vmem:[#allocation11 + $0x11a4] ss:$40 sps:$4 sm:$0xff]  }
 0x88a   :  { %13477 = vmatpush1.bf16.msra.mxu1 %v19543_v46  ;;  %v19597_v46 = vld [vmem:[#allocation11 + $0x2598] ss:$40 sps:$4 sm:$0xff]  }
 0x88b   :  { %13735 = vmatpush1.bf16.msra.mxu0 %v19546_v4  ;;  %13489 = vmatprep.subr.bf16.mxu1 %v19551_v27  ;;  %v19600_v4 = vld [vmem:[#allocation11 + $0x11a0] ss:$40 sps:$4 sm:$0xff]   ;;  %v19605_v27 = vld [vmem:[#allocation11 + $0x25ec] ss:$40 sps:$4 sm:$0xff]  }
 0x88c   :  { %13747 = vmatprep.subr.bf16.mxu0 %v19554_v34  ;;  %v19608_v34 = vld [vmem:[#allocation11 + $0x11f4] ss:$40 sps:$4 sm:$0xff]  }
 0x88d   :  { %13479 = vmatmul.mubr.bf16.vlgmr.msra.gmra.mrb[32].mxu1 %v21414_v19 }
 0x88e   :  { %13737 = vmatmul.mubr.bf16.vlgmr.msra.gmra.mrb[24].mxu0 %v21383_v59  ;;  %13490 = vmatpush1.bf16.msra.mxu1 %v19549_v54  ;;  %v19572_v59 = vld [vmem:[#allocation11 + $0x1014] ss:$40 sps:$4 sm:$0xff]   ;;  %v19603_v54 = vld [vmem:[#allocation11 + $0x25e8] ss:$40 sps:$4 sm:$0xff]  }
 0x88f   :  { %13521 = vmatprep.mubr.bf16.mxu1 %v21426_v38  ;;  %13748 = vmatpush1.bf16.msra.mxu0 %v19552_v62  ;;  %v19606_v62 = vld [vmem:[#allocation11 + $0x11f0] ss:$40 sps:$4 sm:$0xff]  }
 0x890   :  { %13779 = vmatprep.mubr.bf16.mxu0 %v21327_v0  ;;  %13491 = vmatprep.subr.bf16.mxu1 %v19557_v48  ;;  %v19573_v0 = vld [vmem:[#allocation11 + $0x2458] ss:$40 sps:$4 sm:$0xff]   ;;  %v19611_v48 = vld [vmem:[#allocation11 + $0x263c] ss:$40 sps:$4 sm:$0xff]  }
 0x891   :  { %13749 = vmatprep.subr.bf16.mxu0 %v19560_v60  ;;  %v19614_v60 = vld [vmem:[#allocation11 + $0x1244] ss:$40 sps:$4 sm:$0xff]  }
 0x892   :  { %13492 = vmatpush1.bf16.msra.mxu1 %v19555_v51  ;;  %v19609_v51 = vld [vmem:[#allocation11 + $0x2638] ss:$40 sps:$4 sm:$0xff]  }
 0x893   :  { %13750 = vmatpush1.bf16.msra.mxu0 %v19558_v41  ;;  %13493 = vmatprep.subr.bf16.mxu1 %v19563_v8  ;;  %v19612_v41 = vld [vmem:[#allocation11 + $0x1240] ss:$40 sps:$4 sm:$0xff]   ;;  %v19617_v8 = vld [vmem:[#allocation11 + $0x268c] ss:$40 sps:$4 sm:$0xff]  }
 0x894   :  { %13751 = vmatprep.subr.bf16.mxu0 %v19566_v47  ;;  %v19620_v47 = vld [vmem:[#allocation11 + $0x1294] ss:$40 sps:$4 sm:$0xff]  }
 0x896   :  { %13494 = vmatpush1.bf16.msra.mxu1 %v19561_v6  ;;  %v19615_v6 = vld [vmem:[#allocation11 + $0x2688] ss:$40 sps:$4 sm:$0xff]  }
 0x897   :  { %13752 = vmatpush1.bf16.msra.mxu0 %v19564_v15  ;;  %13495 = vmatprep.subr.bf16.mxu1 %v19569_v12  ;;  %v19618_v15 = vld [vmem:[#allocation11 + $0x1290] ss:$40 sps:$4 sm:$0xff]   ;;  %v19623_v12 = vld [vmem:[#allocation11 + $0x26dc] ss:$40 sps:$4 sm:$0xff]  }
 0x898   :  { %13753 = vmatprep.subr.bf16.mxu0 %v19572_v59  ;;  %v19626_v59 = vld [vmem:[#allocation11 + $0x12e4] ss:$40 sps:$4 sm:$0xff]  }
 0x89a   :  { %13496 = vmatpush1.bf16.msra.mxu1 %v19567_v29  ;;  %v19621_v29 = vld [vmem:[#allocation11 + $0x26d8] ss:$40 sps:$4 sm:$0xff]  }
 0x89b   :  { %13754 = vmatpush1.bf16.msra.mxu0 %v19570_v2  ;;  %13497 = vmatprep.subr.bf16.mxu1 %v19575_v45  ;;  %v19624_v2 = vld [vmem:[#allocation11 + $0x12e0] ss:$40 sps:$4 sm:$0xff]   ;;  %v19629_v45 = vld [vmem:[#allocation11 + $0x272c] ss:$40 sps:$4 sm:$0xff]  }
 0x89c   :  { %13755 = vmatprep.subr.bf16.mxu0 %v19578_v43  ;;  %v19632_v43 = vld [vmem:[#allocation11 + $0x1334] ss:$40 sps:$4 sm:$0xff]  }
 0x89e   :  { %13498 = vmatpush1.bf16.msra.mxu1 %v19573_v0  ;;  %v19627_v0 = vld [vmem:[#allocation11 + $0x2728] ss:$40 sps:$4 sm:$0xff]  }
 0x89f   :  { %13756 = vmatpush1.bf16.msra.mxu0 %v19576_v9  ;;  %13499 = vmatprep.subr.bf16.mxu1 %v19581_v56  ;;  %v19630_v9 = vld [vmem:[#allocation11 + $0x1330] ss:$40 sps:$4 sm:$0xff]   ;;  %v19635_v56 = vld [vmem:[#allocation11 + $0x277c] ss:$40 sps:$4 sm:$0xff]  }
 0x8a0   :  { %13757 = vmatprep.subr.bf16.mxu0 %v19584_v30  ;;  %v19638_v30 = vld [vmem:[#allocation11 + $0x1384] ss:$40 sps:$4 sm:$0xff]  }
 0x8a1   :  { %v21563_v1 = vpop.f32.mrb[20].mxu0 }
 0x8a2   :  { %v21565_v58 = vpop.f32.mrb[21].mxu0  ;;  %13500 = vmatpush1.bf16.msra.mxu1 %v19579_v63  ;;  %v19633_v63 = vld [vmem:[#allocation11 + $0x2778] ss:$40 sps:$4 sm:$0xff]  }
 0x8a3   :  { %v21567_v24 = vpop.f32.mrb[22].mxu0  ;;  %13758 = vmatpush1.bf16.msra.mxu0 %v19582_v52  ;;  %13501 = vmatprep.subr.bf16.mxu1 %v19587_v42  ;;  %v19636_v52 = vld [vmem:[#allocation11 + $0x1380] ss:$40 sps:$4 sm:$0xff]   ;;  %v19641_v42 = vld [vmem:[#allocation11 + $0x27cc] ss:$40 sps:$4 sm:$0xff]  }
 0x8a4   :  { %v21569_v55 = vpop.f32.mrb[23].mxu0  ;;  %13759 = vmatprep.subr.bf16.mxu0 %v19590_v61  ;;  %v19644_v61 = vld [vmem:[#allocation11 + $0x13d4] ss:$40 sps:$4 sm:$0xff]  }
 0x8a6   :  { %13502 = vmatpush1.bf16.msra.mxu1 %v19585_v11  ;;  %v19639_v11 = vld [vmem:[#allocation11 + $0x27c8] ss:$40 sps:$4 sm:$0xff]  }
 0x8a7   :  { %13760 = vmatpush1.bf16.msra.mxu0 %v19588_v37  ;;  %13503 = vmatprep.subr.bf16.mxu1 %v19593_v17  ;;  %v19642_v37 = vld [vmem:[#allocation11 + $0x13d0] ss:$40 sps:$4 sm:$0xff]   ;;  %v19647_v17 = vld [vmem:[#allocation11 + $0x281c] ss:$40 sps:$4 sm:$0xff]  }
 0x8a8   :  { %13761 = vmatprep.subr.bf16.mxu0 %v19596_v16  ;;  %v19650_v16 = vld [vmem:[#allocation11 + $0x1424] ss:$40 sps:$4 sm:$0xff]  }
 0x8aa   :  { %13504 = vmatpush1.bf16.msra.mxu1 %v19591_v22  ;;  %v19645_v22 = vld [vmem:[#allocation11 + $0x2818] ss:$40 sps:$4 sm:$0xff]  }
 0x8ab   :  { %13762 = vmatpush1.bf16.msra.mxu0 %v19594_v21  ;;  %13505 = vmatprep.subr.bf16.mxu1 %v19599_v23  ;;  %v19648_v21 = vld [vmem:[#allocation11 + $0x1420] ss:$40 sps:$4 sm:$0xff]   ;;  %v19653_v23 = vld [vmem:[#allocation11 + $0x286c] ss:$40 sps:$4 sm:$0xff]  }
 0x8ac   :  { %13763 = vmatprep.subr.bf16.mxu0 %v19602_v20  ;;  %v19656_v20 = vld [vmem:[#allocation11 + $0x1474] ss:$40 sps:$4 sm:$0xff]  }
 0x8ae   :  { %13506 = vmatpush1.bf16.msra.mxu1 %v19597_v46  ;;  %v19651_v46 = vld [vmem:[#allocation11 + $0x2868] ss:$40 sps:$4 sm:$0xff]  }
 0x8af   :  { %13764 = vmatpush1.bf16.msra.mxu0 %v19600_v4  ;;  %13507 = vmatprep.subr.bf16.mxu1 %v19605_v27  ;;  %v19654_v4 = vld [vmem:[#allocation11 + $0x1470] ss:$40 sps:$4 sm:$0xff]   ;;  %v19659_v27 = vld [vmem:[#allocation11 + $0x28bc] ss:$40 sps:$4 sm:$0xff]  }
 0x8b0   :  { %13765 = vmatprep.subr.bf16.mxu0 %v19608_v34  ;;  %v19662_v34 = vld [vmem:[#allocation11 + $0x14c4] ss:$40 sps:$4 sm:$0xff]  }
 0x8b2   :  { %13508 = vmatpush1.bf16.msra.mxu1 %v19603_v54  ;;  %v19657_v54 = vld [vmem:[#allocation11 + $0x28b8] ss:$40 sps:$4 sm:$0xff]  }
 0x8b3   :  { %13766 = vmatpush1.bf16.msra.mxu0 %v19606_v62  ;;  %13509 = vmatprep.subr.bf16.mxu1 %v19611_v48  ;;  %v19660_v62 = vld [vmem:[#allocation11 + $0x14c0] ss:$40 sps:$4 sm:$0xff]   ;;  %v19665_v48 = vld [vmem:[#allocation11 + $0x290c] ss:$40 sps:$4 sm:$0xff]  }
 0x8b4   :  { %13767 = vmatprep.subr.bf16.mxu0 %v19614_v60  ;;  %v19663_v60 = vld [vmem:[#allocation11 + $0x2908] ss:$40 sps:$4 sm:$0xff]  }
 0x8b6   :  { %13510 = vmatpush1.bf16.msra.mxu1 %v19609_v51  ;;  %v19666_v51 = vld [vmem:[#allocation11 + $0x1510] ss:$40 sps:$4 sm:$0xff]  }
 0x8b7   :  { %13768 = vmatpush1.bf16.msra.mxu0 %v19612_v41  ;;  %13511 = vmatprep.subr.bf16.mxu1 %v19617_v8  ;;  %v19671_v41 = vld [vmem:[#allocation11 + $0x295c] ss:$40 sps:$4 sm:$0xff]  }
 0x8b8   :  { %13769 = vmatprep.subr.bf16.mxu0 %v19620_v47  ;;  %v19674_v8 = vld [vmem:[#allocation11 + $0x1564] ss:$40 sps:$4 sm:$0xff]   ;;  %v19672_v47 = vld [vmem:[#allocation11 + $0x1560] ss:$40 sps:$4 sm:$0xff]  }
 0x8ba   :  { %13512 = vmatpush1.bf16.msra.mxu1 %v19615_v6  ;;  %v19677_v6 = vld [vmem:[#allocation11 + $0x29ac] ss:$40 sps:$4 sm:$0xff]  }
 0x8bb   :  { %13770 = vmatpush1.bf16.msra.mxu0 %v19618_v15  ;;  %13513 = vmatprep.subr.bf16.mxu1 %v19623_v12  ;;  %v19680_v15 = vld [vmem:[#allocation11 + $0x15b4] ss:$40 sps:$4 sm:$0xff]   ;;  %v19675_v12 = vld [vmem:[#allocation11 + $0x29a8] ss:$40 sps:$4 sm:$0xff]  }
 0x8bc   :  { %13771 = vmatprep.subr.bf16.mxu0 %v19626_v59  ;;  %v19678_v59 = vld [vmem:[#allocation11 + $0x15b0] ss:$40 sps:$4 sm:$0xff]  }
 0x8be   :  { %13514 = vmatpush1.bf16.msra.mxu1 %v19621_v29  ;;  %v19683_v29 = vld [vmem:[#allocation11 + $0x29fc] ss:$40 sps:$4 sm:$0xff]  }
 0x8bf   :  { %13772 = vmatpush1.bf16.msra.mxu0 %v19624_v2  ;;  %13515 = vmatprep.subr.bf16.mxu1 %v19629_v45  ;;  %v19686_v2 = vld [vmem:[#allocation11 + $0x1604] ss:$40 sps:$4 sm:$0xff]   ;;  %v19681_v45 = vld [vmem:[#allocation11 + $0x29f8] ss:$40 sps:$4 sm:$0xff]  }
 0x8c0   :  { %13773 = vmatprep.subr.bf16.mxu0 %v19632_v43  ;;  %v19684_v43 = vld [vmem:[#allocation11 + $0x1600] ss:$40 sps:$4 sm:$0xff]  }
 0x8c2   :  { %13516 = vmatpush1.bf16.msra.mxu1 %v19627_v0  ;;  %v19689_v0 = vld [vmem:[#allocation11 + $0x2a4c] ss:$40 sps:$4 sm:$0xff]  }
 0x8c3   :  { %13774 = vmatpush1.bf16.msra.mxu0 %v19630_v9  ;;  %13517 = vmatprep.subr.bf16.mxu1 %v19635_v56  ;;  %v19692_v9 = vld [vmem:[#allocation11 + $0x1654] ss:$40 sps:$4 sm:$0xff]   ;;  %v19687_v56 = vld [vmem:[#allocation11 + $0x2a48] ss:$40 sps:$4 sm:$0xff]  }
 0x8c4   :  { %13775 = vmatprep.subr.bf16.mxu0 %v19638_v30  ;;  %v19690_v30 = vld [vmem:[#allocation11 + $0x1650] ss:$40 sps:$4 sm:$0xff]  }
 0x8c6   :  { %13518 = vmatpush1.bf16.msra.mxu1 %v19633_v63  ;;  %v19695_v63 = vld [vmem:[#allocation11 + $0x2a9c] ss:$40 sps:$4 sm:$0xff]  }
 0x8c7   :  { %13776 = vmatpush1.bf16.msra.mxu0 %v19636_v52  ;;  %13519 = vmatprep.subr.bf16.mxu1 %v19641_v42  ;;  %v19698_v52 = vld [vmem:[#allocation11 + $0x16a4] ss:$40 sps:$4 sm:$0xff]   ;;  %v19693_v42 = vld [vmem:[#allocation11 + $0x2a98] ss:$40 sps:$4 sm:$0xff]  }
 0x8c8   :  { %13777 = vmatprep.subr.bf16.mxu0 %v19644_v61  ;;  %v19696_v61 = vld [vmem:[#allocation11 + $0x16a0] ss:$40 sps:$4 sm:$0xff]  }
 0x8ca   :  { %13520 = vmatpush1.bf16.msra.mxu1 %v19639_v11  ;;  %v19701_v11 = vld [vmem:[#allocation11 + $0x2aec] ss:$40 sps:$4 sm:$0xff]  }
 0x8cb   :  { %13778 = vmatpush1.bf16.msra.mxu0 %v19642_v37  ;;  %13532 = vmatprep.subr.bf16.mxu1 %v19647_v17  ;;  %v19704_v37 = vld [vmem:[#allocation11 + $0x16f4] ss:$40 sps:$4 sm:$0xff]   ;;  %v19699_v17 = vld [vmem:[#allocation11 + $0x2ae8] ss:$40 sps:$4 sm:$0xff]  }
 0x8cc   :  { %13790 = vmatprep.subr.bf16.mxu0 %v19650_v16  ;;  %v19702_v16 = vld [vmem:[#allocation11 + $0x16f0] ss:$40 sps:$4 sm:$0xff]  }
 0x8cd   :  { %13522 = vmatmul.mubr.bf16.vlgmr.msra.gmra.mrb[32].mxu1 %v21430_v32 }
 0x8ce   :  { %13780 = vmatmul.mubr.bf16.vlgmr.msra.gmra.mrb[24].mxu0 %v21331_v57  ;;  %13533 = vmatpush1.bf16.msra.mxu1 %v19645_v22  ;;  %v19668_v57 = vld [vmem:[#allocation11 + $0x1514] ss:$40 sps:$4 sm:$0xff]  }
 0x8cf   :  { %13564 = vmatprep.mubr.bf16.mxu1 %v21443_v49  ;;  %13791 = vmatpush1.bf16.msra.mxu0 %v19648_v21  ;;  %v19707_v22 = vld [vmem:[#allocation11 + $0x2b3c] ss:$40 sps:$4 sm:$0xff]  }
 0x8d0   :  { %13822 = vmatprep.mubr.bf16.mxu0 %v21335_v14  ;;  %13534 = vmatprep.subr.bf16.mxu1 %v19653_v23  ;;  %v19669_v14 = vld [vmem:[#allocation11 + $0x2958] ss:$40 sps:$4 sm:$0xff]   ;;  %v19710_v21 = vld [vmem:[#allocation11 + $0x1744] ss:$40 sps:$4 sm:$0xff]  }
 0x8d1   :  { %13792 = vmatprep.subr.bf16.mxu0 %v19656_v20  ;;  %v19705_v23 = vld [vmem:[#allocation11 + $0x2b38] ss:$40 sps:$4 sm:$0xff]  }
 0x8d2   :  { %13535 = vmatpush1.bf16.msra.mxu1 %v19651_v46  ;;  %v19708_v20 = vld [vmem:[#allocation11 + $0x1740] ss:$40 sps:$4 sm:$0xff]   ;;  %v19713_v46 = vld [vmem:[#allocation11 + $0x2b8c] ss:$40 sps:$4 sm:$0xff]  }
 0x8d3   :  { %13793 = vmatpush1.bf16.msra.mxu0 %v19654_v4  ;;  %13536 = vmatprep.subr.bf16.mxu1 %v19659_v27  ;;  %v19716_v4 = vld [vmem:[#allocation11 + $0x1794] ss:$40 sps:$4 sm:$0xff]   ;;  %v19711_v27 = vld [vmem:[#allocation11 + $0x2b88] ss:$40 sps:$4 sm:$0xff]  }
 0x8d4   :  { %13794 = vmatprep.subr.bf16.mxu0 %v19662_v34  ;;  %v19714_v34 = vld [vmem:[#allocation11 + $0x1790] ss:$40 sps:$4 sm:$0xff]  }
 0x8d6   :  { %13537 = vmatpush1.bf16.msra.mxu1 %v19657_v54  ;;  %v19719_v54 = vld [vmem:[#allocation11 + $0x2bdc] ss:$40 sps:$4 sm:$0xff]  }
 0x8d7   :  { %13795 = vmatpush1.bf16.msra.mxu0 %v19660_v62  ;;  %13538 = vmatprep.subr.bf16.mxu1 %v19665_v48  ;;  %v19722_v62 = vld [vmem:[#allocation11 + $0x17e4] ss:$40 sps:$4 sm:$0xff]   ;;  %v19717_v48 = vld [vmem:[#allocation11 + $0x2bd8] ss:$40 sps:$4 sm:$0xff]  }
 0x8d8   :  { %13796 = vmatprep.subr.bf16.mxu0 %v19668_v57  ;;  %v19720_v57 = vld [vmem:[#allocation11 + $0x17e0] ss:$40 sps:$4 sm:$0xff]  }
 0x8da   :  { %13539 = vmatpush1.bf16.msra.mxu1 %v19663_v60  ;;  %v19725_v60 = vld [vmem:[#allocation11 + $0x2c2c] ss:$40 sps:$4 sm:$0xff]  }
 0x8db   :  { %13797 = vmatpush1.bf16.msra.mxu0 %v19666_v51  ;;  %13540 = vmatprep.subr.bf16.mxu1 %v19671_v41  ;;  %v19728_v51 = vld [vmem:[#allocation11 + $0x1834] ss:$40 sps:$4 sm:$0xff]   ;;  %v19723_v41 = vld [vmem:[#allocation11 + $0x2c28] ss:$40 sps:$4 sm:$0xff]  }
 0x8dc   :  { %13798 = vmatprep.subr.bf16.mxu0 %v19674_v8  ;;  %v19726_v8 = vld [vmem:[#allocation11 + $0x1830] ss:$40 sps:$4 sm:$0xff]  }
 0x8de   :  { %13541 = vmatpush1.bf16.msra.mxu1 %v19669_v14  ;;  %v19731_v14 = vld [vmem:[#allocation11 + $0x2c7c] ss:$40 sps:$4 sm:$0xff]  }
 0x8df   :  { %13799 = vmatpush1.bf16.msra.mxu0 %v19672_v47  ;;  %13542 = vmatprep.subr.bf16.mxu1 %v19677_v6  ;;  %v19734_v47 = vld [vmem:[#allocation11 + $0x1884] ss:$40 sps:$4 sm:$0xff]   ;;  %v19729_v6 = vld [vmem:[#allocation11 + $0x2c78] ss:$40 sps:$4 sm:$0xff]  }
 0x8e0   :  { %13800 = vmatprep.subr.bf16.mxu0 %v19680_v15  ;;  %v19732_v15 = vld [vmem:[#allocation11 + $0x1880] ss:$40 sps:$4 sm:$0xff]  }
 0x8e2   :  { %13543 = vmatpush1.bf16.msra.mxu1 %v19675_v12  ;;  %v19737_v12 = vld [vmem:[#allocation11 + $0x2ccc] ss:$40 sps:$4 sm:$0xff]  }
 0x8e3   :  { %13801 = vmatpush1.bf16.msra.mxu0 %v19678_v59  ;;  %13544 = vmatprep.subr.bf16.mxu1 %v19683_v29  ;;  %v19740_v59 = vld [vmem:[#allocation11 + $0x18d4] ss:$40 sps:$4 sm:$0xff]   ;;  %v19735_v29 = vld [vmem:[#allocation11 + $0x2cc8] ss:$40 sps:$4 sm:$0xff]  }
 0x8e4   :  { %13802 = vmatprep.subr.bf16.mxu0 %v19686_v2  ;;  %v19738_v2 = vld [vmem:[#allocation11 + $0x18d0] ss:$40 sps:$4 sm:$0xff]  }
 0x8e6   :  { %13545 = vmatpush1.bf16.msra.mxu1 %v19681_v45  ;;  %v19743_v45 = vld [vmem:[#allocation11 + $0x2d1c] ss:$40 sps:$4 sm:$0xff]  }
 0x8e7   :  { %13803 = vmatpush1.bf16.msra.mxu0 %v19684_v43  ;;  %13546 = vmatprep.subr.bf16.mxu1 %v19689_v0  ;;  %v19746_v43 = vld [vmem:[#allocation11 + $0x1924] ss:$40 sps:$4 sm:$0xff]   ;;  %v19741_v0 = vld [vmem:[#allocation11 + $0x2d18] ss:$40 sps:$4 sm:$0xff]  }
 0x8e8   :  { %13804 = vmatprep.subr.bf16.mxu0 %v19692_v9  ;;  %v19744_v9 = vld [vmem:[#allocation11 + $0x1920] ss:$40 sps:$4 sm:$0xff]  }
 0x8ea   :  { %13547 = vmatpush1.bf16.msra.mxu1 %v19687_v56  ;;  %v19749_v56 = vld [vmem:[#allocation11 + $0x2d6c] ss:$40 sps:$4 sm:$0xff]  }
 0x8eb   :  { %13805 = vmatpush1.bf16.msra.mxu0 %v19690_v30  ;;  %13548 = vmatprep.subr.bf16.mxu1 %v19695_v63  ;;  %v19752_v30 = vld [vmem:[#allocation11 + $0x1974] ss:$40 sps:$4 sm:$0xff]   ;;  %v19747_v63 = vld [vmem:[#allocation11 + $0x2d68] ss:$40 sps:$4 sm:$0xff]  }
 0x8ec   :  { %13806 = vmatprep.subr.bf16.mxu0 %v19698_v52  ;;  %v19750_v52 = vld [vmem:[#allocation11 + $0x1970] ss:$40 sps:$4 sm:$0xff]  }
 0x8ee   :  { %13549 = vmatpush1.bf16.msra.mxu1 %v19693_v42  ;;  %v19755_v42 = vld [vmem:[#allocation11 + $0x2dbc] ss:$40 sps:$4 sm:$0xff]  }
 0x8ef   :  { %13807 = vmatpush1.bf16.msra.mxu0 %v19696_v61  ;;  %13550 = vmatprep.subr.bf16.mxu1 %v19701_v11  ;;  %v19758_v61 = vld [vmem:[#allocation11 + $0x19c4] ss:$40 sps:$4 sm:$0xff]   ;;  %v19753_v11 = vld [vmem:[#allocation11 + $0x2db8] ss:$40 sps:$4 sm:$0xff]  }
 0x8f0   :  { %13808 = vmatprep.subr.bf16.mxu0 %v19704_v37  ;;  %v19756_v37 = vld [vmem:[#allocation11 + $0x19c0] ss:$40 sps:$4 sm:$0xff]  }
 0x8f2   :  { %13551 = vmatpush1.bf16.msra.mxu1 %v19699_v17  ;;  %v19761_v17 = vld [vmem:[#allocation11 + $0x2e0c] ss:$40 sps:$4 sm:$0xff]  }
 0x8f3   :  { %13809 = vmatpush1.bf16.msra.mxu0 %v19702_v16  ;;  %13552 = vmatprep.subr.bf16.mxu1 %v19707_v22  ;;  %v19759_v16 = vld [vmem:[#allocation11 + $0x2e08] ss:$40 sps:$4 sm:$0xff]  }
 0x8f4   :  { %13810 = vmatprep.subr.bf16.mxu0 %v19710_v21  ;;  %v19762_v22 = vld [vmem:[#allocation11 + $0x1a10] ss:$40 sps:$4 sm:$0xff]   ;;  %v19767_v21 = vld [vmem:[#allocation11 + $0x2e5c] ss:$40 sps:$4 sm:$0xff]  }
 0x8f6   :  { %13553 = vmatpush1.bf16.msra.mxu1 %v19705_v23  ;;  %v19770_v23 = vld [vmem:[#allocation11 + $0x1a64] ss:$40 sps:$4 sm:$0xff]  }
 0x8f7   :  { %13811 = vmatpush1.bf16.msra.mxu0 %v19708_v20  ;;  %13554 = vmatprep.subr.bf16.mxu1 %v19713_v46  ;;  %v19768_v20 = vld [vmem:[#allocation11 + $0x1a60] ss:$40 sps:$4 sm:$0xff]   ;;  %v19773_v46 = vld [vmem:[#allocation11 + $0x2eac] ss:$40 sps:$4 sm:$0xff]  }
 0x8f8   :  { %13812 = vmatprep.subr.bf16.mxu0 %v19716_v4  ;;  %v19776_v4 = vld [vmem:[#allocation11 + $0x1ab4] ss:$40 sps:$4 sm:$0xff]  }
 0x8fa   :  { %13555 = vmatpush1.bf16.msra.mxu1 %v19711_v27  ;;  %v19771_v27 = vld [vmem:[#allocation11 + $0x2ea8] ss:$40 sps:$4 sm:$0xff]  }
 0x8fb   :  { %13813 = vmatpush1.bf16.msra.mxu0 %v19714_v34  ;;  %13556 = vmatprep.subr.bf16.mxu1 %v19719_v54  ;;  %v19774_v34 = vld [vmem:[#allocation11 + $0x1ab0] ss:$40 sps:$4 sm:$0xff]   ;;  %v19779_v54 = vld [vmem:[#allocation11 + $0x2efc] ss:$40 sps:$4 sm:$0xff]  }
 0x8fc   :  { %13814 = vmatprep.subr.bf16.mxu0 %v19722_v62  ;;  %v19782_v62 = vld [vmem:[#allocation11 + $0x1b04] ss:$40 sps:$4 sm:$0xff]  }
 0x8fe   :  { %13557 = vmatpush1.bf16.msra.mxu1 %v19717_v48  ;;  %v19777_v48 = vld [vmem:[#allocation11 + $0x2ef8] ss:$40 sps:$4 sm:$0xff]  }
 0x8ff   :  { %13815 = vmatpush1.bf16.msra.mxu0 %v19720_v57  ;;  %13558 = vmatprep.subr.bf16.mxu1 %v19725_v60  ;;  %v19780_v57 = vld [vmem:[#allocation11 + $0x1b00] ss:$40 sps:$4 sm:$0xff]   ;;  %v19785_v60 = vld [vmem:[#allocation11 + $0x2f4c] ss:$40 sps:$4 sm:$0xff]  }
 0x900   :  { %13816 = vmatprep.subr.bf16.mxu0 %v19728_v51  ;;  %v19788_v51 = vld [vmem:[#allocation11 + $0x1b54] ss:$40 sps:$4 sm:$0xff]  }
 0x902   :  { %13559 = vmatpush1.bf16.msra.mxu1 %v19723_v41  ;;  %v19783_v41 = vld [vmem:[#allocation11 + $0x2f48] ss:$40 sps:$4 sm:$0xff]  }
 0x903   :  { %13817 = vmatpush1.bf16.msra.mxu0 %v19726_v8  ;;  %13560 = vmatprep.subr.bf16.mxu1 %v19731_v14  ;;  %v19786_v8 = vld [vmem:[#allocation11 + $0x1b50] ss:$40 sps:$4 sm:$0xff]   ;;  %v19791_v14 = vld [vmem:[#allocation11 + $0x2f9c] ss:$40 sps:$4 sm:$0xff]  }
 0x904   :  { %13818 = vmatprep.subr.bf16.mxu0 %v19734_v47  ;;  %v19794_v47 = vld [vmem:[#allocation11 + $0x1ba4] ss:$40 sps:$4 sm:$0xff]  }
 0x906   :  { %13561 = vmatpush1.bf16.msra.mxu1 %v19729_v6  ;;  %v19789_v6 = vld [vmem:[#allocation11 + $0x2f98] ss:$40 sps:$4 sm:$0xff]  }
 0x907   :  { %13819 = vmatpush1.bf16.msra.mxu0 %v19732_v15  ;;  %13562 = vmatprep.subr.bf16.mxu1 %v19737_v12  ;;  %v19792_v15 = vld [vmem:[#allocation11 + $0x1ba0] ss:$40 sps:$4 sm:$0xff]   ;;  %v19797_v12 = vld [vmem:[#allocation11 + $0x2fec] ss:$40 sps:$4 sm:$0xff]  }
 0x908   :  { %13820 = vmatprep.subr.bf16.mxu0 %v19740_v59  ;;  %v19800_v59 = vld [vmem:[#allocation11 + $0x1bf4] ss:$40 sps:$4 sm:$0xff]  }
 0x90a   :  { %13563 = vmatpush1.bf16.msra.mxu1 %v19735_v29  ;;  %v19795_v29 = vld [vmem:[#allocation11 + $0x2fe8] ss:$40 sps:$4 sm:$0xff]  }
 0x90b   :  { %13821 = vmatpush1.bf16.msra.mxu0 %v19738_v2  ;;  %13575 = vmatprep.subr.bf16.mxu1 %v19743_v45  ;;  %v19798_v2 = vld [vmem:[#allocation11 + $0x1bf0] ss:$40 sps:$4 sm:$0xff]   ;;  %v19803_v45 = vld [vmem:[#allocation11 + $0x303c] ss:$40 sps:$4 sm:$0xff]  }
 0x90c   :  { %13833 = vmatprep.subr.bf16.mxu0 %v19746_v43  ;;  %v19806_v43 = vld [vmem:[#allocation11 + $0x1c44] ss:$40 sps:$4 sm:$0xff]  }
 0x90d   :  { %13565 = vmatmul.mubr.bf16.vlgmr.msra.gmra.mrb[32].mxu1 %v21450_v18 }
 0x90e   :  { %13823 = vmatmul.mubr.bf16.vlgmr.msra.gmra.mrb[24].mxu0 %v21339_v31  ;;  %13576 = vmatpush1.bf16.msra.mxu1 %v19741_v0  ;;  %v19764_v31 = vld [vmem:[#allocation11 + $0x1a14] ss:$40 sps:$4 sm:$0xff]   ;;  %v19801_v0 = vld [vmem:[#allocation11 + $0x3038] ss:$40 sps:$4 sm:$0xff]  }
 0x90f   :  { %13607 = vmatprep.mubr.bf16.mxu1 %v21453_v13  ;;  %13834 = vmatpush1.bf16.msra.mxu0 %v19744_v9  ;;  %v19804_v9 = vld [vmem:[#allocation11 + $0x1c40] ss:$40 sps:$4 sm:$0xff]  }
 0x910   :  { %13865 = vmatprep.mubr.bf16.mxu0 %v21379_v26  ;;  %13577 = vmatprep.subr.bf16.mxu1 %v19749_v56  ;;  %v19765_v26 = vld [vmem:[#allocation11 + $0x2e58] ss:$40 sps:$4 sm:$0xff]   ;;  %v19809_v56 = vld [vmem:[#allocation11 + $0x308c] ss:$40 sps:$4 sm:$0xff]  }
 0x911   :  { %13835 = vmatprep.subr.bf16.mxu0 %v19752_v30  ;;  %v19812_v30 = vld [vmem:[#allocation11 + $0x1c94] ss:$40 sps:$4 sm:$0xff]  }
 0x912   :  { %13578 = vmatpush1.bf16.msra.mxu1 %v19747_v63  ;;  %v19807_v63 = vld [vmem:[#allocation11 + $0x3088] ss:$40 sps:$4 sm:$0xff]  }
 0x913   :  { %13836 = vmatpush1.bf16.msra.mxu0 %v19750_v52  ;;  %13579 = vmatprep.subr.bf16.mxu1 %v19755_v42  ;;  %v19810_v52 = vld [vmem:[#allocation11 + $0x1c90] ss:$40 sps:$4 sm:$0xff]   ;;  %v19815_v42 = vld [vmem:[#allocation11 + $0x30dc] ss:$40 sps:$4 sm:$0xff]  }
 0x914   :  { %13837 = vmatprep.subr.bf16.mxu0 %v19758_v61  ;;  %v19818_v61 = vld [vmem:[#allocation11 + $0x1ce4] ss:$40 sps:$4 sm:$0xff]  }
 0x916   :  { %13580 = vmatpush1.bf16.msra.mxu1 %v19753_v11  ;;  %v19813_v11 = vld [vmem:[#allocation11 + $0x30d8] ss:$40 sps:$4 sm:$0xff]  }
 0x917   :  { %13838 = vmatpush1.bf16.msra.mxu0 %v19756_v37  ;;  %13581 = vmatprep.subr.bf16.mxu1 %v19761_v17  ;;  %v19816_v37 = vld [vmem:[#allocation11 + $0x1ce0] ss:$40 sps:$4 sm:$0xff]   ;;  %v19821_v17 = vld [vmem:[#allocation11 + $0x312c] ss:$40 sps:$4 sm:$0xff]  }
 0x918   :  { %13839 = vmatprep.subr.bf16.mxu0 %v19764_v31  ;;  %v19824_v31 = vld [vmem:[#allocation11 + $0x1d34] ss:$40 sps:$4 sm:$0xff]  }
 0x91a   :  { %13582 = vmatpush1.bf16.msra.mxu1 %v19759_v16  ;;  %v19819_v16 = vld [vmem:[#allocation11 + $0x3128] ss:$40 sps:$4 sm:$0xff]  }
 0x91b   :  { %13840 = vmatpush1.bf16.msra.mxu0 %v19762_v22  ;;  %13583 = vmatprep.subr.bf16.mxu1 %v19767_v21  ;;  %v19822_v22 = vld [vmem:[#allocation11 + $0x1d30] ss:$40 sps:$4 sm:$0xff]   ;;  %v19827_v21 = vld [vmem:[#allocation11 + $0x317c] ss:$40 sps:$4 sm:$0xff]  }
 0x91c   :  { %13841 = vmatprep.subr.bf16.mxu0 %v19770_v23  ;;  %v19830_v23 = vld [vmem:[#allocation11 + $0x1d84] ss:$40 sps:$4 sm:$0xff]  }
 0x91e   :  { %13584 = vmatpush1.bf16.msra.mxu1 %v19765_v26  ;;  %v19825_v26 = vld [vmem:[#allocation11 + $0x3178] ss:$40 sps:$4 sm:$0xff]  }
 0x91f   :  { %13842 = vmatpush1.bf16.msra.mxu0 %v19768_v20  ;;  %13585 = vmatprep.subr.bf16.mxu1 %v19773_v46  ;;  %v19828_v20 = vld [vmem:[#allocation11 + $0x1d80] ss:$40 sps:$4 sm:$0xff]   ;;  %v19833_v46 = vld [vmem:[#allocation11 + $0x31cc] ss:$40 sps:$4 sm:$0xff]  }
 0x920   :  { %13843 = vmatprep.subr.bf16.mxu0 %v19776_v4  ;;  %v19836_v4 = vld [vmem:[#allocation11 + $0x1dd4] ss:$40 sps:$4 sm:$0xff]  }
 0x922   :  { %13586 = vmatpush1.bf16.msra.mxu1 %v19771_v27  ;;  %v19831_v27 = vld [vmem:[#allocation11 + $0x31c8] ss:$40 sps:$4 sm:$0xff]  }
 0x923   :  { %13844 = vmatpush1.bf16.msra.mxu0 %v19774_v34  ;;  %13587 = vmatprep.subr.bf16.mxu1 %v19779_v54  ;;  %v19834_v34 = vld [vmem:[#allocation11 + $0x1dd0] ss:$40 sps:$4 sm:$0xff]   ;;  %v19839_v54 = vld [vmem:[#allocation11 + $0x1e24] ss:$40 sps:$4 sm:$0xff]  }
 0x924   :  { %13845 = vmatprep.subr.bf16.mxu0 %v19782_v62  ;;  %v19837_v62 = vld [vmem:[#allocation11 + $0x1e20] ss:$40 sps:$4 sm:$0xff]  }
 0x926   :  { %13588 = vmatpush1.bf16.msra.mxu1 %v19777_v48  ;;  %v19842_v48 = vld [vmem:[#allocation11 + $0x1e74] ss:$40 sps:$4 sm:$0xff]  }
 0x927   :  { %13846 = vmatpush1.bf16.msra.mxu0 %v19780_v57  ;;  %13589 = vmatprep.subr.bf16.mxu1 %v19785_v60  ;;  %v19840_v57 = vld [vmem:[#allocation11 + $0x1e70] ss:$40 sps:$4 sm:$0xff]   ;;  %v19845_v60 = vld [vmem:[#allocation11 + $0x1ec4] ss:$40 sps:$4 sm:$0xff]  }
 0x928   :  { %13847 = vmatprep.subr.bf16.mxu0 %v19788_v51  ;;  %v19843_v51 = vld [vmem:[#allocation11 + $0x1ec0] ss:$40 sps:$4 sm:$0xff]  }
 0x92a   :  { %13590 = vmatpush1.bf16.msra.mxu1 %v19783_v41  ;;  %v19848_v41 = vld [vmem:[#allocation11 + $0x1f14] ss:$40 sps:$4 sm:$0xff]  }
 0x92b   :  { %13848 = vmatpush1.bf16.msra.mxu0 %v19786_v8  ;;  %13591 = vmatprep.subr.bf16.mxu1 %v19791_v14  ;;  %v19846_v8 = vld [vmem:[#allocation11 + $0x1f10] ss:$40 sps:$4 sm:$0xff]   ;;  %v19851_v14 = vld [vmem:[#allocation11 + $0x1f64] ss:$40 sps:$4 sm:$0xff]  }
 0x92c   :  { %13849 = vmatprep.subr.bf16.mxu0 %v19794_v47  ;;  %v19849_v47 = vld [vmem:[#allocation11 + $0x1f60] ss:$40 sps:$4 sm:$0xff]  }
 0x92e   :  { %13592 = vmatpush1.bf16.msra.mxu1 %v19789_v6  ;;  %v19854_v6 = vld [vmem:[#allocation11 + $0x1fb4] ss:$40 sps:$4 sm:$0xff]  }
 0x92f   :  { %13850 = vmatpush1.bf16.msra.mxu0 %v19792_v15  ;;  %13593 = vmatprep.subr.bf16.mxu1 %v19797_v12  ;;  %v19857_v15 = vld [vmem:[#allocation11 + $0x2004] ss:$40 sps:$4 sm:$0xff]   ;;  %v19860_v12 = vld [vmem:[#allocation11 + $0x2054] ss:$40 sps:$4 sm:$0xff]  }
 0x930   :  { %13851 = vmatprep.subr.bf16.mxu0 %v19800_v59  ;;  %v19858_v59 = vld [vmem:[#allocation11 + $0x2050] ss:$40 sps:$4 sm:$0xff]  }
 0x932   :  { %13594 = vmatpush1.bf16.msra.mxu1 %v19795_v29  ;;  %v19863_v29 = vld [vmem:[#allocation11 + $0x20a4] ss:$40 sps:$4 sm:$0xff]  }
 0x933   :  { %13852 = vmatpush1.bf16.msra.mxu0 %v19798_v2  ;;  %13595 = vmatprep.subr.bf16.mxu1 %v19803_v45  ;;  %v19861_v2 = vld [vmem:[#allocation11 + $0x20a0] ss:$40 sps:$4 sm:$0xff]   ;;  %v19866_v45 = vld [vmem:[#allocation11 + $0x20f4] ss:$40 sps:$4 sm:$0xff]  }
 0x934   :  { %13853 = vmatprep.subr.bf16.mxu0 %v19806_v43  ;;  %v19864_v43 = vld [vmem:[#allocation11 + $0x20f0] ss:$40 sps:$4 sm:$0xff]  }
 0x936   :  { %13596 = vmatpush1.bf16.msra.mxu1 %v19801_v0  ;;  %v19869_v0 = vld [vmem:[#allocation11 + $0x2144] ss:$40 sps:$4 sm:$0xff]  }
 0x937   :  { %13854 = vmatpush1.bf16.msra.mxu0 %v19804_v9  ;;  %13597 = vmatprep.subr.bf16.mxu1 %v19809_v56  ;;  %v19867_v9 = vld [vmem:[#allocation11 + $0x2140] ss:$40 sps:$4 sm:$0xff]   ;;  %v19872_v56 = vld [vmem:[#allocation11 + $0x2194] ss:$40 sps:$4 sm:$0xff]  }
 0x938   :  { %13855 = vmatprep.subr.bf16.mxu0 %v19812_v30  ;;  %v19870_v30 = vld [vmem:[#allocation11 + $0x2190] ss:$40 sps:$4 sm:$0xff]  }
 0x93a   :  { %13598 = vmatpush1.bf16.msra.mxu1 %v19807_v63  ;;  %v19875_v63 = vld [vmem:[#allocation11 + $0x21e4] ss:$40 sps:$4 sm:$0xff]  }
 0x93b   :  { %13856 = vmatpush1.bf16.msra.mxu0 %v19810_v52  ;;  %13599 = vmatprep.subr.bf16.mxu1 %v19815_v42  ;;  %v19873_v52 = vld [vmem:[#allocation11 + $0x21e0] ss:$40 sps:$4 sm:$0xff]   ;;  %v19878_v42 = vld [vmem:[#allocation11 + $0x2234] ss:$40 sps:$4 sm:$0xff]  }
 0x93c   :  { %13857 = vmatprep.subr.bf16.mxu0 %v19818_v61  ;;  %v19876_v61 = vld [vmem:[#allocation11 + $0x2230] ss:$40 sps:$4 sm:$0xff]  }
 0x93e   :  { %13600 = vmatpush1.bf16.msra.mxu1 %v19813_v11  ;;  %v19881_v11 = vld [vmem:[#allocation11 + $0x2284] ss:$40 sps:$4 sm:$0xff]  }
 0x93f   :  { %13858 = vmatpush1.bf16.msra.mxu0 %v19816_v37  ;;  %13601 = vmatprep.subr.bf16.mxu1 %v19821_v17  ;;  %v19879_v37 = vld [vmem:[#allocation11 + $0x2280] ss:$40 sps:$4 sm:$0xff]   ;;  %v19884_v17 = vld [vmem:[#allocation11 + $0x22d4] ss:$40 sps:$4 sm:$0xff]  }
 0x940   :  { %13859 = vmatprep.subr.bf16.mxu0 %v19824_v31  ;;  %v19882_v31 = vld [vmem:[#allocation11 + $0x22d0] ss:$40 sps:$4 sm:$0xff]  }
 0x942   :  { %13602 = vmatpush1.bf16.msra.mxu1 %v19819_v16  ;;  %v19887_v16 = vld [vmem:[#allocation11 + $0x2324] ss:$40 sps:$4 sm:$0xff]  }
 0x943   :  { %13860 = vmatpush1.bf16.msra.mxu0 %v19822_v22  ;;  %13603 = vmatprep.subr.bf16.mxu1 %v19827_v21  ;;  %v19885_v22 = vld [vmem:[#allocation11 + $0x2320] ss:$40 sps:$4 sm:$0xff]   ;;  %v19890_v21 = vld [vmem:[#allocation11 + $0x2374] ss:$40 sps:$4 sm:$0xff]  }
 0x944   :  { %13861 = vmatprep.subr.bf16.mxu0 %v19830_v23  ;;  %v19888_v23 = vld [vmem:[#allocation11 + $0x2370] ss:$40 sps:$4 sm:$0xff]  }
 0x946   :  { %13604 = vmatpush1.bf16.msra.mxu1 %v19825_v26  ;;  %v19893_v26 = vld [vmem:[#allocation11 + $0x23c4] ss:$40 sps:$4 sm:$0xff]  }
 0x947   :  { %13862 = vmatpush1.bf16.msra.mxu0 %v19828_v20  ;;  %13605 = vmatprep.subr.bf16.mxu1 %v19833_v46  ;;  %v19891_v20 = vld [vmem:[#allocation11 + $0x23c0] ss:$40 sps:$4 sm:$0xff]   ;;  %v19896_v46 = vld [vmem:[#allocation11 + $0x2414] ss:$40 sps:$4 sm:$0xff]  }
 0x948   :  { %13863 = vmatprep.subr.bf16.mxu0 %v19836_v4  ;;  %v19894_v4 = vld [vmem:[#allocation11 + $0x2410] ss:$40 sps:$4 sm:$0xff]  }
 0x94a   :  { %13606 = vmatpush1.bf16.msra.mxu1 %v19831_v27  ;;  %v19899_v27 = vld [vmem:[#allocation11 + $0x2464] ss:$40 sps:$4 sm:$0xff]  }
 0x94b   :  { %13864 = vmatpush1.bf16.msra.mxu0 %v19834_v34  ;;  %v19897_v34 = vld [vmem:[#allocation11 + $0x2460] ss:$40 sps:$4 sm:$0xff]  }
 0x94c   :  { %13876 = vmatprep.subr.bf16.mxu0 %v19839_v54  ;;  %v19902_v54 = vld [vmem:[#allocation11 + $0x24b4] ss:$40 sps:$4 sm:$0xff]  }
 0x94d   :  { %13608 = vmatmul.mubr.bf16.vlgmr.msra.gmra.mrb[32].mxu1 %v21455_v35 }
 0x94e   :  { %13866 = vmatmul.mubr.bf16.vlgmr.msra.gmra.mrb[24].mxu0 %v21391_v33  ;;  %v19852_v33 = vld [vmem:[#allocation11 + $0x1fb0] ss:$40 sps:$4 sm:$0xff]  }
 0x94f   :  { %13877 = vmatpush1.bf16.msra.mxu0 %v19837_v62  ;;  %13908 = vmatprep.mubr.bf16.mxu0 %v21406_v39  ;;  %v19855_v39 = vld [vmem:[#allocation11 + $0x2000] ss:$40 sps:$4 sm:$0xff]   ;;  %v19905_v62 = vld [vmem:[#allocation11 + $0x2504] ss:$40 sps:$4 sm:$0xff]  }
 0x950   :  { %13878 = vmatprep.subr.bf16.mxu0 %v19842_v48  ;;  %v19908_v48 = vld [vmem:[#allocation11 + $0x2554] ss:$40 sps:$4 sm:$0xff]  }
 0x953   :  { %13879 = vmatpush1.bf16.msra.mxu0 %v19840_v57  ;;  %v19906_v57 = vld [vmem:[#allocation11 + $0x2550] ss:$40 sps:$4 sm:$0xff]  }
 0x954   :  { %13880 = vmatprep.subr.bf16.mxu0 %v19845_v60  ;;  %v19911_v60 = vld [vmem:[#allocation11 + $0x25a4] ss:$40 sps:$4 sm:$0xff]  }
 0x957   :  { %13881 = vmatpush1.bf16.msra.mxu0 %v19843_v51  ;;  %v19909_v51 = vld [vmem:[#allocation11 + $0x25a0] ss:$40 sps:$4 sm:$0xff]  }
 0x958   :  { %13882 = vmatprep.subr.bf16.mxu0 %v19848_v41  ;;  %v19914_v41 = vld [vmem:[#allocation11 + $0x25f4] ss:$40 sps:$4 sm:$0xff]  }
 0x95b   :  { %13883 = vmatpush1.bf16.msra.mxu0 %v19846_v8  ;;  %v19912_v8 = vld [vmem:[#allocation11 + $0x25f0] ss:$40 sps:$4 sm:$0xff]  }
 0x95c   :  { %13884 = vmatprep.subr.bf16.mxu0 %v19851_v14  ;;  %v19917_v14 = vld [vmem:[#allocation11 + $0x2644] ss:$40 sps:$4 sm:$0xff]  }
 0x95f   :  { %13885 = vmatpush1.bf16.msra.mxu0 %v19849_v47  ;;  %v19915_v47 = vld [vmem:[#allocation11 + $0x2640] ss:$40 sps:$4 sm:$0xff]  }
 0x960   :  { %13886 = vmatprep.subr.bf16.mxu0 %v19854_v6  ;;  %v19920_v6 = vld [vmem:[#allocation11 + $0x2694] ss:$40 sps:$4 sm:$0xff]  }
 0x963   :  { %13887 = vmatpush1.bf16.msra.mxu0 %v19852_v33  ;;  %v19918_v33 = vld [vmem:[#allocation11 + $0x2690] ss:$40 sps:$4 sm:$0xff]  }
 0x964   :  { %13888 = vmatprep.subr.bf16.mxu0 %v19857_v15  ;;  %v19923_v15 = vld [vmem:[#allocation11 + $0x26e4] ss:$40 sps:$4 sm:$0xff]  }
 0x967   :  { %13889 = vmatpush1.bf16.msra.mxu0 %v19855_v39  ;;  %v19921_v39 = vld [vmem:[#allocation11 + $0x26e0] ss:$40 sps:$4 sm:$0xff]  }
 0x968   :  { %13890 = vmatprep.subr.bf16.mxu0 %v19860_v12  ;;  %v19926_v12 = vld [vmem:[#allocation11 + $0x2734] ss:$40 sps:$4 sm:$0xff]  }
 0x96b   :  { %13891 = vmatpush1.bf16.msra.mxu0 %v19858_v59  ;;  %v19924_v59 = vld [vmem:[#allocation11 + $0x2730] ss:$40 sps:$4 sm:$0xff]  }
 0x96c   :  { %13892 = vmatprep.subr.bf16.mxu0 %v19863_v29  ;;  %v19929_v29 = vld [vmem:[#allocation11 + $0x2784] ss:$40 sps:$4 sm:$0xff]  }
 0x96f   :  { %13893 = vmatpush1.bf16.msra.mxu0 %v19861_v2  ;;  %v19927_v2 = vld [vmem:[#allocation11 + $0x2780] ss:$40 sps:$4 sm:$0xff]  }
 0x970   :  { %13894 = vmatprep.subr.bf16.mxu0 %v19866_v45  ;;  %v19932_v45 = vld [vmem:[#allocation11 + $0x27d4] ss:$40 sps:$4 sm:$0xff]  }
 0x973   :  { %13895 = vmatpush1.bf16.msra.mxu0 %v19864_v43  ;;  %v19930_v43 = vld [vmem:[#allocation11 + $0x27d0] ss:$40 sps:$4 sm:$0xff]  }
 0x974   :  { %13896 = vmatprep.subr.bf16.mxu0 %v19869_v0  ;;  %v19935_v0 = vld [vmem:[#allocation11 + $0x2824] ss:$40 sps:$4 sm:$0xff]  }
 0x977   :  { %13897 = vmatpush1.bf16.msra.mxu0 %v19867_v9  ;;  %v19933_v9 = vld [vmem:[#allocation11 + $0x2820] ss:$40 sps:$4 sm:$0xff]  }
 0x978   :  { %13898 = vmatprep.subr.bf16.mxu0 %v19872_v56  ;;  %v19938_v56 = vld [vmem:[#allocation11 + $0x2874] ss:$40 sps:$4 sm:$0xff]  }
 0x97b   :  { %13899 = vmatpush1.bf16.msra.mxu0 %v19870_v30  ;;  %v19936_v30 = vld [vmem:[#allocation11 + $0x2870] ss:$40 sps:$4 sm:$0xff]  }
 0x97c   :  { %13900 = vmatprep.subr.bf16.mxu0 %v19875_v63  ;;  %v19941_v63 = vld [vmem:[#allocation11 + $0x28c4] ss:$40 sps:$4 sm:$0xff]  }
 0x97f   :  { %13901 = vmatpush1.bf16.msra.mxu0 %v19873_v52  ;;  %v19939_v52 = vld [vmem:[#allocation11 + $0x28c0] ss:$40 sps:$4 sm:$0xff]  }
 0x980   :  { %13902 = vmatprep.subr.bf16.mxu0 %v19878_v42  ;;  %v19944_v42 = vld [vmem:[#allocation11 + $0x2914] ss:$40 sps:$4 sm:$0xff]  }
 0x983   :  { %13903 = vmatpush1.bf16.msra.mxu0 %v19876_v61  ;;  %v19942_v61 = vld [vmem:[#allocation11 + $0x2910] ss:$40 sps:$4 sm:$0xff]  }
 0x984   :  { %13904 = vmatprep.subr.bf16.mxu0 %v19881_v11  ;;  %v19947_v11 = vld [vmem:[#allocation11 + $0x2964] ss:$40 sps:$4 sm:$0xff]  }
 0x987   :  { %13905 = vmatpush1.bf16.msra.mxu0 %v19879_v37  ;;  %v19945_v37 = vld [vmem:[#allocation11 + $0x2960] ss:$40 sps:$4 sm:$0xff]  }
 0x988   :  { %13906 = vmatprep.subr.bf16.mxu0 %v19884_v17  ;;  %v19950_v17 = vld [vmem:[#allocation11 + $0x29b4] ss:$40 sps:$4 sm:$0xff]  }
 0x98b   :  { %13907 = vmatpush1.bf16.msra.mxu0 %v19882_v31  ;;  %v19953_v31 = vld [vmem:[#allocation11 + $0x2a04] ss:$40 sps:$4 sm:$0xff]  }
 0x98c   :  { %13919 = vmatprep.subr.bf16.mxu0 %v19887_v16  ;;  %v19956_v16 = vld [vmem:[#allocation11 + $0x2a54] ss:$40 sps:$4 sm:$0xff]  }
 0x98e   :  { %13909 = vmatmul.mubr.bf16.vlgmr.msra.gmra.mrb[24].mxu0 %v21414_v19  ;;  %v19900_v19 = vld [vmem:[#allocation11 + $0x24b0] ss:$40 sps:$4 sm:$0xff]  }
 0x98f   :  { %13920 = vmatpush1.bf16.msra.mxu0 %v19885_v22  ;;  %13951 = vmatprep.mubr.bf16.mxu0 %v21426_v38  ;;  %v19903_v38 = vld [vmem:[#allocation11 + $0x2500] ss:$40 sps:$4 sm:$0xff]   ;;  %v19954_v22 = vld [vmem:[#allocation11 + $0x2a50] ss:$40 sps:$4 sm:$0xff]  }
 0x990   :  { %13921 = vmatprep.subr.bf16.mxu0 %v19890_v21  ;;  %v19959_v21 = vld [vmem:[#allocation11 + $0x2aa4] ss:$40 sps:$4 sm:$0xff]  }
 0x993   :  { %13922 = vmatpush1.bf16.msra.mxu0 %v19888_v23  ;;  %v19957_v23 = vld [vmem:[#allocation11 + $0x2aa0] ss:$40 sps:$4 sm:$0xff]  }
 0x994   :  { %13923 = vmatprep.subr.bf16.mxu0 %v19893_v26  ;;  %v19962_v26 = vld [vmem:[#allocation11 + $0x2af4] ss:$40 sps:$4 sm:$0xff]  }
 0x997   :  { %13924 = vmatpush1.bf16.msra.mxu0 %v19891_v20  ;;  %v19960_v20 = vld [vmem:[#allocation11 + $0x2af0] ss:$40 sps:$4 sm:$0xff]  }
 0x998   :  { %13925 = vmatprep.subr.bf16.mxu0 %v19896_v46  ;;  %v19965_v46 = vld [vmem:[#allocation11 + $0x2b44] ss:$40 sps:$4 sm:$0xff]  }
 0x99b   :  { %13926 = vmatpush1.bf16.msra.mxu0 %v19894_v4  ;;  %v19963_v4 = vld [vmem:[#allocation11 + $0x2b40] ss:$40 sps:$4 sm:$0xff]  }
 0x99c   :  { %13927 = vmatprep.subr.bf16.mxu0 %v19899_v27  ;;  %v19968_v27 = vld [vmem:[#allocation11 + $0x2b94] ss:$40 sps:$4 sm:$0xff]  }
 0x99f   :  { %13928 = vmatpush1.bf16.msra.mxu0 %v19897_v34  ;;  %v19966_v34 = vld [vmem:[#allocation11 + $0x2b90] ss:$40 sps:$4 sm:$0xff]  }
 0x9a0   :  { %13929 = vmatprep.subr.bf16.mxu0 %v19902_v54  ;;  %v19971_v54 = vld [vmem:[#allocation11 + $0x2be4] ss:$40 sps:$4 sm:$0xff]  }
 0x9a3   :  { %13930 = vmatpush1.bf16.msra.mxu0 %v19900_v19  ;;  %v19969_v19 = vld [vmem:[#allocation11 + $0x2be0] ss:$40 sps:$4 sm:$0xff]  }
 0x9a4   :  { %13931 = vmatprep.subr.bf16.mxu0 %v19905_v62  ;;  %v19974_v62 = vld [vmem:[#allocation11 + $0x2c34] ss:$40 sps:$4 sm:$0xff]  }
 0x9a7   :  { %13932 = vmatpush1.bf16.msra.mxu0 %v19903_v38  ;;  %v19972_v38 = vld [vmem:[#allocation11 + $0x2c30] ss:$40 sps:$4 sm:$0xff]  }
 0x9a8   :  { %13933 = vmatprep.subr.bf16.mxu0 %v19908_v48  ;;  %v19977_v48 = vld [vmem:[#allocation11 + $0x2c84] ss:$40 sps:$4 sm:$0xff]  }
 0x9ab   :  { %13934 = vmatpush1.bf16.msra.mxu0 %v19906_v57  ;;  %v19975_v57 = vld [vmem:[#allocation11 + $0x2c80] ss:$40 sps:$4 sm:$0xff]  }
 0x9ac   :  { %13935 = vmatprep.subr.bf16.mxu0 %v19911_v60  ;;  %v19980_v60 = vld [vmem:[#allocation11 + $0x2cd4] ss:$40 sps:$4 sm:$0xff]  }
 0x9af   :  { %13936 = vmatpush1.bf16.msra.mxu0 %v19909_v51  ;;  %v19978_v51 = vld [vmem:[#allocation11 + $0x2cd0] ss:$40 sps:$4 sm:$0xff]  }
 0x9b0   :  { %13937 = vmatprep.subr.bf16.mxu0 %v19914_v41  ;;  %v19983_v41 = vld [vmem:[#allocation11 + $0x2d24] ss:$40 sps:$4 sm:$0xff]  }
 0x9b3   :  { %13938 = vmatpush1.bf16.msra.mxu0 %v19912_v8  ;;  %v19981_v8 = vld [vmem:[#allocation11 + $0x2d20] ss:$40 sps:$4 sm:$0xff]  }
 0x9b4   :  { %13939 = vmatprep.subr.bf16.mxu0 %v19917_v14  ;;  %v19986_v14 = vld [vmem:[#allocation11 + $0x2d74] ss:$40 sps:$4 sm:$0xff]  }
 0x9b7   :  { %13940 = vmatpush1.bf16.msra.mxu0 %v19915_v47  ;;  %v19984_v47 = vld [vmem:[#allocation11 + $0x2d70] ss:$40 sps:$4 sm:$0xff]  }
 0x9b8   :  { %13941 = vmatprep.subr.bf16.mxu0 %v19920_v6  ;;  %v19989_v6 = vld [vmem:[#allocation11 + $0x2dc4] ss:$40 sps:$4 sm:$0xff]  }
 0x9bb   :  { %13942 = vmatpush1.bf16.msra.mxu0 %v19918_v33  ;;  %v19987_v33 = vld [vmem:[#allocation11 + $0x2dc0] ss:$40 sps:$4 sm:$0xff]  }
 0x9bc   :  { %13943 = vmatprep.subr.bf16.mxu0 %v19923_v15  ;;  %v19992_v15 = vld [vmem:[#allocation11 + $0x2e14] ss:$40 sps:$4 sm:$0xff]  }
 0x9bf   :  { %13944 = vmatpush1.bf16.msra.mxu0 %v19921_v39  ;;  %v19990_v39 = vld [vmem:[#allocation11 + $0x2e10] ss:$40 sps:$4 sm:$0xff]  }
 0x9c0   :  { %13945 = vmatprep.subr.bf16.mxu0 %v19926_v12  ;;  %v19995_v12 = vld [vmem:[#allocation11 + $0x2e64] ss:$40 sps:$4 sm:$0xff]  }
 0x9c3   :  { %13946 = vmatpush1.bf16.msra.mxu0 %v19924_v59  ;;  %v19993_v59 = vld [vmem:[#allocation11 + $0x2e60] ss:$40 sps:$4 sm:$0xff]  }
 0x9c4   :  { %13947 = vmatprep.subr.bf16.mxu0 %v19929_v29  ;;  %v19998_v29 = vld [vmem:[#allocation11 + $0x2eb4] ss:$40 sps:$4 sm:$0xff]  }
 0x9c7   :  { %13948 = vmatpush1.bf16.msra.mxu0 %v19927_v2 }
 0x9c8   :  { %13949 = vmatprep.subr.bf16.mxu0 %v19932_v45 }
 0x9cb   :  { %13950 = vmatpush1.bf16.msra.mxu0 %v19930_v43 }
 0x9cc   :  { %13962 = vmatprep.subr.bf16.mxu0 %v19935_v0 }
 0x9ce   :  { %13952 = vmatmul.mubr.bf16.vlgmr.msra.gmra.mrb[24].mxu0 %v21430_v32  ;;  %v19948_v32 = vld [vmem:[#allocation11 + $0x29b0] ss:$40 sps:$4 sm:$0xff]  }
 0x9cf   :  { %13963 = vmatpush1.bf16.msra.mxu0 %v19933_v9  ;;  %13994 = vmatprep.mubr.bf16.mxu0 %v21443_v49  ;;  %v19951_v49 = vld [vmem:[#allocation11 + $0x2a00] ss:$40 sps:$4 sm:$0xff]  }
 0x9d0   :  { %13964 = vmatprep.subr.bf16.mxu0 %v19938_v56  ;;  %v19999_v9 = vld [vmem:[#allocation11 + $0x2f00] ss:$40 sps:$4 sm:$0xff]   ;;  %v20004_v56 = vld [vmem:[#allocation11 + $0x2f54] ss:$40 sps:$4 sm:$0xff]  }
 0x9d3   :  { %13965 = vmatpush1.bf16.msra.mxu0 %v19936_v30  ;;  %v20002_v30 = vld [vmem:[#allocation11 + $0x2f50] ss:$40 sps:$4 sm:$0xff]  }
 0x9d4   :  { %13966 = vmatprep.subr.bf16.mxu0 %v19941_v63  ;;  %v20007_v63 = vld [vmem:[#allocation11 + $0x2fa4] ss:$40 sps:$4 sm:$0xff]  }
 0x9d7   :  { %13967 = vmatpush1.bf16.msra.mxu0 %v19939_v52  ;;  %v20005_v52 = vld [vmem:[#allocation11 + $0x2fa0] ss:$40 sps:$4 sm:$0xff]  }
 0x9d8   :  { %13968 = vmatprep.subr.bf16.mxu0 %v19944_v42  ;;  %v20010_v42 = vld [vmem:[#allocation11 + $0x2ff4] ss:$40 sps:$4 sm:$0xff]  }
 0x9db   :  { %13969 = vmatpush1.bf16.msra.mxu0 %v19942_v61  ;;  %v20008_v61 = vld [vmem:[#allocation11 + $0x2ff0] ss:$40 sps:$4 sm:$0xff]  }
 0x9dc   :  { %13970 = vmatprep.subr.bf16.mxu0 %v19947_v11  ;;  %v20013_v11 = vld [vmem:[#allocation11 + $0x3044] ss:$40 sps:$4 sm:$0xff]  }
 0x9df   :  { %13971 = vmatpush1.bf16.msra.mxu0 %v19945_v37  ;;  %v20011_v37 = vld [vmem:[#allocation11 + $0x3040] ss:$40 sps:$4 sm:$0xff]  }
 0x9e0   :  { %13972 = vmatprep.subr.bf16.mxu0 %v19950_v17  ;;  %v20016_v17 = vld [vmem:[#allocation11 + $0x3094] ss:$40 sps:$4 sm:$0xff]  }
 0x9e3   :  { %13973 = vmatpush1.bf16.msra.mxu0 %v19948_v32  ;;  %v20014_v32 = vld [vmem:[#allocation11 + $0x3090] ss:$40 sps:$4 sm:$0xff]  }
 0x9e4   :  { %13974 = vmatprep.subr.bf16.mxu0 %v19953_v31  ;;  %v20019_v31 = vld [vmem:[#allocation11 + $0x30e4] ss:$40 sps:$4 sm:$0xff]  }
 0x9e7   :  { %13975 = vmatpush1.bf16.msra.mxu0 %v19951_v49  ;;  %v20017_v49 = vld [vmem:[#allocation11 + $0x30e0] ss:$40 sps:$4 sm:$0xff]  }
 0x9e8   :  { %13976 = vmatprep.subr.bf16.mxu0 %v19956_v16  ;;  %v20022_v16 = vld [vmem:[#allocation11 + $0x3134] ss:$40 sps:$4 sm:$0xff]  }
 0x9eb   :  { %13977 = vmatpush1.bf16.msra.mxu0 %v19954_v22  ;;  %v20020_v22 = vld [vmem:[#allocation11 + $0x3130] ss:$40 sps:$4 sm:$0xff]  }
 0x9ec   :  { %13978 = vmatprep.subr.bf16.mxu0 %v19959_v21  ;;  %v20025_v21 = vld [vmem:[#allocation11 + $0x3184] ss:$40 sps:$4 sm:$0xff]  }
 0x9ef   :  { %13979 = vmatpush1.bf16.msra.mxu0 %v19957_v23  ;;  %v20023_v23 = vld [vmem:[#allocation11 + $0x3180] ss:$40 sps:$4 sm:$0xff]  }
 0x9f0   :  { %13980 = vmatprep.subr.bf16.mxu0 %v19962_v26  ;;  %v20028_v26 = vld [vmem:[#allocation11 + $0x31d4] ss:$40 sps:$4 sm:$0xff]  }
 0x9f3   :  { %13981 = vmatpush1.bf16.msra.mxu0 %v19960_v20  ;;  %v20026_v20 = vld [vmem:[#allocation11 + $0x31d0] ss:$40 sps:$4 sm:$0xff]  }
 0x9f4   :  { %13982 = vmatprep.subr.bf16.mxu0 %v19965_v46  ;;  %v20118_v46 = vld [vmem:[#allocation13] sm:$0xff] }
 0x9f7   :  { %13983 = vmatpush1.bf16.msra.mxu0 %v19963_v4  ;;  %v3859_v4 = vrot.slane %v20118_v46, %v20659_v3 }
 0x9f8   :  { %13984 = vmatprep.subr.bf16.mxu0 %v19968_v27 }
 0x9f9   :  { %v17175_v27 = vadd.f32 %v21539_v44, %v3859_v4 }
 0x9fb   :  { %13985 = vmatpush1.bf16.msra.mxu0 %v19966_v34  ;;  %v21973_v34 = vld [vmem:[#allocation30_spill] sm:$0xff] }
 0x9fc   :  { %13986 = vmatprep.subr.bf16.mxu0 %v19971_v54  ;;  %v3863_v54 = vrot.slane %v20118_v46, %v21973_v34 }
 0x9fe   :  { %v21611_v44 = vadd.f32 %v21545_v25, %v3863_v54 }
 0x9ff   :  { %13987 = vmatpush1.bf16.msra.mxu0 %v19969_v19  ;;  %v14052_v19 = vadd.f32 %v21509_v5, %v21506_v28 }
 0xa00   :  { %13988 = vmatprep.subr.bf16.mxu0 %v19974_v62  ;;  %v21603_v62 = vadd.f32 %v21543_v40, %v3859_v4 }
 0xa03   :  { %13989 = vmatpush1.bf16.msra.mxu0 %v19972_v38  ;;  %v21974_v38 = vld [vmem:[#allocation31_spill] sm:$0xff] }
 0xa04   :  { %13990 = vmatprep.subr.bf16.mxu0 %v19977_v48  ;;  %v3867_v48 = vrot.slane %v20118_v46, %v21974_v38 }
 0xa06   :  { %v21616_v40 = vadd.f32 %v21567_v24, %v3867_v48 }
 0xa07   :  { %13991 = vmatpush1.bf16.msra.mxu0 %v19975_v57  ;;  %v14063_v57 = vadd.f32 %v21513_v10, %v21511_v50 }
 0xa08   :  { %13992 = vmatprep.subr.bf16.mxu0 %v19980_v60  ;;  %v14053_v60 = vadd.f32 %v17175_v27, %v14052_v19 }
 0xa0b   :  { %13993 = vmatpush1.bf16.msra.mxu0 %v19978_v51  ;;  %v14064_v51 = vadd.f32 %v21603_v62, %v14063_v57 }
 0xa0c   :  { %14005 = vmatprep.subr.bf16.mxu0 %v19983_v41  ;;  %v17179_v41 = vadd.f32 %v21563_v1, %v3867_v48 }
 0xa0e   :  { %13995 = vmatmul.mubr.bf16.vlgmr.msra.gmra.mrb[24].mxu0 %v21450_v18  ;;  %v19996_v18 = vld [vmem:[#allocation11 + $0x2eb0] ss:$40 sps:$4 sm:$0xff]  }
 0xa0f   :  { %14006 = vmatpush1.bf16.msra.mxu0 %v19981_v8  ;;  %14037 = vmatprep.mubr.bf16.mxu0 %v21453_v13  ;;  %v20001_v13 = vld [vmem:[#allocation11 + $0x2f04] ss:$40 sps:$4 sm:$0xff]   ;;  %v21975_v8 = vld [vmem:[#allocation32_spill] sm:$0xff] }
 0xa10   :  { %14007 = vmatprep.subr.bf16.mxu0 %v19986_v14  ;;  %v3871_v14 = vrot.slane %v20118_v46, %v21975_v8 }
 0xa12   :  { %v21623_v25 = vadd.f32 %v21569_v55, %v3871_v14 }
 0xa13   :  { %14008 = vmatpush1.bf16.msra.mxu0 %v19984_v47 }
 0xa14   :  { %14009 = vmatprep.subr.bf16.mxu0 %v19989_v6  ;;  %v21976_v6 = vld [vmem:[#allocation33_spill] sm:$0xff] }
 0xa17   :  { %14010 = vmatpush1.bf16.msra.mxu0 %v19987_v33  ;;  %v3875_v33 = vrot.slane %v20118_v46, %v21976_v6 }
 0xa18   :  { %14011 = vmatprep.subr.bf16.mxu0 %v19992_v15  ;;  %v14065_v15 = vadd.f32 %v21611_v44, %v14064_v51 }
 0xa1b   :  { %14012 = vmatpush1.bf16.msra.mxu0 %v19990_v39 }
 0xa1c   :  { %14013 = vmatprep.subr.bf16.mxu0 %v19995_v12  ;;  %v14066_v12 = vadd.f32 %v21616_v40, %v14065_v15 }
 0xa1f   :  { %14014 = vmatpush1.bf16.msra.mxu0 %v19993_v59  ;;  %v21977_v59 = vld [vmem:[#allocation34_spill] sm:$0xff] }
 0xa20   :  { %v21588_v2 = vpop.f32.mrb[32].mxu1  ;;  %14015 = vmatprep.subr.bf16.mxu0 %v19998_v29  ;;  %v3879_v29 = vrot.slane %v20118_v46, %v21977_v59 }
 0xa21   :  { %v21590_v45 = vpop.f32.mrb[33].mxu1  ;;  %v17183_v1 = vadd.f32 %v21588_v2, %v3875_v33 }
 0xa22   :  { %v21592_v43 = vpop.f32.mrb[34].mxu1 }
 0xa23   :  { %14016 = vmatpush1.bf16.msra.mxu0 %v19996_v18  ;;  %v21594_v0 = vpop.f32.mrb[35].mxu1  ;;  %v3845_v18 = vld [vmem:[#allocation13 + $0x8] sm:$0x3]  ;;  %v21628_v24 = vadd.f32 %v21592_v43, %v3875_v33 }
 0xa24   :  { %14017 = vmatprep.subr.bf16.mxu0 %v20001_v13  ;;  %v21636_v2 = vadd.f32 %v21594_v0, %v3879_v29 }
 0xa27   :  { %14018 = vmatpush1.bf16.msra.mxu0 %v19999_v9  ;;  %v14067_v9 = vadd.f32 %v21623_v25, %v14066_v12 }
 0xa28   :  { %14019 = vmatprep.subr.bf16.mxu0 %v20004_v56 }
 0xa29   :  { %v14068_v55 = vadd.f32 %v21628_v24, %v14067_v9 }
 0xa2b   :  { %14020 = vmatpush1.bf16.msra.mxu0 %v20002_v30  ;;  %v17184_v30 = vadd.f32 %v21590_v45, %v3879_v29 }
 0xa2c   :  { %14021 = vmatprep.subr.bf16.mxu0 %v20007_v63  ;;  %v3887_v63 = vrot.slane %v3845_v18, %v21972_v53 }
 0xa2f   :  { %14022 = vmatpush1.bf16.msra.mxu0 %v20005_v52 }
 0xa30   :  { %14023 = vmatprep.subr.bf16.mxu0 %v20010_v42 }
 0xa33   :  { %14024 = vmatpush1.bf16.msra.mxu0 %v20008_v61 }
 0xa34   :  { %14025 = vmatprep.subr.bf16.mxu0 %v20013_v11 }
 0xa37   :  { %14026 = vmatpush1.bf16.msra.mxu0 %v20011_v37 }
 0xa38   :  { %14027 = vmatprep.subr.bf16.mxu0 %v20016_v17  ;;  %v14069_v17 = vadd.f32 %v21636_v2, %v14068_v55 }
 0xa3b   :  { %14028 = vmatpush1.bf16.msra.mxu0 %v20014_v32 }
 0xa3c   :  { %14029 = vmatprep.subr.bf16.mxu0 %v20019_v31 }
 0xa3f   :  { %14030 = vmatpush1.bf16.msra.mxu0 %v20017_v49 }
 0xa40   :  { %14031 = vmatprep.subr.bf16.mxu0 %v20022_v16 }
 0xa43   :  { %14032 = vmatpush1.bf16.msra.mxu0 %v20020_v22 }
 0xa44   :  { %14033 = vmatprep.subr.bf16.mxu0 %v20025_v21  ;;  %v20029_v21 = vld [vmem:[#allocation17 + $0x40] sm:$0xff]  }
 0xa45   :  { %17057 = vmatprep.subr.bf16.mxu1 %v20029_v21 }
 0xa47   :  { %14034 = vmatpush1.bf16.msra.mxu0 %v20023_v23  ;;  %v20030_v23 = vld [vmem:[#allocation17] sm:$0xff]  }
 0xa48   :  { %14035 = vmatprep.subr.bf16.mxu0 %v20028_v26  ;;  %v20031_v26 = vld [vmem:[#allocation17 + $0x48] sm:$0xff]   ;;  %17058 = vmatpush3.bf16.msra.mxu1 %v20030_v23 }
 0xa49   :  { %17059 = vmatprep.subr.bf16.mxu1 %v20031_v26 }
 0xa4b   :  { %14036 = vmatpush1.bf16.msra.mxu0 %v20026_v20 }
 0xa4e   :  { %14038 = vmatmul.mubr.bf16.vlgmr.msra.gmra.mrb[24].mxu0 %v21455_v35  ;;  %v17176_v35 = vadd.f32 %v21541_v36, %v3863_v54  ;;  %v17180_v36 = vadd.f32 %v21565_v58, %v3871_v14  ;;  %v3883_v58 = vrot.slane %v3845_v18, %v21971_v7 }
 0xa50   :  { %v14054_v47 = vadd.f32 %v17176_v35, %v14053_v60 }
 0xa52   :  { %v14055_v39 = vadd.f32 %v17179_v41, %v14054_v47 }
 0xa54   :  { %v14056_v13 = vadd.f32 %v17180_v36, %v14055_v39 }
 0xa56   :  { %v14057_v56 = vadd.f32 %v17183_v1, %v14056_v13 }
 0xa58   :  { %v14058_v42 = vadd.f32 %v17184_v30, %v14057_v56 }
 0xb21   :  { %v14039_v52 = vpop.f32.mrb[24].mxu0 }
 0xb22   :  { %v17187_v61 = vadd.f32 %v14039_v52, %v3883_v58  ;;  %v14041_v11 = vpop.f32.mrb[25].mxu0 }
 0xb23   :  { %v17188_v43 = vadd.f32 %v14041_v11, %v3887_v63  ;;  %v14043_v37 = vpop.f32.mrb[26].mxu0 }
 0xb24   :  { %v14059_v32 = vadd.f32 %v17187_v61, %v14058_v42  ;;  %v21639_v31 = vadd.f32 %v14043_v37, %v3883_v58  ;;  %v14045_v45 = vpop.f32.mrb[27].mxu0 }
 0xb25   :  { %v21641_v49 = vadd.f32 %v14045_v45, %v3887_v63 }
 0xb26   :  { %v14070_v16 = vadd.f32 %v21639_v31, %v14069_v17  ;;  %v14060_v22 = vadd.f32 %v17188_v43, %v14059_v32 }
 0xb28   :  { %14061 = vadd.xlane.f32.xlu0 %v14060_v22  ;;  %v14071_v0 = vadd.f32 %v21641_v49, %v14070_v16 }
 0xb2a   :  { %14072 = vadd.xlane.f32.xlu1 %v14071_v0 }
 0xbb5   :  { %v14062_v20 = vpop.xlane.xlu0 %14061 }
 0xbb6   :  { %v14075_v46 = vmul.f32 0.00078125, %v14062_v20 }
 0xbb7   :  { %v14073_v4 = vpop.xlane.xlu1 %14072 }
 0xbb8   :  { %v21646_v54 = vsub.f32 %v21506_v28, %v14075_v46  ;;  %v21649_v19 = vsub.f32 %v21509_v5, %v14075_v46  ;;  %v14076_v48 = vmul.f32 0.00078125, %v14073_v4  ;;  %v21651_v57 = vsub.f32 %v17175_v27, %v14075_v46 }
 0xbb9   :  { %v21655_v51 = vsub.f32 %v17176_v35, %v14075_v46  ;;  %v21659_v47 = vsub.f32 %v17179_v41, %v14075_v46  ;;  %v21669_v15 = vsub.f32 %v17180_v36, %v14075_v46  ;;  %v21676_v41 = vsub.f32 %v17183_v1, %v14075_v46 }
 0xbba   :  { %v14097_v60 = vmul.f32 %v21646_v54, %v21646_v54  ;;  %v14098_v14 = vmul.f32 %v21649_v19, %v21649_v19  ;;  %v14099_v28 = vmul.f32 %v21651_v57, %v21651_v57  ;;  %v21664_v5 = vsub.f32 %v21511_v50, %v14076_v48 }
 0xbbb   :  { %v21667_v27 = vsub.f32 %v21513_v10, %v14076_v48  ;;  %v14100_v35 = vmul.f32 %v21655_v51, %v21655_v51  ;;  %v21674_v12 = vsub.f32 %v21603_v62, %v14076_v48  ;;  %v14101_v10 = vmul.f32 %v21659_v47, %v21659_v47 }
 0xbbc   :  { %v14117_v33 = vadd.f32 %v14098_v14, %v14097_v60  ;;  %v14107_v29 = vmul.f32 %v21664_v5, %v21664_v5  ;;  %v21685_v18 = vsub.f32 %v21611_v44, %v14076_v48  ;;  %v21687_v13 = vsub.f32 %v17184_v30, %v14075_v46 }
 0xbbd   :  { %v14108_v50 = vmul.f32 %v21667_v27, %v21667_v27  ;;  %v14102_v62 = vmul.f32 %v21669_v15, %v21669_v15  ;;  %v21692_v9 = vsub.f32 %v21616_v40, %v14076_v48  ;;  %v14109_v56 = vmul.f32 %v21674_v12, %v21674_v12 }
 0xbbe   :  { %v14118_v39 = vadd.f32 %v14117_v33, %v14099_v28  ;;  %v21696_v63 = vsub.f32 %v17187_v61, %v14075_v46  ;;  %v14103_v55 = vmul.f32 %v21676_v41, %v21676_v41  ;;  %v21701_v30 = vsub.f32 %v21623_v25, %v14076_v48 }
 0xbbf   :  { %v14128_v58 = vadd.f32 %v14108_v50, %v14107_v29  ;;  %v14110_v52 = vmul.f32 %v21685_v18, %v21685_v18  ;;  %v21705_v11 = vsub.f32 %v17188_v43, %v14075_v46  ;;  %v14104_v40 = vmul.f32 %v21687_v13, %v21687_v13  ;;  %v20036_v29 = vld [vmem:[#allocation17 + $0x18] sm:$0xff]   ;;  %v20037_v50 = vld [vmem:[#allocation17 + $0x60] sm:$0xff]  }
 0xbc0   :  { %v14119_v36 = vadd.f32 %v14118_v39, %v14100_v35  ;;  %v21710_v61 = vsub.f32 %v21628_v24, %v14076_v48  ;;  %v14111_v17 = vmul.f32 %v21692_v9, %v21692_v9  ;;  %v14105_v25 = vmul.f32 %v21696_v63, %v21696_v63  ;;  %v20032_v35 = vld [vmem:[#allocation17 + $0x8] sm:$0xff]   ;;  %v20033_v39 = vld [vmem:[#allocation17 + $0x50] sm:$0xff]  }
 0xbc1   :  { %v14129_v42 = vadd.f32 %v14128_v58, %v14109_v56  ;;  %v21717_v16 = vsub.f32 %v21636_v2, %v14076_v48  ;;  %v14112_v43 = vmul.f32 %v21701_v30, %v21701_v30  ;;  %v14106_v0 = vmul.f32 %v21705_v11, %v21705_v11  ;;  %17060 = vmatpush3.bf16.msra.mxu1 %v20032_v35  ;;  %v20042_v56 = vld [vmem:[#allocation17 + $0x30] sm:$0xff]   ;;  %v20043_v58 = vld [vmem:[#allocation17 + $0x78] sm:$0xff]  }
 0xbc2   :  { %v14120_v1 = vadd.f32 %v14119_v36, %v14101_v10  ;;  %v21724_v21 = vsub.f32 %v21639_v31, %v14076_v48  ;;  %v14113_v23 = vmul.f32 %v21710_v61, %v21710_v61  ;;  %v21729_v46 = vsub.f32 %v21641_v49, %v14076_v48  ;;  %v20034_v49 = vld [vmem:[#allocation17 + $0x10] sm:$0xff]   ;;  %v20035_v48 = vld [vmem:[#allocation17 + $0x58] sm:$0xff]   ;;  %17061 = vmatprep.subr.bf16.mxu1 %v20033_v39  ;;  %v20038_v10 = vld [vmem:[#allocation17 + $0x20] sm:$0xff]  }
 0xbc3   :  { %v14130_v32 = vadd.f32 %v14129_v42, %v14110_v52  ;;  %v14114_v2 = vmul.f32 %v21717_v16, %v21717_v16  ;;  %v20039_v36 = vld [vmem:[#allocation17 + $0x68] sm:$0xff]  }
 0xbc4   :  { %v14121_v44 = vadd.f32 %v14120_v1, %v14102_v62  ;;  %v14115_v60 = vmul.f32 %v21724_v21, %v21724_v21  ;;  %v14116_v31 = vmul.f32 %v21729_v46, %v21729_v46  ;;  %v20040_v62 = vld [vmem:[#allocation17 + $0x28] sm:$0xff]   ;;  %v20041_v1 = vld [vmem:[#allocation17 + $0x70] sm:$0xff]  }
 0xbc5   :  { %v14131_v22 = vadd.f32 %v14130_v32, %v14111_v17  ;;  %17062 = vmatpush3.bf16.msra.mxu1 %v20034_v49 }
 0xbc6   :  { %v14122_v37 = vadd.f32 %v14121_v44, %v14103_v55  ;;  %17063 = vmatprep.subr.bf16.mxu1 %v20035_v48  ;;  %v20044_v55 = vld [vmem:[#allocation17 + $0x38] sm:$0xff]   ;;  %v20045_v44 = vld [vmem:[#allocation17 + $0xc0] sm:$0xff]  }
 0xbc7   :  { %v14132_v26 = vadd.f32 %v14131_v22, %v14112_v43 }
 0xbc8   :  { %v14123_v45 = vadd.f32 %v14122_v37, %v14104_v40 }
 0xbc9   :  { %v14133_v4 = vadd.f32 %v14132_v26, %v14113_v23  ;;  %17064 = vmatpush3.bf16.msra.mxu1 %v20036_v29 }
 0xbca   :  { %v14124_v24 = vadd.f32 %v14123_v45, %v14105_v25  ;;  %17065 = vmatprep.subr.bf16.mxu1 %v20037_v50  ;;  %v21737_v25 = vld [vmem:[#allocation14] sm:$0xff]  ;;  %v21739_v45 = vld [vmem:[#allocation16] sm:$0xff] }
 0xbcb   :  { %v14134_v14 = vadd.f32 %v14133_v4, %v14114_v2  ;;  %v14174_v43 = vrot.slane %v21737_v25, %v21972_v53  ;;  %v14198_v23 = vrot.slane %v21737_v25, %v21977_v59  ;;  %v14194_v26 = vrot.slane %v21737_v25, %v21976_v6 }
 0xbcc   :  { %v14125_v20 = vadd.f32 %v14124_v24, %v14106_v0  ;;  %v14170_v0 = vrot.slane %v21737_v25, %v21971_v7  ;;  %v14186_v24 = vrot.slane %v21737_v25, %v21974_v38  ;;  %v14258_v4 = vrot.slane %v21739_v45, %v21974_v38 }
 0xbcd   :  { %v14135_v28 = vadd.f32 %v14134_v14, %v14115_v60  ;;  %17066 = vmatpush3.bf16.msra.mxu1 %v20038_v10  ;;  %v14270_v60 = vrot.slane %v21739_v45, %v21977_v59  ;;  %v14182_v59 = vrot.slane %v21737_v25, %v21973_v34 }
 0xbce   :  { %14126 = vadd.xlane.f32.xlu0 %v14125_v20  ;;  %17067 = vmatprep.subr.bf16.mxu1 %v20039_v36  ;;  %v14254_v36 = vrot.slane %v21739_v45, %v21973_v34 }
 0xbcf   :  { %v14136_v33 = vadd.f32 %v14135_v28, %v14116_v31 }
 0xbd1   :  { %14137 = vadd.xlane.f32.xlu1 %v14136_v33  ;;  %17068 = vmatpush3.bf16.msra.mxu1 %v20040_v62  ;;  %v14049_v62 = vld [vmem:[#allocation14 + $0x8] sm:$0x3] }
 0xbd2   :  { %17069 = vmatprep.subr.bf16.mxu1 %v20041_v1 }
 0xbd5   :  { %17070 = vmatpush3.bf16.msra.mxu1 %v20042_v56 }
 0xbd6   :  { %17071 = vmatprep.subr.bf16.mxu1 %v20043_v58 }
 0xbd9   :  { %17072 = vmatpush3.bf16.msra.mxu1 %v20044_v55 }
 0xbda   :  { %17079 = vmatprep.subr.bf16.mxu1 %v20045_v44 }
 0xc5b   :  { %v14127_v52 = vpop.xlane.xlu0 %14126 }
 0xc5c   :  { %v14139_v42 = vmul.f32 0.00078125, %v14127_v52 }
 0xc5e   :  { %v14141_v40 = vadd.f32 1e-05, %v14139_v42  ;;  %v14138_v37 = vpop.xlane.xlu1 %14137 }
 0xc5f   :  { %v14140_v17 = vmul.f32 0.00078125, %v14138_v37 }
 0xc60   :  { %20113 = vrsqrt.f32 %v14141_v40 }
 0xc61   :  { %v14142_v32 = vadd.f32 1e-05, %v14140_v17  ;;  %v14051_v17 = vld [vmem:[#allocation16 + $0x8] sm:$0x3] }
 0xc63   :  { %20115 = vrsqrt.f32 %v14142_v32 }
 0xc6a   :  { %v21743_v22 = vpop.eup %20113 }
 0xc6b   :  { %v14146_v20 = vmul.f32 %v21743_v22, %v21649_v19  ;;  %v14145_v2 = vmul.f32 %v21743_v22, %v21646_v54  ;;  %v14149_v14 = vmul.f32 %v21743_v22, %v21659_v47  ;;  %v14152_v31 = vmul.f32 %v21743_v22, %v21687_v13 }
 0xc6c   :  { %v14151_v28 = vmul.f32 %v21743_v22, %v21676_v41  ;;  %v14266_v19 = vrot.slane %v21739_v45, %v21976_v6  ;;  %v14246_v54 = vrot.slane %v21739_v45, %v21972_v53  ;;  %v14148_v38 = vmul.f32 %v21743_v22, %v21655_v51 }
 0xc6d   :  { %v14218_v33 = vmul.f32 %v14174_v43, %v14146_v20  ;;  %v14221_v47 = vmul.f32 %v14186_v24, %v14149_v14  ;;  %v14224_v35 = vmul.f32 %v14198_v23, %v14152_v31  ;;  %v14217_v13 = vmul.f32 %v14170_v0, %v14145_v2  ;;  %v21777_v49 = vpop.eup %20115 }
 0xc6e   :  { %v14223_v39 = vmul.f32 %v14194_v26, %v14151_v28  ;;  %v14242_v41 = vrot.slane %v21739_v45, %v21971_v7  ;;  %v14156_v51 = vmul.f32 %v21777_v49, %v21667_v27  ;;  %v14155_v50 = vmul.f32 %v21777_v49, %v21664_v5 }
 0xc6f   :  { %v14293_v6 = vadd.f32 %v14258_v4, %v14221_v47  ;;  %v14296_v48 = vadd.f32 %v14270_v60, %v14224_v35  ;;  %v14220_v10 = vmul.f32 %v14182_v59, %v14148_v38  ;;  %v14290_v1 = vadd.f32 %v14246_v54, %v14218_v33 }
 0xc70   :  { %v21779_v29 = vadd.f32 %v14266_v19, %v14223_v39  ;;  %v14158_v56 = vmul.f32 %v21777_v49, %v21685_v18  ;;  %v14228_v58 = vmul.f32 %v14174_v43, %v14156_v51  ;;  %v14227_v55 = vmul.f32 %v14170_v0, %v14155_v50  ;;  %v20047_v39 = vld [vmem:[#allocation17 + $0xc8] sm:$0xff]  }
 0xc71   :  { %v14289_v44 = vadd.f32 %v14242_v41, %v14217_v13  ;;  %v14159_v42 = vmul.f32 %v21777_v49, %v21692_v9  ;;  %v14202_v27 = vrot.slane %v14049_v62, %v21971_v7  ;;  %v14292_v37 = vadd.f32 %v14254_v36, %v14220_v10 }
 0xc72   :  { %v14230_v52 = vmul.f32 %v14182_v59, %v14158_v56  ;;  %v14300_v40 = vadd.f32 %v14246_v54, %v14228_v58  ;;  %v14299_v5 = vadd.f32 %v14242_v41, %v14227_v55  ;;  %v14162_v34 = vmul.f32 %v21777_v49, %v21717_v16  ;;  %v20046_v16 = vld [vmem:[#allocation17 + $0x80] sm:$0xff]  }
 0xc73   :  { %v14310_v32 = vmax.f32 %v14290_v1, 0.0  ;;  %v14231_v2 = vmul.f32 %v14186_v24, %v14159_v42  ;;  %v14206_v18 = vrot.slane %v14049_v62, %v21972_v53  ;;  %v14309_v0 = vmax.f32 %v14289_v44, 0.0 }
 0xc74   :  { %v14302_v20 = vadd.f32 %v14254_v36, %v14230_v52  ;;  %v14320_v43 = vmax.f32 %v14300_v40, 0.0  ;;  %v14319_v14 = vmax.f32 %v14299_v5, 0.0  ;;  %v14234_v31 = vmul.f32 %v14198_v23, %v14162_v34  ;;  %v20050_v52 = vld [vmem:[#allocation17 + $0x90] sm:$0xff]   ;;  %v20051_v40 = vld [vmem:[#allocation17 + $0xd8] sm:$0xff]  }
 0xc75   :  { %v14303_v9 = vadd.f32 %v14258_v4, %v14231_v2  ;;  %v14161_v54 = vmul.f32 %v21777_v49, %v21710_v61  ;;  %v14274_v38 = vrot.slane %v14051_v17, %v21971_v7  ;;  %v14312_v47 = vmax.f32 %v14292_v37, 0.0  ;;  %v20055_v2 = vld [vmem:[#allocation17 + $0xe8] sm:$0xff]  }
 0xc76   :  { %v14322_v28 = vmax.f32 %v14302_v20, 0.0  ;;  %v14330_v59 = vpack.c.bf16 %v14320_v43, %v14310_v32  ;;  %v14329_v33 = vpack.c.bf16 %v14319_v14, %v14309_v0  ;;  %v14306_v35 = vadd.f32 %v14270_v60, %v14234_v31  ;;  %v20054_v20 = vld [vmem:[#allocation17 + $0xa0] sm:$0xff]   ;;  %v20056_v31 = vld [vmem:[#allocation17 + $0xa8] sm:$0xff]  }
 0xc77   :  { %v14313_v24 = vmax.f32 %v14293_v6, 0.0  ;;  %v14323_v13 = vmax.f32 %v14303_v9, 0.0  ;;  %v14233_v41 = vmul.f32 %v14194_v26, %v14161_v54  ;;  %v14278_v51 = vrot.slane %v14051_v17, %v21972_v53  ;;  %v20048_v53 = vld [vmem:[#allocation17 + $0x88] sm:$0xff]   ;;  %v20057_v54 = vld [vmem:[#allocation17 + $0xf0] sm:$0xff]  }
 0xc78   :  { %15018 = vmatprep.mubr.bf16.mxu1 %v14330_v59  ;;  %v14332_v23 = vpack.c.bf16 %v14322_v28, %v14312_v47  ;;  %v14316_v50 = vmax.f32 %v14296_v48, 0.0  ;;  %v14326_v4 = vmax.f32 %v14306_v35, 0.0  ;;  %v14154_v61 = vmul.f32 %v21743_v22, %v21705_v11  ;;  %v20049_v11 = vld [vmem:[#allocation17 + $0xd0] sm:$0xff]  }
 0xc79   :  { %15019 = vmatmul.mubr.bf16.vlgmr.msra.gmra.mrb[36].mxu1 %v14329_v33  ;;  %v21801_v7 = vpack.c.bf16 %v14323_v13, %v14313_v24  ;;  %v14305_v10 = vadd.f32 %v14266_v19, %v14233_v41  ;;  %v14164_v60 = vmul.f32 %v21777_v49, %v21729_v46  ;;  %v14153_v6 = vmul.f32 %v21743_v22, %v21696_v63  ;;  %v20061_v24 = vld [vmem:[#allocation17 + $0x140] sm:$0xff]  }
 0xc7a   :  { %17080 = vmatpush3.bf16.msra.mxu1 %v20046_v16  ;;  %15059 = vmatprep.mubr.bf16.mxu1 %v14332_v23  ;;  %v21807_v26 = vpack.c.bf16 %v14326_v4, %v14316_v50  ;;  %v14226_v48 = vmul.f32 %v14206_v18, %v14154_v61  ;;  %v14163_v36 = vmul.f32 %v21777_v49, %v21724_v21  ;;  %v14315_v62 = vmax.f32 %v21779_v29, 0.0  ;;  %v20052_v29 = vld [vmem:[#allocation17 + $0x98] sm:$0xff]   ;;  %v20063_v50 = vld [vmem:[#allocation17 + $0x148] sm:$0xff]   ;;  %v20065_v4 = vld [vmem:[#allocation17 + $0x150] sm:$0xff]  }
 0xc7b   :  { %17081 = vmatprep.subr.bf16.mxu1 %v20047_v39  ;;  %v14325_v19 = vmax.f32 %v14305_v10, 0.0  ;;  %v14236_v1 = vmul.f32 %v14206_v18, %v14164_v60  ;;  %v14225_v56 = vmul.f32 %v14202_v27, %v14153_v6  ;;  %v14157_v18 = vmul.f32 %v21777_v49, %v21674_v12  ;;  %v20059_v16 = vld [vmem:[#allocation17 + $0xf8] sm:$0xff]   ;;  %v20066_v61 = vld [vmem:[#allocation17 + $0x110] sm:$0xff]   ;;  %v20069_v6 = vld [vmem:[#allocation17 + $0x160] sm:$0xff]  }
 0xc7c   :  { %v14298_v46 = vadd.f32 %v14278_v51, %v14226_v48  ;;  %v14235_v58 = vmul.f32 %v14202_v27, %v14163_v36  ;;  %v20053_v27 = vld [vmem:[#allocation17 + $0xe0] sm:$0xff]   ;;  %v14160_v43 = vmul.f32 %v21777_v49, %v21701_v30  ;;  %v14147_v0 = vmul.f32 %v21743_v22, %v21651_v57  ;;  %v20058_v57 = vld [vmem:[#allocation17 + $0xb0] sm:$0xff]   ;;  %v20067_v10 = vld [vmem:[#allocation17 + $0x158] sm:$0xff]  }
 0xc7d   :  { %v21812_v55 = vpack.c.bf16 %v14325_v19, %v14315_v62  ;;  %v14308_v63 = vadd.f32 %v14278_v51, %v14236_v1  ;;  %v14297_v44 = vadd.f32 %v14274_v38, %v14225_v56  ;;  %v14178_v14 = vrot.slane %v21737_v25, %v20659_v3  ;;  %v20068_v60 = vld [vmem:[#allocation17 + $0x118] sm:$0xff]   ;;  %v20071_v48 = vld [vmem:[#allocation17 + $0x168] sm:$0xff]   ;;  %v20074_v62 = vld [vmem:[#allocation17 + $0x130] sm:$0xff]  }
 0xc7e   :  { %17082 = vmatpush3.bf16.msra.mxu1 %v20048_v53  ;;  %v14307_v42 = vadd.f32 %v14274_v38, %v14235_v58  ;;  %v14318_v5 = vmax.f32 %v14298_v46, 0.0  ;;  %v14150_v28 = vmul.f32 %v21743_v22, %v21669_v15  ;;  %v14190_v9 = vrot.slane %v21737_v25, %v21975_v8  ;;  %v20060_v25 = vld [vmem:[#allocation17 + $0xb8] sm:$0xff]   ;;  %v20070_v53 = vld [vmem:[#allocation17 + $0x120] sm:$0xff]   ;;  %v20072_v36 = vld [vmem:[#allocation17 + $0x128] sm:$0xff]  }
 0xc7f   :  { %17083 = vmatprep.subr.bf16.mxu1 %v20049_v11  ;;  %v14328_v21 = vmax.f32 %v14308_v63, 0.0  ;;  %v14317_v37 = vmax.f32 %v14297_v44, 0.0  ;;  %v14229_v12 = vmul.f32 %v14178_v14, %v14157_v18  ;;  %v14219_v59 = vmul.f32 %v14178_v14, %v14147_v0  ;;  %v20073_v11 = vld [vmem:[#allocation17 + $0x170] sm:$0xff]   ;;  %v20075_v19 = vld [vmem:[#allocation17 + $0x178] sm:$0xff]   ;;  %v20077_v56 = vld [vmem:[#allocation17 + $0x1c0] sm:$0xff]  }
 0xc80   :  { %v14327_v34 = vmax.f32 %v14307_v42, 0.0  ;;  %v14232_v38 = vmul.f32 %v14190_v9, %v14160_v43  ;;  %v14250_v30 = vrot.slane %v21739_v45, %v20659_v3  ;;  %v14222_v49 = vmul.f32 %v14190_v9, %v14150_v28  ;;  %v20062_v3 = vld [vmem:[#allocation17 + $0x100] sm:$0xff]   ;;  %v20076_v1 = vld [vmem:[#allocation17 + $0x138] sm:$0xff]   ;;  %v20079_v58 = vld [vmem:[#allocation17 + $0x1c8] sm:$0xff]  }
 0xc81   :  { %v21814_v17 = vpack.c.bf16 %v14328_v21, %v14318_v5  ;;  %v14262_v33 = vrot.slane %v21739_v45, %v21975_v8  ;;  %v20064_v45 = vld [vmem:[#allocation17 + $0x108] sm:$0xff]   ;;  %v20078_v46 = vld [vmem:[#allocation17 + $0x180] sm:$0xff]   ;;  %v20081_v44 = vld [vmem:[#allocation17 + $0x1d0] sm:$0xff]  }
 0xc82   :  { %17084 = vmatpush3.bf16.msra.mxu1 %v20050_v52  ;;  %v21816_v32 = vpack.c.bf16 %v14327_v34, %v14317_v37  ;;  %v14301_v15 = vadd.f32 %v14250_v30, %v14229_v12  ;;  %v14291_v47 = vadd.f32 %v14250_v30, %v14219_v59  ;;  %v20080_v63 = vld [vmem:[#allocation17 + $0x188] sm:$0xff]   ;;  %v20082_v52 = vld [vmem:[#allocation17 + $0x190] sm:$0xff]   ;;  %v20083_v42 = vld [vmem:[#allocation17 + $0x1d8] sm:$0xff]  }
 0xc83   :  { %17085 = vmatprep.subr.bf16.mxu1 %v20051_v40  ;;  %v14304_v22 = vadd.f32 %v14262_v33, %v14232_v38  ;;  %v14294_v35 = vadd.f32 %v14262_v33, %v14222_v49  ;;  %v20084_v40 = vld [vmem:[#allocation17 + $0x198] sm:$0xff]   ;;  %v20085_v5 = vld [vmem:[#allocation17 + $0x1e0] sm:$0xff]   ;;  %v20087_v37 = vld [vmem:[#allocation17 + $0x1e8] sm:$0xff]  }
 0xc84   :  { %v14321_v39 = vmax.f32 %v14301_v15, 0.0  ;;  %v14311_v41 = vmax.f32 %v14291_v47, 0.0  ;;  %v20086_v21 = vld [vmem:[#allocation17 + $0x1a0] sm:$0xff]   ;;  %v20089_v34 = vld [vmem:[#allocation17 + $0x1f0] sm:$0xff]   ;;  %v20095_v18 = vld [vmem:[#allocation17 + $0x248] sm:$0xff]  }
 0xc85   :  { %v14324_v13 = vmax.f32 %v14304_v22, 0.0  ;;  %v14314_v51 = vmax.f32 %v14294_v35, 0.0  ;;  %v20096_v43 = vld [vmem:[#allocation17 + $0x208] sm:$0xff]   ;;  %v20097_v0 = vld [vmem:[#allocation17 + $0x250] sm:$0xff]   ;;  %v20100_v28 = vld [vmem:[#allocation17 + $0x218] sm:$0xff]  }
 0xc86   :  { %17086 = vmatpush3.bf16.msra.mxu1 %v20052_v29  ;;  %v14331_v23 = vpack.c.bf16 %v14321_v39, %v14311_v41  ;;  %v20091_v29 = vld [vmem:[#allocation17 + $0x1f8] sm:$0xff]   ;;  %v20098_v14 = vld [vmem:[#allocation17 + $0x210] sm:$0xff]   ;;  %v20101_v9 = vld [vmem:[#allocation17 + $0x260] sm:$0xff]  }
 0xc87   :  { %17087 = vmatprep.subr.bf16.mxu1 %v20053_v27  ;;  %v14334_v8 = vpack.c.bf16 %v14324_v13, %v14314_v51  ;;  %v20092_v27 = vld [vmem:[#allocation17 + $0x1b8] sm:$0xff]   ;;  %v20103_v12 = vld [vmem:[#allocation17 + $0x268] sm:$0xff]   ;;  %v20105_v38 = vld [vmem:[#allocation17 + $0x270] sm:$0xff]  }
 0xc88   :  { %v20107_v59 = vld [vmem:[#allocation17 + $0x278] sm:$0xff]   ;;  %v16976_v47 = vld [vmem:[#allocation19] ss:$0 sm:$0xff] }
 0xc89   :  { %v20108_v30 = vld [vmem:[#allocation17 + $0x238] sm:$0xff]  }
 0xc8a   :  { %17088 = vmatpush3.bf16.msra.mxu1 %v20054_v20  ;;  %v20093_v20 = vld [vmem:[#allocation17 + $0x240] sm:$0xff]  }
 0xc8b   :  { %17089 = vmatprep.subr.bf16.mxu1 %v20055_v2  ;;  %v20094_v2 = vld [vmem:[#allocation17 + $0x200] sm:$0xff]  }
 0xc8e   :  { %17090 = vmatpush3.bf16.msra.mxu1 %v20056_v31  ;;  %v20099_v31 = vld [vmem:[#allocation17 + $0x258] sm:$0xff]  }
 0xc8f   :  { %17091 = vmatprep.subr.bf16.mxu1 %v20057_v54  ;;  %v20102_v54 = vld [vmem:[#allocation17 + $0x220] sm:$0xff]  }
 0xc92   :  { %17092 = vmatpush3.bf16.msra.mxu1 %v20058_v57 }
 0xc93   :  { %17093 = vmatprep.subr.bf16.mxu1 %v20059_v16 }
 0xc96   :  { %17094 = vmatpush3.bf16.msra.mxu1 %v20060_v25 }
 0xc97   :  { %17101 = vmatprep.subr.bf16.mxu1 %v20061_v24 }
 0xc99   :  { %15060 = vmatmul.mubr.bf16.vlgmr.msra.gmra.mrb[40].mxu1 %v14331_v23 }
 0xc9a   :  { %17102 = vmatpush3.bf16.msra.mxu1 %v20062_v3  ;;  %15100 = vmatprep.mubr.bf16.mxu1 %v14334_v8 }
 0xc9b   :  { %17103 = vmatprep.subr.bf16.mxu1 %v20063_v50 }
 0xc9e   :  { %17104 = vmatpush3.bf16.msra.mxu1 %v20064_v45 }
 0xc9f   :  { %17105 = vmatprep.subr.bf16.mxu1 %v20065_v4 }
 0xca2   :  { %17106 = vmatpush3.bf16.msra.mxu1 %v20066_v61 }
 0xca3   :  { %17107 = vmatprep.subr.bf16.mxu1 %v20067_v10 }
 0xca6   :  { %17108 = vmatpush3.bf16.msra.mxu1 %v20068_v60 }
 0xca7   :  { %17109 = vmatprep.subr.bf16.mxu1 %v20069_v6 }
 0xcaa   :  { %17110 = vmatpush3.bf16.msra.mxu1 %v20070_v53 }
 0xcab   :  { %17111 = vmatprep.subr.bf16.mxu1 %v20071_v48 }
 0xcae   :  { %17112 = vmatpush3.bf16.msra.mxu1 %v20072_v36 }
 0xcaf   :  { %17113 = vmatprep.subr.bf16.mxu1 %v20073_v11 }
 0xcb2   :  { %17114 = vmatpush3.bf16.msra.mxu1 %v20074_v62 }
 0xcb3   :  { %17115 = vmatprep.subr.bf16.mxu1 %v20075_v19 }
 0xcb6   :  { %17116 = vmatpush3.bf16.msra.mxu1 %v20076_v1 }
 0xcb7   :  { %17123 = vmatprep.subr.bf16.mxu1 %v20077_v56 }
 0xcb9   :  { %15101 = vmatmul.mubr.bf16.vlgmr.msra.gmra.mrb[44].mxu1 %v21801_v7  ;;  %v20088_v7 = vld [vmem:[#allocation17 + $0x1a8] sm:$0xff]  }
 0xcba   :  { %17124 = vmatpush3.bf16.msra.mxu1 %v20078_v46  ;;  %15141 = vmatprep.mubr.bf16.mxu1 %v21807_v26  ;;  %v20090_v26 = vld [vmem:[#allocation17 + $0x1b0] sm:$0xff]  }
 0xcbb   :  { %17125 = vmatprep.subr.bf16.mxu1 %v20079_v58 }
 0xcbe   :  { %17126 = vmatpush3.bf16.msra.mxu1 %v20080_v63 }
 0xcbf   :  { %17127 = vmatprep.subr.bf16.mxu1 %v20081_v44 }
 0xcc2   :  { %17128 = vmatpush3.bf16.msra.mxu1 %v20082_v52 }
 0xcc3   :  { %17129 = vmatprep.subr.bf16.mxu1 %v20083_v42 }
 0xcc6   :  { %17130 = vmatpush3.bf16.msra.mxu1 %v20084_v40 }
 0xcc7   :  { %17131 = vmatprep.subr.bf16.mxu1 %v20085_v5 }
 0xcca   :  { %17132 = vmatpush3.bf16.msra.mxu1 %v20086_v21 }
 0xccb   :  { %17133 = vmatprep.subr.bf16.mxu1 %v20087_v37 }
 0xcce   :  { %17134 = vmatpush3.bf16.msra.mxu1 %v20088_v7 }
 0xccf   :  { %17135 = vmatprep.subr.bf16.mxu1 %v20089_v34 }
 0xcd2   :  { %17136 = vmatpush3.bf16.msra.mxu1 %v20090_v26 }
 0xcd3   :  { %17137 = vmatprep.subr.bf16.mxu1 %v20091_v29 }
 0xcd6   :  { %17138 = vmatpush3.bf16.msra.mxu1 %v20092_v27 }
 0xcd7   :  { %17145 = vmatprep.subr.bf16.mxu1 %v20093_v20 }
 0xcd9   :  { %15142 = vmatmul.mubr.bf16.vlgmr.msra.gmra.mrb[48].mxu1 %v21812_v55  ;;  %v20104_v55 = vld [vmem:[#allocation17 + $0x228] sm:$0xff]  }
 0xcda   :  { %17146 = vmatpush3.bf16.msra.mxu1 %v20094_v2  ;;  %15182 = vmatprep.mubr.bf16.mxu1 %v21814_v17  ;;  %v20106_v17 = vld [vmem:[#allocation17 + $0x230] sm:$0xff]  }
 0xcdb   :  { %17147 = vmatprep.subr.bf16.mxu1 %v20095_v18 }
 0xcde   :  { %17148 = vmatpush3.bf16.msra.mxu1 %v20096_v43 }
 0xcdf   :  { %17149 = vmatprep.subr.bf16.mxu1 %v20097_v0 }
 0xce2   :  { %17150 = vmatpush3.bf16.msra.mxu1 %v20098_v14 }
 0xce3   :  { %17151 = vmatprep.subr.bf16.mxu1 %v20099_v31 }
 0xce6   :  { %17152 = vmatpush3.bf16.msra.mxu1 %v20100_v28 }
 0xce7   :  { %17153 = vmatprep.subr.bf16.mxu1 %v20101_v9 }
 0xcea   :  { %17154 = vmatpush3.bf16.msra.mxu1 %v20102_v54 }
 0xceb   :  { %17155 = vmatprep.subr.bf16.mxu1 %v20103_v12 }
 0xcee   :  { %17156 = vmatpush3.bf16.msra.mxu1 %v20104_v55 }
 0xcef   :  { %17157 = vmatprep.subr.bf16.mxu1 %v20105_v38 }
 0xcf2   :  { %17158 = vmatpush3.bf16.msra.mxu1 %v20106_v17 }
 0xcf3   :  { %17159 = vmatprep.subr.bf16.mxu1 %v20107_v59 }
 0xcf6   :  { %17160 = vmatpush3.bf16.msra.mxu1 %v20108_v30 }
 0xcf9   :  { %15183 = vmatmul.mubr.bf16.vlgmr.msra.gmra.mrb[52].mxu1 %v21816_v32 }
 0xd4c   :  { %v17073_v57 = vpop.f32.mrb[36].mxu1 }
 0xd4d   :  { %v17074_v49 = vpop.f32.mrb[37].mxu1 }
 0xd4e   :  { %v17075_v33 = vadd.f32 %v17074_v49, %v17073_v57  ;;  %v17076_v16 = vpop.f32.mrb[38].mxu1 }
 0xd4f   :  { %v17077_v15 = vpop.f32.mrb[39].mxu1 }
 0xd50   :  { %v17078_v22 = vadd.f32 %v17077_v15, %v17076_v16  ;;  %v15021_v39 = vadd.f32 %v17075_v33, %v16976_v47 }
 0xd52   :  { %v15024_v3 = vadd.f32 %v17078_v22, %v16976_v47 }
 0xd6c   :  { %v17095_v25 = vpop.f32.mrb[40].mxu1 }
 0xd6d   :  { %v17096_v35 = vpop.f32.mrb[41].mxu1 }
 0xd6e   :  { %v17097_v24 = vadd.f32 %v17096_v35, %v17095_v25  ;;  %v17098_v13 = vpop.f32.mrb[42].mxu1 }
 0xd6f   :  { %v17099_v41 = vpop.f32.mrb[43].mxu1 }
 0xd70   :  { %v15062_v51 = vadd.f32 %v17097_v24, %v15021_v39  ;;  %v17100_v23 = vadd.f32 %v17099_v41, %v17098_v13 }
 0xd72   :  { %v15065_v50 = vadd.f32 %v17100_v23, %v15024_v3 }
 0xd8c   :  { %v17117_v8 = vpop.f32.mrb[44].mxu1 }
 0xd8d   :  { %v17118_v45 = vpop.f32.mrb[45].mxu1 }
 0xd8e   :  { %v17119_v32 = vadd.f32 %v17118_v45, %v17117_v8  ;;  %v17120_v4 = vpop.f32.mrb[46].mxu1 }
 0xd8f   :  { %v17121_v61 = vpop.f32.mrb[47].mxu1 }
 0xd90   :  { %v15103_v10 = vadd.f32 %v17119_v32, %v15062_v51  ;;  %v17122_v60 = vadd.f32 %v17121_v61, %v17120_v4 }
 0xd92   :  { %v15106_v6 = vadd.f32 %v17122_v60, %v15065_v50 }
 0xdac   :  { %v17139_v53 = vpop.f32.mrb[48].mxu1 }
 0xdad   :  { %v17140_v48 = vpop.f32.mrb[49].mxu1 }
 0xdae   :  { %v17141_v36 = vadd.f32 %v17140_v48, %v17139_v53  ;;  %v17142_v11 = vpop.f32.mrb[50].mxu1 }
 0xdaf   :  { %v17143_v62 = vpop.f32.mrb[51].mxu1 }
 0xdb0   :  { %v15144_v19 = vadd.f32 %v17141_v36, %v15103_v10  ;;  %v17144_v1 = vadd.f32 %v17143_v62, %v17142_v11 }
 0xdb2   :  { %v15147_v56 = vadd.f32 %v17144_v1, %v15106_v6 }
 0xdcc   :  { %v17161_v46 = vpop.f32.mrb[52].mxu1 }
 0xdcd   :  { %v17162_v58 = vpop.f32.mrb[53].mxu1 }
 0xdce   :  { %v17163_v63 = vadd.f32 %v17162_v58, %v17161_v46  ;;  %v17164_v44 = vpop.f32.mrb[54].mxu1 }
 0xdcf   :  { %v17165_v52 = vpop.f32.mrb[55].mxu1 }
 0xdd0   :  { %v15185_v42 = vadd.f32 %v17163_v63, %v15144_v19  ;;  %v17166_v40 = vadd.f32 %v17165_v52, %v17164_v44 }
 0xdd2   :  { %15191 = vst [vmem:[#allocation20] sm:$0xff] %v15185_v42  ;;  %v15188_v5 = vadd.f32 %v17166_v40, %v15147_v56 }
 0xdd4   :  { %15192 = vst [vmem:[#allocation20 + $0x8] sm:$0xff] %v15188_v5 }
 0xdd5   :  { %20372 = shalt.err (!%p20369_p8)
}
 0xdd6   :  { %s20373_s3 = scalar_lea.hbm %s21862_s11, 256 }
 0xdd7   :  { %p20374_p9 = scmp.ne.s32.totalorder %s21862_s11, %s20373_s3  ;;  %p20377_p10 = scmp.lt.u32.totalorder %s20373_s3, %s21862_s11 }
 0xdd9   :  { %p20379_p11 = pnand %p20377_p10, %p20374_p9 }
 0xddb   :  { %20382 = shalt.err (!%p20379_p11)
}
 0xddc   :  { %s20416_s21 = smov 128   ;;  %s20417_s1 = smov 8  }
 0xddd   :  { %15204 = dma.vmem_to_hbm [thread:$0]  %s15199_s19, 256, %s21862_s11, [#allocation4], %s20416_s21, %s20416_s21, %s20417_s1  }
 0xdde   :  { %20395 = dma.done.wait [#allocation4], 256  }
 0xddf   :  { %20396 = vsyncadd [#allocation4], 4294967040 }
 0xde0   :  { %15208 = vsyncpa [#allocation3], 1 }
 0xde1   :  { %15209 = vsyncpa [#allocation6], 1 }
 0xde2   :  { %15210 = vsyncpa [#allocation9], 1 }
 0xde3   :  { %15211 = vsyncpa [#allocation12], 1 }
 0xde4   :  { %15212 = vsyncpa [#allocation15], 1 }
 0xde5   :  { %15213 = vsyncpa [#allocation18], 1 }
 0xde6   :  { %15214 = vsyncpa [#allocation4], 1 }

</bundles_post_ra>
